<compile_context>
chip_gen: v7x
topology: tpu7x:2x2x1
jax: 0.10.0
libtpu: 0.0.40
codegen_flags: <defaults>
</compile_context>

<pallas_src>
import math
import functools

import jax
import jax.numpy as jnp
from jax import lax
from jax.experimental import pallas as pl
from jax.experimental.pallas import tpu as pltpu


CFG = dict(
    seq_len=8, pred_len=8, d_model=32, d_state=8, d_ff=32, e_layers=2,
    enc_in=4, time_feat_dim=7, activation="relu", use_norm=True,
)

_VMEM = pl.BlockSpec(memory_space=pltpu.MemorySpace.VMEM)


# ----------------------------- small helpers (traced inside the kernel) ------------

def _silu(x):
    return x * jax.nn.sigmoid(x)


def _softplus(x):
    # numerically stable softplus built only from exp/log/abs/max
    return jnp.maximum(x, 0.0) + jnp.log(1.0 + jnp.exp(-jnp.abs(x)))


def _layernorm(x, g, b, eps=1e-5):
    mean = jnp.mean(x, axis=-1, keepdims=True)
    var = jnp.mean((x - mean) ** 2, axis=-1, keepdims=True)
    return (x - mean) * lax.rsqrt(var + eps) * g + b


def _mm(a, b):
    return jnp.dot(a, b, preferred_element_type=jnp.float32)


# ----------------------------- the single fused kernel ------------------------------

def _fused_forward_kernel(*refs, treedef, cfg):
    f32 = jnp.float32
    B = cfg["batch"]
    L = cfg["seq_len"]
    N = cfg["enc_in"]
    P = cfg["pred_len"]
    dm = cfg["d_model"]
    S = cfg["d_state"]
    di = dm                                # expand = 1  ->  d_inner == d_model
    dt_rank = math.ceil(dm / 16)
    n_tok = N + cfg["time_feat_dim"]
    M = B * n_tok                          # token rows (b-major: row = b*n_tok + t)
    DS = di * S                            # flattened, lane-dense scan-state width

    n_leaves = treedef.num_leaves
    x_ref, xm_ref = refs[0], refs[1]
    p = jax.tree_util.tree_unflatten(treedef, refs[2:2 + n_leaves])
    out_ref = refs[2 + n_leaves]
    tok_scr = refs[3 + n_leaves]           # (M, L)   token-matrix staging
    h_scr = refs[4 + n_leaves]             # (M, DS)  per-token scan states

    x_t = x_ref[...]                       # (B, N, L)   (pre-transposed in wrapper)
    xm_t = xm_ref[...]                     # (B, F, L)

    # ---------------- masked per-variate normalization + token build ----------------
    eps = 1e-8
    means, stdevs = [], []
    for b in range(B):
        xb = x_t[b]                                               # (N, L)
        if cfg["use_norm"]:
            var_idx = lax.broadcasted_iota(jnp.int32, (N, L), 0)
            mask = jnp.logical_or(xb != 0.0, var_idx == 0).astype(f32)
            cnt = jnp.sum(mask, axis=-1, keepdims=True) + eps     # (N, 1)
            mean_b = jnp.sum(xb * mask, axis=-1, keepdims=True) / cnt
            var_b = jnp.sum(((xb - mean_b) ** 2) * mask, axis=-1, keepdims=True) / cnt
            std_b = jnp.sqrt(var_b + eps)
            xnb = (xb - mean_b) / std_b * mask
        else:
            mean_b = jnp.zeros((N, 1), f32)
            std_b = jnp.ones((N, 1), f32)
            xnb = xb
        means.append(mean_b)
        stdevs.append(std_b)
        tok_scr[b * n_tok:b * n_tok + N, :] = xnb                 # variate tokens
        tok_scr[b * n_tok + N:(b + 1) * n_tok, :] = xm_t[b]       # time-feature tokens
    tokens = tok_scr[...]                                         # (M, L)

    # ---------------- inverted embedding: Linear(seq_len -> d_model) ----------------
    x = _mm(tokens, p["emb_w"][...]) + p["emb_b"][...]            # (M, dm)

    # ---------------- constants (built once; exact 0/1 selection matrices) ----------
    r1 = lax.broadcasted_iota(jnp.int32, (M, 1), 0)
    mask_first = jnp.ones((M, 1), f32)     # 0 on rows that are the first token of a batch
    mask_last = jnp.ones((M, 1), f32)      # 0 on rows that are the last token of a batch
    for b in range(B):
        mask_first = mask_first * (r1 != b * n_tok).astype(f32)
        mask_last = mask_last * (r1 != (b * n_tok + n_tok - 1)).astype(f32)

    r_i = lax.broadcasted_iota(jnp.int32, (M, M), 0)
    c_i = lax.broadcasted_iota(jnp.int32, (M, M), 1)
    shift_prev = (c_i == r_i - 1).astype(f32) * mask_first        # row r <- row r-1 (0 at t==0)
    shift_next = (c_i == r_i + 1).astype(f32) * mask_last         # row r <- row r+1 (0 at t==T-1)

    # R_tile[d, s*di + d] = 1 : expands (M, di) -> (M, DS) (value replicated per state s)
    d_i = lax.broadcasted_iota(jnp.int32, (di, DS), 0)
    j_i = lax.broadcasted_iota(jnp.int32, (di, DS), 1)
    R_tile = jnp.zeros((di, DS), f32)
    for s in range(S):
        R_tile = R_tile + (j_i == d_i + s * di).astype(f32)

    # R_state[s, s*di + d] = 1 : expands (M, S) -> (M, DS) (value replicated per channel d)
    s_i = lax.broadcasted_iota(jnp.int32, (S, DS), 0)
    js_i = lax.broadcasted_iota(jnp.int32, (S, DS), 1)
    off = js_i - s_i * di
    R_state = jnp.logical_and(off >= 0, off < di).astype(f32)

    # ---------------- one Mamba direction (fwd or rev), all tokens at once ----------
    def mamba_dir(mp, xi, z, reverse):
        # depthwise causal conv (k=2) in scan order, then SiLU
        w_prev = mp["conv_w"][...][0:1, :]                        # (1, di)
        w_cur = mp["conv_w"][...][1:2, :]
        neigh = _mm(shift_next if reverse else shift_prev, xi)    # previous token in scan order
        u = _silu(w_cur * xi + w_prev * neigh + mp["conv_b"][...])

        # x_proj -> (dt, B, C);  dt_proj -> delta
        x_dbl = _mm(u, mp["x_proj_w"][...])                       # (M, dt_rank + 2S)
        dt_in = x_dbl[:, :dt_rank]
        Bc = x_dbl[:, dt_rank:dt_rank + S]
        Cc = x_dbl[:, dt_rank + S:]
        delta = _softplus(_mm(dt_in, mp["dt_proj_w"][...]) + mp["dt_proj_b"][...])

        # vectorized, lane-dense scan coefficients (M, DS)
        A_neg = -jnp.exp(mp["A_log_flat"][...])                   # (1, DS), s-major
        dA = jnp.exp(_mm(delta, R_tile) * A_neg)
        dBu = _mm(delta * u, R_tile) * _mm(Bc, R_state)

        # sequential recurrence: 2 vector ops per step, fully unrolled
        for b in range(B):
            h = jnp.zeros((1, DS), f32)
            order = range(n_tok - 1, -1, -1) if reverse else range(n_tok)
            for t in order:
                r = b * n_tok + t
                h = dA[r:r + 1, :] * h + dBu[r:r + 1, :]
                h_scr[r:r + 1, :] = h
        h_all = h_scr[...]                                        # (M, DS), token order

        # y = C . h + D * u, gated by SiLU(z), then out_proj
        hc = h_all * _mm(Cc, R_state)
        y = u * mp["D"][...]
        for s in range(S):
            y = y + hc[:, s * di:(s + 1) * di]
        y = y * _silu(z)
        return _mm(y, mp["out_proj_w"][...])                      # (M, dm)

    # ---------------- encoder layers -------------------------------------------------
    for lp in p["layers"]:
        xz_f = _mm(x, lp["mamba_f"]["in_proj_w"][...])            # (M, 2*di)
        xz_r = _mm(x, lp["mamba_r"]["in_proj_w"][...])
        out_f = mamba_dir(lp["mamba_f"], xz_f[:, :di], xz_f[:, di:], reverse=False)
        out_r = mamba_dir(lp["mamba_r"], xz_r[:, :di], xz_r[:, di:], reverse=True)
        x = x + out_f + out_r
        x = _layernorm(x, lp["ln1_g"][...], lp["ln1_b"][...])
        y = _mm(x, lp["conv1_w"][...]) + lp["conv1_b"][...]
        y = jnp.maximum(y, 0.0) if cfg["activation"] == "relu" else jax.nn.gelu(y)
        y = _mm(y, lp["conv2_w"][...]) + lp["conv2_b"][...]
        x = _layernorm(x + y, lp["ln2_g"][...], lp["ln2_b"][...])

    x = _layernorm(x, p["enc_norm_g"][...], p["enc_norm_b"][...])

    # ---------------- projector + de-normalization ----------------------------------
    dec = _mm(x, p["proj_w"][...]) + p["proj_b"][...]             # (M, pred_len)
    for b in range(B):
        blk = dec[b * n_tok:b * n_tok + N, :]                     # (N, pred_len)
        out_ref[b] = blk * stdevs[b] + means[b]                   # kernel emits (B, N, pred_len)


# ----------------------------- wrapper (single pallas_call) -------------------------

def model_forward(params, x_enc, x_mark_enc, cfg):
    B = x_enc.shape[0]
    N = cfg["enc_in"]
    P = cfg["pred_len"]
    L = cfg["seq_len"]
    DS = cfg["d_model"] * cfg["d_state"]
    M = B * (N + cfg["time_feat_dim"])

    leaves, treedef = jax.tree_util.tree_flatten(params)
    kernel = functools.partial(_fused_forward_kernel, treedef=treedef,
                               cfg=dict(cfg, batch=B))
    out = pl.pallas_call(
        kernel,
        out_shape=jax.ShapeDtypeStruct((B, N, P), jnp.float32),
        in_specs=[_VMEM] * (2 + len(leaves)),
        out_specs=_VMEM,
        scratch_shapes=[pltpu.VMEM((M, L), jnp.float32),     # token staging
                        pltpu.VMEM((M, DS), jnp.float32)],   # per-token scan states
    )(jnp.transpose(x_enc, (0, 2, 1)),
      jnp.transpose(x_mark_enc, (0, 2, 1)),
      *leaves)
    # kernel output layout is (B, enc_in, pred_len); final permute is a tiny JAX op
    return jnp.transpose(out, (0, 2, 1))


# ----------------------------- parameters -------------------------------------------

def init_params(key, cfg):
    dm, S, dff = cfg["d_model"], cfg["d_state"], cfg["d_ff"]
    L, P = cfg["seq_len"], cfg["pred_len"]
    di = dm                                 # expand = 1
    dt_rank = math.ceil(dm / 16)
    keys = iter(jax.random.split(key, 256))
    nrm = lambda shape, s=0.02: (s * jax.random.normal(next(keys), shape)).astype(jnp.float32)
    ones = lambda n: jnp.ones((1, n), jnp.float32)
    zeros = lambda n: jnp.zeros((1, n), jnp.float32)

    # A_log stored pre-flattened in s-major order: A_log_flat[0, s*di + d] = log(s+1)
    A_log_flat = jnp.log(jnp.repeat(jnp.arange(1, S + 1, dtype=jnp.float32), di))[None, :]

    def mamba_params():
        return dict(
            in_proj_w=nrm((dm, 2 * di)),
            conv_w=nrm((2, di), 0.2),        # row 0: w[t-1] tap, row 1: w[t] tap
            conv_b=zeros(di),
            x_proj_w=nrm((di, dt_rank + 2 * S)),
            dt_proj_w=nrm((dt_rank, di), 0.5),
            dt_proj_b=jnp.full((1, di), -1.0, jnp.float32),
            A_log_flat=A_log_flat,
            D=ones(di),
            out_proj_w=nrm((di, dm)),
        )

    layers = []
    for _ in range(cfg["e_layers"]):
        layers.append(dict(
            mamba_f=mamba_params(), mamba_r=mamba_params(),
            conv1_w=nrm((dm, dff)), conv1_b=zeros(dff),
            conv2_w=nrm((dff, dm)), conv2_b=zeros(dm),
            ln1_g=ones(dm), ln1_b=zeros(dm),
            ln2_g=ones(dm), ln2_b=zeros(dm),
        ))

    return dict(
        emb_w=nrm((L, dm)), emb_b=zeros(dm),
        layers=layers,
        enc_norm_g=ones(dm), enc_norm_b=zeros(dm),
        proj_w=nrm((dm, P)), proj_b=zeros(P),
    )


# ----------------------------- main --------------------------------------------------

if __name__ == "__main__":
    cfg = CFG
    key = jax.random.PRNGKey(0)
    k1, k2 = jax.random.split(key)
    B = 2
    x_enc = jax.random.normal(k1, (B, cfg["seq_len"], cfg["enc_in"]), jnp.float32)
    x_mark_enc = jax.random.normal(k2, (B, cfg["seq_len"], cfg["time_feat_dim"]), jnp.float32)
    x_dec = jnp.zeros((B, cfg["pred_len"], cfg["enc_in"]), jnp.float32)              # unused by forward
    x_mark_dec = jnp.zeros((B, cfg["pred_len"], cfg["time_feat_dim"]), jnp.float32)  # unused by forward

    params = init_params(jax.random.PRNGKey(42), cfg)

    @jax.jit
    def forward(p, xe, xme, xd, xmd):
        return model_forward(p, xe, xme, cfg)

    out = forward(params, x_enc, x_mark_enc, x_dec, x_mark_dec)
    jax.block_until_ready(out)
    assert out.shape == (B, cfg["pred_len"], cfg["enc_in"]), out.shape
    assert bool(jnp.all(jnp.isfinite(out)))
    print("KERNEL_OK")
</pallas_src>

<mosaic_0001>
module attributes {stable_mosaic.version = 11 : i64} {
  func.func @_fused_forward_kernel(%arg0: memref<2x4x8xf32, #tpu.memory_space<vmem>>, %arg1: memref<2x7x8xf32, #tpu.memory_space<vmem>>, %arg2: memref<1x32xf32, #tpu.memory_space<vmem>>, %arg3: memref<8x32xf32, #tpu.memory_space<vmem>>, %arg4: memref<1x32xf32, #tpu.memory_space<vmem>>, %arg5: memref<1x32xf32, #tpu.memory_space<vmem>>, %arg6: memref<1x32xf32, #tpu.memory_space<vmem>>, %arg7: memref<32x32xf32, #tpu.memory_space<vmem>>, %arg8: memref<1x32xf32, #tpu.memory_space<vmem>>, %arg9: memref<32x32xf32, #tpu.memory_space<vmem>>, %arg10: memref<1x32xf32, #tpu.memory_space<vmem>>, %arg11: memref<1x32xf32, #tpu.memory_space<vmem>>, %arg12: memref<1x32xf32, #tpu.memory_space<vmem>>, %arg13: memref<1x32xf32, #tpu.memory_space<vmem>>, %arg14: memref<1x256xf32, #tpu.memory_space<vmem>>, %arg15: memref<1x32xf32, #tpu.memory_space<vmem>>, %arg16: memref<1x32xf32, #tpu.memory_space<vmem>>, %arg17: memref<2x32xf32, #tpu.memory_space<vmem>>, %arg18: memref<1x32xf32, #tpu.memory_space<vmem>>, %arg19: memref<2x32xf32, #tpu.memory_space<vmem>>, %arg20: memref<32x64xf32, #tpu.memory_space<vmem>>, %arg21: memref<32x32xf32, #tpu.memory_space<vmem>>, %arg22: memref<32x18xf32, #tpu.memory_space<vmem>>, %arg23: memref<1x256xf32, #tpu.memory_space<vmem>>, %arg24: memref<1x32xf32, #tpu.memory_space<vmem>>, %arg25: memref<1x32xf32, #tpu.memory_space<vmem>>, %arg26: memref<2x32xf32, #tpu.memory_space<vmem>>, %arg27: memref<1x32xf32, #tpu.memory_space<vmem>>, %arg28: memref<2x32xf32, #tpu.memory_space<vmem>>, %arg29: memref<32x64xf32, #tpu.memory_space<vmem>>, %arg30: memref<32x32xf32, #tpu.memory_space<vmem>>, %arg31: memref<32x18xf32, #tpu.memory_space<vmem>>, %arg32: memref<1x32xf32, #tpu.memory_space<vmem>>, %arg33: memref<32x32xf32, #tpu.memory_space<vmem>>, %arg34: memref<1x32xf32, #tpu.memory_space<vmem>>, %arg35: memref<32x32xf32, #tpu.memory_space<vmem>>, %arg36: memref<1x32xf32, #tpu.memory_space<vmem>>, %arg37: memref<1x32xf32, #tpu.memory_space<vmem>>, %arg38: memref<1x32xf32, #tpu.memory_space<vmem>>, %arg39: memref<1x32xf32, #tpu.memory_space<vmem>>, %arg40: memref<1x256xf32, #tpu.memory_space<vmem>>, %arg41: memref<1x32xf32, #tpu.memory_space<vmem>>, %arg42: memref<1x32xf32, #tpu.memory_space<vmem>>, %arg43: memref<2x32xf32, #tpu.memory_space<vmem>>, %arg44: memref<1x32xf32, #tpu.memory_space<vmem>>, %arg45: memref<2x32xf32, #tpu.memory_space<vmem>>, %arg46: memref<32x64xf32, #tpu.memory_space<vmem>>, %arg47: memref<32x32xf32, #tpu.memory_space<vmem>>, %arg48: memref<32x18xf32, #tpu.memory_space<vmem>>, %arg49: memref<1x256xf32, #tpu.memory_space<vmem>>, %arg50: memref<1x32xf32, #tpu.memory_space<vmem>>, %arg51: memref<1x32xf32, #tpu.memory_space<vmem>>, %arg52: memref<2x32xf32, #tpu.memory_space<vmem>>, %arg53: memref<1x32xf32, #tpu.memory_space<vmem>>, %arg54: memref<2x32xf32, #tpu.memory_space<vmem>>, %arg55: memref<32x64xf32, #tpu.memory_space<vmem>>, %arg56: memref<32x32xf32, #tpu.memory_space<vmem>>, %arg57: memref<32x18xf32, #tpu.memory_space<vmem>>, %arg58: memref<1x8xf32, #tpu.memory_space<vmem>>, %arg59: memref<32x8xf32, #tpu.memory_space<vmem>>, %arg60: memref<2x4x8xf32, #tpu.memory_space<vmem>>, %arg61: memref<22x8xf32, #tpu.memory_space<vmem>>, %arg62: memref<22x256xf32, #tpu.memory_space<vmem>>) attributes {dimension_semantics = [], scalar_prefetch = 0 : i64, scratch_operands = 2 : i64, tpu.core_type = #tpu.core_type<tc>} {
    %c0 = arith.constant 0 : index
    %c0_0 = arith.constant 0 : index
    %c0_1 = arith.constant 0 : index
    %0 = vector.load %arg0[%c0, %c0_0, %c0_1] : memref<2x4x8xf32, #tpu.memory_space<vmem>>, vector<2x4x8xf32>
    %c0_2 = arith.constant 0 : index
    %c0_3 = arith.constant 0 : index
    %c0_4 = arith.constant 0 : index
    %1 = vector.load %arg1[%c0_2, %c0_3, %c0_4] : memref<2x7x8xf32, #tpu.memory_space<vmem>>, vector<2x7x8xf32>
    %2 = vector.extract_strided_slice %0 {offsets = [0, 0, 0], sizes = [1, 4, 8], strides = [1, 1, 1]} : vector<2x4x8xf32> to vector<1x4x8xf32>
    %3 = vector.shape_cast %2 : vector<1x4x8xf32> to vector<4x8xf32>
    %4 = tpu.iota {dimensions = array<i32: 0>} : vector<4x8xi32>
    %cst = arith.constant 0.000000e+00 : f32
    %5 = vector.broadcast %cst : f32 to vector<4x8xf32>
    %6 = arith.cmpf one, %3, %5 : vector<4x8xf32>
    %c0_i32 = arith.constant 0 : i32
    %7 = vector.broadcast %c0_i32 : i32 to vector<4x8xi32>
    %8 = arith.cmpi eq, %4, %7 : vector<4x8xi32>
    %9 = arith.ori %6, %8 : vector<4x8xi1>
    %10 = arith.extui %9 : vector<4x8xi1> to vector<4x8xi32>
    %11 = arith.sitofp %10 : vector<4x8xi32> to vector<4x8xf32>
    %cst_5 = arith.constant dense<0.000000e+00> : vector<4xf32>
    %12 = vector.multi_reduction <add>, %11, %cst_5 [1] : vector<4x8xf32> to vector<4xf32>
    %13 = vector.shape_cast %12 : vector<4xf32> to vector<4x1xf32>
    %cst_6 = arith.constant 9.99999993E-9 : f32
    %14 = vector.broadcast %cst_6 : f32 to vector<4x1xf32>
    %15 = arith.addf %13, %14 : vector<4x1xf32>
    %16 = arith.mulf %3, %11 : vector<4x8xf32>
    %cst_7 = arith.constant dense<0.000000e+00> : vector<4xf32>
    %17 = vector.multi_reduction <add>, %16, %cst_7 [1] : vector<4x8xf32> to vector<4xf32>
    %18 = vector.shape_cast %17 : vector<4xf32> to vector<4x1xf32>
    %19 = arith.divf %18, %15 : vector<4x1xf32>
    %20 = vector.broadcast %19 : vector<4x1xf32> to vector<4x8xf32>
    %21 = arith.subf %3, %20 : vector<4x8xf32>
    %22 = arith.mulf %21, %21 : vector<4x8xf32>
    %23 = arith.mulf %22, %11 : vector<4x8xf32>
    %cst_8 = arith.constant dense<0.000000e+00> : vector<4xf32>
    %24 = vector.multi_reduction <add>, %23, %cst_8 [1] : vector<4x8xf32> to vector<4xf32>
    %25 = vector.shape_cast %24 : vector<4xf32> to vector<4x1xf32>
    %26 = arith.divf %25, %15 : vector<4x1xf32>
    %cst_9 = arith.constant 9.99999993E-9 : f32
    %27 = vector.broadcast %cst_9 : f32 to vector<4x1xf32>
    %28 = arith.addf %26, %27 : vector<4x1xf32>
    %29 = math.sqrt %28 : vector<4x1xf32>
    %30 = vector.broadcast %19 : vector<4x1xf32> to vector<4x8xf32>
    %31 = arith.subf %3, %30 : vector<4x8xf32>
    %32 = vector.broadcast %29 : vector<4x1xf32> to vector<4x8xf32>
    %33 = arith.divf %31, %32 : vector<4x8xf32>
    %34 = arith.mulf %33, %11 : vector<4x8xf32>
    %c0_10 = arith.constant 0 : index
    %c0_11 = arith.constant 0 : index
    %35 = vector.load %arg61[%c0_10, %c0_11] : memref<22x8xf32, #tpu.memory_space<vmem>>, vector<4x8xf32>
    tpu.vector_store %arg61[%c0_10, %c0_11], %34 {strides = array<i32>} : memref<22x8xf32, #tpu.memory_space<vmem>>, vector<4x8xf32>,
    %36 = vector.extract_strided_slice %1 {offsets = [0, 0, 0], sizes = [1, 7, 8], strides = [1, 1, 1]} : vector<2x7x8xf32> to vector<1x7x8xf32>
    %37 = vector.shape_cast %36 : vector<1x7x8xf32> to vector<7x8xf32>
    %c4 = arith.constant 4 : index
    %c0_12 = arith.constant 0 : index
    %38 = vector.load %arg61[%c4, %c0_12] : memref<22x8xf32, #tpu.memory_space<vmem>>, vector<7x8xf32>
    tpu.vector_store %arg61[%c4, %c0_12], %37 {strides = array<i32>} : memref<22x8xf32, #tpu.memory_space<vmem>>, vector<7x8xf32>,
    %39 = vector.extract_strided_slice %0 {offsets = [1, 0, 0], sizes = [1, 4, 8], strides = [1, 1, 1]} : vector<2x4x8xf32> to vector<1x4x8xf32>
    %40 = vector.shape_cast %39 : vector<1x4x8xf32> to vector<4x8xf32>
    %41 = tpu.iota {dimensions = array<i32: 0>} : vector<4x8xi32>
    %cst_13 = arith.constant 0.000000e+00 : f32
    %42 = vector.broadcast %cst_13 : f32 to vector<4x8xf32>
    %43 = arith.cmpf one, %40, %42 : vector<4x8xf32>
    %c0_i32_14 = arith.constant 0 : i32
    %44 = vector.broadcast %c0_i32_14 : i32 to vector<4x8xi32>
    %45 = arith.cmpi eq, %41, %44 : vector<4x8xi32>
    %46 = arith.ori %43, %45 : vector<4x8xi1>
    %47 = arith.extui %46 : vector<4x8xi1> to vector<4x8xi32>
    %48 = arith.sitofp %47 : vector<4x8xi32> to vector<4x8xf32>
    %cst_15 = arith.constant dense<0.000000e+00> : vector<4xf32>
    %49 = vector.multi_reduction <add>, %48, %cst_15 [1] : vector<4x8xf32> to vector<4xf32>
    %50 = vector.shape_cast %49 : vector<4xf32> to vector<4x1xf32>
    %cst_16 = arith.constant 9.99999993E-9 : f32
    %51 = vector.broadcast %cst_16 : f32 to vector<4x1xf32>
    %52 = arith.addf %50, %51 : vector<4x1xf32>
    %53 = arith.mulf %40, %48 : vector<4x8xf32>
    %cst_17 = arith.constant dense<0.000000e+00> : vector<4xf32>
    %54 = vector.multi_reduction <add>, %53, %cst_17 [1] : vector<4x8xf32> to vector<4xf32>
    %55 = vector.shape_cast %54 : vector<4xf32> to vector<4x1xf32>
    %56 = arith.divf %55, %52 : vector<4x1xf32>
    %57 = vector.broadcast %56 : vector<4x1xf32> to vector<4x8xf32>
    %58 = arith.subf %40, %57 : vector<4x8xf32>
    %59 = arith.mulf %58, %58 : vector<4x8xf32>
    %60 = arith.mulf %59, %48 : vector<4x8xf32>
    %cst_18 = arith.constant dense<0.000000e+00> : vector<4xf32>
    %61 = vector.multi_reduction <add>, %60, %cst_18 [1] : vector<4x8xf32> to vector<4xf32>
    %62 = vector.shape_cast %61 : vector<4xf32> to vector<4x1xf32>
    %63 = arith.divf %62, %52 : vector<4x1xf32>
    %cst_19 = arith.constant 9.99999993E-9 : f32
    %64 = vector.broadcast %cst_19 : f32 to vector<4x1xf32>
    %65 = arith.addf %63, %64 : vector<4x1xf32>
    %66 = math.sqrt %65 : vector<4x1xf32>
    %67 = vector.broadcast %56 : vector<4x1xf32> to vector<4x8xf32>
    %68 = arith.subf %40, %67 : vector<4x8xf32>
    %69 = vector.broadcast %66 : vector<4x1xf32> to vector<4x8xf32>
    %70 = arith.divf %68, %69 : vector<4x8xf32>
    %71 = arith.mulf %70, %48 : vector<4x8xf32>
    %c11 = arith.constant 11 : index
    %c0_20 = arith.constant 0 : index
    %72 = vector.load %arg61[%c11, %c0_20] : memref<22x8xf32, #tpu.memory_space<vmem>>, vector<4x8xf32>
    tpu.vector_store %arg61[%c11, %c0_20], %71 {strides = array<i32>} : memref<22x8xf32, #tpu.memory_space<vmem>>, vector<4x8xf32>,
    %73 = vector.extract_strided_slice %1 {offsets = [1, 0, 0], sizes = [1, 7, 8], strides = [1, 1, 1]} : vector<2x7x8xf32> to vector<1x7x8xf32>
    %74 = vector.shape_cast %73 : vector<1x7x8xf32> to vector<7x8xf32>
    %c15 = arith.constant 15 : index
    %c0_21 = arith.constant 0 : index
    %75 = vector.load %arg61[%c15, %c0_21] : memref<22x8xf32, #tpu.memory_space<vmem>>, vector<7x8xf32>
    tpu.vector_store %arg61[%c15, %c0_21], %74 {strides = array<i32>} : memref<22x8xf32, #tpu.memory_space<vmem>>, vector<7x8xf32>,
    %c0_22 = arith.constant 0 : index
    %c0_23 = arith.constant 0 : index
    %76 = vector.load %arg61[%c0_22, %c0_23] : memref<22x8xf32, #tpu.memory_space<vmem>>, vector<22x8xf32>
    %c0_24 = arith.constant 0 : index
    %c0_25 = arith.constant 0 : index
    %77 = vector.load %arg3[%c0_24, %c0_25] : memref<8x32xf32, #tpu.memory_space<vmem>>, vector<8x32xf32>
    %cst_26 = arith.constant dense<0.000000e+00> : vector<22x32xf32>
    %78 = tpu.matmul %76, %77, %cst_26 {dimension_numbers = #tpu.dot_dimension_numbers<[1], [0], [0], [1], [0, 0, 1, 1], [], []>} : vector<22x8xf32>, vector<8x32xf32>, vector<22x32xf32> -> vector<22x32xf32>
    %c0_27 = arith.constant 0 : index
    %c0_28 = arith.constant 0 : index
    %79 = vector.load %arg2[%c0_27, %c0_28] : memref<1x32xf32, #tpu.memory_space<vmem>>, vector<1x32xf32>
    %80 = vector.broadcast %79 : vector<1x32xf32> to vector<22x32xf32>
    %81 = arith.addf %78, %80 : vector<22x32xf32>
    %82 = tpu.iota {dimensions = array<i32: 0>} : vector<22x1xi32>
    %cst_29 = arith.constant 1.000000e+00 : f32
    %83 = vector.broadcast %cst_29 : f32 to vector<22x1xf32>
    %cst_30 = arith.constant 1.000000e+00 : f32
    %84 = vector.broadcast %cst_30 : f32 to vector<22x1xf32>
    %c0_i32_31 = arith.constant 0 : i32
    %85 = vector.broadcast %c0_i32_31 : i32 to vector<22x1xi32>
    %86 = arith.cmpi ne, %82, %85 : vector<22x1xi32>
    %87 = arith.extui %86 : vector<22x1xi1> to vector<22x1xi32>
    %88 = arith.sitofp %87 : vector<22x1xi32> to vector<22x1xf32>
    %89 = arith.mulf %83, %88 : vector<22x1xf32>
    %c10_i32 = arith.constant 10 : i32
    %90 = vector.broadcast %c10_i32 : i32 to vector<22x1xi32>
    %91 = arith.cmpi ne, %82, %90 : vector<22x1xi32>
    %92 = arith.extui %91 : vector<22x1xi1> to vector<22x1xi32>
    %93 = arith.sitofp %92 : vector<22x1xi32> to vector<22x1xf32>
    %94 = arith.mulf %84, %93 : vector<22x1xf32>
    %c11_i32 = arith.constant 11 : i32
    %95 = vector.broadcast %c11_i32 : i32 to vector<22x1xi32>
    %96 = arith.cmpi ne, %82, %95 : vector<22x1xi32>
    %97 = arith.extui %96 : vector<22x1xi1> to vector<22x1xi32>
    %98 = arith.sitofp %97 : vector<22x1xi32> to vector<22x1xf32>
    %99 = arith.mulf %89, %98 : vector<22x1xf32>
    %c21_i32 = arith.constant 21 : i32
    %100 = vector.broadcast %c21_i32 : i32 to vector<22x1xi32>
    %101 = arith.cmpi ne, %82, %100 : vector<22x1xi32>
    %102 = arith.extui %101 : vector<22x1xi1> to vector<22x1xi32>
    %103 = arith.sitofp %102 : vector<22x1xi32> to vector<22x1xf32>
    %104 = arith.mulf %94, %103 : vector<22x1xf32>
    %105 = tpu.iota {dimensions = array<i32: 0>} : vector<22x22xi32>
    %106 = tpu.iota {dimensions = array<i32: 1>} : vector<22x22xi32>
    %c1_i32 = arith.constant 1 : i32
    %107 = vector.broadcast %c1_i32 : i32 to vector<22x22xi32>
    %108 = arith.subi %105, %107 : vector<22x22xi32>
    %109 = arith.cmpi eq, %106, %108 : vector<22x22xi32>
    %110 = arith.extui %109 : vector<22x22xi1> to vector<22x22xi32>
    %111 = arith.sitofp %110 : vector<22x22xi32> to vector<22x22xf32>
    %112 = vector.broadcast %99 : vector<22x1xf32> to vector<22x22xf32>
    %113 = arith.mulf %111, %112 : vector<22x22xf32>
    %c1_i32_32 = arith.constant 1 : i32
    %114 = vector.broadcast %c1_i32_32 : i32 to vector<22x22xi32>
    %115 = arith.addi %105, %114 : vector<22x22xi32>
    %116 = arith.cmpi eq, %106, %115 : vector<22x22xi32>
    %117 = arith.extui %116 : vector<22x22xi1> to vector<22x22xi32>
    %118 = arith.sitofp %117 : vector<22x22xi32> to vector<22x22xf32>
    %119 = vector.broadcast %104 : vector<22x1xf32> to vector<22x22xf32>
    %120 = arith.mulf %118, %119 : vector<22x22xf32>
    %121 = tpu.iota {dimensions = array<i32: 0>} : vector<32x256xi32>
    %122 = tpu.iota {dimensions = array<i32: 1>} : vector<32x256xi32>
    %cst_33 = arith.constant 0.000000e+00 : f32
    %123 = vector.broadcast %cst_33 : f32 to vector<32x256xf32>
    %c0_i32_34 = arith.constant 0 : i32
    %124 = vector.broadcast %c0_i32_34 : i32 to vector<32x256xi32>
    %125 = arith.addi %121, %124 : vector<32x256xi32>
    %126 = arith.cmpi eq, %122, %125 : vector<32x256xi32>
    %127 = arith.extui %126 : vector<32x256xi1> to vector<32x256xi32>
    %128 = arith.sitofp %127 : vector<32x256xi32> to vector<32x256xf32>
    %129 = arith.addf %123, %128 : vector<32x256xf32>
    %c32_i32 = arith.constant 32 : i32
    %130 = vector.broadcast %c32_i32 : i32 to vector<32x256xi32>
    %131 = arith.addi %121, %130 : vector<32x256xi32>
    %132 = arith.cmpi eq, %122, %131 : vector<32x256xi32>
    %133 = arith.extui %132 : vector<32x256xi1> to vector<32x256xi32>
    %134 = arith.sitofp %133 : vector<32x256xi32> to vector<32x256xf32>
    %135 = arith.addf %129, %134 : vector<32x256xf32>
    %c64_i32 = arith.constant 64 : i32
    %136 = vector.broadcast %c64_i32 : i32 to vector<32x256xi32>
    %137 = arith.addi %121, %136 : vector<32x256xi32>
    %138 = arith.cmpi eq, %122, %137 : vector<32x256xi32>
    %139 = arith.extui %138 : vector<32x256xi1> to vector<32x256xi32>
    %140 = arith.sitofp %139 : vector<32x256xi32> to vector<32x256xf32>
    %141 = arith.addf %135, %140 : vector<32x256xf32>
    %c96_i32 = arith.constant 96 : i32
    %142 = vector.broadcast %c96_i32 : i32 to vector<32x256xi32>
    %143 = arith.addi %121, %142 : vector<32x256xi32>
    %144 = arith.cmpi eq, %122, %143 : vector<32x256xi32>
    %145 = arith.extui %144 : vector<32x256xi1> to vector<32x256xi32>
    %146 = arith.sitofp %145 : vector<32x256xi32> to vector<32x256xf32>
    %147 = arith.addf %141, %146 : vector<32x256xf32>
    %c128_i32 = arith.constant 128 : i32
    %148 = vector.broadcast %c128_i32 : i32 to vector<32x256xi32>
    %149 = arith.addi %121, %148 : vector<32x256xi32>
    %150 = arith.cmpi eq, %122, %149 : vector<32x256xi32>
    %151 = arith.extui %150 : vector<32x256xi1> to vector<32x256xi32>
    %152 = arith.sitofp %151 : vector<32x256xi32> to vector<32x256xf32>
    %153 = arith.addf %147, %152 : vector<32x256xf32>
    %c160_i32 = arith.constant 160 : i32
    %154 = vector.broadcast %c160_i32 : i32 to vector<32x256xi32>
    %155 = arith.addi %121, %154 : vector<32x256xi32>
    %156 = arith.cmpi eq, %122, %155 : vector<32x256xi32>
    %157 = arith.extui %156 : vector<32x256xi1> to vector<32x256xi32>
    %158 = arith.sitofp %157 : vector<32x256xi32> to vector<32x256xf32>
    %159 = arith.addf %153, %158 : vector<32x256xf32>
    %c192_i32 = arith.constant 192 : i32
    %160 = vector.broadcast %c192_i32 : i32 to vector<32x256xi32>
    %161 = arith.addi %121, %160 : vector<32x256xi32>
    %162 = arith.cmpi eq, %122, %161 : vector<32x256xi32>
    %163 = arith.extui %162 : vector<32x256xi1> to vector<32x256xi32>
    %164 = arith.sitofp %163 : vector<32x256xi32> to vector<32x256xf32>
    %165 = arith.addf %159, %164 : vector<32x256xf32>
    %c224_i32 = arith.constant 224 : i32
    %166 = vector.broadcast %c224_i32 : i32 to vector<32x256xi32>
    %167 = arith.addi %121, %166 : vector<32x256xi32>
    %168 = arith.cmpi eq, %122, %167 : vector<32x256xi32>
    %169 = arith.extui %168 : vector<32x256xi1> to vector<32x256xi32>
    %170 = arith.sitofp %169 : vector<32x256xi32> to vector<32x256xf32>
    %171 = arith.addf %165, %170 : vector<32x256xf32>
    %172 = tpu.iota {dimensions = array<i32: 0>} : vector<8x256xi32>
    %173 = tpu.iota {dimensions = array<i32: 1>} : vector<8x256xi32>
    %c32_i32_35 = arith.constant 32 : i32
    %174 = vector.broadcast %c32_i32_35 : i32 to vector<8x256xi32>
    %175 = arith.muli %172, %174 : vector<8x256xi32>
    %176 = arith.subi %173, %175 : vector<8x256xi32>
    %c0_i32_36 = arith.constant 0 : i32
    %177 = vector.broadcast %c0_i32_36 : i32 to vector<8x256xi32>
    %178 = arith.cmpi sge, %176, %177 : vector<8x256xi32>
    %c32_i32_37 = arith.constant 32 : i32
    %179 = vector.broadcast %c32_i32_37 : i32 to vector<8x256xi32>
    %180 = arith.cmpi slt, %176, %179 : vector<8x256xi32>
    %181 = arith.andi %178, %180 : vector<8x256xi1>
    %182 = arith.extui %181 : vector<8x256xi1> to vector<8x256xi32>
    %183 = arith.sitofp %182 : vector<8x256xi32> to vector<8x256xf32>
    %c0_38 = arith.constant 0 : index
    %c0_39 = arith.constant 0 : index
    %184 = vector.load %arg20[%c0_38, %c0_39] : memref<32x64xf32, #tpu.memory_space<vmem>>, vector<32x64xf32>
    %cst_40 = arith.constant dense<0.000000e+00> : vector<22x64xf32>
    %185 = tpu.matmul %81, %184, %cst_40 {dimension_numbers = #tpu.dot_dimension_numbers<[1], [0], [0], [1], [0, 0, 1, 1], [], []>} : vector<22x32xf32>, vector<32x64xf32>, vector<22x64xf32> -> vector<22x64xf32>
    %c0_41 = arith.constant 0 : index
    %c0_42 = arith.constant 0 : index
    %186 = vector.load %arg29[%c0_41, %c0_42] : memref<32x64xf32, #tpu.memory_space<vmem>>, vector<32x64xf32>
    %cst_43 = arith.constant dense<0.000000e+00> : vector<22x64xf32>
    %187 = tpu.matmul %81, %186, %cst_43 {dimension_numbers = #tpu.dot_dimension_numbers<[1], [0], [0], [1], [0, 0, 1, 1], [], []>} : vector<22x32xf32>, vector<32x64xf32>, vector<22x64xf32> -> vector<22x64xf32>
    %188 = vector.extract_strided_slice %185 {offsets = [0, 0], sizes = [22, 32], strides = [1, 1]} : vector<22x64xf32> to vector<22x32xf32>
    %189 = vector.extract_strided_slice %185 {offsets = [0, 32], sizes = [22, 32], strides = [1, 1]} : vector<22x64xf32> to vector<22x32xf32>
    %c0_44 = arith.constant 0 : index
    %c0_45 = arith.constant 0 : index
    %190 = vector.load %arg17[%c0_44, %c0_45] : memref<2x32xf32, #tpu.memory_space<vmem>>, vector<2x32xf32>
    %191 = vector.extract_strided_slice %190 {offsets = [0, 0], sizes = [1, 32], strides = [1, 1]} : vector<2x32xf32> to vector<1x32xf32>
    %c0_46 = arith.constant 0 : index
    %c0_47 = arith.constant 0 : index
    %192 = vector.load %arg17[%c0_46, %c0_47] : memref<2x32xf32, #tpu.memory_space<vmem>>, vector<2x32xf32>
    %193 = vector.extract_strided_slice %192 {offsets = [1, 0], sizes = [1, 32], strides = [1, 1]} : vector<2x32xf32> to vector<1x32xf32>
    %cst_48 = arith.constant dense<0.000000e+00> : vector<22x32xf32>
    %194 = tpu.matmul %113, %188, %cst_48 {dimension_numbers = #tpu.dot_dimension_numbers<[1], [0], [0], [1], [0, 0, 1, 1], [], []>} : vector<22x22xf32>, vector<22x32xf32>, vector<22x32xf32> -> vector<22x32xf32>
    %195 = vector.broadcast %193 : vector<1x32xf32> to vector<22x32xf32>
    %196 = arith.mulf %195, %188 : vector<22x32xf32>
    %197 = vector.broadcast %191 : vector<1x32xf32> to vector<22x32xf32>
    %198 = arith.mulf %197, %194 : vector<22x32xf32>
    %199 = arith.addf %196, %198 : vector<22x32xf32>
    %c0_49 = arith.constant 0 : index
    %c0_50 = arith.constant 0 : index
    %200 = vector.load %arg16[%c0_49, %c0_50] : memref<1x32xf32, #tpu.memory_space<vmem>>, vector<1x32xf32>
    %201 = vector.broadcast %200 : vector<1x32xf32> to vector<22x32xf32>
    %202 = arith.addf %199, %201 : vector<22x32xf32>
    %203 = arith.negf %202 : vector<22x32xf32>
    %204 = math.exp %203 : vector<22x32xf32>
    %cst_51 = arith.constant 1.000000e+00 : f32
    %205 = vector.broadcast %cst_51 : f32 to vector<22x32xf32>
    %206 = arith.addf %205, %204 : vector<22x32xf32>
    %207 = arith.divf %205, %206 : vector<22x32xf32>
    %208 = arith.mulf %202, %207 : vector<22x32xf32>
    %c0_52 = arith.constant 0 : index
    %c0_53 = arith.constant 0 : index
    %209 = vector.load %arg22[%c0_52, %c0_53] : memref<32x18xf32, #tpu.memory_space<vmem>>, vector<32x18xf32>
    %cst_54 = arith.constant dense<0.000000e+00> : vector<22x18xf32>
    %210 = tpu.matmul %208, %209, %cst_54 {dimension_numbers = #tpu.dot_dimension_numbers<[1], [0], [0], [1], [0, 0, 1, 1], [], []>} : vector<22x32xf32>, vector<32x18xf32>, vector<22x18xf32> -> vector<22x18xf32>
    %211 = vector.extract_strided_slice %210 {offsets = [0, 0], sizes = [22, 2], strides = [1, 1]} : vector<22x18xf32> to vector<22x2xf32>
    %212 = vector.extract_strided_slice %210 {offsets = [0, 2], sizes = [22, 8], strides = [1, 1]} : vector<22x18xf32> to vector<22x8xf32>
    %213 = vector.extract_strided_slice %210 {offsets = [0, 10], sizes = [22, 8], strides = [1, 1]} : vector<22x18xf32> to vector<22x8xf32>
    %c0_55 = arith.constant 0 : index
    %c0_56 = arith.constant 0 : index
    %214 = vector.load %arg19[%c0_55, %c0_56] : memref<2x32xf32, #tpu.memory_space<vmem>>, vector<2x32xf32>
    %cst_57 = arith.constant dense<0.000000e+00> : vector<22x32xf32>
    %215 = tpu.matmul %211, %214, %cst_57 {dimension_numbers = #tpu.dot_dimension_numbers<[1], [0], [0], [1], [0, 0, 1, 1], [], []>} : vector<22x2xf32>, vector<2x32xf32>, vector<22x32xf32> -> vector<22x32xf32>
    %c0_58 = arith.constant 0 : index
    %c0_59 = arith.constant 0 : index
    %216 = vector.load %arg18[%c0_58, %c0_59] : memref<1x32xf32, #tpu.memory_space<vmem>>, vector<1x32xf32>
    %217 = vector.broadcast %216 : vector<1x32xf32> to vector<22x32xf32>
    %218 = arith.addf %215, %217 : vector<22x32xf32>
    %cst_60 = arith.constant 0.000000e+00 : f32
    %219 = vector.broadcast %cst_60 : f32 to vector<22x32xf32>
    %220 = arith.maximumf %218, %219 : vector<22x32xf32>
    %221 = math.absf %218 : vector<22x32xf32>
    %cst_61 = arith.constant 0.000000e+00 : f32
    %222 = vector.broadcast %cst_61 : f32 to vector<22x32xf32>
    %223 = arith.subf %222, %221 : vector<22x32xf32>
    %224 = math.exp %223 : vector<22x32xf32>
    %cst_62 = arith.constant 1.000000e+00 : f32
    %225 = vector.broadcast %cst_62 : f32 to vector<22x32xf32>
    %226 = arith.addf %225, %224 : vector<22x32xf32>
    %227 = math.log %226 : vector<22x32xf32>
    %228 = arith.addf %220, %227 : vector<22x32xf32>
    %c0_63 = arith.constant 0 : index
    %c0_64 = arith.constant 0 : index
    %229 = vector.load %arg14[%c0_63, %c0_64] : memref<1x256xf32, #tpu.memory_space<vmem>>, vector<1x256xf32>
    %230 = math.exp %229 : vector<1x256xf32>
    %cst_65 = arith.constant 0.000000e+00 : f32
    %231 = vector.broadcast %cst_65 : f32 to vector<1x256xf32>
    %232 = arith.subf %231, %230 : vector<1x256xf32>
    %cst_66 = arith.constant dense<0.000000e+00> : vector<22x256xf32>
    %233 = tpu.matmul %228, %171, %cst_66 {dimension_numbers = #tpu.dot_dimension_numbers<[1], [0], [0], [1], [0, 0, 1, 1], [], []>} : vector<22x32xf32>, vector<32x256xf32>, vector<22x256xf32> -> vector<22x256xf32>
    %234 = vector.broadcast %232 : vector<1x256xf32> to vector<22x256xf32>
    %235 = arith.mulf %233, %234 : vector<22x256xf32>
    %236 = math.exp %235 : vector<22x256xf32>
    %237 = arith.mulf %228, %208 : vector<22x32xf32>
    %cst_67 = arith.constant dense<0.000000e+00> : vector<22x256xf32>
    %238 = tpu.matmul %237, %171, %cst_67 {dimension_numbers = #tpu.dot_dimension_numbers<[1], [0], [0], [1], [0, 0, 1, 1], [], []>} : vector<22x32xf32>, vector<32x256xf32>, vector<22x256xf32> -> vector<22x256xf32>
    %cst_68 = arith.constant dense<0.000000e+00> : vector<22x256xf32>
    %239 = tpu.matmul %212, %183, %cst_68 {dimension_numbers = #tpu.dot_dimension_numbers<[1], [0], [0], [1], [0, 0, 1, 1], [], []>} : vector<22x8xf32>, vector<8x256xf32>, vector<22x256xf32> -> vector<22x256xf32>
    %240 = arith.mulf %238, %239 : vector<22x256xf32>
    %cst_69 = arith.constant 0.000000e+00 : f32
    %241 = vector.broadcast %cst_69 : f32 to vector<1x256xf32>
    %242 = vector.extract_strided_slice %236 {offsets = [0, 0], sizes = [1, 256], strides = [1, 1]} : vector<22x256xf32> to vector<1x256xf32>
    %243 = arith.mulf %242, %241 : vector<1x256xf32>
    %244 = vector.extract_strided_slice %240 {offsets = [0, 0], sizes = [1, 256], strides = [1, 1]} : vector<22x256xf32> to vector<1x256xf32>
    %245 = arith.addf %243, %244 : vector<1x256xf32>
    %c0_70 = arith.constant 0 : index
    %c0_71 = arith.constant 0 : index
    %246 = vector.load %arg62[%c0_70, %c0_71] : memref<22x256xf32, #tpu.memory_space<vmem>>, vector<1x256xf32>
    tpu.vector_store %arg62[%c0_70, %c0_71], %245 {strides = array<i32>} : memref<22x256xf32, #tpu.memory_space<vmem>>, vector<1x256xf32>,
    %247 = vector.extract_strided_slice %236 {offsets = [1, 0], sizes = [1, 256], strides = [1, 1]} : vector<22x256xf32> to vector<1x256xf32>
    %248 = arith.mulf %247, %245 : vector<1x256xf32>
    %249 = vector.extract_strided_slice %240 {offsets = [1, 0], sizes = [1, 256], strides = [1, 1]} : vector<22x256xf32> to vector<1x256xf32>
    %250 = arith.addf %248, %249 : vector<1x256xf32>
    %c1 = arith.constant 1 : index
    %c0_72 = arith.constant 0 : index
    %251 = vector.load %arg62[%c1, %c0_72] : memref<22x256xf32, #tpu.memory_space<vmem>>, vector<1x256xf32>
    tpu.vector_store %arg62[%c1, %c0_72], %250 {strides = array<i32>} : memref<22x256xf32, #tpu.memory_space<vmem>>, vector<1x256xf32>,
    %252 = vector.extract_strided_slice %236 {offsets = [2, 0], sizes = [1, 256], strides = [1, 1]} : vector<22x256xf32> to vector<1x256xf32>
    %253 = arith.mulf %252, %250 : vector<1x256xf32>
    %254 = vector.extract_strided_slice %240 {offsets = [2, 0], sizes = [1, 256], strides = [1, 1]} : vector<22x256xf32> to vector<1x256xf32>
    %255 = arith.addf %253, %254 : vector<1x256xf32>
    %c2 = arith.constant 2 : index
    %c0_73 = arith.constant 0 : index
    %256 = vector.load %arg62[%c2, %c0_73] : memref<22x256xf32, #tpu.memory_space<vmem>>, vector<1x256xf32>
    tpu.vector_store %arg62[%c2, %c0_73], %255 {strides = array<i32>} : memref<22x256xf32, #tpu.memory_space<vmem>>, vector<1x256xf32>,
    %257 = vector.extract_strided_slice %236 {offsets = [3, 0], sizes = [1, 256], strides = [1, 1]} : vector<22x256xf32> to vector<1x256xf32>
    %258 = arith.mulf %257, %255 : vector<1x256xf32>
    %259 = vector.extract_strided_slice %240 {offsets = [3, 0], sizes = [1, 256], strides = [1, 1]} : vector<22x256xf32> to vector<1x256xf32>
    %260 = arith.addf %258, %259 : vector<1x256xf32>
    %c3 = arith.constant 3 : index
    %c0_74 = arith.constant 0 : index
    %261 = vector.load %arg62[%c3, %c0_74] : memref<22x256xf32, #tpu.memory_space<vmem>>, vector<1x256xf32>
    tpu.vector_store %arg62[%c3, %c0_74], %260 {strides = array<i32>} : memref<22x256xf32, #tpu.memory_space<vmem>>, vector<1x256xf32>,
    %262 = vector.extract_strided_slice %236 {offsets = [4, 0], sizes = [1, 256], strides = [1, 1]} : vector<22x256xf32> to vector<1x256xf32>
    %263 = arith.mulf %262, %260 : vector<1x256xf32>
    %264 = vector.extract_strided_slice %240 {offsets = [4, 0], sizes = [1, 256], strides = [1, 1]} : vector<22x256xf32> to vector<1x256xf32>
    %265 = arith.addf %263, %264 : vector<1x256xf32>
    %c4_75 = arith.constant 4 : index
    %c0_76 = arith.constant 0 : index
    %266 = vector.load %arg62[%c4_75, %c0_76] : memref<22x256xf32, #tpu.memory_space<vmem>>, vector<1x256xf32>
    tpu.vector_store %arg62[%c4_75, %c0_76], %265 {strides = array<i32>} : memref<22x256xf32, #tpu.memory_space<vmem>>, vector<1x256xf32>,
    %267 = vector.extract_strided_slice %236 {offsets = [5, 0], sizes = [1, 256], strides = [1, 1]} : vector<22x256xf32> to vector<1x256xf32>
    %268 = arith.mulf %267, %265 : vector<1x256xf32>
    %269 = vector.extract_strided_slice %240 {offsets = [5, 0], sizes = [1, 256], strides = [1, 1]} : vector<22x256xf32> to vector<1x256xf32>
    %270 = arith.addf %268, %269 : vector<1x256xf32>
    %c5 = arith.constant 5 : index
    %c0_77 = arith.constant 0 : index
    %271 = vector.load %arg62[%c5, %c0_77] : memref<22x256xf32, #tpu.memory_space<vmem>>, vector<1x256xf32>
    tpu.vector_store %arg62[%c5, %c0_77], %270 {strides = array<i32>} : memref<22x256xf32, #tpu.memory_space<vmem>>, vector<1x256xf32>,
    %272 = vector.extract_strided_slice %236 {offsets = [6, 0], sizes = [1, 256], strides = [1, 1]} : vector<22x256xf32> to vector<1x256xf32>
    %273 = arith.mulf %272, %270 : vector<1x256xf32>
    %274 = vector.extract_strided_slice %240 {offsets = [6, 0], sizes = [1, 256], strides = [1, 1]} : vector<22x256xf32> to vector<1x256xf32>
    %275 = arith.addf %273, %274 : vector<1x256xf32>
    %c6 = arith.constant 6 : index
    %c0_78 = arith.constant 0 : index
    %276 = vector.load %arg62[%c6, %c0_78] : memref<22x256xf32, #tpu.memory_space<vmem>>, vector<1x256xf32>
    tpu.vector_store %arg62[%c6, %c0_78], %275 {strides = array<i32>} : memref<22x256xf32, #tpu.memory_space<vmem>>, vector<1x256xf32>,
    %277 = vector.extract_strided_slice %236 {offsets = [7, 0], sizes = [1, 256], strides = [1, 1]} : vector<22x256xf32> to vector<1x256xf32>
    %278 = arith.mulf %277, %275 : vector<1x256xf32>
    %279 = vector.extract_strided_slice %240 {offsets = [7, 0], sizes = [1, 256], strides = [1, 1]} : vector<22x256xf32> to vector<1x256xf32>
    %280 = arith.addf %278, %279 : vector<1x256xf32>
    %c7 = arith.constant 7 : index
    %c0_79 = arith.constant 0 : index
    %281 = vector.load %arg62[%c7, %c0_79] : memref<22x256xf32, #tpu.memory_space<vmem>>, vector<1x256xf32>
    tpu.vector_store %arg62[%c7, %c0_79], %280 {strides = array<i32>} : memref<22x256xf32, #tpu.memory_space<vmem>>, vector<1x256xf32>,
    %282 = vector.extract_strided_slice %236 {offsets = [8, 0], sizes = [1, 256], strides = [1, 1]} : vector<22x256xf32> to vector<1x256xf32>
    %283 = arith.mulf %282, %280 : vector<1x256xf32>
    %284 = vector.extract_strided_slice %240 {offsets = [8, 0], sizes = [1, 256], strides = [1, 1]} : vector<22x256xf32> to vector<1x256xf32>
    %285 = arith.addf %283, %284 : vector<1x256xf32>
    %c8 = arith.constant 8 : index
    %c0_80 = arith.constant 0 : index
    %286 = vector.load %arg62[%c8, %c0_80] : memref<22x256xf32, #tpu.memory_space<vmem>>, vector<1x256xf32>
    tpu.vector_store %arg62[%c8, %c0_80], %285 {strides = array<i32>} : memref<22x256xf32, #tpu.memory_space<vmem>>, vector<1x256xf32>,
    %287 = vector.extract_strided_slice %236 {offsets = [9, 0], sizes = [1, 256], strides = [1, 1]} : vector<22x256xf32> to vector<1x256xf32>
    %288 = arith.mulf %287, %285 : vector<1x256xf32>
    %289 = vector.extract_strided_slice %240 {offsets = [9, 0], sizes = [1, 256], strides = [1, 1]} : vector<22x256xf32> to vector<1x256xf32>
    %290 = arith.addf %288, %289 : vector<1x256xf32>
    %c9 = arith.constant 9 : index
    %c0_81 = arith.constant 0 : index
    %291 = vector.load %arg62[%c9, %c0_81] : memref<22x256xf32, #tpu.memory_space<vmem>>, vector<1x256xf32>
    tpu.vector_store %arg62[%c9, %c0_81], %290 {strides = array<i32>} : memref<22x256xf32, #tpu.memory_space<vmem>>, vector<1x256xf32>,
    %292 = vector.extract_strided_slice %236 {offsets = [10, 0], sizes = [1, 256], strides = [1, 1]} : vector<22x256xf32> to vector<1x256xf32>
    %293 = arith.mulf %292, %290 : vector<1x256xf32>
    %294 = vector.extract_strided_slice %240 {offsets = [10, 0], sizes = [1, 256], strides = [1, 1]} : vector<22x256xf32> to vector<1x256xf32>
    %295 = arith.addf %293, %294 : vector<1x256xf32>
    %c10 = arith.constant 10 : index
    %c0_82 = arith.constant 0 : index
    %296 = vector.load %arg62[%c10, %c0_82] : memref<22x256xf32, #tpu.memory_space<vmem>>, vector<1x256xf32>
    tpu.vector_store %arg62[%c10, %c0_82], %295 {strides = array<i32>} : memref<22x256xf32, #tpu.memory_space<vmem>>, vector<1x256xf32>,
    %cst_83 = arith.constant 0.000000e+00 : f32
    %297 = vector.broadcast %cst_83 : f32 to vector<1x256xf32>
    %298 = vector.extract_strided_slice %236 {offsets = [11, 0], sizes = [1, 256], strides = [1, 1]} : vector<22x256xf32> to vector<1x256xf32>
    %299 = arith.mulf %298, %297 : vector<1x256xf32>
    %300 = vector.extract_strided_slice %240 {offsets = [11, 0], sizes = [1, 256], strides = [1, 1]} : vector<22x256xf32> to vector<1x256xf32>
    %301 = arith.addf %299, %300 : vector<1x256xf32>
    %c11_84 = arith.constant 11 : index
    %c0_85 = arith.constant 0 : index
    %302 = vector.load %arg62[%c11_84, %c0_85] : memref<22x256xf32, #tpu.memory_space<vmem>>, vector<1x256xf32>
    tpu.vector_store %arg62[%c11_84, %c0_85], %301 {strides = array<i32>} : memref<22x256xf32, #tpu.memory_space<vmem>>, vector<1x256xf32>,
    %303 = vector.extract_strided_slice %236 {offsets = [12, 0], sizes = [1, 256], strides = [1, 1]} : vector<22x256xf32> to vector<1x256xf32>
    %304 = arith.mulf %303, %301 : vector<1x256xf32>
    %305 = vector.extract_strided_slice %240 {offsets = [12, 0], sizes = [1, 256], strides = [1, 1]} : vector<22x256xf32> to vector<1x256xf32>
    %306 = arith.addf %304, %305 : vector<1x256xf32>
    %c12 = arith.constant 12 : index
    %c0_86 = arith.constant 0 : index
    %307 = vector.load %arg62[%c12, %c0_86] : memref<22x256xf32, #tpu.memory_space<vmem>>, vector<1x256xf32>
    tpu.vector_store %arg62[%c12, %c0_86], %306 {strides = array<i32>} : memref<22x256xf32, #tpu.memory_space<vmem>>, vector<1x256xf32>,
    %308 = vector.extract_strided_slice %236 {offsets = [13, 0], sizes = [1, 256], strides = [1, 1]} : vector<22x256xf32> to vector<1x256xf32>
    %309 = arith.mulf %308, %306 : vector<1x256xf32>
    %310 = vector.extract_strided_slice %240 {offsets = [13, 0], sizes = [1, 256], strides = [1, 1]} : vector<22x256xf32> to vector<1x256xf32>
    %311 = arith.addf %309, %310 : vector<1x256xf32>
    %c13 = arith.constant 13 : index
    %c0_87 = arith.constant 0 : index
    %312 = vector.load %arg62[%c13, %c0_87] : memref<22x256xf32, #tpu.memory_space<vmem>>, vector<1x256xf32>
    tpu.vector_store %arg62[%c13, %c0_87], %311 {strides = array<i32>} : memref<22x256xf32, #tpu.memory_space<vmem>>, vector<1x256xf32>,
    %313 = vector.extract_strided_slice %236 {offsets = [14, 0], sizes = [1, 256], strides = [1, 1]} : vector<22x256xf32> to vector<1x256xf32>
    %314 = arith.mulf %313, %311 : vector<1x256xf32>
    %315 = vector.extract_strided_slice %240 {offsets = [14, 0], sizes = [1, 256], strides = [1, 1]} : vector<22x256xf32> to vector<1x256xf32>
    %316 = arith.addf %314, %315 : vector<1x256xf32>
    %c14 = arith.constant 14 : index
    %c0_88 = arith.constant 0 : index
    %317 = vector.load %arg62[%c14, %c0_88] : memref<22x256xf32, #tpu.memory_space<vmem>>, vector<1x256xf32>
    tpu.vector_store %arg62[%c14, %c0_88], %316 {strides = array<i32>} : memref<22x256xf32, #tpu.memory_space<vmem>>, vector<1x256xf32>,
    %318 = vector.extract_strided_slice %236 {offsets = [15, 0], sizes = [1, 256], strides = [1, 1]} : vector<22x256xf32> to vector<1x256xf32>
    %319 = arith.mulf %318, %316 : vector<1x256xf32>
    %320 = vector.extract_strided_slice %240 {offsets = [15, 0], sizes = [1, 256], strides = [1, 1]} : vector<22x256xf32> to vector<1x256xf32>
    %321 = arith.addf %319, %320 : vector<1x256xf32>
    %c15_89 = arith.constant 15 : index
    %c0_90 = arith.constant 0 : index
    %322 = vector.load %arg62[%c15_89, %c0_90] : memref<22x256xf32, #tpu.memory_space<vmem>>, vector<1x256xf32>
    tpu.vector_store %arg62[%c15_89, %c0_90], %321 {strides = array<i32>} : memref<22x256xf32, #tpu.memory_space<vmem>>, vector<1x256xf32>,
    %323 = vector.extract_strided_slice %236 {offsets = [16, 0], sizes = [1, 256], strides = [1, 1]} : vector<22x256xf32> to vector<1x256xf32>
    %324 = arith.mulf %323, %321 : vector<1x256xf32>
    %325 = vector.extract_strided_slice %240 {offsets = [16, 0], sizes = [1, 256], strides = [1, 1]} : vector<22x256xf32> to vector<1x256xf32>
    %326 = arith.addf %324, %325 : vector<1x256xf32>
    %c16 = arith.constant 16 : index
    %c0_91 = arith.constant 0 : index
    %327 = vector.load %arg62[%c16, %c0_91] : memref<22x256xf32, #tpu.memory_space<vmem>>, vector<1x256xf32>
    tpu.vector_store %arg62[%c16, %c0_91], %326 {strides = array<i32>} : memref<22x256xf32, #tpu.memory_space<vmem>>, vector<1x256xf32>,
    %328 = vector.extract_strided_slice %236 {offsets = [17, 0], sizes = [1, 256], strides = [1, 1]} : vector<22x256xf32> to vector<1x256xf32>
    %329 = arith.mulf %328, %326 : vector<1x256xf32>
    %330 = vector.extract_strided_slice %240 {offsets = [17, 0], sizes = [1, 256], strides = [1, 1]} : vector<22x256xf32> to vector<1x256xf32>
    %331 = arith.addf %329, %330 : vector<1x256xf32>
    %c17 = arith.constant 17 : index
    %c0_92 = arith.constant 0 : index
    %332 = vector.load %arg62[%c17, %c0_92] : memref<22x256xf32, #tpu.memory_space<vmem>>, vector<1x256xf32>
    tpu.vector_store %arg62[%c17, %c0_92], %331 {strides = array<i32>} : memref<22x256xf32, #tpu.memory_space<vmem>>, vector<1x256xf32>,
    %333 = vector.extract_strided_slice %236 {offsets = [18, 0], sizes = [1, 256], strides = [1, 1]} : vector<22x256xf32> to vector<1x256xf32>
    %334 = arith.mulf %333, %331 : vector<1x256xf32>
    %335 = vector.extract_strided_slice %240 {offsets = [18, 0], sizes = [1, 256], strides = [1, 1]} : vector<22x256xf32> to vector<1x256xf32>
    %336 = arith.addf %334, %335 : vector<1x256xf32>
    %c18 = arith.constant 18 : index
    %c0_93 = arith.constant 0 : index
    %337 = vector.load %arg62[%c18, %c0_93] : memref<22x256xf32, #tpu.memory_space<vmem>>, vector<1x256xf32>
    tpu.vector_store %arg62[%c18, %c0_93], %336 {strides = array<i32>} : memref<22x256xf32, #tpu.memory_space<vmem>>, vector<1x256xf32>,
    %338 = vector.extract_strided_slice %236 {offsets = [19, 0], sizes = [1, 256], strides = [1, 1]} : vector<22x256xf32> to vector<1x256xf32>
    %339 = arith.mulf %338, %336 : vector<1x256xf32>
    %340 = vector.extract_strided_slice %240 {offsets = [19, 0], sizes = [1, 256], strides = [1, 1]} : vector<22x256xf32> to vector<1x256xf32>
    %341 = arith.addf %339, %340 : vector<1x256xf32>
    %c19 = arith.constant 19 : index
    %c0_94 = arith.constant 0 : index
    %342 = vector.load %arg62[%c19, %c0_94] : memref<22x256xf32, #tpu.memory_space<vmem>>, vector<1x256xf32>
    tpu.vector_store %arg62[%c19, %c0_94], %341 {strides = array<i32>} : memref<22x256xf32, #tpu.memory_space<vmem>>, vector<1x256xf32>,
    %343 = vector.extract_strided_slice %236 {offsets = [20, 0], sizes = [1, 256], strides = [1, 1]} : vector<22x256xf32> to vector<1x256xf32>
    %344 = arith.mulf %343, %341 : vector<1x256xf32>
    %345 = vector.extract_strided_slice %240 {offsets = [20, 0], sizes = [1, 256], strides = [1, 1]} : vector<22x256xf32> to vector<1x256xf32>
    %346 = arith.addf %344, %345 : vector<1x256xf32>
    %c20 = arith.constant 20 : index
    %c0_95 = arith.constant 0 : index
    %347 = vector.load %arg62[%c20, %c0_95] : memref<22x256xf32, #tpu.memory_space<vmem>>, vector<1x256xf32>
    tpu.vector_store %arg62[%c20, %c0_95], %346 {strides = array<i32>} : memref<22x256xf32, #tpu.memory_space<vmem>>, vector<1x256xf32>,
    %348 = vector.extract_strided_slice %236 {offsets = [21, 0], sizes = [1, 256], strides = [1, 1]} : vector<22x256xf32> to vector<1x256xf32>
    %349 = arith.mulf %348, %346 : vector<1x256xf32>
    %350 = vector.extract_strided_slice %240 {offsets = [21, 0], sizes = [1, 256], strides = [1, 1]} : vector<22x256xf32> to vector<1x256xf32>
    %351 = arith.addf %349, %350 : vector<1x256xf32>
    %c21 = arith.constant 21 : index
    %c0_96 = arith.constant 0 : index
    %352 = vector.load %arg62[%c21, %c0_96] : memref<22x256xf32, #tpu.memory_space<vmem>>, vector<1x256xf32>
    tpu.vector_store %arg62[%c21, %c0_96], %351 {strides = array<i32>} : memref<22x256xf32, #tpu.memory_space<vmem>>, vector<1x256xf32>,
    %c0_97 = arith.constant 0 : index
    %c0_98 = arith.constant 0 : index
    %353 = vector.load %arg62[%c0_97, %c0_98] : memref<22x256xf32, #tpu.memory_space<vmem>>, vector<22x256xf32>
    %cst_99 = arith.constant dense<0.000000e+00> : vector<22x256xf32>
    %354 = tpu.matmul %213, %183, %cst_99 {dimension_numbers = #tpu.dot_dimension_numbers<[1], [0], [0], [1], [0, 0, 1, 1], [], []>} : vector<22x8xf32>, vector<8x256xf32>, vector<22x256xf32> -> vector<22x256xf32>
    %355 = arith.mulf %353, %354 : vector<22x256xf32>
    %c0_100 = arith.constant 0 : index
    %c0_101 = arith.constant 0 : index
    %356 = vector.load %arg15[%c0_100, %c0_101] : memref<1x32xf32, #tpu.memory_space<vmem>>, vector<1x32xf32>
    %357 = vector.broadcast %356 : vector<1x32xf32> to vector<22x32xf32>
    %358 = arith.mulf %208, %357 : vector<22x32xf32>
    %359 = vector.extract_strided_slice %355 {offsets = [0, 0], sizes = [22, 32], strides = [1, 1]} : vector<22x256xf32> to vector<22x32xf32>
    %360 = arith.addf %358, %359 : vector<22x32xf32>
    %361 = vector.extract_strided_slice %355 {offsets = [0, 32], sizes = [22, 32], strides = [1, 1]} : vector<22x256xf32> to vector<22x32xf32>
    %362 = arith.addf %360, %361 : vector<22x32xf32>
    %363 = vector.extract_strided_slice %355 {offsets = [0, 64], sizes = [22, 32], strides = [1, 1]} : vector<22x256xf32> to vector<22x32xf32>
    %364 = arith.addf %362, %363 : vector<22x32xf32>
    %365 = vector.extract_strided_slice %355 {offsets = [0, 96], sizes = [22, 32], strides = [1, 1]} : vector<22x256xf32> to vector<22x32xf32>
    %366 = arith.addf %364, %365 : vector<22x32xf32>
    %367 = vector.extract_strided_slice %355 {offsets = [0, 128], sizes = [22, 32], strides = [1, 1]} : vector<22x256xf32> to vector<22x32xf32>
    %368 = arith.addf %366, %367 : vector<22x32xf32>
    %369 = vector.extract_strided_slice %355 {offsets = [0, 160], sizes = [22, 32], strides = [1, 1]} : vector<22x256xf32> to vector<22x32xf32>
    %370 = arith.addf %368, %369 : vector<22x32xf32>
    %371 = vector.extract_strided_slice %355 {offsets = [0, 192], sizes = [22, 32], strides = [1, 1]} : vector<22x256xf32> to vector<22x32xf32>
    %372 = arith.addf %370, %371 : vector<22x32xf32>
    %373 = vector.extract_strided_slice %355 {offsets = [0, 224], sizes = [22, 32], strides = [1, 1]} : vector<22x256xf32> to vector<22x32xf32>
    %374 = arith.addf %372, %373 : vector<22x32xf32>
    %375 = arith.negf %189 : vector<22x32xf32>
    %376 = math.exp %375 : vector<22x32xf32>
    %cst_102 = arith.constant 1.000000e+00 : f32
    %377 = vector.broadcast %cst_102 : f32 to vector<22x32xf32>
    %378 = arith.addf %377, %376 : vector<22x32xf32>
    %379 = arith.divf %377, %378 : vector<22x32xf32>
    %380 = arith.mulf %189, %379 : vector<22x32xf32>
    %381 = arith.mulf %374, %380 : vector<22x32xf32>
    %c0_103 = arith.constant 0 : index
    %c0_104 = arith.constant 0 : index
    %382 = vector.load %arg21[%c0_103, %c0_104] : memref<32x32xf32, #tpu.memory_space<vmem>>, vector<32x32xf32>
    %cst_105 = arith.constant dense<0.000000e+00> : vector<22x32xf32>
    %383 = tpu.matmul %381, %382, %cst_105 {dimension_numbers = #tpu.dot_dimension_numbers<[1], [0], [0], [1], [0, 0, 1, 1], [], []>} : vector<22x32xf32>, vector<32x32xf32>, vector<22x32xf32> -> vector<22x32xf32>
    %384 = vector.extract_strided_slice %187 {offsets = [0, 0], sizes = [22, 32], strides = [1, 1]} : vector<22x64xf32> to vector<22x32xf32>
    %385 = vector.extract_strided_slice %187 {offsets = [0, 32], sizes = [22, 32], strides = [1, 1]} : vector<22x64xf32> to vector<22x32xf32>
    %c0_106 = arith.constant 0 : index
    %c0_107 = arith.constant 0 : index
    %386 = vector.load %arg26[%c0_106, %c0_107] : memref<2x32xf32, #tpu.memory_space<vmem>>, vector<2x32xf32>
    %387 = vector.extract_strided_slice %386 {offsets = [0, 0], sizes = [1, 32], strides = [1, 1]} : vector<2x32xf32> to vector<1x32xf32>
    %c0_108 = arith.constant 0 : index
    %c0_109 = arith.constant 0 : index
    %388 = vector.load %arg26[%c0_108, %c0_109] : memref<2x32xf32, #tpu.memory_space<vmem>>, vector<2x32xf32>
    %389 = vector.extract_strided_slice %388 {offsets = [1, 0], sizes = [1, 32], strides = [1, 1]} : vector<2x32xf32> to vector<1x32xf32>
    %cst_110 = arith.constant dense<0.000000e+00> : vector<22x32xf32>
    %390 = tpu.matmul %120, %384, %cst_110 {dimension_numbers = #tpu.dot_dimension_numbers<[1], [0], [0], [1], [0, 0, 1, 1], [], []>} : vector<22x22xf32>, vector<22x32xf32>, vector<22x32xf32> -> vector<22x32xf32>
    %391 = vector.broadcast %389 : vector<1x32xf32> to vector<22x32xf32>
    %392 = arith.mulf %391, %384 : vector<22x32xf32>
    %393 = vector.broadcast %387 : vector<1x32xf32> to vector<22x32xf32>
    %394 = arith.mulf %393, %390 : vector<22x32xf32>
    %395 = arith.addf %392, %394 : vector<22x32xf32>
    %c0_111 = arith.constant 0 : index
    %c0_112 = arith.constant 0 : index
    %396 = vector.load %arg25[%c0_111, %c0_112] : memref<1x32xf32, #tpu.memory_space<vmem>>, vector<1x32xf32>
    %397 = vector.broadcast %396 : vector<1x32xf32> to vector<22x32xf32>
    %398 = arith.addf %395, %397 : vector<22x32xf32>
    %399 = arith.negf %398 : vector<22x32xf32>
    %400 = math.exp %399 : vector<22x32xf32>
    %cst_113 = arith.constant 1.000000e+00 : f32
    %401 = vector.broadcast %cst_113 : f32 to vector<22x32xf32>
    %402 = arith.addf %401, %400 : vector<22x32xf32>
    %403 = arith.divf %401, %402 : vector<22x32xf32>
    %404 = arith.mulf %398, %403 : vector<22x32xf32>
    %c0_114 = arith.constant 0 : index
    %c0_115 = arith.constant 0 : index
    %405 = vector.load %arg31[%c0_114, %c0_115] : memref<32x18xf32, #tpu.memory_space<vmem>>, vector<32x18xf32>
    %cst_116 = arith.constant dense<0.000000e+00> : vector<22x18xf32>
    %406 = tpu.matmul %404, %405, %cst_116 {dimension_numbers = #tpu.dot_dimension_numbers<[1], [0], [0], [1], [0, 0, 1, 1], [], []>} : vector<22x32xf32>, vector<32x18xf32>, vector<22x18xf32> -> vector<22x18xf32>
    %407 = vector.extract_strided_slice %406 {offsets = [0, 0], sizes = [22, 2], strides = [1, 1]} : vector<22x18xf32> to vector<22x2xf32>
    %408 = vector.extract_strided_slice %406 {offsets = [0, 2], sizes = [22, 8], strides = [1, 1]} : vector<22x18xf32> to vector<22x8xf32>
    %409 = vector.extract_strided_slice %406 {offsets = [0, 10], sizes = [22, 8], strides = [1, 1]} : vector<22x18xf32> to vector<22x8xf32>
    %c0_117 = arith.constant 0 : index
    %c0_118 = arith.constant 0 : index
    %410 = vector.load %arg28[%c0_117, %c0_118] : memref<2x32xf32, #tpu.memory_space<vmem>>, vector<2x32xf32>
    %cst_119 = arith.constant dense<0.000000e+00> : vector<22x32xf32>
    %411 = tpu.matmul %407, %410, %cst_119 {dimension_numbers = #tpu.dot_dimension_numbers<[1], [0], [0], [1], [0, 0, 1, 1], [], []>} : vector<22x2xf32>, vector<2x32xf32>, vector<22x32xf32> -> vector<22x32xf32>
    %c0_120 = arith.constant 0 : index
    %c0_121 = arith.constant 0 : index
    %412 = vector.load %arg27[%c0_120, %c0_121] : memref<1x32xf32, #tpu.memory_space<vmem>>, vector<1x32xf32>
    %413 = vector.broadcast %412 : vector<1x32xf32> to vector<22x32xf32>
    %414 = arith.addf %411, %413 : vector<22x32xf32>
    %cst_122 = arith.constant 0.000000e+00 : f32
    %415 = vector.broadcast %cst_122 : f32 to vector<22x32xf32>
    %416 = arith.maximumf %414, %415 : vector<22x32xf32>
    %417 = math.absf %414 : vector<22x32xf32>
    %cst_123 = arith.constant 0.000000e+00 : f32
    %418 = vector.broadcast %cst_123 : f32 to vector<22x32xf32>
    %419 = arith.subf %418, %417 : vector<22x32xf32>
    %420 = math.exp %419 : vector<22x32xf32>
    %cst_124 = arith.constant 1.000000e+00 : f32
    %421 = vector.broadcast %cst_124 : f32 to vector<22x32xf32>
    %422 = arith.addf %421, %420 : vector<22x32xf32>
    %423 = math.log %422 : vector<22x32xf32>
    %424 = arith.addf %416, %423 : vector<22x32xf32>
    %c0_125 = arith.constant 0 : index
    %c0_126 = arith.constant 0 : index
    %425 = vector.load %arg23[%c0_125, %c0_126] : memref<1x256xf32, #tpu.memory_space<vmem>>, vector<1x256xf32>
    %426 = math.exp %425 : vector<1x256xf32>
    %cst_127 = arith.constant 0.000000e+00 : f32
    %427 = vector.broadcast %cst_127 : f32 to vector<1x256xf32>
    %428 = arith.subf %427, %426 : vector<1x256xf32>
    %cst_128 = arith.constant dense<0.000000e+00> : vector<22x256xf32>
    %429 = tpu.matmul %424, %171, %cst_128 {dimension_numbers = #tpu.dot_dimension_numbers<[1], [0], [0], [1], [0, 0, 1, 1], [], []>} : vector<22x32xf32>, vector<32x256xf32>, vector<22x256xf32> -> vector<22x256xf32>
    %430 = vector.broadcast %428 : vector<1x256xf32> to vector<22x256xf32>
    %431 = arith.mulf %429, %430 : vector<22x256xf32>
    %432 = math.exp %431 : vector<22x256xf32>
    %433 = arith.mulf %424, %404 : vector<22x32xf32>
    %cst_129 = arith.constant dense<0.000000e+00> : vector<22x256xf32>
    %434 = tpu.matmul %433, %171, %cst_129 {dimension_numbers = #tpu.dot_dimension_numbers<[1], [0], [0], [1], [0, 0, 1, 1], [], []>} : vector<22x32xf32>, vector<32x256xf32>, vector<22x256xf32> -> vector<22x256xf32>
    %cst_130 = arith.constant dense<0.000000e+00> : vector<22x256xf32>
    %435 = tpu.matmul %408, %183, %cst_130 {dimension_numbers = #tpu.dot_dimension_numbers<[1], [0], [0], [1], [0, 0, 1, 1], [], []>} : vector<22x8xf32>, vector<8x256xf32>, vector<22x256xf32> -> vector<22x256xf32>
    %436 = arith.mulf %434, %435 : vector<22x256xf32>
    %cst_131 = arith.constant 0.000000e+00 : f32
    %437 = vector.broadcast %cst_131 : f32 to vector<1x256xf32>
    %438 = vector.extract_strided_slice %432 {offsets = [10, 0], sizes = [1, 256], strides = [1, 1]} : vector<22x256xf32> to vector<1x256xf32>
    %439 = arith.mulf %438, %437 : vector<1x256xf32>
    %440 = vector.extract_strided_slice %436 {offsets = [10, 0], sizes = [1, 256], strides = [1, 1]} : vector<22x256xf32> to vector<1x256xf32>
    %441 = arith.addf %439, %440 : vector<1x256xf32>
    %c10_132 = arith.constant 10 : index
    %c0_133 = arith.constant 0 : index
    %442 = vector.load %arg62[%c10_132, %c0_133] : memref<22x256xf32, #tpu.memory_space<vmem>>, vector<1x256xf32>
    tpu.vector_store %arg62[%c10_132, %c0_133], %441 {strides = array<i32>} : memref<22x256xf32, #tpu.memory_space<vmem>>, vector<1x256xf32>,
    %443 = vector.extract_strided_slice %432 {offsets = [9, 0], sizes = [1, 256], strides = [1, 1]} : vector<22x256xf32> to vector<1x256xf32>
    %444 = arith.mulf %443, %441 : vector<1x256xf32>
    %445 = vector.extract_strided_slice %436 {offsets = [9, 0], sizes = [1, 256], strides = [1, 1]} : vector<22x256xf32> to vector<1x256xf32>
    %446 = arith.addf %444, %445 : vector<1x256xf32>
    %c9_134 = arith.constant 9 : index
    %c0_135 = arith.constant 0 : index
    %447 = vector.load %arg62[%c9_134, %c0_135] : memref<22x256xf32, #tpu.memory_space<vmem>>, vector<1x256xf32>
    tpu.vector_store %arg62[%c9_134, %c0_135], %446 {strides = array<i32>} : memref<22x256xf32, #tpu.memory_space<vmem>>, vector<1x256xf32>,
    %448 = vector.extract_strided_slice %432 {offsets = [8, 0], sizes = [1, 256], strides = [1, 1]} : vector<22x256xf32> to vector<1x256xf32>
    %449 = arith.mulf %448, %446 : vector<1x256xf32>
    %450 = vector.extract_strided_slice %436 {offsets = [8, 0], sizes = [1, 256], strides = [1, 1]} : vector<22x256xf32> to vector<1x256xf32>
    %451 = arith.addf %449, %450 : vector<1x256xf32>
    %c8_136 = arith.constant 8 : index
    %c0_137 = arith.constant 0 : index
    %452 = vector.load %arg62[%c8_136, %c0_137] : memref<22x256xf32, #tpu.memory_space<vmem>>, vector<1x256xf32>
    tpu.vector_store %arg62[%c8_136, %c0_137], %451 {strides = array<i32>} : memref<22x256xf32, #tpu.memory_space<vmem>>, vector<1x256xf32>,
    %453 = vector.extract_strided_slice %432 {offsets = [7, 0], sizes = [1, 256], strides = [1, 1]} : vector<22x256xf32> to vector<1x256xf32>
    %454 = arith.mulf %453, %451 : vector<1x256xf32>
    %455 = vector.extract_strided_slice %436 {offsets = [7, 0], sizes = [1, 256], strides = [1, 1]} : vector<22x256xf32> to vector<1x256xf32>
    %456 = arith.addf %454, %455 : vector<1x256xf32>
    %c7_138 = arith.constant 7 : index
    %c0_139 = arith.constant 0 : index
    %457 = vector.load %arg62[%c7_138, %c0_139] : memref<22x256xf32, #tpu.memory_space<vmem>>, vector<1x256xf32>
    tpu.vector_store %arg62[%c7_138, %c0_139], %456 {strides = array<i32>} : memref<22x256xf32, #tpu.memory_space<vmem>>, vector<1x256xf32>,
    %458 = vector.extract_strided_slice %432 {offsets = [6, 0], sizes = [1, 256], strides = [1, 1]} : vector<22x256xf32> to vector<1x256xf32>
    %459 = arith.mulf %458, %456 : vector<1x256xf32>
    %460 = vector.extract_strided_slice %436 {offsets = [6, 0], sizes = [1, 256], strides = [1, 1]} : vector<22x256xf32> to vector<1x256xf32>
    %461 = arith.addf %459, %460 : vector<1x256xf32>
    %c6_140 = arith.constant 6 : index
    %c0_141 = arith.constant 0 : index
    %462 = vector.load %arg62[%c6_140, %c0_141] : memref<22x256xf32, #tpu.memory_space<vmem>>, vector<1x256xf32>
    tpu.vector_store %arg62[%c6_140, %c0_141], %461 {strides = array<i32>} : memref<22x256xf32, #tpu.memory_space<vmem>>, vector<1x256xf32>,
    %463 = vector.extract_strided_slice %432 {offsets = [5, 0], sizes = [1, 256], strides = [1, 1]} : vector<22x256xf32> to vector<1x256xf32>
    %464 = arith.mulf %463, %461 : vector<1x256xf32>
    %465 = vector.extract_strided_slice %436 {offsets = [5, 0], sizes = [1, 256], strides = [1, 1]} : vector<22x256xf32> to vector<1x256xf32>
    %466 = arith.addf %464, %465 : vector<1x256xf32>
    %c5_142 = arith.constant 5 : index
    %c0_143 = arith.constant 0 : index
    %467 = vector.load %arg62[%c5_142, %c0_143] : memref<22x256xf32, #tpu.memory_space<vmem>>, vector<1x256xf32>
    tpu.vector_store %arg62[%c5_142, %c0_143], %466 {strides = array<i32>} : memref<22x256xf32, #tpu.memory_space<vmem>>, vector<1x256xf32>,
    %468 = vector.extract_strided_slice %432 {offsets = [4, 0], sizes = [1, 256], strides = [1, 1]} : vector<22x256xf32> to vector<1x256xf32>
    %469 = arith.mulf %468, %466 : vector<1x256xf32>
    %470 = vector.extract_strided_slice %436 {offsets = [4, 0], sizes = [1, 256], strides = [1, 1]} : vector<22x256xf32> to vector<1x256xf32>
    %471 = arith.addf %469, %470 : vector<1x256xf32>
    %c4_144 = arith.constant 4 : index
    %c0_145 = arith.constant 0 : index
    %472 = vector.load %arg62[%c4_144, %c0_145] : memref<22x256xf32, #tpu.memory_space<vmem>>, vector<1x256xf32>
    tpu.vector_store %arg62[%c4_144, %c0_145], %471 {strides = array<i32>} : memref<22x256xf32, #tpu.memory_space<vmem>>, vector<1x256xf32>,
    %473 = vector.extract_strided_slice %432 {offsets = [3, 0], sizes = [1, 256], strides = [1, 1]} : vector<22x256xf32> to vector<1x256xf32>
    %474 = arith.mulf %473, %471 : vector<1x256xf32>
    %475 = vector.extract_strided_slice %436 {offsets = [3, 0], sizes = [1, 256], strides = [1, 1]} : vector<22x256xf32> to vector<1x256xf32>
    %476 = arith.addf %474, %475 : vector<1x256xf32>
    %c3_146 = arith.constant 3 : index
    %c0_147 = arith.constant 0 : index
    %477 = vector.load %arg62[%c3_146, %c0_147] : memref<22x256xf32, #tpu.memory_space<vmem>>, vector<1x256xf32>
    tpu.vector_store %arg62[%c3_146, %c0_147], %476 {strides = array<i32>} : memref<22x256xf32, #tpu.memory_space<vmem>>, vector<1x256xf32>,
    %478 = vector.extract_strided_slice %432 {offsets = [2, 0], sizes = [1, 256], strides = [1, 1]} : vector<22x256xf32> to vector<1x256xf32>
    %479 = arith.mulf %478, %476 : vector<1x256xf32>
    %480 = vector.extract_strided_slice %436 {offsets = [2, 0], sizes = [1, 256], strides = [1, 1]} : vector<22x256xf32> to vector<1x256xf32>
    %481 = arith.addf %479, %480 : vector<1x256xf32>
    %c2_148 = arith.constant 2 : index
    %c0_149 = arith.constant 0 : index
    %482 = vector.load %arg62[%c2_148, %c0_149] : memref<22x256xf32, #tpu.memory_space<vmem>>, vector<1x256xf32>
    tpu.vector_store %arg62[%c2_148, %c0_149], %481 {strides = array<i32>} : memref<22x256xf32, #tpu.memory_space<vmem>>, vector<1x256xf32>,
    %483 = vector.extract_strided_slice %432 {offsets = [1, 0], sizes = [1, 256], strides = [1, 1]} : vector<22x256xf32> to vector<1x256xf32>
    %484 = arith.mulf %483, %481 : vector<1x256xf32>
    %485 = vector.extract_strided_slice %436 {offsets = [1, 0], sizes = [1, 256], strides = [1, 1]} : vector<22x256xf32> to vector<1x256xf32>
    %486 = arith.addf %484, %485 : vector<1x256xf32>
    %c1_150 = arith.constant 1 : index
    %c0_151 = arith.constant 0 : index
    %487 = vector.load %arg62[%c1_150, %c0_151] : memref<22x256xf32, #tpu.memory_space<vmem>>, vector<1x256xf32>
    tpu.vector_store %arg62[%c1_150, %c0_151], %486 {strides = array<i32>} : memref<22x256xf32, #tpu.memory_space<vmem>>, vector<1x256xf32>,
    %488 = vector.extract_strided_slice %432 {offsets = [0, 0], sizes = [1, 256], strides = [1, 1]} : vector<22x256xf32> to vector<1x256xf32>
    %489 = arith.mulf %488, %486 : vector<1x256xf32>
    %490 = vector.extract_strided_slice %436 {offsets = [0, 0], sizes = [1, 256], strides = [1, 1]} : vector<22x256xf32> to vector<1x256xf32>
    %491 = arith.addf %489, %490 : vector<1x256xf32>
    %c0_152 = arith.constant 0 : index
    %c0_153 = arith.constant 0 : index
    %492 = vector.load %arg62[%c0_152, %c0_153] : memref<22x256xf32, #tpu.memory_space<vmem>>, vector<1x256xf32>
    tpu.vector_store %arg62[%c0_152, %c0_153], %491 {strides = array<i32>} : memref<22x256xf32, #tpu.memory_space<vmem>>, vector<1x256xf32>,
    %cst_154 = arith.constant 0.000000e+00 : f32
    %493 = vector.broadcast %cst_154 : f32 to vector<1x256xf32>
    %494 = vector.extract_strided_slice %432 {offsets = [21, 0], sizes = [1, 256], strides = [1, 1]} : vector<22x256xf32> to vector<1x256xf32>
    %495 = arith.mulf %494, %493 : vector<1x256xf32>
    %496 = vector.extract_strided_slice %436 {offsets = [21, 0], sizes = [1, 256], strides = [1, 1]} : vector<22x256xf32> to vector<1x256xf32>
    %497 = arith.addf %495, %496 : vector<1x256xf32>
    %c21_155 = arith.constant 21 : index
    %c0_156 = arith.constant 0 : index
    %498 = vector.load %arg62[%c21_155, %c0_156] : memref<22x256xf32, #tpu.memory_space<vmem>>, vector<1x256xf32>
    tpu.vector_store %arg62[%c21_155, %c0_156], %497 {strides = array<i32>} : memref<22x256xf32, #tpu.memory_space<vmem>>, vector<1x256xf32>,
    %499 = vector.extract_strided_slice %432 {offsets = [20, 0], sizes = [1, 256], strides = [1, 1]} : vector<22x256xf32> to vector<1x256xf32>
    %500 = arith.mulf %499, %497 : vector<1x256xf32>
    %501 = vector.extract_strided_slice %436 {offsets = [20, 0], sizes = [1, 256], strides = [1, 1]} : vector<22x256xf32> to vector<1x256xf32>
    %502 = arith.addf %500, %501 : vector<1x256xf32>
    %c20_157 = arith.constant 20 : index
    %c0_158 = arith.constant 0 : index
    %503 = vector.load %arg62[%c20_157, %c0_158] : memref<22x256xf32, #tpu.memory_space<vmem>>, vector<1x256xf32>
    tpu.vector_store %arg62[%c20_157, %c0_158], %502 {strides = array<i32>} : memref<22x256xf32, #tpu.memory_space<vmem>>, vector<1x256xf32>,
    %504 = vector.extract_strided_slice %432 {offsets = [19, 0], sizes = [1, 256], strides = [1, 1]} : vector<22x256xf32> to vector<1x256xf32>
    %505 = arith.mulf %504, %502 : vector<1x256xf32>
    %506 = vector.extract_strided_slice %436 {offsets = [19, 0], sizes = [1, 256], strides = [1, 1]} : vector<22x256xf32> to vector<1x256xf32>
    %507 = arith.addf %505, %506 : vector<1x256xf32>
    %c19_159 = arith.constant 19 : index
    %c0_160 = arith.constant 0 : index
    %508 = vector.load %arg62[%c19_159, %c0_160] : memref<22x256xf32, #tpu.memory_space<vmem>>, vector<1x256xf32>
    tpu.vector_store %arg62[%c19_159, %c0_160], %507 {strides = array<i32>} : memref<22x256xf32, #tpu.memory_space<vmem>>, vector<1x256xf32>,
    %509 = vector.extract_strided_slice %432 {offsets = [18, 0], sizes = [1, 256], strides = [1, 1]} : vector<22x256xf32> to vector<1x256xf32>
    %510 = arith.mulf %509, %507 : vector<1x256xf32>
    %511 = vector.extract_strided_slice %436 {offsets = [18, 0], sizes = [1, 256], strides = [1, 1]} : vector<22x256xf32> to vector<1x256xf32>
    %512 = arith.addf %510, %511 : vector<1x256xf32>
    %c18_161 = arith.constant 18 : index
    %c0_162 = arith.constant 0 : index
    %513 = vector.load %arg62[%c18_161, %c0_162] : memref<22x256xf32, #tpu.memory_space<vmem>>, vector<1x256xf32>
    tpu.vector_store %arg62[%c18_161, %c0_162], %512 {strides = array<i32>} : memref<22x256xf32, #tpu.memory_space<vmem>>, vector<1x256xf32>,
    %514 = vector.extract_strided_slice %432 {offsets = [17, 0], sizes = [1, 256], strides = [1, 1]} : vector<22x256xf32> to vector<1x256xf32>
    %515 = arith.mulf %514, %512 : vector<1x256xf32>
    %516 = vector.extract_strided_slice %436 {offsets = [17, 0], sizes = [1, 256], strides = [1, 1]} : vector<22x256xf32> to vector<1x256xf32>
    %517 = arith.addf %515, %516 : vector<1x256xf32>
    %c17_163 = arith.constant 17 : index
    %c0_164 = arith.constant 0 : index
    %518 = vector.load %arg62[%c17_163, %c0_164] : memref<22x256xf32, #tpu.memory_space<vmem>>, vector<1x256xf32>
    tpu.vector_store %arg62[%c17_163, %c0_164], %517 {strides = array<i32>} : memref<22x256xf32, #tpu.memory_space<vmem>>, vector<1x256xf32>,
    %519 = vector.extract_strided_slice %432 {offsets = [16, 0], sizes = [1, 256], strides = [1, 1]} : vector<22x256xf32> to vector<1x256xf32>
    %520 = arith.mulf %519, %517 : vector<1x256xf32>
    %521 = vector.extract_strided_slice %436 {offsets = [16, 0], sizes = [1, 256], strides = [1, 1]} : vector<22x256xf32> to vector<1x256xf32>
    %522 = arith.addf %520, %521 : vector<1x256xf32>
    %c16_165 = arith.constant 16 : index
    %c0_166 = arith.constant 0 : index
    %523 = vector.load %arg62[%c16_165, %c0_166] : memref<22x256xf32, #tpu.memory_space<vmem>>, vector<1x256xf32>
    tpu.vector_store %arg62[%c16_165, %c0_166], %522 {strides = array<i32>} : memref<22x256xf32, #tpu.memory_space<vmem>>, vector<1x256xf32>,
    %524 = vector.extract_strided_slice %432 {offsets = [15, 0], sizes = [1, 256], strides = [1, 1]} : vector<22x256xf32> to vector<1x256xf32>
    %525 = arith.mulf %524, %522 : vector<1x256xf32>
    %526 = vector.extract_strided_slice %436 {offsets = [15, 0], sizes = [1, 256], strides = [1, 1]} : vector<22x256xf32> to vector<1x256xf32>
    %527 = arith.addf %525, %526 : vector<1x256xf32>
    %c15_167 = arith.constant 15 : index
    %c0_168 = arith.constant 0 : index
    %528 = vector.load %arg62[%c15_167, %c0_168] : memref<22x256xf32, #tpu.memory_space<vmem>>, vector<1x256xf32>
    tpu.vector_store %arg62[%c15_167, %c0_168], %527 {strides = array<i32>} : memref<22x256xf32, #tpu.memory_space<vmem>>, vector<1x256xf32>,
    %529 = vector.extract_strided_slice %432 {offsets = [14, 0], sizes = [1, 256], strides = [1, 1]} : vector<22x256xf32> to vector<1x256xf32>
    %530 = arith.mulf %529, %527 : vector<1x256xf32>
    %531 = vector.extract_strided_slice %436 {offsets = [14, 0], sizes = [1, 256], strides = [1, 1]} : vector<22x256xf32> to vector<1x256xf32>
    %532 = arith.addf %530, %531 : vector<1x256xf32>
    %c14_169 = arith.constant 14 : index
    %c0_170 = arith.constant 0 : index
    %533 = vector.load %arg62[%c14_169, %c0_170] : memref<22x256xf32, #tpu.memory_space<vmem>>, vector<1x256xf32>
    tpu.vector_store %arg62[%c14_169, %c0_170], %532 {strides = array<i32>} : memref<22x256xf32, #tpu.memory_space<vmem>>, vector<1x256xf32>,
    %534 = vector.extract_strided_slice %432 {offsets = [13, 0], sizes = [1, 256], strides = [1, 1]} : vector<22x256xf32> to vector<1x256xf32>
    %535 = arith.mulf %534, %532 : vector<1x256xf32>
    %536 = vector.extract_strided_slice %436 {offsets = [13, 0], sizes = [1, 256], strides = [1, 1]} : vector<22x256xf32> to vector<1x256xf32>
    %537 = arith.addf %535, %536 : vector<1x256xf32>
    %c13_171 = arith.constant 13 : index
    %c0_172 = arith.constant 0 : index
    %538 = vector.load %arg62[%c13_171, %c0_172] : memref<22x256xf32, #tpu.memory_space<vmem>>, vector<1x256xf32>
    tpu.vector_store %arg62[%c13_171, %c0_172], %537 {strides = array<i32>} : memref<22x256xf32, #tpu.memory_space<vmem>>, vector<1x256xf32>,
    %539 = vector.extract_strided_slice %432 {offsets = [12, 0], sizes = [1, 256], strides = [1, 1]} : vector<22x256xf32> to vector<1x256xf32>
    %540 = arith.mulf %539, %537 : vector<1x256xf32>
    %541 = vector.extract_strided_slice %436 {offsets = [12, 0], sizes = [1, 256], strides = [1, 1]} : vector<22x256xf32> to vector<1x256xf32>
    %542 = arith.addf %540, %541 : vector<1x256xf32>
    %c12_173 = arith.constant 12 : index
    %c0_174 = arith.constant 0 : index
    %543 = vector.load %arg62[%c12_173, %c0_174] : memref<22x256xf32, #tpu.memory_space<vmem>>, vector<1x256xf32>
    tpu.vector_store %arg62[%c12_173, %c0_174], %542 {strides = array<i32>} : memref<22x256xf32, #tpu.memory_space<vmem>>, vector<1x256xf32>,
    %544 = vector.extract_strided_slice %432 {offsets = [11, 0], sizes = [1, 256], strides = [1, 1]} : vector<22x256xf32> to vector<1x256xf32>
    %545 = arith.mulf %544, %542 : vector<1x256xf32>
    %546 = vector.extract_strided_slice %436 {offsets = [11, 0], sizes = [1, 256], strides = [1, 1]} : vector<22x256xf32> to vector<1x256xf32>
    %547 = arith.addf %545, %546 : vector<1x256xf32>
    %c11_175 = arith.constant 11 : index
    %c0_176 = arith.constant 0 : index
    %548 = vector.load %arg62[%c11_175, %c0_176] : memref<22x256xf32, #tpu.memory_space<vmem>>, vector<1x256xf32>
    tpu.vector_store %arg62[%c11_175, %c0_176], %547 {strides = array<i32>} : memref<22x256xf32, #tpu.memory_space<vmem>>, vector<1x256xf32>,
    %c0_177 = arith.constant 0 : index
    %c0_178 = arith.constant 0 : index
    %549 = vector.load %arg62[%c0_177, %c0_178] : memref<22x256xf32, #tpu.memory_space<vmem>>, vector<22x256xf32>
    %cst_179 = arith.constant dense<0.000000e+00> : vector<22x256xf32>
    %550 = tpu.matmul %409, %183, %cst_179 {dimension_numbers = #tpu.dot_dimension_numbers<[1], [0], [0], [1], [0, 0, 1, 1], [], []>} : vector<22x8xf32>, vector<8x256xf32>, vector<22x256xf32> -> vector<22x256xf32>
    %551 = arith.mulf %549, %550 : vector<22x256xf32>
    %c0_180 = arith.constant 0 : index
    %c0_181 = arith.constant 0 : index
    %552 = vector.load %arg24[%c0_180, %c0_181] : memref<1x32xf32, #tpu.memory_space<vmem>>, vector<1x32xf32>
    %553 = vector.broadcast %552 : vector<1x32xf32> to vector<22x32xf32>
    %554 = arith.mulf %404, %553 : vector<22x32xf32>
    %555 = vector.extract_strided_slice %551 {offsets = [0, 0], sizes = [22, 32], strides = [1, 1]} : vector<22x256xf32> to vector<22x32xf32>
    %556 = arith.addf %554, %555 : vector<22x32xf32>
    %557 = vector.extract_strided_slice %551 {offsets = [0, 32], sizes = [22, 32], strides = [1, 1]} : vector<22x256xf32> to vector<22x32xf32>
    %558 = arith.addf %556, %557 : vector<22x32xf32>
    %559 = vector.extract_strided_slice %551 {offsets = [0, 64], sizes = [22, 32], strides = [1, 1]} : vector<22x256xf32> to vector<22x32xf32>
    %560 = arith.addf %558, %559 : vector<22x32xf32>
    %561 = vector.extract_strided_slice %551 {offsets = [0, 96], sizes = [22, 32], strides = [1, 1]} : vector<22x256xf32> to vector<22x32xf32>
    %562 = arith.addf %560, %561 : vector<22x32xf32>
    %563 = vector.extract_strided_slice %551 {offsets = [0, 128], sizes = [22, 32], strides = [1, 1]} : vector<22x256xf32> to vector<22x32xf32>
    %564 = arith.addf %562, %563 : vector<22x32xf32>
    %565 = vector.extract_strided_slice %551 {offsets = [0, 160], sizes = [22, 32], strides = [1, 1]} : vector<22x256xf32> to vector<22x32xf32>
    %566 = arith.addf %564, %565 : vector<22x32xf32>
    %567 = vector.extract_strided_slice %551 {offsets = [0, 192], sizes = [22, 32], strides = [1, 1]} : vector<22x256xf32> to vector<22x32xf32>
    %568 = arith.addf %566, %567 : vector<22x32xf32>
    %569 = vector.extract_strided_slice %551 {offsets = [0, 224], sizes = [22, 32], strides = [1, 1]} : vector<22x256xf32> to vector<22x32xf32>
    %570 = arith.addf %568, %569 : vector<22x32xf32>
    %571 = arith.negf %385 : vector<22x32xf32>
    %572 = math.exp %571 : vector<22x32xf32>
    %cst_182 = arith.constant 1.000000e+00 : f32
    %573 = vector.broadcast %cst_182 : f32 to vector<22x32xf32>
    %574 = arith.addf %573, %572 : vector<22x32xf32>
    %575 = arith.divf %573, %574 : vector<22x32xf32>
    %576 = arith.mulf %385, %575 : vector<22x32xf32>
    %577 = arith.mulf %570, %576 : vector<22x32xf32>
    %c0_183 = arith.constant 0 : index
    %c0_184 = arith.constant 0 : index
    %578 = vector.load %arg30[%c0_183, %c0_184] : memref<32x32xf32, #tpu.memory_space<vmem>>, vector<32x32xf32>
    %cst_185 = arith.constant dense<0.000000e+00> : vector<22x32xf32>
    %579 = tpu.matmul %577, %578, %cst_185 {dimension_numbers = #tpu.dot_dimension_numbers<[1], [0], [0], [1], [0, 0, 1, 1], [], []>} : vector<22x32xf32>, vector<32x32xf32>, vector<22x32xf32> -> vector<22x32xf32>
    %580 = arith.addf %81, %383 : vector<22x32xf32>
    %581 = arith.addf %580, %579 : vector<22x32xf32>
    %c0_186 = arith.constant 0 : index
    %c0_187 = arith.constant 0 : index
    %582 = vector.load %arg11[%c0_186, %c0_187] : memref<1x32xf32, #tpu.memory_space<vmem>>, vector<1x32xf32>
    %c0_188 = arith.constant 0 : index
    %c0_189 = arith.constant 0 : index
    %583 = vector.load %arg10[%c0_188, %c0_189] : memref<1x32xf32, #tpu.memory_space<vmem>>, vector<1x32xf32>
    %cst_190 = arith.constant dense<0.000000e+00> : vector<22xf32>
    %584 = vector.multi_reduction <add>, %581, %cst_190 [1] : vector<22x32xf32> to vector<22xf32>
    %585 = vector.shape_cast %584 : vector<22xf32> to vector<22x1xf32>
    %cst_191 = arith.constant 3.200000e+01 : f32
    %586 = vector.broadcast %cst_191 : f32 to vector<22x1xf32>
    %587 = arith.divf %585, %586 : vector<22x1xf32>
    %588 = vector.broadcast %587 : vector<22x1xf32> to vector<22x32xf32>
    %589 = arith.subf %581, %588 : vector<22x32xf32>
    %590 = arith.mulf %589, %589 : vector<22x32xf32>
    %cst_192 = arith.constant dense<0.000000e+00> : vector<22xf32>
    %591 = vector.multi_reduction <add>, %590, %cst_192 [1] : vector<22x32xf32> to vector<22xf32>
    %592 = vector.shape_cast %591 : vector<22xf32> to vector<22x1xf32>
    %cst_193 = arith.constant 3.200000e+01 : f32
    %593 = vector.broadcast %cst_193 : f32 to vector<22x1xf32>
    %594 = arith.divf %592, %593 : vector<22x1xf32>
    %595 = vector.broadcast %587 : vector<22x1xf32> to vector<22x32xf32>
    %596 = arith.subf %581, %595 : vector<22x32xf32>
    %cst_194 = arith.constant 9.99999974E-6 : f32
    %597 = vector.broadcast %cst_194 : f32 to vector<22x1xf32>
    %598 = arith.addf %594, %597 : vector<22x1xf32>
    %599 = math.rsqrt %598 : vector<22x1xf32>
    %600 = vector.broadcast %599 : vector<22x1xf32> to vector<22x32xf32>
    %601 = arith.mulf %596, %600 : vector<22x32xf32>
    %602 = vector.broadcast %582 : vector<1x32xf32> to vector<22x32xf32>
    %603 = arith.mulf %601, %602 : vector<22x32xf32>
    %604 = vector.broadcast %583 : vector<1x32xf32> to vector<22x32xf32>
    %605 = arith.addf %603, %604 : vector<22x32xf32>
    %c0_195 = arith.constant 0 : index
    %c0_196 = arith.constant 0 : index
    %606 = vector.load %arg7[%c0_195, %c0_196] : memref<32x32xf32, #tpu.memory_space<vmem>>, vector<32x32xf32>
    %cst_197 = arith.constant dense<0.000000e+00> : vector<22x32xf32>
    %607 = tpu.matmul %605, %606, %cst_197 {dimension_numbers = #tpu.dot_dimension_numbers<[1], [0], [0], [1], [0, 0, 1, 1], [], []>} : vector<22x32xf32>, vector<32x32xf32>, vector<22x32xf32> -> vector<22x32xf32>
    %c0_198 = arith.constant 0 : index
    %c0_199 = arith.constant 0 : index
    %608 = vector.load %arg6[%c0_198, %c0_199] : memref<1x32xf32, #tpu.memory_space<vmem>>, vector<1x32xf32>
    %609 = vector.broadcast %608 : vector<1x32xf32> to vector<22x32xf32>
    %610 = arith.addf %607, %609 : vector<22x32xf32>
    %cst_200 = arith.constant 0.000000e+00 : f32
    %611 = vector.broadcast %cst_200 : f32 to vector<22x32xf32>
    %612 = arith.maximumf %610, %611 : vector<22x32xf32>
    %c0_201 = arith.constant 0 : index
    %c0_202 = arith.constant 0 : index
    %613 = vector.load %arg9[%c0_201, %c0_202] : memref<32x32xf32, #tpu.memory_space<vmem>>, vector<32x32xf32>
    %cst_203 = arith.constant dense<0.000000e+00> : vector<22x32xf32>
    %614 = tpu.matmul %612, %613, %cst_203 {dimension_numbers = #tpu.dot_dimension_numbers<[1], [0], [0], [1], [0, 0, 1, 1], [], []>} : vector<22x32xf32>, vector<32x32xf32>, vector<22x32xf32> -> vector<22x32xf32>
    %c0_204 = arith.constant 0 : index
    %c0_205 = arith.constant 0 : index
    %615 = vector.load %arg8[%c0_204, %c0_205] : memref<1x32xf32, #tpu.memory_space<vmem>>, vector<1x32xf32>
    %616 = vector.broadcast %615 : vector<1x32xf32> to vector<22x32xf32>
    %617 = arith.addf %614, %616 : vector<22x32xf32>
    %618 = arith.addf %605, %617 : vector<22x32xf32>
    %c0_206 = arith.constant 0 : index
    %c0_207 = arith.constant 0 : index
    %619 = vector.load %arg13[%c0_206, %c0_207] : memref<1x32xf32, #tpu.memory_space<vmem>>, vector<1x32xf32>
    %c0_208 = arith.constant 0 : index
    %c0_209 = arith.constant 0 : index
    %620 = vector.load %arg12[%c0_208, %c0_209] : memref<1x32xf32, #tpu.memory_space<vmem>>, vector<1x32xf32>
    %cst_210 = arith.constant dense<0.000000e+00> : vector<22xf32>
    %621 = vector.multi_reduction <add>, %618, %cst_210 [1] : vector<22x32xf32> to vector<22xf32>
    %622 = vector.shape_cast %621 : vector<22xf32> to vector<22x1xf32>
    %cst_211 = arith.constant 3.200000e+01 : f32
    %623 = vector.broadcast %cst_211 : f32 to vector<22x1xf32>
    %624 = arith.divf %622, %623 : vector<22x1xf32>
    %625 = vector.broadcast %624 : vector<22x1xf32> to vector<22x32xf32>
    %626 = arith.subf %618, %625 : vector<22x32xf32>
    %627 = arith.mulf %626, %626 : vector<22x32xf32>
    %cst_212 = arith.constant dense<0.000000e+00> : vector<22xf32>
    %628 = vector.multi_reduction <add>, %627, %cst_212 [1] : vector<22x32xf32> to vector<22xf32>
    %629 = vector.shape_cast %628 : vector<22xf32> to vector<22x1xf32>
    %cst_213 = arith.constant 3.200000e+01 : f32
    %630 = vector.broadcast %cst_213 : f32 to vector<22x1xf32>
    %631 = arith.divf %629, %630 : vector<22x1xf32>
    %632 = vector.broadcast %624 : vector<22x1xf32> to vector<22x32xf32>
    %633 = arith.subf %618, %632 : vector<22x32xf32>
    %cst_214 = arith.constant 9.99999974E-6 : f32
    %634 = vector.broadcast %cst_214 : f32 to vector<22x1xf32>
    %635 = arith.addf %631, %634 : vector<22x1xf32>
    %636 = math.rsqrt %635 : vector<22x1xf32>
    %637 = vector.broadcast %636 : vector<22x1xf32> to vector<22x32xf32>
    %638 = arith.mulf %633, %637 : vector<22x32xf32>
    %639 = vector.broadcast %619 : vector<1x32xf32> to vector<22x32xf32>
    %640 = arith.mulf %638, %639 : vector<22x32xf32>
    %641 = vector.broadcast %620 : vector<1x32xf32> to vector<22x32xf32>
    %642 = arith.addf %640, %641 : vector<22x32xf32>
    %c0_215 = arith.constant 0 : index
    %c0_216 = arith.constant 0 : index
    %643 = vector.load %arg46[%c0_215, %c0_216] : memref<32x64xf32, #tpu.memory_space<vmem>>, vector<32x64xf32>
    %cst_217 = arith.constant dense<0.000000e+00> : vector<22x64xf32>
    %644 = tpu.matmul %642, %643, %cst_217 {dimension_numbers = #tpu.dot_dimension_numbers<[1], [0], [0], [1], [0, 0, 1, 1], [], []>} : vector<22x32xf32>, vector<32x64xf32>, vector<22x64xf32> -> vector<22x64xf32>
    %c0_218 = arith.constant 0 : index
    %c0_219 = arith.constant 0 : index
    %645 = vector.load %arg55[%c0_218, %c0_219] : memref<32x64xf32, #tpu.memory_space<vmem>>, vector<32x64xf32>
    %cst_220 = arith.constant dense<0.000000e+00> : vector<22x64xf32>
    %646 = tpu.matmul %642, %645, %cst_220 {dimension_numbers = #tpu.dot_dimension_numbers<[1], [0], [0], [1], [0, 0, 1, 1], [], []>} : vector<22x32xf32>, vector<32x64xf32>, vector<22x64xf32> -> vector<22x64xf32>
    %647 = vector.extract_strided_slice %644 {offsets = [0, 0], sizes = [22, 32], strides = [1, 1]} : vector<22x64xf32> to vector<22x32xf32>
    %648 = vector.extract_strided_slice %644 {offsets = [0, 32], sizes = [22, 32], strides = [1, 1]} : vector<22x64xf32> to vector<22x32xf32>
    %c0_221 = arith.constant 0 : index
    %c0_222 = arith.constant 0 : index
    %649 = vector.load %arg43[%c0_221, %c0_222] : memref<2x32xf32, #tpu.memory_space<vmem>>, vector<2x32xf32>
    %650 = vector.extract_strided_slice %649 {offsets = [0, 0], sizes = [1, 32], strides = [1, 1]} : vector<2x32xf32> to vector<1x32xf32>
    %c0_223 = arith.constant 0 : index
    %c0_224 = arith.constant 0 : index
    %651 = vector.load %arg43[%c0_223, %c0_224] : memref<2x32xf32, #tpu.memory_space<vmem>>, vector<2x32xf32>
    %652 = vector.extract_strided_slice %651 {offsets = [1, 0], sizes = [1, 32], strides = [1, 1]} : vector<2x32xf32> to vector<1x32xf32>
    %cst_225 = arith.constant dense<0.000000e+00> : vector<22x32xf32>
    %653 = tpu.matmul %113, %647, %cst_225 {dimension_numbers = #tpu.dot_dimension_numbers<[1], [0], [0], [1], [0, 0, 1, 1], [], []>} : vector<22x22xf32>, vector<22x32xf32>, vector<22x32xf32> -> vector<22x32xf32>
    %654 = vector.broadcast %652 : vector<1x32xf32> to vector<22x32xf32>
    %655 = arith.mulf %654, %647 : vector<22x32xf32>
    %656 = vector.broadcast %650 : vector<1x32xf32> to vector<22x32xf32>
    %657 = arith.mulf %656, %653 : vector<22x32xf32>
    %658 = arith.addf %655, %657 : vector<22x32xf32>
    %c0_226 = arith.constant 0 : index
    %c0_227 = arith.constant 0 : index
    %659 = vector.load %arg42[%c0_226, %c0_227] : memref<1x32xf32, #tpu.memory_space<vmem>>, vector<1x32xf32>
    %660 = vector.broadcast %659 : vector<1x32xf32> to vector<22x32xf32>
    %661 = arith.addf %658, %660 : vector<22x32xf32>
    %662 = arith.negf %661 : vector<22x32xf32>
    %663 = math.exp %662 : vector<22x32xf32>
    %cst_228 = arith.constant 1.000000e+00 : f32
    %664 = vector.broadcast %cst_228 : f32 to vector<22x32xf32>
    %665 = arith.addf %664, %663 : vector<22x32xf32>
    %666 = arith.divf %664, %665 : vector<22x32xf32>
    %667 = arith.mulf %661, %666 : vector<22x32xf32>
    %c0_229 = arith.constant 0 : index
    %c0_230 = arith.constant 0 : index
    %668 = vector.load %arg48[%c0_229, %c0_230] : memref<32x18xf32, #tpu.memory_space<vmem>>, vector<32x18xf32>
    %cst_231 = arith.constant dense<0.000000e+00> : vector<22x18xf32>
    %669 = tpu.matmul %667, %668, %cst_231 {dimension_numbers = #tpu.dot_dimension_numbers<[1], [0], [0], [1], [0, 0, 1, 1], [], []>} : vector<22x32xf32>, vector<32x18xf32>, vector<22x18xf32> -> vector<22x18xf32>
    %670 = vector.extract_strided_slice %669 {offsets = [0, 0], sizes = [22, 2], strides = [1, 1]} : vector<22x18xf32> to vector<22x2xf32>
    %671 = vector.extract_strided_slice %669 {offsets = [0, 2], sizes = [22, 8], strides = [1, 1]} : vector<22x18xf32> to vector<22x8xf32>
    %672 = vector.extract_strided_slice %669 {offsets = [0, 10], sizes = [22, 8], strides = [1, 1]} : vector<22x18xf32> to vector<22x8xf32>
    %c0_232 = arith.constant 0 : index
    %c0_233 = arith.constant 0 : index
    %673 = vector.load %arg45[%c0_232, %c0_233] : memref<2x32xf32, #tpu.memory_space<vmem>>, vector<2x32xf32>
    %cst_234 = arith.constant dense<0.000000e+00> : vector<22x32xf32>
    %674 = tpu.matmul %670, %673, %cst_234 {dimension_numbers = #tpu.dot_dimension_numbers<[1], [0], [0], [1], [0, 0, 1, 1], [], []>} : vector<22x2xf32>, vector<2x32xf32>, vector<22x32xf32> -> vector<22x32xf32>
    %c0_235 = arith.constant 0 : index
    %c0_236 = arith.constant 0 : index
    %675 = vector.load %arg44[%c0_235, %c0_236] : memref<1x32xf32, #tpu.memory_space<vmem>>, vector<1x32xf32>
    %676 = vector.broadcast %675 : vector<1x32xf32> to vector<22x32xf32>
    %677 = arith.addf %674, %676 : vector<22x32xf32>
    %cst_237 = arith.constant 0.000000e+00 : f32
    %678 = vector.broadcast %cst_237 : f32 to vector<22x32xf32>
    %679 = arith.maximumf %677, %678 : vector<22x32xf32>
    %680 = math.absf %677 : vector<22x32xf32>
    %cst_238 = arith.constant 0.000000e+00 : f32
    %681 = vector.broadcast %cst_238 : f32 to vector<22x32xf32>
    %682 = arith.subf %681, %680 : vector<22x32xf32>
    %683 = math.exp %682 : vector<22x32xf32>
    %cst_239 = arith.constant 1.000000e+00 : f32
    %684 = vector.broadcast %cst_239 : f32 to vector<22x32xf32>
    %685 = arith.addf %684, %683 : vector<22x32xf32>
    %686 = math.log %685 : vector<22x32xf32>
    %687 = arith.addf %679, %686 : vector<22x32xf32>
    %c0_240 = arith.constant 0 : index
    %c0_241 = arith.constant 0 : index
    %688 = vector.load %arg40[%c0_240, %c0_241] : memref<1x256xf32, #tpu.memory_space<vmem>>, vector<1x256xf32>
    %689 = math.exp %688 : vector<1x256xf32>
    %cst_242 = arith.constant 0.000000e+00 : f32
    %690 = vector.broadcast %cst_242 : f32 to vector<1x256xf32>
    %691 = arith.subf %690, %689 : vector<1x256xf32>
    %cst_243 = arith.constant dense<0.000000e+00> : vector<22x256xf32>
    %692 = tpu.matmul %687, %171, %cst_243 {dimension_numbers = #tpu.dot_dimension_numbers<[1], [0], [0], [1], [0, 0, 1, 1], [], []>} : vector<22x32xf32>, vector<32x256xf32>, vector<22x256xf32> -> vector<22x256xf32>
    %693 = vector.broadcast %691 : vector<1x256xf32> to vector<22x256xf32>
    %694 = arith.mulf %692, %693 : vector<22x256xf32>
    %695 = math.exp %694 : vector<22x256xf32>
    %696 = arith.mulf %687, %667 : vector<22x32xf32>
    %cst_244 = arith.constant dense<0.000000e+00> : vector<22x256xf32>
    %697 = tpu.matmul %696, %171, %cst_244 {dimension_numbers = #tpu.dot_dimension_numbers<[1], [0], [0], [1], [0, 0, 1, 1], [], []>} : vector<22x32xf32>, vector<32x256xf32>, vector<22x256xf32> -> vector<22x256xf32>
    %cst_245 = arith.constant dense<0.000000e+00> : vector<22x256xf32>
    %698 = tpu.matmul %671, %183, %cst_245 {dimension_numbers = #tpu.dot_dimension_numbers<[1], [0], [0], [1], [0, 0, 1, 1], [], []>} : vector<22x8xf32>, vector<8x256xf32>, vector<22x256xf32> -> vector<22x256xf32>
    %699 = arith.mulf %697, %698 : vector<22x256xf32>
    %cst_246 = arith.constant 0.000000e+00 : f32
    %700 = vector.broadcast %cst_246 : f32 to vector<1x256xf32>
    %701 = vector.extract_strided_slice %695 {offsets = [0, 0], sizes = [1, 256], strides = [1, 1]} : vector<22x256xf32> to vector<1x256xf32>
    %702 = arith.mulf %701, %700 : vector<1x256xf32>
    %703 = vector.extract_strided_slice %699 {offsets = [0, 0], sizes = [1, 256], strides = [1, 1]} : vector<22x256xf32> to vector<1x256xf32>
    %704 = arith.addf %702, %703 : vector<1x256xf32>
    %c0_247 = arith.constant 0 : index
    %c0_248 = arith.constant 0 : index
    %705 = vector.load %arg62[%c0_247, %c0_248] : memref<22x256xf32, #tpu.memory_space<vmem>>, vector<1x256xf32>
    tpu.vector_store %arg62[%c0_247, %c0_248], %704 {strides = array<i32>} : memref<22x256xf32, #tpu.memory_space<vmem>>, vector<1x256xf32>,
    %706 = vector.extract_strided_slice %695 {offsets = [1, 0], sizes = [1, 256], strides = [1, 1]} : vector<22x256xf32> to vector<1x256xf32>
    %707 = arith.mulf %706, %704 : vector<1x256xf32>
    %708 = vector.extract_strided_slice %699 {offsets = [1, 0], sizes = [1, 256], strides = [1, 1]} : vector<22x256xf32> to vector<1x256xf32>
    %709 = arith.addf %707, %708 : vector<1x256xf32>
    %c1_249 = arith.constant 1 : index
    %c0_250 = arith.constant 0 : index
    %710 = vector.load %arg62[%c1_249, %c0_250] : memref<22x256xf32, #tpu.memory_space<vmem>>, vector<1x256xf32>
    tpu.vector_store %arg62[%c1_249, %c0_250], %709 {strides = array<i32>} : memref<22x256xf32, #tpu.memory_space<vmem>>, vector<1x256xf32>,
    %711 = vector.extract_strided_slice %695 {offsets = [2, 0], sizes = [1, 256], strides = [1, 1]} : vector<22x256xf32> to vector<1x256xf32>
    %712 = arith.mulf %711, %709 : vector<1x256xf32>
    %713 = vector.extract_strided_slice %699 {offsets = [2, 0], sizes = [1, 256], strides = [1, 1]} : vector<22x256xf32> to vector<1x256xf32>
    %714 = arith.addf %712, %713 : vector<1x256xf32>
    %c2_251 = arith.constant 2 : index
    %c0_252 = arith.constant 0 : index
    %715 = vector.load %arg62[%c2_251, %c0_252] : memref<22x256xf32, #tpu.memory_space<vmem>>, vector<1x256xf32>
    tpu.vector_store %arg62[%c2_251, %c0_252], %714 {strides = array<i32>} : memref<22x256xf32, #tpu.memory_space<vmem>>, vector<1x256xf32>,
    %716 = vector.extract_strided_slice %695 {offsets = [3, 0], sizes = [1, 256], strides = [1, 1]} : vector<22x256xf32> to vector<1x256xf32>
    %717 = arith.mulf %716, %714 : vector<1x256xf32>
    %718 = vector.extract_strided_slice %699 {offsets = [3, 0], sizes = [1, 256], strides = [1, 1]} : vector<22x256xf32> to vector<1x256xf32>
    %719 = arith.addf %717, %718 : vector<1x256xf32>
    %c3_253 = arith.constant 3 : index
    %c0_254 = arith.constant 0 : index
    %720 = vector.load %arg62[%c3_253, %c0_254] : memref<22x256xf32, #tpu.memory_space<vmem>>, vector<1x256xf32>
    tpu.vector_store %arg62[%c3_253, %c0_254], %719 {strides = array<i32>} : memref<22x256xf32, #tpu.memory_space<vmem>>, vector<1x256xf32>,
    %721 = vector.extract_strided_slice %695 {offsets = [4, 0], sizes = [1, 256], strides = [1, 1]} : vector<22x256xf32> to vector<1x256xf32>
    %722 = arith.mulf %721, %719 : vector<1x256xf32>
    %723 = vector.extract_strided_slice %699 {offsets = [4, 0], sizes = [1, 256], strides = [1, 1]} : vector<22x256xf32> to vector<1x256xf32>
    %724 = arith.addf %722, %723 : vector<1x256xf32>
    %c4_255 = arith.constant 4 : index
    %c0_256 = arith.constant 0 : index
    %725 = vector.load %arg62[%c4_255, %c0_256] : memref<22x256xf32, #tpu.memory_space<vmem>>, vector<1x256xf32>
    tpu.vector_store %arg62[%c4_255, %c0_256], %724 {strides = array<i32>} : memref<22x256xf32, #tpu.memory_space<vmem>>, vector<1x256xf32>,
    %726 = vector.extract_strided_slice %695 {offsets = [5, 0], sizes = [1, 256], strides = [1, 1]} : vector<22x256xf32> to vector<1x256xf32>
    %727 = arith.mulf %726, %724 : vector<1x256xf32>
    %728 = vector.extract_strided_slice %699 {offsets = [5, 0], sizes = [1, 256], strides = [1, 1]} : vector<22x256xf32> to vector<1x256xf32>
    %729 = arith.addf %727, %728 : vector<1x256xf32>
    %c5_257 = arith.constant 5 : index
    %c0_258 = arith.constant 0 : index
    %730 = vector.load %arg62[%c5_257, %c0_258] : memref<22x256xf32, #tpu.memory_space<vmem>>, vector<1x256xf32>
    tpu.vector_store %arg62[%c5_257, %c0_258], %729 {strides = array<i32>} : memref<22x256xf32, #tpu.memory_space<vmem>>, vector<1x256xf32>,
    %731 = vector.extract_strided_slice %695 {offsets = [6, 0], sizes = [1, 256], strides = [1, 1]} : vector<22x256xf32> to vector<1x256xf32>
    %732 = arith.mulf %731, %729 : vector<1x256xf32>
    %733 = vector.extract_strided_slice %699 {offsets = [6, 0], sizes = [1, 256], strides = [1, 1]} : vector<22x256xf32> to vector<1x256xf32>
    %734 = arith.addf %732, %733 : vector<1x256xf32>
    %c6_259 = arith.constant 6 : index
    %c0_260 = arith.constant 0 : index
    %735 = vector.load %arg62[%c6_259, %c0_260] : memref<22x256xf32, #tpu.memory_space<vmem>>, vector<1x256xf32>
    tpu.vector_store %arg62[%c6_259, %c0_260], %734 {strides = array<i32>} : memref<22x256xf32, #tpu.memory_space<vmem>>, vector<1x256xf32>,
    %736 = vector.extract_strided_slice %695 {offsets = [7, 0], sizes = [1, 256], strides = [1, 1]} : vector<22x256xf32> to vector<1x256xf32>
    %737 = arith.mulf %736, %734 : vector<1x256xf32>
    %738 = vector.extract_strided_slice %699 {offsets = [7, 0], sizes = [1, 256], strides = [1, 1]} : vector<22x256xf32> to vector<1x256xf32>
    %739 = arith.addf %737, %738 : vector<1x256xf32>
    %c7_261 = arith.constant 7 : index
    %c0_262 = arith.constant 0 : index
    %740 = vector.load %arg62[%c7_261, %c0_262] : memref<22x256xf32, #tpu.memory_space<vmem>>, vector<1x256xf32>
    tpu.vector_store %arg62[%c7_261, %c0_262], %739 {strides = array<i32>} : memref<22x256xf32, #tpu.memory_space<vmem>>, vector<1x256xf32>,
    %741 = vector.extract_strided_slice %695 {offsets = [8, 0], sizes = [1, 256], strides = [1, 1]} : vector<22x256xf32> to vector<1x256xf32>
    %742 = arith.mulf %741, %739 : vector<1x256xf32>
    %743 = vector.extract_strided_slice %699 {offsets = [8, 0], sizes = [1, 256], strides = [1, 1]} : vector<22x256xf32> to vector<1x256xf32>
    %744 = arith.addf %742, %743 : vector<1x256xf32>
    %c8_263 = arith.constant 8 : index
    %c0_264 = arith.constant 0 : index
    %745 = vector.load %arg62[%c8_263, %c0_264] : memref<22x256xf32, #tpu.memory_space<vmem>>, vector<1x256xf32>
    tpu.vector_store %arg62[%c8_263, %c0_264], %744 {strides = array<i32>} : memref<22x256xf32, #tpu.memory_space<vmem>>, vector<1x256xf32>,
    %746 = vector.extract_strided_slice %695 {offsets = [9, 0], sizes = [1, 256], strides = [1, 1]} : vector<22x256xf32> to vector<1x256xf32>
    %747 = arith.mulf %746, %744 : vector<1x256xf32>
    %748 = vector.extract_strided_slice %699 {offsets = [9, 0], sizes = [1, 256], strides = [1, 1]} : vector<22x256xf32> to vector<1x256xf32>
    %749 = arith.addf %747, %748 : vector<1x256xf32>
    %c9_265 = arith.constant 9 : index
    %c0_266 = arith.constant 0 : index
    %750 = vector.load %arg62[%c9_265, %c0_266] : memref<22x256xf32, #tpu.memory_space<vmem>>, vector<1x256xf32>
    tpu.vector_store %arg62[%c9_265, %c0_266], %749 {strides = array<i32>} : memref<22x256xf32, #tpu.memory_space<vmem>>, vector<1x256xf32>,
    %751 = vector.extract_strided_slice %695 {offsets = [10, 0], sizes = [1, 256], strides = [1, 1]} : vector<22x256xf32> to vector<1x256xf32>
    %752 = arith.mulf %751, %749 : vector<1x256xf32>
    %753 = vector.extract_strided_slice %699 {offsets = [10, 0], sizes = [1, 256], strides = [1, 1]} : vector<22x256xf32> to vector<1x256xf32>
    %754 = arith.addf %752, %753 : vector<1x256xf32>
    %c10_267 = arith.constant 10 : index
    %c0_268 = arith.constant 0 : index
    %755 = vector.load %arg62[%c10_267, %c0_268] : memref<22x256xf32, #tpu.memory_space<vmem>>, vector<1x256xf32>
    tpu.vector_store %arg62[%c10_267, %c0_268], %754 {strides = array<i32>} : memref<22x256xf32, #tpu.memory_space<vmem>>, vector<1x256xf32>,
    %cst_269 = arith.constant 0.000000e+00 : f32
    %756 = vector.broadcast %cst_269 : f32 to vector<1x256xf32>
    %757 = vector.extract_strided_slice %695 {offsets = [11, 0], sizes = [1, 256], strides = [1, 1]} : vector<22x256xf32> to vector<1x256xf32>
    %758 = arith.mulf %757, %756 : vector<1x256xf32>
    %759 = vector.extract_strided_slice %699 {offsets = [11, 0], sizes = [1, 256], strides = [1, 1]} : vector<22x256xf32> to vector<1x256xf32>
    %760 = arith.addf %758, %759 : vector<1x256xf32>
    %c11_270 = arith.constant 11 : index
    %c0_271 = arith.constant 0 : index
    %761 = vector.load %arg62[%c11_270, %c0_271] : memref<22x256xf32, #tpu.memory_space<vmem>>, vector<1x256xf32>
    tpu.vector_store %arg62[%c11_270, %c0_271], %760 {strides = array<i32>} : memref<22x256xf32, #tpu.memory_space<vmem>>, vector<1x256xf32>,
    %762 = vector.extract_strided_slice %695 {offsets = [12, 0], sizes = [1, 256], strides = [1, 1]} : vector<22x256xf32> to vector<1x256xf32>
    %763 = arith.mulf %762, %760 : vector<1x256xf32>
    %764 = vector.extract_strided_slice %699 {offsets = [12, 0], sizes = [1, 256], strides = [1, 1]} : vector<22x256xf32> to vector<1x256xf32>
    %765 = arith.addf %763, %764 : vector<1x256xf32>
    %c12_272 = arith.constant 12 : index
    %c0_273 = arith.constant 0 : index
    %766 = vector.load %arg62[%c12_272, %c0_273] : memref<22x256xf32, #tpu.memory_space<vmem>>, vector<1x256xf32>
    tpu.vector_store %arg62[%c12_272, %c0_273], %765 {strides = array<i32>} : memref<22x256xf32, #tpu.memory_space<vmem>>, vector<1x256xf32>,
    %767 = vector.extract_strided_slice %695 {offsets = [13, 0], sizes = [1, 256], strides = [1, 1]} : vector<22x256xf32> to vector<1x256xf32>
    %768 = arith.mulf %767, %765 : vector<1x256xf32>
    %769 = vector.extract_strided_slice %699 {offsets = [13, 0], sizes = [1, 256], strides = [1, 1]} : vector<22x256xf32> to vector<1x256xf32>
    %770 = arith.addf %768, %769 : vector<1x256xf32>
    %c13_274 = arith.constant 13 : index
    %c0_275 = arith.constant 0 : index
    %771 = vector.load %arg62[%c13_274, %c0_275] : memref<22x256xf32, #tpu.memory_space<vmem>>, vector<1x256xf32>
    tpu.vector_store %arg62[%c13_274, %c0_275], %770 {strides = array<i32>} : memref<22x256xf32, #tpu.memory_space<vmem>>, vector<1x256xf32>,
    %772 = vector.extract_strided_slice %695 {offsets = [14, 0], sizes = [1, 256], strides = [1, 1]} : vector<22x256xf32> to vector<1x256xf32>
    %773 = arith.mulf %772, %770 : vector<1x256xf32>
    %774 = vector.extract_strided_slice %699 {offsets = [14, 0], sizes = [1, 256], strides = [1, 1]} : vector<22x256xf32> to vector<1x256xf32>
    %775 = arith.addf %773, %774 : vector<1x256xf32>
    %c14_276 = arith.constant 14 : index
    %c0_277 = arith.constant 0 : index
    %776 = vector.load %arg62[%c14_276, %c0_277] : memref<22x256xf32, #tpu.memory_space<vmem>>, vector<1x256xf32>
    tpu.vector_store %arg62[%c14_276, %c0_277], %775 {strides = array<i32>} : memref<22x256xf32, #tpu.memory_space<vmem>>, vector<1x256xf32>,
    %777 = vector.extract_strided_slice %695 {offsets = [15, 0], sizes = [1, 256], strides = [1, 1]} : vector<22x256xf32> to vector<1x256xf32>
    %778 = arith.mulf %777, %775 : vector<1x256xf32>
    %779 = vector.extract_strided_slice %699 {offsets = [15, 0], sizes = [1, 256], strides = [1, 1]} : vector<22x256xf32> to vector<1x256xf32>
    %780 = arith.addf %778, %779 : vector<1x256xf32>
    %c15_278 = arith.constant 15 : index
    %c0_279 = arith.constant 0 : index
    %781 = vector.load %arg62[%c15_278, %c0_279] : memref<22x256xf32, #tpu.memory_space<vmem>>, vector<1x256xf32>
    tpu.vector_store %arg62[%c15_278, %c0_279], %780 {strides = array<i32>} : memref<22x256xf32, #tpu.memory_space<vmem>>, vector<1x256xf32>,
    %782 = vector.extract_strided_slice %695 {offsets = [16, 0], sizes = [1, 256], strides = [1, 1]} : vector<22x256xf32> to vector<1x256xf32>
    %783 = arith.mulf %782, %780 : vector<1x256xf32>
    %784 = vector.extract_strided_slice %699 {offsets = [16, 0], sizes = [1, 256], strides = [1, 1]} : vector<22x256xf32> to vector<1x256xf32>
    %785 = arith.addf %783, %784 : vector<1x256xf32>
    %c16_280 = arith.constant 16 : index
    %c0_281 = arith.constant 0 : index
    %786 = vector.load %arg62[%c16_280, %c0_281] : memref<22x256xf32, #tpu.memory_space<vmem>>, vector<1x256xf32>
    tpu.vector_store %arg62[%c16_280, %c0_281], %785 {strides = array<i32>} : memref<22x256xf32, #tpu.memory_space<vmem>>, vector<1x256xf32>,
    %787 = vector.extract_strided_slice %695 {offsets = [17, 0], sizes = [1, 256], strides = [1, 1]} : vector<22x256xf32> to vector<1x256xf32>
    %788 = arith.mulf %787, %785 : vector<1x256xf32>
    %789 = vector.extract_strided_slice %699 {offsets = [17, 0], sizes = [1, 256], strides = [1, 1]} : vector<22x256xf32> to vector<1x256xf32>
    %790 = arith.addf %788, %789 : vector<1x256xf32>
    %c17_282 = arith.constant 17 : index
    %c0_283 = arith.constant 0 : index
    %791 = vector.load %arg62[%c17_282, %c0_283] : memref<22x256xf32, #tpu.memory_space<vmem>>, vector<1x256xf32>
    tpu.vector_store %arg62[%c17_282, %c0_283], %790 {strides = array<i32>} : memref<22x256xf32, #tpu.memory_space<vmem>>, vector<1x256xf32>,
    %792 = vector.extract_strided_slice %695 {offsets = [18, 0], sizes = [1, 256], strides = [1, 1]} : vector<22x256xf32> to vector<1x256xf32>
    %793 = arith.mulf %792, %790 : vector<1x256xf32>
    %794 = vector.extract_strided_slice %699 {offsets = [18, 0], sizes = [1, 256], strides = [1, 1]} : vector<22x256xf32> to vector<1x256xf32>
    %795 = arith.addf %793, %794 : vector<1x256xf32>
    %c18_284 = arith.constant 18 : index
    %c0_285 = arith.constant 0 : index
    %796 = vector.load %arg62[%c18_284, %c0_285] : memref<22x256xf32, #tpu.memory_space<vmem>>, vector<1x256xf32>
    tpu.vector_store %arg62[%c18_284, %c0_285], %795 {strides = array<i32>} : memref<22x256xf32, #tpu.memory_space<vmem>>, vector<1x256xf32>,
    %797 = vector.extract_strided_slice %695 {offsets = [19, 0], sizes = [1, 256], strides = [1, 1]} : vector<22x256xf32> to vector<1x256xf32>
    %798 = arith.mulf %797, %795 : vector<1x256xf32>
    %799 = vector.extract_strided_slice %699 {offsets = [19, 0], sizes = [1, 256], strides = [1, 1]} : vector<22x256xf32> to vector<1x256xf32>
    %800 = arith.addf %798, %799 : vector<1x256xf32>
    %c19_286 = arith.constant 19 : index
    %c0_287 = arith.constant 0 : index
    %801 = vector.load %arg62[%c19_286, %c0_287] : memref<22x256xf32, #tpu.memory_space<vmem>>, vector<1x256xf32>
    tpu.vector_store %arg62[%c19_286, %c0_287], %800 {strides = array<i32>} : memref<22x256xf32, #tpu.memory_space<vmem>>, vector<1x256xf32>,
    %802 = vector.extract_strided_slice %695 {offsets = [20, 0], sizes = [1, 256], strides = [1, 1]} : vector<22x256xf32> to vector<1x256xf32>
    %803 = arith.mulf %802, %800 : vector<1x256xf32>
    %804 = vector.extract_strided_slice %699 {offsets = [20, 0], sizes = [1, 256], strides = [1, 1]} : vector<22x256xf32> to vector<1x256xf32>
    %805 = arith.addf %803, %804 : vector<1x256xf32>
    %c20_288 = arith.constant 20 : index
    %c0_289 = arith.constant 0 : index
    %806 = vector.load %arg62[%c20_288, %c0_289] : memref<22x256xf32, #tpu.memory_space<vmem>>, vector<1x256xf32>
    tpu.vector_store %arg62[%c20_288, %c0_289], %805 {strides = array<i32>} : memref<22x256xf32, #tpu.memory_space<vmem>>, vector<1x256xf32>,
    %807 = vector.extract_strided_slice %695 {offsets = [21, 0], sizes = [1, 256], strides = [1, 1]} : vector<22x256xf32> to vector<1x256xf32>
    %808 = arith.mulf %807, %805 : vector<1x256xf32>
    %809 = vector.extract_strided_slice %699 {offsets = [21, 0], sizes = [1, 256], strides = [1, 1]} : vector<22x256xf32> to vector<1x256xf32>
    %810 = arith.addf %808, %809 : vector<1x256xf32>
    %c21_290 = arith.constant 21 : index
    %c0_291 = arith.constant 0 : index
    %811 = vector.load %arg62[%c21_290, %c0_291] : memref<22x256xf32, #tpu.memory_space<vmem>>, vector<1x256xf32>
    tpu.vector_store %arg62[%c21_290, %c0_291], %810 {strides = array<i32>} : memref<22x256xf32, #tpu.memory_space<vmem>>, vector<1x256xf32>,
    %c0_292 = arith.constant 0 : index
    %c0_293 = arith.constant 0 : index
    %812 = vector.load %arg62[%c0_292, %c0_293] : memref<22x256xf32, #tpu.memory_space<vmem>>, vector<22x256xf32>
    %cst_294 = arith.constant dense<0.000000e+00> : vector<22x256xf32>
    %813 = tpu.matmul %672, %183, %cst_294 {dimension_numbers = #tpu.dot_dimension_numbers<[1], [0], [0], [1], [0, 0, 1, 1], [], []>} : vector<22x8xf32>, vector<8x256xf32>, vector<22x256xf32> -> vector<22x256xf32>
    %814 = arith.mulf %812, %813 : vector<22x256xf32>
    %c0_295 = arith.constant 0 : index
    %c0_296 = arith.constant 0 : index
    %815 = vector.load %arg41[%c0_295, %c0_296] : memref<1x32xf32, #tpu.memory_space<vmem>>, vector<1x32xf32>
    %816 = vector.broadcast %815 : vector<1x32xf32> to vector<22x32xf32>
    %817 = arith.mulf %667, %816 : vector<22x32xf32>
    %818 = vector.extract_strided_slice %814 {offsets = [0, 0], sizes = [22, 32], strides = [1, 1]} : vector<22x256xf32> to vector<22x32xf32>
    %819 = arith.addf %817, %818 : vector<22x32xf32>
    %820 = vector.extract_strided_slice %814 {offsets = [0, 32], sizes = [22, 32], strides = [1, 1]} : vector<22x256xf32> to vector<22x32xf32>
    %821 = arith.addf %819, %820 : vector<22x32xf32>
    %822 = vector.extract_strided_slice %814 {offsets = [0, 64], sizes = [22, 32], strides = [1, 1]} : vector<22x256xf32> to vector<22x32xf32>
    %823 = arith.addf %821, %822 : vector<22x32xf32>
    %824 = vector.extract_strided_slice %814 {offsets = [0, 96], sizes = [22, 32], strides = [1, 1]} : vector<22x256xf32> to vector<22x32xf32>
    %825 = arith.addf %823, %824 : vector<22x32xf32>
    %826 = vector.extract_strided_slice %814 {offsets = [0, 128], sizes = [22, 32], strides = [1, 1]} : vector<22x256xf32> to vector<22x32xf32>
    %827 = arith.addf %825, %826 : vector<22x32xf32>
    %828 = vector.extract_strided_slice %814 {offsets = [0, 160], sizes = [22, 32], strides = [1, 1]} : vector<22x256xf32> to vector<22x32xf32>
    %829 = arith.addf %827, %828 : vector<22x32xf32>
    %830 = vector.extract_strided_slice %814 {offsets = [0, 192], sizes = [22, 32], strides = [1, 1]} : vector<22x256xf32> to vector<22x32xf32>
    %831 = arith.addf %829, %830 : vector<22x32xf32>
    %832 = vector.extract_strided_slice %814 {offsets = [0, 224], sizes = [22, 32], strides = [1, 1]} : vector<22x256xf32> to vector<22x32xf32>
    %833 = arith.addf %831, %832 : vector<22x32xf32>
    %834 = arith.negf %648 : vector<22x32xf32>
    %835 = math.exp %834 : vector<22x32xf32>
    %cst_297 = arith.constant 1.000000e+00 : f32
    %836 = vector.broadcast %cst_297 : f32 to vector<22x32xf32>
    %837 = arith.addf %836, %835 : vector<22x32xf32>
    %838 = arith.divf %836, %837 : vector<22x32xf32>
    %839 = arith.mulf %648, %838 : vector<22x32xf32>
    %840 = arith.mulf %833, %839 : vector<22x32xf32>
    %c0_298 = arith.constant 0 : index
    %c0_299 = arith.constant 0 : index
    %841 = vector.load %arg47[%c0_298, %c0_299] : memref<32x32xf32, #tpu.memory_space<vmem>>, vector<32x32xf32>
    %cst_300 = arith.constant dense<0.000000e+00> : vector<22x32xf32>
    %842 = tpu.matmul %840, %841, %cst_300 {dimension_numbers = #tpu.dot_dimension_numbers<[1], [0], [0], [1], [0, 0, 1, 1], [], []>} : vector<22x32xf32>, vector<32x32xf32>, vector<22x32xf32> -> vector<22x32xf32>
    %843 = vector.extract_strided_slice %646 {offsets = [0, 0], sizes = [22, 32], strides = [1, 1]} : vector<22x64xf32> to vector<22x32xf32>
    %844 = vector.extract_strided_slice %646 {offsets = [0, 32], sizes = [22, 32], strides = [1, 1]} : vector<22x64xf32> to vector<22x32xf32>
    %c0_301 = arith.constant 0 : index
    %c0_302 = arith.constant 0 : index
    %845 = vector.load %arg52[%c0_301, %c0_302] : memref<2x32xf32, #tpu.memory_space<vmem>>, vector<2x32xf32>
    %846 = vector.extract_strided_slice %845 {offsets = [0, 0], sizes = [1, 32], strides = [1, 1]} : vector<2x32xf32> to vector<1x32xf32>
    %c0_303 = arith.constant 0 : index
    %c0_304 = arith.constant 0 : index
    %847 = vector.load %arg52[%c0_303, %c0_304] : memref<2x32xf32, #tpu.memory_space<vmem>>, vector<2x32xf32>
    %848 = vector.extract_strided_slice %847 {offsets = [1, 0], sizes = [1, 32], strides = [1, 1]} : vector<2x32xf32> to vector<1x32xf32>
    %cst_305 = arith.constant dense<0.000000e+00> : vector<22x32xf32>
    %849 = tpu.matmul %120, %843, %cst_305 {dimension_numbers = #tpu.dot_dimension_numbers<[1], [0], [0], [1], [0, 0, 1, 1], [], []>} : vector<22x22xf32>, vector<22x32xf32>, vector<22x32xf32> -> vector<22x32xf32>
    %850 = vector.broadcast %848 : vector<1x32xf32> to vector<22x32xf32>
    %851 = arith.mulf %850, %843 : vector<22x32xf32>
    %852 = vector.broadcast %846 : vector<1x32xf32> to vector<22x32xf32>
    %853 = arith.mulf %852, %849 : vector<22x32xf32>
    %854 = arith.addf %851, %853 : vector<22x32xf32>
    %c0_306 = arith.constant 0 : index
    %c0_307 = arith.constant 0 : index
    %855 = vector.load %arg51[%c0_306, %c0_307] : memref<1x32xf32, #tpu.memory_space<vmem>>, vector<1x32xf32>
    %856 = vector.broadcast %855 : vector<1x32xf32> to vector<22x32xf32>
    %857 = arith.addf %854, %856 : vector<22x32xf32>
    %858 = arith.negf %857 : vector<22x32xf32>
    %859 = math.exp %858 : vector<22x32xf32>
    %cst_308 = arith.constant 1.000000e+00 : f32
    %860 = vector.broadcast %cst_308 : f32 to vector<22x32xf32>
    %861 = arith.addf %860, %859 : vector<22x32xf32>
    %862 = arith.divf %860, %861 : vector<22x32xf32>
    %863 = arith.mulf %857, %862 : vector<22x32xf32>
    %c0_309 = arith.constant 0 : index
    %c0_310 = arith.constant 0 : index
    %864 = vector.load %arg57[%c0_309, %c0_310] : memref<32x18xf32, #tpu.memory_space<vmem>>, vector<32x18xf32>
    %cst_311 = arith.constant dense<0.000000e+00> : vector<22x18xf32>
    %865 = tpu.matmul %863, %864, %cst_311 {dimension_numbers = #tpu.dot_dimension_numbers<[1], [0], [0], [1], [0, 0, 1, 1], [], []>} : vector<22x32xf32>, vector<32x18xf32>, vector<22x18xf32> -> vector<22x18xf32>
    %866 = vector.extract_strided_slice %865 {offsets = [0, 0], sizes = [22, 2], strides = [1, 1]} : vector<22x18xf32> to vector<22x2xf32>
    %867 = vector.extract_strided_slice %865 {offsets = [0, 2], sizes = [22, 8], strides = [1, 1]} : vector<22x18xf32> to vector<22x8xf32>
    %868 = vector.extract_strided_slice %865 {offsets = [0, 10], sizes = [22, 8], strides = [1, 1]} : vector<22x18xf32> to vector<22x8xf32>
    %c0_312 = arith.constant 0 : index
    %c0_313 = arith.constant 0 : index
    %869 = vector.load %arg54[%c0_312, %c0_313] : memref<2x32xf32, #tpu.memory_space<vmem>>, vector<2x32xf32>
    %cst_314 = arith.constant dense<0.000000e+00> : vector<22x32xf32>
    %870 = tpu.matmul %866, %869, %cst_314 {dimension_numbers = #tpu.dot_dimension_numbers<[1], [0], [0], [1], [0, 0, 1, 1], [], []>} : vector<22x2xf32>, vector<2x32xf32>, vector<22x32xf32> -> vector<22x32xf32>
    %c0_315 = arith.constant 0 : index
    %c0_316 = arith.constant 0 : index
    %871 = vector.load %arg53[%c0_315, %c0_316] : memref<1x32xf32, #tpu.memory_space<vmem>>, vector<1x32xf32>
    %872 = vector.broadcast %871 : vector<1x32xf32> to vector<22x32xf32>
    %873 = arith.addf %870, %872 : vector<22x32xf32>
    %cst_317 = arith.constant 0.000000e+00 : f32
    %874 = vector.broadcast %cst_317 : f32 to vector<22x32xf32>
    %875 = arith.maximumf %873, %874 : vector<22x32xf32>
    %876 = math.absf %873 : vector<22x32xf32>
    %cst_318 = arith.constant 0.000000e+00 : f32
    %877 = vector.broadcast %cst_318 : f32 to vector<22x32xf32>
    %878 = arith.subf %877, %876 : vector<22x32xf32>
    %879 = math.exp %878 : vector<22x32xf32>
    %cst_319 = arith.constant 1.000000e+00 : f32
    %880 = vector.broadcast %cst_319 : f32 to vector<22x32xf32>
    %881 = arith.addf %880, %879 : vector<22x32xf32>
    %882 = math.log %881 : vector<22x32xf32>
    %883 = arith.addf %875, %882 : vector<22x32xf32>
    %c0_320 = arith.constant 0 : index
    %c0_321 = arith.constant 0 : index
    %884 = vector.load %arg49[%c0_320, %c0_321] : memref<1x256xf32, #tpu.memory_space<vmem>>, vector<1x256xf32>
    %885 = math.exp %884 : vector<1x256xf32>
    %cst_322 = arith.constant 0.000000e+00 : f32
    %886 = vector.broadcast %cst_322 : f32 to vector<1x256xf32>
    %887 = arith.subf %886, %885 : vector<1x256xf32>
    %cst_323 = arith.constant dense<0.000000e+00> : vector<22x256xf32>
    %888 = tpu.matmul %883, %171, %cst_323 {dimension_numbers = #tpu.dot_dimension_numbers<[1], [0], [0], [1], [0, 0, 1, 1], [], []>} : vector<22x32xf32>, vector<32x256xf32>, vector<22x256xf32> -> vector<22x256xf32>
    %889 = vector.broadcast %887 : vector<1x256xf32> to vector<22x256xf32>
    %890 = arith.mulf %888, %889 : vector<22x256xf32>
    %891 = math.exp %890 : vector<22x256xf32>
    %892 = arith.mulf %883, %863 : vector<22x32xf32>
    %cst_324 = arith.constant dense<0.000000e+00> : vector<22x256xf32>
    %893 = tpu.matmul %892, %171, %cst_324 {dimension_numbers = #tpu.dot_dimension_numbers<[1], [0], [0], [1], [0, 0, 1, 1], [], []>} : vector<22x32xf32>, vector<32x256xf32>, vector<22x256xf32> -> vector<22x256xf32>
    %cst_325 = arith.constant dense<0.000000e+00> : vector<22x256xf32>
    %894 = tpu.matmul %867, %183, %cst_325 {dimension_numbers = #tpu.dot_dimension_numbers<[1], [0], [0], [1], [0, 0, 1, 1], [], []>} : vector<22x8xf32>, vector<8x256xf32>, vector<22x256xf32> -> vector<22x256xf32>
    %895 = arith.mulf %893, %894 : vector<22x256xf32>
    %cst_326 = arith.constant 0.000000e+00 : f32
    %896 = vector.broadcast %cst_326 : f32 to vector<1x256xf32>
    %897 = vector.extract_strided_slice %891 {offsets = [10, 0], sizes = [1, 256], strides = [1, 1]} : vector<22x256xf32> to vector<1x256xf32>
    %898 = arith.mulf %897, %896 : vector<1x256xf32>
    %899 = vector.extract_strided_slice %895 {offsets = [10, 0], sizes = [1, 256], strides = [1, 1]} : vector<22x256xf32> to vector<1x256xf32>
    %900 = arith.addf %898, %899 : vector<1x256xf32>
    %c10_327 = arith.constant 10 : index
    %c0_328 = arith.constant 0 : index
    %901 = vector.load %arg62[%c10_327, %c0_328] : memref<22x256xf32, #tpu.memory_space<vmem>>, vector<1x256xf32>
    tpu.vector_store %arg62[%c10_327, %c0_328], %900 {strides = array<i32>} : memref<22x256xf32, #tpu.memory_space<vmem>>, vector<1x256xf32>,
    %902 = vector.extract_strided_slice %891 {offsets = [9, 0], sizes = [1, 256], strides = [1, 1]} : vector<22x256xf32> to vector<1x256xf32>
    %903 = arith.mulf %902, %900 : vector<1x256xf32>
    %904 = vector.extract_strided_slice %895 {offsets = [9, 0], sizes = [1, 256], strides = [1, 1]} : vector<22x256xf32> to vector<1x256xf32>
    %905 = arith.addf %903, %904 : vector<1x256xf32>
    %c9_329 = arith.constant 9 : index
    %c0_330 = arith.constant 0 : index
    %906 = vector.load %arg62[%c9_329, %c0_330] : memref<22x256xf32, #tpu.memory_space<vmem>>, vector<1x256xf32>
    tpu.vector_store %arg62[%c9_329, %c0_330], %905 {strides = array<i32>} : memref<22x256xf32, #tpu.memory_space<vmem>>, vector<1x256xf32>,
    %907 = vector.extract_strided_slice %891 {offsets = [8, 0], sizes = [1, 256], strides = [1, 1]} : vector<22x256xf32> to vector<1x256xf32>
    %908 = arith.mulf %907, %905 : vector<1x256xf32>
    %909 = vector.extract_strided_slice %895 {offsets = [8, 0], sizes = [1, 256], strides = [1, 1]} : vector<22x256xf32> to vector<1x256xf32>
    %910 = arith.addf %908, %909 : vector<1x256xf32>
    %c8_331 = arith.constant 8 : index
    %c0_332 = arith.constant 0 : index
    %911 = vector.load %arg62[%c8_331, %c0_332] : memref<22x256xf32, #tpu.memory_space<vmem>>, vector<1x256xf32>
    tpu.vector_store %arg62[%c8_331, %c0_332], %910 {strides = array<i32>} : memref<22x256xf32, #tpu.memory_space<vmem>>, vector<1x256xf32>,
    %912 = vector.extract_strided_slice %891 {offsets = [7, 0], sizes = [1, 256], strides = [1, 1]} : vector<22x256xf32> to vector<1x256xf32>
    %913 = arith.mulf %912, %910 : vector<1x256xf32>
    %914 = vector.extract_strided_slice %895 {offsets = [7, 0], sizes = [1, 256], strides = [1, 1]} : vector<22x256xf32> to vector<1x256xf32>
    %915 = arith.addf %913, %914 : vector<1x256xf32>
    %c7_333 = arith.constant 7 : index
    %c0_334 = arith.constant 0 : index
    %916 = vector.load %arg62[%c7_333, %c0_334] : memref<22x256xf32, #tpu.memory_space<vmem>>, vector<1x256xf32>
    tpu.vector_store %arg62[%c7_333, %c0_334], %915 {strides = array<i32>} : memref<22x256xf32, #tpu.memory_space<vmem>>, vector<1x256xf32>,
    %917 = vector.extract_strided_slice %891 {offsets = [6, 0], sizes = [1, 256], strides = [1, 1]} : vector<22x256xf32> to vector<1x256xf32>
    %918 = arith.mulf %917, %915 : vector<1x256xf32>
    %919 = vector.extract_strided_slice %895 {offsets = [6, 0], sizes = [1, 256], strides = [1, 1]} : vector<22x256xf32> to vector<1x256xf32>
    %920 = arith.addf %918, %919 : vector<1x256xf32>
    %c6_335 = arith.constant 6 : index
    %c0_336 = arith.constant 0 : index
    %921 = vector.load %arg62[%c6_335, %c0_336] : memref<22x256xf32, #tpu.memory_space<vmem>>, vector<1x256xf32>
    tpu.vector_store %arg62[%c6_335, %c0_336], %920 {strides = array<i32>} : memref<22x256xf32, #tpu.memory_space<vmem>>, vector<1x256xf32>,
    %922 = vector.extract_strided_slice %891 {offsets = [5, 0], sizes = [1, 256], strides = [1, 1]} : vector<22x256xf32> to vector<1x256xf32>
    %923 = arith.mulf %922, %920 : vector<1x256xf32>
    %924 = vector.extract_strided_slice %895 {offsets = [5, 0], sizes = [1, 256], strides = [1, 1]} : vector<22x256xf32> to vector<1x256xf32>
    %925 = arith.addf %923, %924 : vector<1x256xf32>
    %c5_337 = arith.constant 5 : index
    %c0_338 = arith.constant 0 : index
    %926 = vector.load %arg62[%c5_337, %c0_338] : memref<22x256xf32, #tpu.memory_space<vmem>>, vector<1x256xf32>
    tpu.vector_store %arg62[%c5_337, %c0_338], %925 {strides = array<i32>} : memref<22x256xf32, #tpu.memory_space<vmem>>, vector<1x256xf32>,
    %927 = vector.extract_strided_slice %891 {offsets = [4, 0], sizes = [1, 256], strides = [1, 1]} : vector<22x256xf32> to vector<1x256xf32>
    %928 = arith.mulf %927, %925 : vector<1x256xf32>
    %929 = vector.extract_strided_slice %895 {offsets = [4, 0], sizes = [1, 256], strides = [1, 1]} : vector<22x256xf32> to vector<1x256xf32>
    %930 = arith.addf %928, %929 : vector<1x256xf32>
    %c4_339 = arith.constant 4 : index
    %c0_340 = arith.constant 0 : index
    %931 = vector.load %arg62[%c4_339, %c0_340] : memref<22x256xf32, #tpu.memory_space<vmem>>, vector<1x256xf32>
    tpu.vector_store %arg62[%c4_339, %c0_340], %930 {strides = array<i32>} : memref<22x256xf32, #tpu.memory_space<vmem>>, vector<1x256xf32>,
    %932 = vector.extract_strided_slice %891 {offsets = [3, 0], sizes = [1, 256], strides = [1, 1]} : vector<22x256xf32> to vector<1x256xf32>
    %933 = arith.mulf %932, %930 : vector<1x256xf32>
    %934 = vector.extract_strided_slice %895 {offsets = [3, 0], sizes = [1, 256], strides = [1, 1]} : vector<22x256xf32> to vector<1x256xf32>
    %935 = arith.addf %933, %934 : vector<1x256xf32>
    %c3_341 = arith.constant 3 : index
    %c0_342 = arith.constant 0 : index
    %936 = vector.load %arg62[%c3_341, %c0_342] : memref<22x256xf32, #tpu.memory_space<vmem>>, vector<1x256xf32>
    tpu.vector_store %arg62[%c3_341, %c0_342], %935 {strides = array<i32>} : memref<22x256xf32, #tpu.memory_space<vmem>>, vector<1x256xf32>,
    %937 = vector.extract_strided_slice %891 {offsets = [2, 0], sizes = [1, 256], strides = [1, 1]} : vector<22x256xf32> to vector<1x256xf32>
    %938 = arith.mulf %937, %935 : vector<1x256xf32>
    %939 = vector.extract_strided_slice %895 {offsets = [2, 0], sizes = [1, 256], strides = [1, 1]} : vector<22x256xf32> to vector<1x256xf32>
    %940 = arith.addf %938, %939 : vector<1x256xf32>
    %c2_343 = arith.constant 2 : index
    %c0_344 = arith.constant 0 : index
    %941 = vector.load %arg62[%c2_343, %c0_344] : memref<22x256xf32, #tpu.memory_space<vmem>>, vector<1x256xf32>
    tpu.vector_store %arg62[%c2_343, %c0_344], %940 {strides = array<i32>} : memref<22x256xf32, #tpu.memory_space<vmem>>, vector<1x256xf32>,
    %942 = vector.extract_strided_slice %891 {offsets = [1, 0], sizes = [1, 256], strides = [1, 1]} : vector<22x256xf32> to vector<1x256xf32>
    %943 = arith.mulf %942, %940 : vector<1x256xf32>
    %944 = vector.extract_strided_slice %895 {offsets = [1, 0], sizes = [1, 256], strides = [1, 1]} : vector<22x256xf32> to vector<1x256xf32>
    %945 = arith.addf %943, %944 : vector<1x256xf32>
    %c1_345 = arith.constant 1 : index
    %c0_346 = arith.constant 0 : index
    %946 = vector.load %arg62[%c1_345, %c0_346] : memref<22x256xf32, #tpu.memory_space<vmem>>, vector<1x256xf32>
    tpu.vector_store %arg62[%c1_345, %c0_346], %945 {strides = array<i32>} : memref<22x256xf32, #tpu.memory_space<vmem>>, vector<1x256xf32>,
    %947 = vector.extract_strided_slice %891 {offsets = [0, 0], sizes = [1, 256], strides = [1, 1]} : vector<22x256xf32> to vector<1x256xf32>
    %948 = arith.mulf %947, %945 : vector<1x256xf32>
    %949 = vector.extract_strided_slice %895 {offsets = [0, 0], sizes = [1, 256], strides = [1, 1]} : vector<22x256xf32> to vector<1x256xf32>
    %950 = arith.addf %948, %949 : vector<1x256xf32>
    %c0_347 = arith.constant 0 : index
    %c0_348 = arith.constant 0 : index
    %951 = vector.load %arg62[%c0_347, %c0_348] : memref<22x256xf32, #tpu.memory_space<vmem>>, vector<1x256xf32>
    tpu.vector_store %arg62[%c0_347, %c0_348], %950 {strides = array<i32>} : memref<22x256xf32, #tpu.memory_space<vmem>>, vector<1x256xf32>,
    %cst_349 = arith.constant 0.000000e+00 : f32
    %952 = vector.broadcast %cst_349 : f32 to vector<1x256xf32>
    %953 = vector.extract_strided_slice %891 {offsets = [21, 0], sizes = [1, 256], strides = [1, 1]} : vector<22x256xf32> to vector<1x256xf32>
    %954 = arith.mulf %953, %952 : vector<1x256xf32>
    %955 = vector.extract_strided_slice %895 {offsets = [21, 0], sizes = [1, 256], strides = [1, 1]} : vector<22x256xf32> to vector<1x256xf32>
    %956 = arith.addf %954, %955 : vector<1x256xf32>
    %c21_350 = arith.constant 21 : index
    %c0_351 = arith.constant 0 : index
    %957 = vector.load %arg62[%c21_350, %c0_351] : memref<22x256xf32, #tpu.memory_space<vmem>>, vector<1x256xf32>
    tpu.vector_store %arg62[%c21_350, %c0_351], %956 {strides = array<i32>} : memref<22x256xf32, #tpu.memory_space<vmem>>, vector<1x256xf32>,
    %958 = vector.extract_strided_slice %891 {offsets = [20, 0], sizes = [1, 256], strides = [1, 1]} : vector<22x256xf32> to vector<1x256xf32>
    %959 = arith.mulf %958, %956 : vector<1x256xf32>
    %960 = vector.extract_strided_slice %895 {offsets = [20, 0], sizes = [1, 256], strides = [1, 1]} : vector<22x256xf32> to vector<1x256xf32>
    %961 = arith.addf %959, %960 : vector<1x256xf32>
    %c20_352 = arith.constant 20 : index
    %c0_353 = arith.constant 0 : index
    %962 = vector.load %arg62[%c20_352, %c0_353] : memref<22x256xf32, #tpu.memory_space<vmem>>, vector<1x256xf32>
    tpu.vector_store %arg62[%c20_352, %c0_353], %961 {strides = array<i32>} : memref<22x256xf32, #tpu.memory_space<vmem>>, vector<1x256xf32>,
    %963 = vector.extract_strided_slice %891 {offsets = [19, 0], sizes = [1, 256], strides = [1, 1]} : vector<22x256xf32> to vector<1x256xf32>
    %964 = arith.mulf %963, %961 : vector<1x256xf32>
    %965 = vector.extract_strided_slice %895 {offsets = [19, 0], sizes = [1, 256], strides = [1, 1]} : vector<22x256xf32> to vector<1x256xf32>
    %966 = arith.addf %964, %965 : vector<1x256xf32>
    %c19_354 = arith.constant 19 : index
    %c0_355 = arith.constant 0 : index
    %967 = vector.load %arg62[%c19_354, %c0_355] : memref<22x256xf32, #tpu.memory_space<vmem>>, vector<1x256xf32>
    tpu.vector_store %arg62[%c19_354, %c0_355], %966 {strides = array<i32>} : memref<22x256xf32, #tpu.memory_space<vmem>>, vector<1x256xf32>,
    %968 = vector.extract_strided_slice %891 {offsets = [18, 0], sizes = [1, 256], strides = [1, 1]} : vector<22x256xf32> to vector<1x256xf32>
    %969 = arith.mulf %968, %966 : vector<1x256xf32>
    %970 = vector.extract_strided_slice %895 {offsets = [18, 0], sizes = [1, 256], strides = [1, 1]} : vector<22x256xf32> to vector<1x256xf32>
    %971 = arith.addf %969, %970 : vector<1x256xf32>
    %c18_356 = arith.constant 18 : index
    %c0_357 = arith.constant 0 : index
    %972 = vector.load %arg62[%c18_356, %c0_357] : memref<22x256xf32, #tpu.memory_space<vmem>>, vector<1x256xf32>
    tpu.vector_store %arg62[%c18_356, %c0_357], %971 {strides = array<i32>} : memref<22x256xf32, #tpu.memory_space<vmem>>, vector<1x256xf32>,
    %973 = vector.extract_strided_slice %891 {offsets = [17, 0], sizes = [1, 256], strides = [1, 1]} : vector<22x256xf32> to vector<1x256xf32>
    %974 = arith.mulf %973, %971 : vector<1x256xf32>
    %975 = vector.extract_strided_slice %895 {offsets = [17, 0], sizes = [1, 256], strides = [1, 1]} : vector<22x256xf32> to vector<1x256xf32>
    %976 = arith.addf %974, %975 : vector<1x256xf32>
    %c17_358 = arith.constant 17 : index
    %c0_359 = arith.constant 0 : index
    %977 = vector.load %arg62[%c17_358, %c0_359] : memref<22x256xf32, #tpu.memory_space<vmem>>, vector<1x256xf32>
    tpu.vector_store %arg62[%c17_358, %c0_359], %976 {strides = array<i32>} : memref<22x256xf32, #tpu.memory_space<vmem>>, vector<1x256xf32>,
    %978 = vector.extract_strided_slice %891 {offsets = [16, 0], sizes = [1, 256], strides = [1, 1]} : vector<22x256xf32> to vector<1x256xf32>
    %979 = arith.mulf %978, %976 : vector<1x256xf32>
    %980 = vector.extract_strided_slice %895 {offsets = [16, 0], sizes = [1, 256], strides = [1, 1]} : vector<22x256xf32> to vector<1x256xf32>
    %981 = arith.addf %979, %980 : vector<1x256xf32>
    %c16_360 = arith.constant 16 : index
    %c0_361 = arith.constant 0 : index
    %982 = vector.load %arg62[%c16_360, %c0_361] : memref<22x256xf32, #tpu.memory_space<vmem>>, vector<1x256xf32>
    tpu.vector_store %arg62[%c16_360, %c0_361], %981 {strides = array<i32>} : memref<22x256xf32, #tpu.memory_space<vmem>>, vector<1x256xf32>,
    %983 = vector.extract_strided_slice %891 {offsets = [15, 0], sizes = [1, 256], strides = [1, 1]} : vector<22x256xf32> to vector<1x256xf32>
    %984 = arith.mulf %983, %981 : vector<1x256xf32>
    %985 = vector.extract_strided_slice %895 {offsets = [15, 0], sizes = [1, 256], strides = [1, 1]} : vector<22x256xf32> to vector<1x256xf32>
    %986 = arith.addf %984, %985 : vector<1x256xf32>
    %c15_362 = arith.constant 15 : index
    %c0_363 = arith.constant 0 : index
    %987 = vector.load %arg62[%c15_362, %c0_363] : memref<22x256xf32, #tpu.memory_space<vmem>>, vector<1x256xf32>
    tpu.vector_store %arg62[%c15_362, %c0_363], %986 {strides = array<i32>} : memref<22x256xf32, #tpu.memory_space<vmem>>, vector<1x256xf32>,
    %988 = vector.extract_strided_slice %891 {offsets = [14, 0], sizes = [1, 256], strides = [1, 1]} : vector<22x256xf32> to vector<1x256xf32>
    %989 = arith.mulf %988, %986 : vector<1x256xf32>
    %990 = vector.extract_strided_slice %895 {offsets = [14, 0], sizes = [1, 256], strides = [1, 1]} : vector<22x256xf32> to vector<1x256xf32>
    %991 = arith.addf %989, %990 : vector<1x256xf32>
    %c14_364 = arith.constant 14 : index
    %c0_365 = arith.constant 0 : index
    %992 = vector.load %arg62[%c14_364, %c0_365] : memref<22x256xf32, #tpu.memory_space<vmem>>, vector<1x256xf32>
    tpu.vector_store %arg62[%c14_364, %c0_365], %991 {strides = array<i32>} : memref<22x256xf32, #tpu.memory_space<vmem>>, vector<1x256xf32>,
    %993 = vector.extract_strided_slice %891 {offsets = [13, 0], sizes = [1, 256], strides = [1, 1]} : vector<22x256xf32> to vector<1x256xf32>
    %994 = arith.mulf %993, %991 : vector<1x256xf32>
    %995 = vector.extract_strided_slice %895 {offsets = [13, 0], sizes = [1, 256], strides = [1, 1]} : vector<22x256xf32> to vector<1x256xf32>
    %996 = arith.addf %994, %995 : vector<1x256xf32>
    %c13_366 = arith.constant 13 : index
    %c0_367 = arith.constant 0 : index
    %997 = vector.load %arg62[%c13_366, %c0_367] : memref<22x256xf32, #tpu.memory_space<vmem>>, vector<1x256xf32>
    tpu.vector_store %arg62[%c13_366, %c0_367], %996 {strides = array<i32>} : memref<22x256xf32, #tpu.memory_space<vmem>>, vector<1x256xf32>,
    %998 = vector.extract_strided_slice %891 {offsets = [12, 0], sizes = [1, 256], strides = [1, 1]} : vector<22x256xf32> to vector<1x256xf32>
    %999 = arith.mulf %998, %996 : vector<1x256xf32>
    %1000 = vector.extract_strided_slice %895 {offsets = [12, 0], sizes = [1, 256], strides = [1, 1]} : vector<22x256xf32> to vector<1x256xf32>
    %1001 = arith.addf %999, %1000 : vector<1x256xf32>
    %c12_368 = arith.constant 12 : index
    %c0_369 = arith.constant 0 : index
    %1002 = vector.load %arg62[%c12_368, %c0_369] : memref<22x256xf32, #tpu.memory_space<vmem>>, vector<1x256xf32>
    tpu.vector_store %arg62[%c12_368, %c0_369], %1001 {strides = array<i32>} : memref<22x256xf32, #tpu.memory_space<vmem>>, vector<1x256xf32>,
    %1003 = vector.extract_strided_slice %891 {offsets = [11, 0], sizes = [1, 256], strides = [1, 1]} : vector<22x256xf32> to vector<1x256xf32>
    %1004 = arith.mulf %1003, %1001 : vector<1x256xf32>
    %1005 = vector.extract_strided_slice %895 {offsets = [11, 0], sizes = [1, 256], strides = [1, 1]} : vector<22x256xf32> to vector<1x256xf32>
    %1006 = arith.addf %1004, %1005 : vector<1x256xf32>
    %c11_370 = arith.constant 11 : index
    %c0_371 = arith.constant 0 : index
    %1007 = vector.load %arg62[%c11_370, %c0_371] : memref<22x256xf32, #tpu.memory_space<vmem>>, vector<1x256xf32>
    tpu.vector_store %arg62[%c11_370, %c0_371], %1006 {strides = array<i32>} : memref<22x256xf32, #tpu.memory_space<vmem>>, vector<1x256xf32>,
    %c0_372 = arith.constant 0 : index
    %c0_373 = arith.constant 0 : index
    %1008 = vector.load %arg62[%c0_372, %c0_373] : memref<22x256xf32, #tpu.memory_space<vmem>>, vector<22x256xf32>
    %cst_374 = arith.constant dense<0.000000e+00> : vector<22x256xf32>
    %1009 = tpu.matmul %868, %183, %cst_374 {dimension_numbers = #tpu.dot_dimension_numbers<[1], [0], [0], [1], [0, 0, 1, 1], [], []>} : vector<22x8xf32>, vector<8x256xf32>, vector<22x256xf32> -> vector<22x256xf32>
    %1010 = arith.mulf %1008, %1009 : vector<22x256xf32>
    %c0_375 = arith.constant 0 : index
    %c0_376 = arith.constant 0 : index
    %1011 = vector.load %arg50[%c0_375, %c0_376] : memref<1x32xf32, #tpu.memory_space<vmem>>, vector<1x32xf32>
    %1012 = vector.broadcast %1011 : vector<1x32xf32> to vector<22x32xf32>
    %1013 = arith.mulf %863, %1012 : vector<22x32xf32>
    %1014 = vector.extract_strided_slice %1010 {offsets = [0, 0], sizes = [22, 32], strides = [1, 1]} : vector<22x256xf32> to vector<22x32xf32>
    %1015 = arith.addf %1013, %1014 : vector<22x32xf32>
    %1016 = vector.extract_strided_slice %1010 {offsets = [0, 32], sizes = [22, 32], strides = [1, 1]} : vector<22x256xf32> to vector<22x32xf32>
    %1017 = arith.addf %1015, %1016 : vector<22x32xf32>
    %1018 = vector.extract_strided_slice %1010 {offsets = [0, 64], sizes = [22, 32], strides = [1, 1]} : vector<22x256xf32> to vector<22x32xf32>
    %1019 = arith.addf %1017, %1018 : vector<22x32xf32>
    %1020 = vector.extract_strided_slice %1010 {offsets = [0, 96], sizes = [22, 32], strides = [1, 1]} : vector<22x256xf32> to vector<22x32xf32>
    %1021 = arith.addf %1019, %1020 : vector<22x32xf32>
    %1022 = vector.extract_strided_slice %1010 {offsets = [0, 128], sizes = [22, 32], strides = [1, 1]} : vector<22x256xf32> to vector<22x32xf32>
    %1023 = arith.addf %1021, %1022 : vector<22x32xf32>
    %1024 = vector.extract_strided_slice %1010 {offsets = [0, 160], sizes = [22, 32], strides = [1, 1]} : vector<22x256xf32> to vector<22x32xf32>
    %1025 = arith.addf %1023, %1024 : vector<22x32xf32>
    %1026 = vector.extract_strided_slice %1010 {offsets = [0, 192], sizes = [22, 32], strides = [1, 1]} : vector<22x256xf32> to vector<22x32xf32>
    %1027 = arith.addf %1025, %1026 : vector<22x32xf32>
    %1028 = vector.extract_strided_slice %1010 {offsets = [0, 224], sizes = [22, 32], strides = [1, 1]} : vector<22x256xf32> to vector<22x32xf32>
    %1029 = arith.addf %1027, %1028 : vector<22x32xf32>
    %1030 = arith.negf %844 : vector<22x32xf32>
    %1031 = math.exp %1030 : vector<22x32xf32>
    %cst_377 = arith.constant 1.000000e+00 : f32
    %1032 = vector.broadcast %cst_377 : f32 to vector<22x32xf32>
    %1033 = arith.addf %1032, %1031 : vector<22x32xf32>
    %1034 = arith.divf %1032, %1033 : vector<22x32xf32>
    %1035 = arith.mulf %844, %1034 : vector<22x32xf32>
    %1036 = arith.mulf %1029, %1035 : vector<22x32xf32>
    %c0_378 = arith.constant 0 : index
    %c0_379 = arith.constant 0 : index
    %1037 = vector.load %arg56[%c0_378, %c0_379] : memref<32x32xf32, #tpu.memory_space<vmem>>, vector<32x32xf32>
    %cst_380 = arith.constant dense<0.000000e+00> : vector<22x32xf32>
    %1038 = tpu.matmul %1036, %1037, %cst_380 {dimension_numbers = #tpu.dot_dimension_numbers<[1], [0], [0], [1], [0, 0, 1, 1], [], []>} : vector<22x32xf32>, vector<32x32xf32>, vector<22x32xf32> -> vector<22x32xf32>
    %1039 = arith.addf %642, %842 : vector<22x32xf32>
    %1040 = arith.addf %1039, %1038 : vector<22x32xf32>
    %c0_381 = arith.constant 0 : index
    %c0_382 = arith.constant 0 : index
    %1041 = vector.load %arg37[%c0_381, %c0_382] : memref<1x32xf32, #tpu.memory_space<vmem>>, vector<1x32xf32>
    %c0_383 = arith.constant 0 : index
    %c0_384 = arith.constant 0 : index
    %1042 = vector.load %arg36[%c0_383, %c0_384] : memref<1x32xf32, #tpu.memory_space<vmem>>, vector<1x32xf32>
    %cst_385 = arith.constant dense<0.000000e+00> : vector<22xf32>
    %1043 = vector.multi_reduction <add>, %1040, %cst_385 [1] : vector<22x32xf32> to vector<22xf32>
    %1044 = vector.shape_cast %1043 : vector<22xf32> to vector<22x1xf32>
    %cst_386 = arith.constant 3.200000e+01 : f32
    %1045 = vector.broadcast %cst_386 : f32 to vector<22x1xf32>
    %1046 = arith.divf %1044, %1045 : vector<22x1xf32>
    %1047 = vector.broadcast %1046 : vector<22x1xf32> to vector<22x32xf32>
    %1048 = arith.subf %1040, %1047 : vector<22x32xf32>
    %1049 = arith.mulf %1048, %1048 : vector<22x32xf32>
    %cst_387 = arith.constant dense<0.000000e+00> : vector<22xf32>
    %1050 = vector.multi_reduction <add>, %1049, %cst_387 [1] : vector<22x32xf32> to vector<22xf32>
    %1051 = vector.shape_cast %1050 : vector<22xf32> to vector<22x1xf32>
    %cst_388 = arith.constant 3.200000e+01 : f32
    %1052 = vector.broadcast %cst_388 : f32 to vector<22x1xf32>
    %1053 = arith.divf %1051, %1052 : vector<22x1xf32>
    %1054 = vector.broadcast %1046 : vector<22x1xf32> to vector<22x32xf32>
    %1055 = arith.subf %1040, %1054 : vector<22x32xf32>
    %cst_389 = arith.constant 9.99999974E-6 : f32
    %1056 = vector.broadcast %cst_389 : f32 to vector<22x1xf32>
    %1057 = arith.addf %1053, %1056 : vector<22x1xf32>
    %1058 = math.rsqrt %1057 : vector<22x1xf32>
    %1059 = vector.broadcast %1058 : vector<22x1xf32> to vector<22x32xf32>
    %1060 = arith.mulf %1055, %1059 : vector<22x32xf32>
    %1061 = vector.broadcast %1041 : vector<1x32xf32> to vector<22x32xf32>
    %1062 = arith.mulf %1060, %1061 : vector<22x32xf32>
    %1063 = vector.broadcast %1042 : vector<1x32xf32> to vector<22x32xf32>
    %1064 = arith.addf %1062, %1063 : vector<22x32xf32>
    %c0_390 = arith.constant 0 : index
    %c0_391 = arith.constant 0 : index
    %1065 = vector.load %arg33[%c0_390, %c0_391] : memref<32x32xf32, #tpu.memory_space<vmem>>, vector<32x32xf32>
    %cst_392 = arith.constant dense<0.000000e+00> : vector<22x32xf32>
    %1066 = tpu.matmul %1064, %1065, %cst_392 {dimension_numbers = #tpu.dot_dimension_numbers<[1], [0], [0], [1], [0, 0, 1, 1], [], []>} : vector<22x32xf32>, vector<32x32xf32>, vector<22x32xf32> -> vector<22x32xf32>
    %c0_393 = arith.constant 0 : index
    %c0_394 = arith.constant 0 : index
    %1067 = vector.load %arg32[%c0_393, %c0_394] : memref<1x32xf32, #tpu.memory_space<vmem>>, vector<1x32xf32>
    %1068 = vector.broadcast %1067 : vector<1x32xf32> to vector<22x32xf32>
    %1069 = arith.addf %1066, %1068 : vector<22x32xf32>
    %cst_395 = arith.constant 0.000000e+00 : f32
    %1070 = vector.broadcast %cst_395 : f32 to vector<22x32xf32>
    %1071 = arith.maximumf %1069, %1070 : vector<22x32xf32>
    %c0_396 = arith.constant 0 : index
    %c0_397 = arith.constant 0 : index
    %1072 = vector.load %arg35[%c0_396, %c0_397] : memref<32x32xf32, #tpu.memory_space<vmem>>, vector<32x32xf32>
    %cst_398 = arith.constant dense<0.000000e+00> : vector<22x32xf32>
    %1073 = tpu.matmul %1071, %1072, %cst_398 {dimension_numbers = #tpu.dot_dimension_numbers<[1], [0], [0], [1], [0, 0, 1, 1], [], []>} : vector<22x32xf32>, vector<32x32xf32>, vector<22x32xf32> -> vector<22x32xf32>
    %c0_399 = arith.constant 0 : index
    %c0_400 = arith.constant 0 : index
    %1074 = vector.load %arg34[%c0_399, %c0_400] : memref<1x32xf32, #tpu.memory_space<vmem>>, vector<1x32xf32>
    %1075 = vector.broadcast %1074 : vector<1x32xf32> to vector<22x32xf32>
    %1076 = arith.addf %1073, %1075 : vector<22x32xf32>
    %1077 = arith.addf %1064, %1076 : vector<22x32xf32>
    %c0_401 = arith.constant 0 : index
    %c0_402 = arith.constant 0 : index
    %1078 = vector.load %arg39[%c0_401, %c0_402] : memref<1x32xf32, #tpu.memory_space<vmem>>, vector<1x32xf32>
    %c0_403 = arith.constant 0 : index
    %c0_404 = arith.constant 0 : index
    %1079 = vector.load %arg38[%c0_403, %c0_404] : memref<1x32xf32, #tpu.memory_space<vmem>>, vector<1x32xf32>
    %cst_405 = arith.constant dense<0.000000e+00> : vector<22xf32>
    %1080 = vector.multi_reduction <add>, %1077, %cst_405 [1] : vector<22x32xf32> to vector<22xf32>
    %1081 = vector.shape_cast %1080 : vector<22xf32> to vector<22x1xf32>
    %cst_406 = arith.constant 3.200000e+01 : f32
    %1082 = vector.broadcast %cst_406 : f32 to vector<22x1xf32>
    %1083 = arith.divf %1081, %1082 : vector<22x1xf32>
    %1084 = vector.broadcast %1083 : vector<22x1xf32> to vector<22x32xf32>
    %1085 = arith.subf %1077, %1084 : vector<22x32xf32>
    %1086 = arith.mulf %1085, %1085 : vector<22x32xf32>
    %cst_407 = arith.constant dense<0.000000e+00> : vector<22xf32>
    %1087 = vector.multi_reduction <add>, %1086, %cst_407 [1] : vector<22x32xf32> to vector<22xf32>
    %1088 = vector.shape_cast %1087 : vector<22xf32> to vector<22x1xf32>
    %cst_408 = arith.constant 3.200000e+01 : f32
    %1089 = vector.broadcast %cst_408 : f32 to vector<22x1xf32>
    %1090 = arith.divf %1088, %1089 : vector<22x1xf32>
    %1091 = vector.broadcast %1083 : vector<22x1xf32> to vector<22x32xf32>
    %1092 = arith.subf %1077, %1091 : vector<22x32xf32>
    %cst_409 = arith.constant 9.99999974E-6 : f32
    %1093 = vector.broadcast %cst_409 : f32 to vector<22x1xf32>
    %1094 = arith.addf %1090, %1093 : vector<22x1xf32>
    %1095 = math.rsqrt %1094 : vector<22x1xf32>
    %1096 = vector.broadcast %1095 : vector<22x1xf32> to vector<22x32xf32>
    %1097 = arith.mulf %1092, %1096 : vector<22x32xf32>
    %1098 = vector.broadcast %1078 : vector<1x32xf32> to vector<22x32xf32>
    %1099 = arith.mulf %1097, %1098 : vector<22x32xf32>
    %1100 = vector.broadcast %1079 : vector<1x32xf32> to vector<22x32xf32>
    %1101 = arith.addf %1099, %1100 : vector<22x32xf32>
    %c0_410 = arith.constant 0 : index
    %c0_411 = arith.constant 0 : index
    %1102 = vector.load %arg5[%c0_410, %c0_411] : memref<1x32xf32, #tpu.memory_space<vmem>>, vector<1x32xf32>
    %c0_412 = arith.constant 0 : index
    %c0_413 = arith.constant 0 : index
    %1103 = vector.load %arg4[%c0_412, %c0_413] : memref<1x32xf32, #tpu.memory_space<vmem>>, vector<1x32xf32>
    %cst_414 = arith.constant dense<0.000000e+00> : vector<22xf32>
    %1104 = vector.multi_reduction <add>, %1101, %cst_414 [1] : vector<22x32xf32> to vector<22xf32>
    %1105 = vector.shape_cast %1104 : vector<22xf32> to vector<22x1xf32>
    %cst_415 = arith.constant 3.200000e+01 : f32
    %1106 = vector.broadcast %cst_415 : f32 to vector<22x1xf32>
    %1107 = arith.divf %1105, %1106 : vector<22x1xf32>
    %1108 = vector.broadcast %1107 : vector<22x1xf32> to vector<22x32xf32>
    %1109 = arith.subf %1101, %1108 : vector<22x32xf32>
    %1110 = arith.mulf %1109, %1109 : vector<22x32xf32>
    %cst_416 = arith.constant dense<0.000000e+00> : vector<22xf32>
    %1111 = vector.multi_reduction <add>, %1110, %cst_416 [1] : vector<22x32xf32> to vector<22xf32>
    %1112 = vector.shape_cast %1111 : vector<22xf32> to vector<22x1xf32>
    %cst_417 = arith.constant 3.200000e+01 : f32
    %1113 = vector.broadcast %cst_417 : f32 to vector<22x1xf32>
    %1114 = arith.divf %1112, %1113 : vector<22x1xf32>
    %1115 = vector.broadcast %1107 : vector<22x1xf32> to vector<22x32xf32>
    %1116 = arith.subf %1101, %1115 : vector<22x32xf32>
    %cst_418 = arith.constant 9.99999974E-6 : f32
    %1117 = vector.broadcast %cst_418 : f32 to vector<22x1xf32>
    %1118 = arith.addf %1114, %1117 : vector<22x1xf32>
    %1119 = math.rsqrt %1118 : vector<22x1xf32>
    %1120 = vector.broadcast %1119 : vector<22x1xf32> to vector<22x32xf32>
    %1121 = arith.mulf %1116, %1120 : vector<22x32xf32>
    %1122 = vector.broadcast %1102 : vector<1x32xf32> to vector<22x32xf32>
    %1123 = arith.mulf %1121, %1122 : vector<22x32xf32>
    %1124 = vector.broadcast %1103 : vector<1x32xf32> to vector<22x32xf32>
    %1125 = arith.addf %1123, %1124 : vector<22x32xf32>
    %c0_419 = arith.constant 0 : index
    %c0_420 = arith.constant 0 : index
    %1126 = vector.load %arg59[%c0_419, %c0_420] : memref<32x8xf32, #tpu.memory_space<vmem>>, vector<32x8xf32>
    %cst_421 = arith.constant dense<0.000000e+00> : vector<22x8xf32>
    %1127 = tpu.matmul %1125, %1126, %cst_421 {dimension_numbers = #tpu.dot_dimension_numbers<[1], [0], [0], [1], [0, 0, 1, 1], [], []>} : vector<22x32xf32>, vector<32x8xf32>, vector<22x8xf32> -> vector<22x8xf32>
    %c0_422 = arith.constant 0 : index
    %c0_423 = arith.constant 0 : index
    %1128 = vector.load %arg58[%c0_422, %c0_423] : memref<1x8xf32, #tpu.memory_space<vmem>>, vector<1x8xf32>
    %1129 = vector.broadcast %1128 : vector<1x8xf32> to vector<22x8xf32>
    %1130 = arith.addf %1127, %1129 : vector<22x8xf32>
    %1131 = vector.extract_strided_slice %1130 {offsets = [0, 0], sizes = [4, 8], strides = [1, 1]} : vector<22x8xf32> to vector<4x8xf32>
    %1132 = vector.broadcast %29 : vector<4x1xf32> to vector<4x8xf32>
    %1133 = arith.mulf %1131, %1132 : vector<4x8xf32>
    %1134 = vector.broadcast %19 : vector<4x1xf32> to vector<4x8xf32>
    %1135 = arith.addf %1133, %1134 : vector<4x8xf32>
    %c0_424 = arith.constant 0 : index
    %c0_425 = arith.constant 0 : index
    %c0_426 = arith.constant 0 : index
    %1136 = vector.load %arg60[%c0_424, %c0_425, %c0_426] : memref<2x4x8xf32, #tpu.memory_space<vmem>>, vector<1x4x8xf32>
    %1137 = vector.shape_cast %1136 : vector<1x4x8xf32> to vector<4x8xf32>
    %1138 = vector.shape_cast %1135 : vector<4x8xf32> to vector<1x4x8xf32>
    tpu.vector_store %arg60[%c0_424, %c0_425, %c0_426], %1138 {strides = array<i32>} : memref<2x4x8xf32, #tpu.memory_space<vmem>>, vector<1x4x8xf32>,
    %1139 = vector.extract_strided_slice %1130 {offsets = [11, 0], sizes = [4, 8], strides = [1, 1]} : vector<22x8xf32> to vector<4x8xf32>
    %1140 = vector.broadcast %66 : vector<4x1xf32> to vector<4x8xf32>
    %1141 = arith.mulf %1139, %1140 : vector<4x8xf32>
    %1142 = vector.broadcast %56 : vector<4x1xf32> to vector<4x8xf32>
    %1143 = arith.addf %1141, %1142 : vector<4x8xf32>
    %c1_427 = arith.constant 1 : index
    %c0_428 = arith.constant 0 : index
    %c0_429 = arith.constant 0 : index
    %1144 = vector.load %arg60[%c1_427, %c0_428, %c0_429] : memref<2x4x8xf32, #tpu.memory_space<vmem>>, vector<1x4x8xf32>
    %1145 = vector.shape_cast %1144 : vector<1x4x8xf32> to vector<4x8xf32>
    %1146 = vector.shape_cast %1143 : vector<4x8xf32> to vector<1x4x8xf32>
    tpu.vector_store %arg60[%c1_427, %c0_428, %c0_429], %1146 {strides = array<i32>} : memref<2x4x8xf32, #tpu.memory_space<vmem>>, vector<1x4x8xf32>,
    return
  }
}

</mosaic_0001>

<bundles_post_ra>
// kernel: forward.1
= control target key start
LH: loop header
LB: loop body
LE: loop exit
PB: predicated region body
PF: predicated region fallthrough
CT: control target
= control target key end

     0   :  { %s11110_s6 = smov 1   ;;  %s11111_s10 = smov 2   ;;  %s13799_s0 = inlined_call_operand.smem [shape: u32[61], index: -1, kind: input, shape index: {}] }
   0x1   :  { %s11221_s5 = sld [smem:[%s13799_s0]]   ;;  %s11112_s14 = smov 3  }
   0x2   :  { %s11226_s9 = sld [smem:[%s13799_s0 + %s11110_s6]]   ;;  %s11113_s18 = smov 4  }
   0x3   :  { %s11231_s13 = sld [smem:[%s13799_s0 + %s11111_s10]]   ;;  %s11114_s22 = smov 5  }
   0x4   :  { %s11236_s17 = sld [smem:[%s13799_s0 + %s11112_s14]]   ;;  %s11115_s26 = smov 6  }
   0x5   :  { %s11241_s21 = sld [smem:[%s13799_s0 + %s11113_s18]]   ;;  %s11116_s30 = smov 7  }
   0x6   :  { %s11246_s25 = sld [smem:[%s13799_s0 + %s11114_s22]]   ;;  %s11117_s4 = smov 8  }
   0x7   :  { %13858 = sst [smem:[#allocation70_spill]] %s11221_s5  ;;  %s11118_s10 = smov 9  }
   0x8   :  { %13859 = sst [smem:[#allocation71_spill]] %s11226_s9  ;;  %s11119_s15 = smov 10  }
   0x9   :  { %13860 = sst [smem:[#allocation72_spill]] %s11231_s13  ;;  %s11120_s20 = smov 11  }
   0xa   :  { %s11251_s29 = sld [smem:[%s13799_s0 + %s11115_s26]]   ;;  %s11121_s26 = smov 12  }
   0xb   :  { %13861 = sst [smem:[#allocation73_spill]] %s11241_s21  ;;  %s11122_s1 = smov 13  }
   0xc   :  { %s11256_s3 = sld [smem:[%s13799_s0 + %s11116_s30]]   ;;  %s11123_s7 = smov 14  }
   0xd   :  { %s11261_s8 = sld [smem:[%s13799_s0 + %s11117_s4]]   ;;  %s11125_s22 = smov 16  }
   0xe   :  { %s11266_s14 = sld [smem:[%s13799_s0 + %s11118_s10]]   ;;  %s11126_s28 = smov 17  }
   0xf   :  { %s11271_s19 = sld [smem:[%s13799_s0 + %s11119_s15]]   ;;  %s11124_s15 = smov 15  }
  0x10   :  { %13862 = sst [smem:[#allocation74_spill]] %s11251_s29 }
  0x11   :  { %s11276_s24 = sld [smem:[%s13799_s0 + %s11120_s20]]  }
  0x12   :  { %13863 = sst [smem:[#allocation75_spill]] %s11256_s3 }
  0x13   :  { %s11281_s30 = sld [smem:[%s13799_s0 + %s11121_s26]]  }
  0x14   :  { %13864 = sst [smem:[#allocation76_spill]] %s11266_s14 }
  0x15   :  { %13865 = sst [smem:[#allocation77_spill]] %s11271_s19 }
  0x16   :  { %s11286_s6 = sld [smem:[%s13799_s0 + %s11122_s1]]  }
  0x17   :  { %s11291_s12 = sld [smem:[%s13799_s0 + %s11123_s7]]   ;;  %s11127_s7 = smov 18  }
  0x18   :  { %s11296_s20 = sld [smem:[%s13799_s0 + %s11124_s15]]   ;;  %s11128_s15 = smov 19  }
  0x19   :  { %13866 = sst [smem:[#allocation78_spill]] %s11281_s30 }
  0x1a   :  { %s11301_s27 = sld [smem:[%s13799_s0 + %s11125_s22]]   ;;  %s11129_s22 = smov 20  }
  0x1b   :  { %s11306_s4 = sld [smem:[%s13799_s0 + %s11126_s28]]   ;;  %s11130_s28 = smov 21  }
  0x1c   :  { %s11311_s14 = sld [smem:[%s13799_s0 + %s11127_s7]]   ;;  %s11131_s7 = smov 22  }
  0x1d   :  { %13867 = sst [smem:[#allocation79_spill]] %s11291_s12 }
  0x1e   :  { %s11316_s3 = sld [smem:[%s13799_s0 + %s11128_s15]]   ;;  %s11132_s15 = smov 23  }
  0x1f   :  { %s11321_s9 = sld [smem:[%s13799_s0 + %s11129_s22]]   ;;  %s11133_s22 = smov 24  }
  0x20   :  { %13868 = sst [smem:[#allocation80_spill]] %s11301_s27 }
  0x21   :  { %s11326_s5 = sld [smem:[%s13799_s0 + %s11130_s28]]   ;;  %s11134_s28 = smov 25  }
  0x22   :  { %13869 = sst [smem:[#allocation81_spill]] %s11311_s14 }
  0x23   :  { %s11331_s14 = sld [smem:[%s13799_s0 + %s11131_s7]]   ;;  %s11135_s7 = smov 26  }
  0x24   :  { %s11336_s27 = sld [smem:[%s13799_s0 + %s11132_s15]]   ;;  %s11136_s15 = smov 27  }
  0x25   :  { %13870 = sst [smem:[#allocation82_spill]] %s11321_s9 }
  0x26   :  { %s11341_s9 = sld [smem:[%s13799_s0 + %s11133_s22]]   ;;  %s11137_s22 = smov 28  }
  0x27   :  { %13871 = sst [smem:[#allocation83_spill]] %s11326_s5 }
  0x28   :  { %s11346_s5 = sld [smem:[%s13799_s0 + %s11134_s28]]   ;;  %s11138_s28 = smov 29  }
  0x29   :  { %13872 = sst [smem:[#allocation84_spill]] %s11331_s14 }
  0x2a   :  { %13873 = sst [smem:[#allocation85_spill]] %s11336_s27 }
  0x2b   :  { %s11351_s14 = sld [smem:[%s13799_s0 + %s11135_s7]]   ;;  %s11139_s7 = smov 30  }
  0x2c   :  { %s11356_s27 = sld [smem:[%s13799_s0 + %s11136_s15]]   ;;  %s11140_s15 = smov 31  }
  0x2d   :  { %s11361_s12 = sld [smem:[%s13799_s0 + %s11137_s22]]   ;;  %s11141_s22 = smov 32  }
  0x2e   :  { %13874 = sst [smem:[#allocation86_spill]] %s11346_s5 }
  0x2f   :  { %s11366_s5 = sld [smem:[%s13799_s0 + %s11138_s28]]   ;;  %s11142_s28 = smov 33  }
  0x30   :  { %s11371_s30 = sld [smem:[%s13799_s0 + %s11139_s7]]   ;;  %s11143_s7 = smov 34  }
  0x32   :  { %13875 = sst [smem:[#allocation87_spill]] %s11356_s27 }
  0x33   :  { %13876 = sst [smem:[#allocation88_spill]] %s11361_s12 }
  0x34   :  { %s11376_s27 = sld [smem:[%s13799_s0 + %s11140_s15]]   ;;  %s11144_s15 = smov 35  }
  0x35   :  { %13877 = sst [smem:[#allocation89_spill]] %s11366_s5 }
  0x36   :  { %13878 = sst [smem:[#allocation90_spill]] %s11371_s30 }
  0x37   :  { %s11381_s12 = sld [smem:[%s13799_s0 + %s11141_s22]]   ;;  %s11145_s22 = smov 36  }
  0x38   :  { %s11386_s5 = sld [smem:[%s13799_s0 + %s11142_s28]]   ;;  %s11146_s28 = smov 37  }
  0x39   :  { %s11391_s30 = sld [smem:[%s13799_s0 + %s11143_s7]]   ;;  %s11147_s7 = smov 38  }
  0x3a   :  { %13879 = sst [smem:[#allocation91_spill]] %s11376_s27 }
  0x3b   :  { %s11396_s27 = sld [smem:[%s13799_s0 + %s11144_s15]]   ;;  %s11148_s15 = smov 39  }
  0x3c   :  { %s11401_s19 = sld [smem:[%s13799_s0 + %s11145_s22]]   ;;  %s11149_s22 = smov 40  }
  0x3d   :  { %s11421_s29 = sld [smem:[%s13799_s0 + %s11149_s22]]   ;;  %s11153_s22 = smov 44  }
  0x3e   :  { %13880 = sst [smem:[#allocation92_spill]] %s11386_s5 }
  0x3f   :  { %13881 = sst [smem:[#allocation93_spill]] %s11391_s30 }
  0x40   :  { %s11406_s5 = sld [smem:[%s13799_s0 + %s11146_s28]]   ;;  %s11150_s28 = smov 41  }
  0x41   :  { %13882 = sst [smem:[#allocation94_spill]] %s11396_s27 }
  0x42   :  { %s11411_s30 = sld [smem:[%s13799_s0 + %s11147_s7]]   ;;  %s11151_s7 = smov 42  }
  0x43   :  { %s11416_s27 = sld [smem:[%s13799_s0 + %s11148_s15]]   ;;  %s11152_s15 = smov 43  }
  0x44   :  { %s11431_s21 = sld [smem:[%s13799_s0 + %s11151_s7]]   ;;  %s11155_s7 = smov 46  }
  0x45   :  { %s11441_s13 = sld [smem:[%s13799_s0 + %s11153_s22]]   ;;  %s11157_s22 = smov 48  }
  0x46   :  { %13883 = sst [smem:[#allocation95_spill]] %s11406_s5 }
  0x47   :  { %s11426_s5 = sld [smem:[%s13799_s0 + %s11150_s28]]   ;;  %s11154_s28 = smov 45  }
  0x49   :  { %13884 = sst [smem:[#allocation96_spill]] %s11416_s27 }
  0x4a   :  { %13886 = sst [smem:[#allocation98_spill]] %s11431_s21 }
  0x4b   :  { %s11436_s27 = sld [smem:[%s13799_s0 + %s11152_s15]]   ;;  %s11156_s15 = smov 47  }
  0x4c   :  { %13888 = sst [smem:[#allocation100_spill]] %s11441_s13 }
  0x4d   :  { %13885 = sst [smem:[#allocation97_spill]] %s11426_s5 }
  0x4e   :  { %s11446_s5 = sld [smem:[%s13799_s0 + %s11154_s28]]   ;;  %s11158_s28 = smov 49  }
  0x4f   :  { %s11451_s21 = sld [smem:[%s13799_s0 + %s11155_s7]]   ;;  %s11159_s7 = smov 50  }
  0x50   :  { %s11461_s13 = sld [smem:[%s13799_s0 + %s11157_s22]]   ;;  %s11161_s22 = smov 52  }
  0x51   :  { %13887 = sst [smem:[#allocation99_spill]] %s11436_s27 }
  0x52   :  { %s11456_s27 = sld [smem:[%s13799_s0 + %s11156_s15]]   ;;  %s11160_s15 = smov 51  }
  0x54   :  { %13889 = sst [smem:[#allocation101_spill]] %s11446_s5 }
  0x55   :  { %13890 = sst [smem:[#allocation102_spill]] %s11451_s21 }
  0x56   :  { %13892 = sst [smem:[#allocation104_spill]] %s11461_s13 }
  0x57   :  { %s11466_s5 = sld [smem:[%s13799_s0 + %s11158_s28]]   ;;  %s11162_s28 = smov 53  }
  0x58   :  { %13891 = sst [smem:[#allocation103_spill]] %s11456_s27 }
  0x59   :  { %s11471_s21 = sld [smem:[%s13799_s0 + %s11159_s7]]   ;;  %s11163_s7 = smov 54  }
  0x5a   :  { %s11476_s27 = sld [smem:[%s13799_s0 + %s11160_s15]]   ;;  %s11164_s15 = smov 55  }
  0x5b   :  { %s11481_s13 = sld [smem:[%s13799_s0 + %s11161_s22]]   ;;  %s11165_s22 = smov 56  }
  0x5d   :  { %13893 = sst [smem:[#allocation105_spill]] %s11466_s5 }
  0x5e   :  { %s11486_s5 = sld [smem:[%s13799_s0 + %s11162_s28]]   ;;  %s11166_s28 = smov 57  }
  0x5f   :  { %13894 = sst [smem:[#allocation106_spill]] %s11471_s21 }
  0x60   :  { %13895 = sst [smem:[#allocation107_spill]] %s11476_s27 }
  0x61   :  { %13896 = sst [smem:[#allocation108_spill]] %s11481_s13 }
  0x62   :  { %s11491_s21 = sld [smem:[%s13799_s0 + %s11163_s7]]   ;;  %s11167_s7 = smov 58  }
  0x63   :  { %s11496_s27 = sld [smem:[%s13799_s0 + %s11164_s15]]   ;;  %s11168_s15 = smov 59  }
  0x64   :  { %13897 = sst [smem:[#allocation109_spill]] %s11486_s5 }
  0x65   :  { %s11501_s13 = sld [smem:[%s13799_s0 + %s11165_s22]]   ;;  %s11169_s22 = smov 60  }
  0x66   :  { %s11506_s5 = sld [smem:[%s13799_s0 + %s11166_s28]]  }
  0x68   :  { %13898 = sst [smem:[#allocation110_spill]] %s11491_s21 }
  0x69   :  { %13899 = sst [smem:[#allocation111_spill]] %s11496_s27 }
  0x6a   :  { %s11511_s21 = sld [smem:[%s13799_s0 + %s11167_s7]]  }
  0x6b   :  { %13900 = sst [smem:[#allocation112_spill]] %s11501_s13 }
  0x6c   :  { %s11516_s27 = sld [smem:[%s13799_s0 + %s11168_s15]]  }
  0x6d   :  { %s11521_s13 = sld [smem:[%s13799_s0 + %s11169_s22]]  }
  0x6e   :  { %126 = vsyncpa [#allocation5], 0 }
  0x6f   :  { %127 = vsyncpa [#allocation8], 0 }
  0x70   :  { %128 = vsyncpa [#allocation11], 0 }
  0x71   :  { %129 = vsyncpa [#allocation14], 0 }
  0x72   :  { %130 = vsyncpa [#allocation17], 0 }
  0x73   :  { %131 = vsyncpa [#allocation20], 0 }
  0x74   :  { %132 = vsyncpa [#allocation23], 0 }
  0x75   :  { %133 = vsyncpa [#allocation26], 0 }
  0x76   :  { %134 = vsyncpa [#allocation29], 0 }
  0x77   :  { %135 = vsyncpa [#allocation32], 0 }
  0x78   :  { %136 = vsyncpa [#allocation35], 0 }
  0x79   :  { %137 = vsyncpa [#allocation38], 0 }
  0x7a   :  { %138 = vsyncpa [#allocation41], 0 }
  0x7b   :  { %139 = vsyncpa [#allocation44], 0 }
  0x7c   :  { %140 = vsyncpa [#allocation47], 0 }
  0x7d   :  { %141 = vsyncpa [#allocation50], 0 }
  0x7e   :  { %142 = vsyncpa [#allocation6], 0  ;;  %s11170_s0 = smov [#allocation7]   ;;  %s11171_s1 = smov [#allocation10]  }
  0x7f   :  { %s163_s28 = sshll.u32 %s11170_s0, 4  ;;  %s183_s2 = sshll.u32 %s11171_s1, 4  ;;  %s164_s28 = int_to_ptr.vmem [resolvable:$true] %s163_s28  ;;  %s184_s2 = int_to_ptr.vmem [resolvable:$true] %s183_s2 }
  0x80   :  { %s10372_s7 = scalar_lea.hbm %s11236_s17, 128 }
  0x81   :  { %p10373_p0 = scmp.ne.s32.totalorder %s11236_s17, %s10372_s7  ;;  %p10376_p1 = scmp.lt.u32.totalorder %s10372_s7, %s11236_s17 }
  0x83   :  { %p10378_p2 = pnand %p10376_p1, %p10373_p0 }
  0x85   :  { %10381 = shalt.err (!%p10378_p2)
}
  0x86   :  { %s10382_s10 = scalar_lea.vmem %s164_s28, 128  ;;  %p10387_p4 = scmp.lt.s32.totalorder %s164_s28, %s164_s28 }
  0x87   :  { %p10383_p3 = scmp.ne.s32.totalorder %s164_s28, %s10382_s10  ;;  %p10388_p5 = scmp.lt.s32.totalorder %s10382_s10, %s10382_s10 }
  0x89   :  { %p10389_p6 = por %p10388_p5, %p10387_p4 }
  0x8b   :  { %p10390_p7 = pnand %p10389_p6, %p10383_p3 }
  0x8d   :  { %10393 = shalt.err (!%p10390_p7)
}
  0x8e   :  { %166 = dma.hbm_to_vmem [thread:$0]  %s11236_s17, 128, %s164_s28, [#allocation8]  }
  0x8f   :  { %s10394_s11 = scalar_lea.hbm %s11246_s25, 16 }
  0x90   :  { %p10395_p8 = scmp.ne.s32.totalorder %s11246_s25, %s10394_s11  ;;  %p10398_p9 = scmp.lt.u32.totalorder %s10394_s11, %s11246_s25 }
  0x92   :  { %p10400_p10 = pnand %p10398_p9, %p10395_p8 }
  0x94   :  { %10403 = shalt.err (!%p10400_p10)
}
  0x95   :  { %s10404_s15 = scalar_lea.vmem %s184_s2, 16  ;;  %s10408_s16 = scalar_lea.vmem %s184_s2, 32 }
  0x96   :  { %p10405_p11 = scmp.ne.s32.totalorder %s184_s2, %s10404_s15  ;;  %p10409_p12 = scmp.lt.s32.totalorder %s184_s2, %s184_s2 }
  0x97   :  { %p10410_p13 = scmp.lt.s32.totalorder %s10408_s16, %s10404_s15 }
  0x99   :  { %p10411_p0 = por %p10410_p13, %p10409_p12 }
  0x9b   :  { %p10412_p1 = pnand %p10411_p0, %p10405_p11 }
  0x9d   :  { %10415 = shalt.err (!%p10412_p1)
}
  0x9e   :  { %186 = dma.hbm_to_vmem [thread:$0]  %s11246_s25, 16, %s184_s2, [#allocation11]  }
  0x9f   :  { %s11172_s18 = smov [#allocation13]   ;;  %s11173_s22 = smov [#allocation16]  }
  0xa0   :  { %s205_s17 = sshll.u32 %s11172_s18, 4  ;;  %s227_s23 = sshll.u32 %s11173_s22, 4  ;;  %s206_s17 = int_to_ptr.vmem [resolvable:$true] %s205_s17  ;;  %s228_s23 = int_to_ptr.vmem [resolvable:$true] %s227_s23 }
  0xa1   :  { %s10416_s26 = scalar_lea.hbm %s11261_s8, 16 }
  0xa2   :  { %p10417_p2 = scmp.ne.s32.totalorder %s11261_s8, %s10416_s26  ;;  %p10420_p3 = scmp.lt.u32.totalorder %s10416_s26, %s11261_s8 }
  0xa4   :  { %p10422_p4 = pnand %p10420_p3, %p10417_p2 }
  0xa6   :  { %10425 = shalt.err (!%p10422_p4)
}
  0xa7   :  { %s10426_s0 = scalar_lea.vmem %s206_s17, 16  ;;  %s10430_s28 = scalar_lea.vmem %s206_s17, 32 }
  0xa8   :  { %p10427_p5 = scmp.ne.s32.totalorder %s206_s17, %s10426_s0  ;;  %p10431_p6 = scmp.lt.s32.totalorder %s206_s17, %s206_s17 }
  0xa9   :  { %p10432_p7 = scmp.lt.s32.totalorder %s10430_s28, %s10426_s0 }
  0xab   :  { %p10433_p8 = por %p10432_p7, %p10431_p6 }
  0xad   :  { %p10434_p9 = pnand %p10433_p8, %p10427_p5 }
  0xaf   :  { %10437 = shalt.err (!%p10434_p9)
}
  0xb0   :  { %208 = dma.hbm_to_vmem [thread:$0]  %s11261_s8, 16, %s206_s17, [#allocation14]  }
  0xb1   :  { %s10438_s25 = scalar_lea.hbm %s11276_s24, 16 }
  0xb2   :  { %p10439_p10 = scmp.ne.s32.totalorder %s11276_s24, %s10438_s25  ;;  %p10442_p11 = scmp.lt.u32.totalorder %s10438_s25, %s11276_s24 }
  0xb4   :  { %p10444_p12 = pnand %p10442_p11, %p10439_p10 }
  0xb6   :  { %10447 = shalt.err (!%p10444_p12)
}
  0xb7   :  { %s10448_s1 = scalar_lea.vmem %s228_s23, 16  ;;  %s10452_s2 = scalar_lea.vmem %s228_s23, 32 }
  0xb8   :  { %p10449_p13 = scmp.ne.s32.totalorder %s228_s23, %s10448_s1  ;;  %p10453_p0 = scmp.lt.s32.totalorder %s228_s23, %s228_s23 }
  0xb9   :  { %p10454_p1 = scmp.lt.s32.totalorder %s10452_s2, %s10448_s1 }
  0xbb   :  { %p10455_p2 = por %p10454_p1, %p10453_p0 }
  0xbd   :  { %p10456_p3 = pnand %p10455_p2, %p10449_p13 }
  0xbf   :  { %10459 = shalt.err (!%p10456_p3)
}
  0xc0   :  { %230 = dma.hbm_to_vmem [thread:$0]  %s11276_s24, 16, %s228_s23, [#allocation17]  }
  0xc1   :  { %s11174_s7 = smov [#allocation19]   ;;  %s11175_s10 = smov [#allocation22]  }
  0xc2   :  { %s247_s8 = sshll.u32 %s11174_s7, 4  ;;  %s267_s11 = sshll.u32 %s11175_s10, 4  ;;  %s248_s8 = int_to_ptr.vmem [resolvable:$true] %s247_s8  ;;  %s268_s11 = int_to_ptr.vmem [resolvable:$true] %s267_s11 }
  0xc3   :  { %s10460_s15 = scalar_lea.hbm %s11286_s6, 16 }
  0xc4   :  { %p10461_p4 = scmp.ne.s32.totalorder %s11286_s6, %s10460_s15  ;;  %p10464_p5 = scmp.lt.u32.totalorder %s10460_s15, %s11286_s6 }
  0xc6   :  { %p10466_p6 = pnand %p10464_p5, %p10461_p4 }
  0xc8   :  { %10469 = shalt.err (!%p10466_p6)
}
  0xc9   :  { %s10470_s16 = scalar_lea.vmem %s248_s8, 16  ;;  %s10474_s18 = scalar_lea.vmem %s248_s8, 32 }
  0xca   :  { %p10471_p7 = scmp.ne.s32.totalorder %s248_s8, %s10470_s16  ;;  %p10475_p8 = scmp.lt.s32.totalorder %s248_s8, %s248_s8 }
  0xcb   :  { %p10476_p9 = scmp.lt.s32.totalorder %s10474_s18, %s10470_s16 }
  0xcd   :  { %p10477_p10 = por %p10476_p9, %p10475_p8 }
  0xcf   :  { %p10478_p11 = pnand %p10477_p10, %p10471_p7 }
  0xd1   :  { %10481 = shalt.err (!%p10478_p11)
}
  0xd2   :  { %250 = dma.hbm_to_vmem [thread:$0]  %s11286_s6, 16, %s248_s8, [#allocation20]  }
  0xd3   :  { %s10482_s24 = scalar_lea.hbm %s11296_s20, 16 }
  0xd4   :  { %p10483_p12 = scmp.ne.s32.totalorder %s11296_s20, %s10482_s24  ;;  %p10486_p13 = scmp.lt.u32.totalorder %s10482_s24, %s11296_s20 }
  0xd6   :  { %p10488_p0 = pnand %p10486_p13, %p10483_p12 }
  0xd8   :  { %10491 = shalt.err (!%p10488_p0)
}
  0xd9   :  { %s10492_s17 = scalar_lea.vmem %s268_s11, 16  ;;  %s10496_s22 = scalar_lea.vmem %s268_s11, 32 }
  0xda   :  { %p10493_p1 = scmp.ne.s32.totalorder %s268_s11, %s10492_s17  ;;  %p10497_p2 = scmp.lt.s32.totalorder %s268_s11, %s268_s11 }
  0xdb   :  { %p10498_p3 = scmp.lt.s32.totalorder %s10496_s22, %s10492_s17 }
  0xdd   :  { %p10499_p4 = por %p10498_p3, %p10497_p2 }
  0xdf   :  { %p10500_p5 = pnand %p10499_p4, %p10493_p1 }
  0xe1   :  { %10503 = shalt.err (!%p10500_p5)
}
  0xe2   :  { %270 = dma.hbm_to_vmem [thread:$0]  %s11296_s20, 16, %s268_s11, [#allocation23]  }
  0xe3   :  { %s11176_s23 = smov [#allocation25]   ;;  %s11177_s26 = smov [#allocation28]  }
  0xe4   :  { %s287_s6 = sshll.u32 %s11176_s23, 4  ;;  %s307_s0 = sshll.u32 %s11177_s26, 4  ;;  %s288_s6 = int_to_ptr.vmem [resolvable:$true] %s287_s6  ;;  %s308_s0 = int_to_ptr.vmem [resolvable:$true] %s307_s0 }
  0xe5   :  { %s10504_s28 = scalar_lea.hbm %s11306_s4, 32 }
  0xe6   :  { %p10505_p6 = scmp.ne.s32.totalorder %s11306_s4, %s10504_s28  ;;  %p10508_p7 = scmp.lt.u32.totalorder %s10504_s28, %s11306_s4 }
  0xe8   :  { %p10510_p8 = pnand %p10508_p7, %p10505_p6 }
  0xea   :  { %10513 = shalt.err (!%p10510_p8)
}
  0xeb   :  { %s10514_s25 = scalar_lea.vmem %s288_s6, 32  ;;  %p10519_p10 = scmp.lt.s32.totalorder %s288_s6, %s288_s6 }
  0xec   :  { %p10515_p9 = scmp.ne.s32.totalorder %s288_s6, %s10514_s25  ;;  %p10520_p11 = scmp.lt.s32.totalorder %s10514_s25, %s10514_s25 }
  0xee   :  { %p10521_p12 = por %p10520_p11, %p10519_p10 }
  0xf0   :  { %p10522_p13 = pnand %p10521_p12, %p10515_p9 }
  0xf2   :  { %10525 = shalt.err (!%p10522_p13)
}
  0xf3   :  { %290 = dma.hbm_to_vmem [thread:$0]  %s11306_s4, 32, %s288_s6, [#allocation26]  }
  0xf4   :  { %s10526_s20 = scalar_lea.hbm %s11316_s3, 32 }
  0xf5   :  { %p10527_p0 = scmp.ne.s32.totalorder %s11316_s3, %s10526_s20  ;;  %p10530_p1 = scmp.lt.u32.totalorder %s10526_s20, %s11316_s3 }
  0xf7   :  { %p10532_p2 = pnand %p10530_p1, %p10527_p0 }
  0xf9   :  { %10535 = shalt.err (!%p10532_p2)
}
  0xfa   :  { %s10536_s1 = scalar_lea.vmem %s308_s0, 32  ;;  %p10541_p4 = scmp.lt.s32.totalorder %s308_s0, %s308_s0 }
  0xfb   :  { %p10537_p3 = scmp.ne.s32.totalorder %s308_s0, %s10536_s1  ;;  %p10542_p5 = scmp.lt.s32.totalorder %s10536_s1, %s10536_s1 }
  0xfd   :  { %p10543_p6 = por %p10542_p5, %p10541_p4 }
  0xff   :  { %p10544_p7 = pnand %p10543_p6, %p10537_p3 }
 0x101   :  { %10547 = shalt.err (!%p10544_p7)
}
 0x102   :  { %310 = dma.hbm_to_vmem [thread:$0]  %s11316_s3, 32, %s308_s0, [#allocation29]  }
 0x103   :  { %s11178_s2 = smov [#allocation31]   ;;  %s11179_s4 = smov [#allocation34]  }
 0x104   :  { %s333_s7 = sshll.u32 %s11178_s2, 4  ;;  %s353_s8 = sshll.u32 %s11179_s4, 4  ;;  %s334_s7 = int_to_ptr.vmem [resolvable:$true] %s333_s7  ;;  %s354_s8 = int_to_ptr.vmem [resolvable:$true] %s353_s8 }
 0x105   :  { %s10548_s10 = scalar_lea.hbm %s11341_s9, 16 }
 0x106   :  { %p10549_p8 = scmp.ne.s32.totalorder %s11341_s9, %s10548_s10  ;;  %p10552_p9 = scmp.lt.u32.totalorder %s10548_s10, %s11341_s9 }
 0x108   :  { %p10554_p10 = pnand %p10552_p9, %p10549_p8 }
 0x10a   :  { %10557 = shalt.err (!%p10554_p10)
}
 0x10b   :  { %s10558_s11 = scalar_lea.vmem %s334_s7, 16  ;;  %s10562_s15 = scalar_lea.vmem %s334_s7, 32 }
 0x10c   :  { %p10559_p11 = scmp.ne.s32.totalorder %s334_s7, %s10558_s11  ;;  %p10563_p12 = scmp.lt.s32.totalorder %s334_s7, %s334_s7 }
 0x10d   :  { %p10564_p13 = scmp.lt.s32.totalorder %s10562_s15, %s10558_s11 }
 0x10f   :  { %p10565_p0 = por %p10564_p13, %p10563_p12 }
 0x111   :  { %p10566_p1 = pnand %p10565_p0, %p10559_p11 }
 0x113   :  { %10569 = shalt.err (!%p10566_p1)
}
 0x114   :  { %336 = dma.hbm_to_vmem [thread:$0]  %s11341_s9, 16, %s334_s7, [#allocation32]  }
 0x115   :  { %s10570_s3 = scalar_lea.hbm %s11351_s14, 32 }
 0x116   :  { %p10571_p2 = scmp.ne.s32.totalorder %s11351_s14, %s10570_s3  ;;  %p10574_p3 = scmp.lt.u32.totalorder %s10570_s3, %s11351_s14 }
 0x118   :  { %p10576_p4 = pnand %p10574_p3, %p10571_p2 }
 0x11a   :  { %10579 = shalt.err (!%p10576_p4)
}
 0x11b   :  { %s10580_s16 = scalar_lea.vmem %s354_s8, 32  ;;  %p10585_p6 = scmp.lt.s32.totalorder %s354_s8, %s354_s8 }
 0x11c   :  { %p10581_p5 = scmp.ne.s32.totalorder %s354_s8, %s10580_s16  ;;  %p10586_p7 = scmp.lt.s32.totalorder %s10580_s16, %s10580_s16 }
 0x11e   :  { %p10587_p8 = por %p10586_p7, %p10585_p6 }
 0x120   :  { %p10588_p9 = pnand %p10587_p8, %p10581_p5 }
 0x122   :  { %10591 = shalt.err (!%p10588_p9)
}
 0x123   :  { %356 = dma.hbm_to_vmem [thread:$0]  %s11351_s14, 32, %s354_s8, [#allocation35]  }
 0x124   :  { %s11180_s18 = smov [#allocation37]   ;;  %s11181_s9 = smov [#allocation40]  }
 0x125   :  { %s381_s24 = sshll.u32 %s11180_s18, 4  ;;  %s405_s17 = sshll.u32 %s11181_s9, 4  ;;  %s382_s24 = int_to_ptr.vmem [resolvable:$true] %s381_s24  ;;  %s406_s17 = int_to_ptr.vmem [resolvable:$true] %s405_s17 }
 0x126   :  { %s10592_s22 = scalar_lea.hbm %s11381_s12, 16 }
 0x127   :  { %p10593_p10 = scmp.ne.s32.totalorder %s11381_s12, %s10592_s22  ;;  %p10596_p11 = scmp.lt.u32.totalorder %s10592_s22, %s11381_s12 }
 0x129   :  { %p10598_p12 = pnand %p10596_p11, %p10593_p10 }
 0x12b   :  { %10601 = shalt.err (!%p10598_p12)
}
 0x12c   :  { %s10602_s23 = scalar_lea.vmem %s382_s24, 16  ;;  %s10606_s6 = scalar_lea.vmem %s382_s24, 32 }
 0x12d   :  { %p10603_p13 = scmp.ne.s32.totalorder %s382_s24, %s10602_s23  ;;  %p10607_p0 = scmp.lt.s32.totalorder %s382_s24, %s382_s24 }
 0x12e   :  { %p10608_p1 = scmp.lt.s32.totalorder %s10606_s6, %s10602_s23 }
 0x130   :  { %p10609_p2 = por %p10608_p1, %p10607_p0 }
 0x132   :  { %p10610_p3 = pnand %p10609_p2, %p10603_p13 }
 0x134   :  { %10613 = shalt.err (!%p10610_p3)
}
 0x135   :  { %384 = dma.hbm_to_vmem [thread:$0]  %s11381_s12, 16, %s382_s24, [#allocation38]  }
 0x136   :  { %s10614_s14 = scalar_lea.hbm %s11401_s19, 16 }
 0x137   :  { %p10615_p4 = scmp.ne.s32.totalorder %s11401_s19, %s10614_s14  ;;  %p10618_p5 = scmp.lt.u32.totalorder %s10614_s14, %s11401_s19 }
 0x139   :  { %p10620_p6 = pnand %p10618_p5, %p10615_p4 }
 0x13b   :  { %10623 = shalt.err (!%p10620_p6)
}
 0x13c   :  { %s10624_s26 = scalar_lea.vmem %s406_s17, 16  ;;  %s10628_s0 = scalar_lea.vmem %s406_s17, 32 }
 0x13d   :  { %p10625_p7 = scmp.ne.s32.totalorder %s406_s17, %s10624_s26  ;;  %p10629_p8 = scmp.lt.s32.totalorder %s406_s17, %s406_s17 }
 0x13e   :  { %p10630_p9 = scmp.lt.s32.totalorder %s10628_s0, %s10624_s26 }
 0x140   :  { %p10631_p10 = por %p10630_p9, %p10629_p8 }
 0x142   :  { %p10632_p11 = pnand %p10631_p10, %p10625_p7 }
 0x144   :  { %10635 = shalt.err (!%p10632_p11)
}
 0x145   :  { %408 = dma.hbm_to_vmem [thread:$0]  %s11401_s19, 16, %s406_s17, [#allocation41]  }
 0x146   :  { %s11182_s28 = smov [#allocation43]   ;;  %s11183_s25 = smov [#allocation46]  }
 0x147   :  { %s425_s12 = sshll.u32 %s11182_s28, 4  ;;  %s445_s20 = sshll.u32 %s11183_s25, 4  ;;  %s426_s12 = int_to_ptr.vmem [resolvable:$true] %s425_s12  ;;  %s446_s20 = int_to_ptr.vmem [resolvable:$true] %s445_s20 }
 0x148   :  { %s10636_s1 = scalar_lea.hbm %s11411_s30, 16 }
 0x149   :  { %p10637_p12 = scmp.ne.s32.totalorder %s11411_s30, %s10636_s1  ;;  %p10640_p13 = scmp.lt.u32.totalorder %s10636_s1, %s11411_s30 }
 0x14b   :  { %p10642_p0 = pnand %p10640_p13, %p10637_p12 }
 0x14d   :  { %10645 = shalt.err (!%p10642_p0)
}
 0x14e   :  { %s10646_s2 = scalar_lea.vmem %s426_s12, 16  ;;  %s10650_s7 = scalar_lea.vmem %s426_s12, 32 }
 0x14f   :  { %p10647_p1 = scmp.ne.s32.totalorder %s426_s12, %s10646_s2  ;;  %p10651_p2 = scmp.lt.s32.totalorder %s426_s12, %s426_s12 }
 0x150   :  { %p10652_p3 = scmp.lt.s32.totalorder %s10650_s7, %s10646_s2 }
 0x152   :  { %p10653_p4 = por %p10652_p3, %p10651_p2 }
 0x154   :  { %p10654_p5 = pnand %p10653_p4, %p10647_p1 }
 0x156   :  { %10657 = shalt.err (!%p10654_p5)
}
 0x157   :  { %428 = dma.hbm_to_vmem [thread:$0]  %s11411_s30, 16, %s426_s12, [#allocation44]  }
 0x158   :  { %s10658_s19 = scalar_lea.hbm %s11421_s29, 32 }
 0x159   :  { %p10659_p6 = scmp.ne.s32.totalorder %s11421_s29, %s10658_s19  ;;  %p10662_p7 = scmp.lt.u32.totalorder %s10658_s19, %s11421_s29 }
 0x15b   :  { %p10664_p8 = pnand %p10662_p7, %p10659_p6 }
 0x15d   :  { %10667 = shalt.err (!%p10664_p8)
}
 0x15e   :  { %s10668_s4 = scalar_lea.vmem %s446_s20, 32  ;;  %p10673_p10 = scmp.lt.s32.totalorder %s446_s20, %s446_s20 }
 0x15f   :  { %p10669_p9 = scmp.ne.s32.totalorder %s446_s20, %s10668_s4  ;;  %p10674_p11 = scmp.lt.s32.totalorder %s10668_s4, %s10668_s4 }
 0x161   :  { %p10675_p12 = por %p10674_p11, %p10673_p10 }
 0x163   :  { %p10676_p13 = pnand %p10675_p12, %p10669_p9 }
 0x165   :  { %10679 = shalt.err (!%p10676_p13)
}
 0x166   :  { %s13901_s8 = sld [smem:[#allocation98_spill]]  ;;  %s11184_s10 = smov [#allocation49]  }
 0x167   :  { %448 = dma.hbm_to_vmem [thread:$0]  %s11421_s29, 32, %s446_s20, [#allocation47]  }
 0x168   :  { %s465_s11 = sshll.u32 %s11184_s10, 4  ;;  %s11185_s30 = smov [#allocation4]   ;;  %s466_s11 = int_to_ptr.vmem [resolvable:$true] %s465_s11 }
 0x169   :  { %s153_s15 = sshll.u32 %s11185_s30, 4  ;;  %s154_s15 = int_to_ptr.vmem [resolvable:$true] %s153_s15 }
 0x16c   :  { %s10680_s3 = scalar_lea.hbm %s13901_s8, 16 }
 0x16d   :  { %p10681_p0 = scmp.ne.s32.totalorder %s13901_s8, %s10680_s3  ;;  %p10684_p1 = scmp.lt.u32.totalorder %s10680_s3, %s13901_s8 }
 0x16f   :  { %p10686_p2 = pnand %p10684_p1, %p10681_p0 }
 0x171   :  { %10689 = shalt.err (!%p10686_p2)
}
 0x172   :  { %s10690_s16 = scalar_lea.vmem %s466_s11, 16  ;;  %s10694_s18 = scalar_lea.vmem %s466_s11, 32 }
 0x173   :  { %p10691_p3 = scmp.ne.s32.totalorder %s466_s11, %s10690_s16  ;;  %p10695_p4 = scmp.lt.s32.totalorder %s466_s11, %s466_s11 }
 0x174   :  { %p10696_p5 = scmp.lt.s32.totalorder %s10694_s18, %s10690_s16 }
 0x176   :  { %p10697_p6 = por %p10696_p5, %p10695_p4 }
 0x178   :  { %p10698_p7 = pnand %p10697_p6, %p10691_p3 }
 0x17a   :  { %10701 = shalt.err (!%p10698_p7)
}
 0x17b   :  { %s13902_s29 = sld [smem:[#allocation72_spill]] }
 0x17c   :  { %468 = dma.hbm_to_vmem [thread:$0]  %s13901_s8, 16, %s466_s11, [#allocation50]  }
 0x181   :  { %s10702_s24 = scalar_lea.hbm %s13902_s29, 16 }
 0x182   :  { %p10703_p8 = scmp.ne.s32.totalorder %s13902_s29, %s10702_s24  ;;  %p10706_p9 = scmp.lt.u32.totalorder %s10702_s24, %s13902_s29 }
 0x184   :  { %p10708_p10 = pnand %p10706_p9, %p10703_p8 }
 0x186   :  { %10711 = shalt.err (!%p10708_p10)
}
 0x187   :  { %s10712_s9 = scalar_lea.vmem %s154_s15, 16  ;;  %s10716_s17 = scalar_lea.vmem %s154_s15, 32 }
 0x188   :  { %p10713_p11 = scmp.ne.s32.totalorder %s154_s15, %s10712_s9  ;;  %p10717_p12 = scmp.lt.s32.totalorder %s154_s15, %s154_s15 }
 0x189   :  { %p10718_p13 = scmp.lt.s32.totalorder %s10716_s17, %s10712_s9 }
 0x18b   :  { %p10719_p0 = por %p10718_p13, %p10717_p12 }
 0x18d   :  { %p10720_p1 = pnand %p10719_p0, %p10713_p11 }
 0x18f   :  { %10723 = shalt.err (!%p10720_p1)
}
 0x190   :  { %s13903_s22 = sld [smem:[#allocation73_spill]]  ;;  %s11186_s23 = smov [#allocation9]  }
 0x191   :  { %156 = dma.hbm_to_vmem [thread:$0]  %s13902_s29, 16, %s154_s15, [#allocation5]  }
 0x192   :  { %s173_s6 = sshll.u32 %s11186_s23, 4  ;;  %s11187_s14 = smov [#allocation12]   ;;  %s174_s6 = int_to_ptr.vmem [resolvable:$true] %s173_s6 }
 0x193   :  { %s193_s26 = sshll.u32 %s11187_s14, 4  ;;  %s194_s26 = int_to_ptr.vmem [resolvable:$true] %s193_s26 }
 0x196   :  { %s10724_s0 = scalar_lea.hbm %s13903_s22, 16 }
 0x197   :  { %p10725_p2 = scmp.ne.s32.totalorder %s13903_s22, %s10724_s0  ;;  %p10728_p3 = scmp.lt.u32.totalorder %s10724_s0, %s13903_s22 }
 0x199   :  { %p10730_p4 = pnand %p10728_p3, %p10725_p2 }
 0x19b   :  { %10733 = shalt.err (!%p10730_p4)
}
 0x19c   :  { %s10734_s28 = scalar_lea.vmem %s174_s6, 16  ;;  %s10738_s12 = scalar_lea.vmem %s174_s6, 32 }
 0x19d   :  { %p10735_p5 = scmp.ne.s32.totalorder %s174_s6, %s10734_s28  ;;  %p10739_p6 = scmp.lt.s32.totalorder %s174_s6, %s174_s6 }
 0x19e   :  { %p10740_p7 = scmp.lt.s32.totalorder %s10738_s12, %s10734_s28 }
 0x1a0   :  { %p10741_p8 = por %p10740_p7, %p10739_p6 }
 0x1a2   :  { %p10742_p9 = pnand %p10741_p8, %p10735_p5 }
 0x1a4   :  { %10745 = shalt.err (!%p10742_p9)
}
 0x1a5   :  { %s13904_s25 = sld [smem:[#allocation74_spill]] }
 0x1a6   :  { %176 = dma.hbm_to_vmem [thread:$0]  %s13903_s22, 16, %s174_s6, [#allocation8]  }
 0x1ab   :  { %s10746_s20 = scalar_lea.hbm %s13904_s25, 16 }
 0x1ac   :  { %p10747_p10 = scmp.ne.s32.totalorder %s13904_s25, %s10746_s20  ;;  %p10750_p11 = scmp.lt.u32.totalorder %s10746_s20, %s13904_s25 }
 0x1ae   :  { %p10752_p12 = pnand %p10750_p11, %p10747_p10 }
 0x1b0   :  { %10755 = shalt.err (!%p10752_p12)
}
 0x1b1   :  { %s10756_s1 = scalar_lea.vmem %s194_s26, 16  ;;  %s10760_s2 = scalar_lea.vmem %s194_s26, 32 }
 0x1b2   :  { %p10757_p13 = scmp.ne.s32.totalorder %s194_s26, %s10756_s1  ;;  %p10761_p0 = scmp.lt.s32.totalorder %s194_s26, %s194_s26 }
 0x1b3   :  { %p10762_p1 = scmp.lt.s32.totalorder %s10760_s2, %s10756_s1 }
 0x1b5   :  { %p10763_p2 = por %p10762_p1, %p10761_p0 }
 0x1b7   :  { %p10764_p3 = pnand %p10763_p2, %p10757_p13 }
 0x1b9   :  { %10767 = shalt.err (!%p10764_p3)
}
 0x1ba   :  { %s13905_s7 = sld [smem:[#allocation77_spill]]  ;;  %s11188_s19 = smov [#allocation15]  }
 0x1bb   :  { %196 = dma.hbm_to_vmem [thread:$0]  %s13904_s25, 16, %s194_s26, [#allocation11]  }
 0x1bc   :  { %s217_s4 = sshll.u32 %s11188_s19, 4  ;;  %s11189_s8 = smov [#allocation18]   ;;  %s218_s4 = int_to_ptr.vmem [resolvable:$true] %s217_s4 }
 0x1bd   :  { %s237_s10 = sshll.u32 %s11189_s8, 4  ;;  %s238_s10 = int_to_ptr.vmem [resolvable:$true] %s237_s10 }
 0x1c0   :  { %s10768_s11 = scalar_lea.hbm %s13905_s7, 16 }
 0x1c1   :  { %p10769_p4 = scmp.ne.s32.totalorder %s13905_s7, %s10768_s11  ;;  %p10772_p5 = scmp.lt.u32.totalorder %s10768_s11, %s13905_s7 }
 0x1c3   :  { %p10774_p6 = pnand %p10772_p5, %p10769_p4 }
 0x1c5   :  { %10777 = shalt.err (!%p10774_p6)
}
 0x1c6   :  { %s10778_s30 = scalar_lea.vmem %s218_s4, 16  ;;  %s10782_s15 = scalar_lea.vmem %s218_s4, 32 }
 0x1c7   :  { %p10779_p7 = scmp.ne.s32.totalorder %s218_s4, %s10778_s30  ;;  %p10783_p8 = scmp.lt.s32.totalorder %s218_s4, %s218_s4 }
 0x1c8   :  { %p10784_p9 = scmp.lt.s32.totalorder %s10782_s15, %s10778_s30 }
 0x1ca   :  { %p10785_p10 = por %p10784_p9, %p10783_p8 }
 0x1cc   :  { %p10786_p11 = pnand %p10785_p10, %p10779_p7 }
 0x1ce   :  { %10789 = shalt.err (!%p10786_p11)
}
 0x1cf   :  { %s13906_s3 = sld [smem:[#allocation78_spill]] }
 0x1d0   :  { %220 = dma.hbm_to_vmem [thread:$0]  %s13905_s7, 16, %s218_s4, [#allocation14]  }
 0x1d5   :  { %s10790_s16 = scalar_lea.hbm %s13906_s3, 16 }
 0x1d6   :  { %p10791_p12 = scmp.ne.s32.totalorder %s13906_s3, %s10790_s16  ;;  %p10794_p13 = scmp.lt.u32.totalorder %s10790_s16, %s13906_s3 }
 0x1d8   :  { %p10796_p0 = pnand %p10794_p13, %p10791_p12 }
 0x1da   :  { %10799 = shalt.err (!%p10796_p0)
}
 0x1db   :  { %s10800_s18 = scalar_lea.vmem %s238_s10, 16  ;;  %s10804_s29 = scalar_lea.vmem %s238_s10, 32 }
 0x1dc   :  { %p10801_p1 = scmp.ne.s32.totalorder %s238_s10, %s10800_s18  ;;  %p10805_p2 = scmp.lt.s32.totalorder %s238_s10, %s238_s10 }
 0x1dd   :  { %p10806_p3 = scmp.lt.s32.totalorder %s10804_s29, %s10800_s18 }
 0x1df   :  { %p10807_p4 = por %p10806_p3, %p10805_p2 }
 0x1e1   :  { %p10808_p5 = pnand %p10807_p4, %p10801_p1 }
 0x1e3   :  { %10811 = shalt.err (!%p10808_p5)
}
 0x1e4   :  { %s13907_s24 = sld [smem:[#allocation79_spill]]  ;;  %s11190_s9 = smov [#allocation21]  }
 0x1e5   :  { %240 = dma.hbm_to_vmem [thread:$0]  %s13906_s3, 16, %s238_s10, [#allocation17]  }
 0x1e6   :  { %s257_s17 = sshll.u32 %s11190_s9, 4  ;;  %s11191_s22 = smov [#allocation24]   ;;  %s258_s17 = int_to_ptr.vmem [resolvable:$true] %s257_s17 }
 0x1e7   :  { %s277_s23 = sshll.u32 %s11191_s22, 4  ;;  %s278_s23 = int_to_ptr.vmem [resolvable:$true] %s277_s23 }
 0x1ea   :  { %s10812_s6 = scalar_lea.hbm %s13907_s24, 32 }
 0x1eb   :  { %p10813_p6 = scmp.ne.s32.totalorder %s13907_s24, %s10812_s6  ;;  %p10816_p7 = scmp.lt.u32.totalorder %s10812_s6, %s13907_s24 }
 0x1ed   :  { %p10818_p8 = pnand %p10816_p7, %p10813_p6 }
 0x1ef   :  { %10821 = shalt.err (!%p10818_p8)
}
 0x1f0   :  { %s10822_s14 = scalar_lea.vmem %s258_s17, 32  ;;  %p10827_p10 = scmp.lt.s32.totalorder %s258_s17, %s258_s17 }
 0x1f1   :  { %p10823_p9 = scmp.ne.s32.totalorder %s258_s17, %s10822_s14  ;;  %p10828_p11 = scmp.lt.s32.totalorder %s10822_s14, %s10822_s14 }
 0x1f3   :  { %p10829_p12 = por %p10828_p11, %p10827_p10 }
 0x1f5   :  { %p10830_p13 = pnand %p10829_p12, %p10823_p9 }
 0x1f7   :  { %10833 = shalt.err (!%p10830_p13)
}
 0x1f8   :  { %s13908_s26 = sld [smem:[#allocation80_spill]] }
 0x1f9   :  { %260 = dma.hbm_to_vmem [thread:$0]  %s13907_s24, 32, %s258_s17, [#allocation20]  }
 0x1fe   :  { %s10834_s0 = scalar_lea.hbm %s13908_s26, 16 }
 0x1ff   :  { %p10835_p0 = scmp.ne.s32.totalorder %s13908_s26, %s10834_s0  ;;  %p10838_p1 = scmp.lt.u32.totalorder %s10834_s0, %s13908_s26 }
 0x201   :  { %p10840_p2 = pnand %p10838_p1, %p10835_p0 }
 0x203   :  { %10843 = shalt.err (!%p10840_p2)
}
 0x204   :  { %s10844_s28 = scalar_lea.vmem %s278_s23, 16  ;;  %s10848_s12 = scalar_lea.vmem %s278_s23, 32 }
 0x205   :  { %p10845_p3 = scmp.ne.s32.totalorder %s278_s23, %s10844_s28  ;;  %p10849_p4 = scmp.lt.s32.totalorder %s278_s23, %s278_s23 }
 0x206   :  { %p10850_p5 = scmp.lt.s32.totalorder %s10848_s12, %s10844_s28 }
 0x208   :  { %p10851_p6 = por %p10850_p5, %p10849_p4 }
 0x20a   :  { %p10852_p7 = pnand %p10851_p6, %p10845_p3 }
 0x20c   :  { %10855 = shalt.err (!%p10852_p7)
}
 0x20d   :  { %s13909_s25 = sld [smem:[#allocation81_spill]]  ;;  %s11192_s20 = smov [#allocation27]  }
 0x20e   :  { %280 = dma.hbm_to_vmem [thread:$0]  %s13908_s26, 16, %s278_s23, [#allocation23]  }
 0x20f   :  { %s297_s1 = sshll.u32 %s11192_s20, 4  ;;  %s11193_s2 = smov [#allocation30]   ;;  %s298_s1 = int_to_ptr.vmem [resolvable:$true] %s297_s1 }
 0x210   :  { %s323_s7 = sshll.u32 %s11193_s2, 4  ;;  %s324_s7 = int_to_ptr.vmem [resolvable:$true] %s323_s7 }
 0x213   :  { %s10856_s19 = scalar_lea.hbm %s13909_s25, 16 }
 0x214   :  { %p10857_p8 = scmp.ne.s32.totalorder %s13909_s25, %s10856_s19  ;;  %p10860_p9 = scmp.lt.u32.totalorder %s10856_s19, %s13909_s25 }
 0x216   :  { %p10862_p10 = pnand %p10860_p9, %p10857_p8 }
 0x218   :  { %10865 = shalt.err (!%p10862_p10)
}
 0x219   :  { %s10866_s4 = scalar_lea.vmem %s298_s1, 16  ;;  %s10870_s8 = scalar_lea.vmem %s298_s1, 32 }
 0x21a   :  { %p10867_p11 = scmp.ne.s32.totalorder %s298_s1, %s10866_s4  ;;  %p10871_p12 = scmp.lt.s32.totalorder %s298_s1, %s298_s1 }
 0x21b   :  { %p10872_p13 = scmp.lt.s32.totalorder %s10870_s8, %s10866_s4 }
 0x21d   :  { %p10873_p0 = por %p10872_p13, %p10871_p12 }
 0x21f   :  { %p10874_p1 = pnand %p10873_p0, %p10867_p11 }
 0x221   :  { %10877 = shalt.err (!%p10874_p1)
}
 0x222   :  { %s13910_s10 = sld [smem:[#allocation85_spill]] }
 0x223   :  { %300 = dma.hbm_to_vmem [thread:$0]  %s13909_s25, 16, %s298_s1, [#allocation26]  }
 0x228   :  { %s10878_s11 = scalar_lea.hbm %s13910_s10, 32 }
 0x229   :  { %p10879_p2 = scmp.ne.s32.totalorder %s13910_s10, %s10878_s11  ;;  %p10882_p3 = scmp.lt.u32.totalorder %s10878_s11, %s13910_s10 }
 0x22b   :  { %p10884_p4 = pnand %p10882_p3, %p10879_p2 }
 0x22d   :  { %10887 = shalt.err (!%p10884_p4)
}
 0x22e   :  { %s10888_s30 = scalar_lea.vmem %s324_s7, 32  ;;  %p10893_p6 = scmp.lt.s32.totalorder %s324_s7, %s324_s7 }
 0x22f   :  { %p10889_p5 = scmp.ne.s32.totalorder %s324_s7, %s10888_s30  ;;  %p10894_p7 = scmp.lt.s32.totalorder %s10888_s30, %s10888_s30 }
 0x231   :  { %p10895_p8 = por %p10894_p7, %p10893_p6 }
 0x233   :  { %p10896_p9 = pnand %p10895_p8, %p10889_p5 }
 0x235   :  { %10899 = shalt.err (!%p10896_p9)
}
 0x236   :  { %s13911_s15 = sld [smem:[#allocation86_spill]]  ;;  %s11194_s3 = smov [#allocation33]  }
 0x237   :  { %326 = dma.hbm_to_vmem [thread:$0]  %s13910_s10, 32, %s324_s7, [#allocation29]  }
 0x238   :  { %s343_s16 = sshll.u32 %s11194_s3, 4  ;;  %s11195_s18 = smov [#allocation36]   ;;  %s344_s16 = int_to_ptr.vmem [resolvable:$true] %s343_s16 }
 0x239   :  { %s363_s29 = sshll.u32 %s11195_s18, 4  ;;  %s364_s29 = int_to_ptr.vmem [resolvable:$true] %s363_s29 }
 0x23c   :  { %s10900_s24 = scalar_lea.hbm %s13911_s15, 16 }
 0x23d   :  { %p10901_p10 = scmp.ne.s32.totalorder %s13911_s15, %s10900_s24  ;;  %p10904_p11 = scmp.lt.u32.totalorder %s10900_s24, %s13911_s15 }
 0x23f   :  { %p10906_p12 = pnand %p10904_p11, %p10901_p10 }
 0x241   :  { %10909 = shalt.err (!%p10906_p12)
}
 0x242   :  { %s10910_s9 = scalar_lea.vmem %s344_s16, 16  ;;  %s10914_s17 = scalar_lea.vmem %s344_s16, 32 }
 0x243   :  { %p10911_p13 = scmp.ne.s32.totalorder %s344_s16, %s10910_s9  ;;  %p10915_p0 = scmp.lt.s32.totalorder %s344_s16, %s344_s16 }
 0x244   :  { %p10916_p1 = scmp.lt.s32.totalorder %s10914_s17, %s10910_s9 }
 0x246   :  { %p10917_p2 = por %p10916_p1, %p10915_p0 }
 0x248   :  { %p10918_p3 = pnand %p10917_p2, %p10911_p13 }
 0x24a   :  { %10921 = shalt.err (!%p10918_p3)
}
 0x24b   :  { %s13912_s22 = sld [smem:[#allocation87_spill]] }
 0x24c   :  { %346 = dma.hbm_to_vmem [thread:$0]  %s13911_s15, 16, %s344_s16, [#allocation32]  }
 0x251   :  { %s10922_s23 = scalar_lea.hbm %s13912_s22, 16 }
 0x252   :  { %p10923_p4 = scmp.ne.s32.totalorder %s13912_s22, %s10922_s23  ;;  %p10926_p5 = scmp.lt.u32.totalorder %s10922_s23, %s13912_s22 }
 0x254   :  { %p10928_p6 = pnand %p10926_p5, %p10923_p4 }
 0x256   :  { %10931 = shalt.err (!%p10928_p6)
}
 0x257   :  { %s10932_s6 = scalar_lea.vmem %s364_s29, 16  ;;  %s10936_s14 = scalar_lea.vmem %s364_s29, 32 }
 0x258   :  { %p10933_p7 = scmp.ne.s32.totalorder %s364_s29, %s10932_s6  ;;  %p10937_p8 = scmp.lt.s32.totalorder %s364_s29, %s364_s29 }
 0x259   :  { %p10938_p9 = scmp.lt.s32.totalorder %s10936_s14, %s10932_s6 }
 0x25b   :  { %p10939_p10 = por %p10938_p9, %p10937_p8 }
 0x25d   :  { %p10940_p11 = pnand %p10939_p10, %p10933_p7 }
 0x25f   :  { %10943 = shalt.err (!%p10940_p11)
}
 0x260   :  { %s13913_s26 = sld [smem:[#allocation93_spill]]  ;;  %s11196_s0 = smov [#allocation39]  }
 0x261   :  { %366 = dma.hbm_to_vmem [thread:$0]  %s13912_s22, 16, %s364_s29, [#allocation35]  }
 0x262   :  { %s393_s28 = sshll.u32 %s11196_s0, 4  ;;  %s11197_s12 = smov [#allocation42]   ;;  %s394_s28 = int_to_ptr.vmem [resolvable:$true] %s393_s28 }
 0x263   :  { %s415_s25 = sshll.u32 %s11197_s12, 4  ;;  %s416_s25 = int_to_ptr.vmem [resolvable:$true] %s415_s25 }
 0x266   :  { %s10944_s20 = scalar_lea.hbm %s13913_s26, 16 }
 0x267   :  { %p10945_p12 = scmp.ne.s32.totalorder %s13913_s26, %s10944_s20  ;;  %p10948_p13 = scmp.lt.u32.totalorder %s10944_s20, %s13913_s26 }
 0x269   :  { %p10950_p0 = pnand %p10948_p13, %p10945_p12 }
 0x26b   :  { %10953 = shalt.err (!%p10950_p0)
}
 0x26c   :  { %s10954_s1 = scalar_lea.vmem %s394_s28, 16  ;;  %s10958_s2 = scalar_lea.vmem %s394_s28, 32 }
 0x26d   :  { %p10955_p1 = scmp.ne.s32.totalorder %s394_s28, %s10954_s1  ;;  %p10959_p2 = scmp.lt.s32.totalorder %s394_s28, %s394_s28 }
 0x26e   :  { %p10960_p3 = scmp.lt.s32.totalorder %s10958_s2, %s10954_s1 }
 0x270   :  { %p10961_p4 = por %p10960_p3, %p10959_p2 }
 0x272   :  { %p10962_p5 = pnand %p10961_p4, %p10955_p1 }
 0x274   :  { %10965 = shalt.err (!%p10962_p5)
}
 0x275   :  { %s13914_s7 = sld [smem:[#allocation95_spill]] }
 0x276   :  { %396 = dma.hbm_to_vmem [thread:$0]  %s13913_s26, 16, %s394_s28, [#allocation38]  }
 0x27b   :  { %s10966_s19 = scalar_lea.hbm %s13914_s7, 16 }
 0x27c   :  { %p10967_p6 = scmp.ne.s32.totalorder %s13914_s7, %s10966_s19  ;;  %p10970_p7 = scmp.lt.u32.totalorder %s10966_s19, %s13914_s7 }
 0x27e   :  { %p10972_p8 = pnand %p10970_p7, %p10967_p6 }
 0x280   :  { %10975 = shalt.err (!%p10972_p8)
}
 0x281   :  { %s10976_s4 = scalar_lea.vmem %s416_s25, 16  ;;  %s10980_s8 = scalar_lea.vmem %s416_s25, 32 }
 0x282   :  { %p10977_p9 = scmp.ne.s32.totalorder %s416_s25, %s10976_s4  ;;  %p10981_p10 = scmp.lt.s32.totalorder %s416_s25, %s416_s25 }
 0x283   :  { %p10982_p11 = scmp.lt.s32.totalorder %s10980_s8, %s10976_s4 }
 0x285   :  { %p10983_p12 = por %p10982_p11, %p10981_p10 }
 0x287   :  { %p10984_p13 = pnand %p10983_p12, %p10977_p9 }
 0x289   :  { %10987 = shalt.err (!%p10984_p13)
}
 0x28a   :  { %s13915_s10 = sld [smem:[#allocation96_spill]]  ;;  %s11198_s11 = smov [#allocation45]  }
 0x28b   :  { %418 = dma.hbm_to_vmem [thread:$0]  %s13914_s7, 16, %s416_s25, [#allocation41]  }
 0x28c   :  { %s435_s30 = sshll.u32 %s11198_s11, 4  ;;  %s11199_s15 = smov [#allocation48]   ;;  %s436_s30 = int_to_ptr.vmem [resolvable:$true] %s435_s30 }
 0x28d   :  { %s455_s3 = sshll.u32 %s11199_s15, 4  ;;  %s456_s3 = int_to_ptr.vmem [resolvable:$true] %s455_s3 }
 0x290   :  { %s10988_s16 = scalar_lea.hbm %s13915_s10, 16 }
 0x291   :  { %p10989_p0 = scmp.ne.s32.totalorder %s13915_s10, %s10988_s16  ;;  %p10992_p1 = scmp.lt.u32.totalorder %s10988_s16, %s13915_s10 }
 0x293   :  { %p10994_p2 = pnand %p10992_p1, %p10989_p0 }
 0x295   :  { %10997 = shalt.err (!%p10994_p2)
}
 0x296   :  { %s10998_s18 = scalar_lea.vmem %s436_s30, 16  ;;  %s11002_s29 = scalar_lea.vmem %s436_s30, 32 }
 0x297   :  { %p10999_p3 = scmp.ne.s32.totalorder %s436_s30, %s10998_s18  ;;  %p11003_p4 = scmp.lt.s32.totalorder %s436_s30, %s436_s30 }
 0x298   :  { %p11004_p5 = scmp.lt.s32.totalorder %s11002_s29, %s10998_s18 }
 0x29a   :  { %p11005_p6 = por %p11004_p5, %p11003_p4 }
 0x29c   :  { %p11006_p7 = pnand %p11005_p6, %p10999_p3 }
 0x29e   :  { %11009 = shalt.err (!%p11006_p7)
}
 0x29f   :  { %s13916_s24 = sld [smem:[#allocation97_spill]] }
 0x2a0   :  { %438 = dma.hbm_to_vmem [thread:$0]  %s13915_s10, 16, %s436_s30, [#allocation44]  }
 0x2a5   :  { %s11010_s9 = scalar_lea.hbm %s13916_s24, 16 }
 0x2a6   :  { %p11011_p8 = scmp.ne.s32.totalorder %s13916_s24, %s11010_s9  ;;  %p11014_p9 = scmp.lt.u32.totalorder %s11010_s9, %s13916_s24 }
 0x2a8   :  { %p11016_p10 = pnand %p11014_p9, %p11011_p8 }
 0x2aa   :  { %11019 = shalt.err (!%p11016_p10)
}
 0x2ab   :  { %s11020_s17 = scalar_lea.vmem %s456_s3, 16  ;;  %s11024_s22 = scalar_lea.vmem %s456_s3, 32 }
 0x2ac   :  { %p11021_p11 = scmp.ne.s32.totalorder %s456_s3, %s11020_s17  ;;  %p11025_p12 = scmp.lt.s32.totalorder %s456_s3, %s456_s3 }
 0x2ad   :  { %p11026_p13 = scmp.lt.s32.totalorder %s11024_s22, %s11020_s17 }
 0x2af   :  { %p11027_p0 = por %p11026_p13, %p11025_p12 }
 0x2b1   :  { %p11028_p1 = pnand %p11027_p0, %p11021_p11 }
 0x2b3   :  { %11031 = shalt.err (!%p11028_p1)
}
 0x2b4   :  { %s13917_s23 = sld [smem:[#allocation100_spill]]  ;;  %s11200_s6 = smov [#allocation51]  }
 0x2b5   :  { %458 = dma.hbm_to_vmem [thread:$0]  %s13916_s24, 16, %s456_s3, [#allocation47]  }
 0x2b6   :  { %s477_s14 = sshll.u32 %s11200_s6, 4  ;;  %s478_s14 = int_to_ptr.vmem [resolvable:$true] %s477_s14 }
 0x2ba   :  { %s11032_s26 = scalar_lea.hbm %s13917_s23, 16 }
 0x2bb   :  { %p11033_p2 = scmp.ne.s32.totalorder %s13917_s23, %s11032_s26  ;;  %p11036_p3 = scmp.lt.u32.totalorder %s11032_s26, %s13917_s23 }
 0x2bd   :  { %p11038_p4 = pnand %p11036_p3, %p11033_p2 }
 0x2bf   :  { %11041 = shalt.err (!%p11038_p4)
}
 0x2c0   :  { %s11042_s0 = scalar_lea.vmem %s478_s14, 16  ;;  %s11046_s28 = scalar_lea.vmem %s478_s14, 32 }
 0x2c1   :  { %p11043_p5 = scmp.ne.s32.totalorder %s478_s14, %s11042_s0  ;;  %p11047_p6 = scmp.lt.s32.totalorder %s478_s14, %s478_s14 }
 0x2c2   :  { %p11048_p7 = scmp.lt.s32.totalorder %s11046_s28, %s11042_s0 }
 0x2c4   :  { %p11049_p8 = por %p11048_p7, %p11047_p6 }
 0x2c6   :  { %p11050_p9 = pnand %p11049_p8, %p11043_p5 }
 0x2c8   :  { %11053 = shalt.err (!%p11050_p9)
}
 0x2c9   :  { %480 = dma.hbm_to_vmem [thread:$0]  %s13917_s23, 16, %s478_s14, [#allocation50]  }
 0x2ca   :  { %11076 = dma.done.wait [#allocation5], 16  }
 0x2cb   :  { %11077 = vsyncadd [#allocation5], 4294967280 }
 0x2cc   :  { %11078 = dma.done.wait [#allocation8], 144  }
 0x2cd   :  { %11079 = vsyncadd [#allocation8], 4294967152 }
 0x2ce   :  { %11080 = dma.done.wait [#allocation11], 32  }
 0x2cf   :  { %11081 = vsyncadd [#allocation11], 4294967264 }
 0x2d0   :  { %11082 = dma.done.wait [#allocation14], 32  }
 0x2d1   :  { %11083 = vsyncadd [#allocation14], 4294967264 }
 0x2d2   :  { %11084 = dma.done.wait [#allocation17], 32  }
 0x2d3   :  { %11085 = vsyncadd [#allocation17], 4294967264 }
 0x2d4   :  { %11086 = dma.done.wait [#allocation20], 48  }
 0x2d5   :  { %11087 = vsyncadd [#allocation20], 4294967248 }
 0x2d6   :  { %11088 = dma.done.wait [#allocation23], 32  }
 0x2d7   :  { %11089 = vsyncadd [#allocation23], 4294967264 }
 0x2d8   :  { %11090 = dma.done.wait [#allocation26], 48  }
 0x2d9   :  { %11091 = vsyncadd [#allocation26], 4294967248 }
 0x2da   :  { %11092 = dma.done.wait [#allocation29], 64  }
 0x2db   :  { %11093 = vsyncadd [#allocation29], 4294967232 }
 0x2dc   :  { %11094 = dma.done.wait [#allocation32], 32  }
 0x2dd   :  { %11095 = vsyncadd [#allocation32], 4294967264 }
 0x2de   :  { %11096 = dma.done.wait [#allocation35], 48  }
 0x2df   :  { %11097 = vsyncadd [#allocation35], 4294967248 }
 0x2e0   :  { %11098 = dma.done.wait [#allocation38], 32  }
 0x2e1   :  { %11099 = vsyncadd [#allocation38], 4294967264 }
 0x2e2   :  { %11100 = dma.done.wait [#allocation41], 32  }
 0x2e3   :  { %11101 = vsyncadd [#allocation41], 4294967264 }
 0x2e4   :  { %11102 = dma.done.wait [#allocation44], 32  }
 0x2e5   :  { %11103 = vsyncadd [#allocation44], 4294967264 }
 0x2e6   :  { %11104 = dma.done.wait [#allocation47], 48  }
 0x2e7   :  { %11105 = vsyncadd [#allocation47], 4294967248 }
 0x2e8   :  { %11106 = dma.done.wait [#allocation50], 32  }
 0x2e9   :  { %11107 = vsyncadd [#allocation50], 4294967264  ;;  %s13918_s12 = sld [smem:[#allocation70_spill]]  ;;  %v13840_v0 = vlaneseq  ;;  %v13836_v1 = vmov 0.0   ;;  %vm615_vm2 = vcmask 60416   ;;  %s13919_s25 = sld [smem:[#allocation71_spill]] }
 0x2ea   :  { %9427 = vmatprep.subr.mxu0 %v13836_v1  ;;  %s13922_s20 = sld [smem:[#allocation82_spill]]  ;;  %vm645_vm6 = vcmask 63488   ;;  %v684_v33 = vld [vmem:[#allocation7] sm:$0xff]  ;;  %vm11202_vm7 = vmmov 0   ;;  %v13838_v36 = vmov 0.0|0.0   ;;  %s13924_s1 = sld [smem:[#allocation89_spill]] }
 0x2eb   :  { %v11649_v2 = vshrl.u32 %v13840_v0, 7  ;;  %9428 = vmatpush3.msra.mxu0 %v684_v33  ;;  %9429 = vmatprep.mubr.msk.f32.mxu0 %vm11202_vm7, %v13836_v1  ;;  %vm692_vm12 = vcmask 64512   ;;  %vm1161_vm13 = vcmask 261120   ;;  %s13928_s2 = sld [smem:[#allocation84_spill]]  ;;  %s11204_s7 = smov 126  }
 0x2ec   :  { %9446 = vmatprep.mubr.msk.f32.mxu1 %vm11202_vm7, %v13836_v1  ;;  %9831 = vmatprep.subr.bf16.mxu1 %v13838_v36  ;;  %s11205_s19 = smov 118   ;;  %s11206_s4 = smov 96  }
 0x2ed   :  { %vm611_vm0 = vcmp.eq.s32.totalorder %v11649_v2, 0  ;;  %9837 = vmatprep.subr.bf16.mxu0 %v13838_v36  ;;  %vm784_vm14 = vcmp.ne.s32.totalorder %v11649_v2, 0  ;;  %s13942_s8 = sld [smem:[#allocation83_spill]]  ;;  %s11209_s10 = smov 64  }
 0x2ee   :  { %s11210_s11 = smov 32   ;;  %s13944_s30 = sld [smem:[#allocation88_spill]] }
 0x2ef   :  { %v604_v3 = vld [vmem:[%s13918_s12] sm:$0xf]  ;;  %v605_v4 = vld [vmem:[%s13918_s12 + $0x4] sm:$0xf]  ;;  %v607_v32 = vld [vmem:[%s13919_s25 + $0x8] sm:$0x7f] }
 0x2f0   :  { %vm610_vm1 = vcmp.ne.f32.partialorder %v604_v3, 0.0  ;;  %vm647_vm3 = vcmp.ne.f32.partialorder %v605_v4, 0.0  ;;  %v606_v31 = vld [vmem:[%s13919_s25] sm:$0x7f]  ;;  %680 = vst.msk [vmem:[#allocation2 + $0xf] sm:$0x7f] %vm645_vm6, %v607_v32 }
 0x2f1   :  { %vm612_vm4 = vmor %vm610_vm1, %vm611_vm0  ;;  %646 = vst.msk [vmem:[#allocation2 + $0x4] sm:$0x7f] %vm645_vm6, %v606_v31  ;;  %v1157_v34 = vld [vmem:[%s13922_s20] sm:$0xff]  ;;  %v1158_v35 = vld [vmem:[%s13922_s20 + $0x8] sm:$0xff]  ;;  %vm1589_vm6 = vcmask 1041408   ;;  %s13945_s15 = sld [smem:[#allocation91_spill]] }
 0x2f2   :  { %v11655_v5 = vsel %vm612_vm4, 1.0, %v13836_v1  ;;  %vm648_vm5 = vmor %vm647_vm3, %vm611_vm0  ;;  %v9832_v37 = vpack.c.bf16 %v1158_v35, %v1157_v34  ;;  %v1251_v59 = vld [vmem:[%s13924_s1] sm:$0xff]  ;;  %v1252_v60 = vld [vmem:[%s13924_s1 + $0x8] sm:$0xff]  ;;  %vm1346_vm3 = vcmask 1045504   ;;  %vm1336_vm4 = vcmask 179200   ;;  %s13948_s3 = sld [smem:[#allocation90_spill]] }
 0x2f3   :  { %v616_v6 = vsel %vm615_vm2, %v11655_v5, 0.0  ;;  %v11660_v7 = vsel %vm648_vm5, 1.0, %v13836_v1  ;;  %v620_v8 = vmul.f32 %v11655_v5, %v604_v3  ;;  %v9838_v62 = vpack.c.bf16 %v1252_v60, %v1251_v59  ;;  %v1571_v59 = vld [vmem:[#allocation28] sm:$0x3]  ;;  %s13950_s16 = sld [smem:[#allocation75_spill]]  ;;  %s13951_s18 = sld [smem:[#allocation76_spill]] }
 0x2f4   :  { %617 = vadd.xlane.f32.xlu0 %v616_v6  ;;  %v655_v9 = vmul.f32 %v11660_v7, %v605_v4  ;;  %v651_v10 = vsel %vm615_vm2, %v11660_v7, 0.0  ;;  %9833 = vmatpush3.bf16.msra.mxu1 %v9832_v37  ;;  %v1160_v6 = vld [vmem:[%s13922_s20 + $0x18] sm:$0xff]  ;;  %v11814_v60 = vsub.s32 1, %v11649_v2  ;;  %s13952_s29 = sld [smem:[#allocation102_spill]]  ;;  %s13953_s24 = sld [smem:[#allocation111_spill]] }
 0x2f5   :  { %v621_v11 = vsel %vm615_vm2, %v620_v8, 0.0  ;;  %9834 = vmatprep.subr.bf16.mxu1 %v13838_v36  ;;  %s13958_s9 = sld [smem:[#allocation104_spill]]  ;;  %s13959_s17 = sld [smem:[#allocation101_spill]] }
 0x2f6   :  { %622 = vadd.xlane.f32.xlu1 %v621_v11  ;;  %v656_v12 = vsel %vm615_vm2, %v655_v9, 0.0  ;;  %v1254_v9 = vld [vmem:[%s13924_s1 + $0x18] sm:$0xff]  ;;  %v9015_v11 = vld [vmem:[#allocation4] ss:$0 sm:$0xff]  ;;  %13931 = vst [vmem:[#allocation121_spill] sm:$0xff] %v11814_v60  ;;  %s13963_s22 = sld [smem:[#allocation99_spill]] }
 0x2f7   :  { %s13967_s23 = sld [smem:[#allocation108_spill]]  ;;  %s13968_s6 = sld [smem:[#allocation103_spill]] }
 0x2f8   :  { %652 = vadd.xlane.f32.xlu0 %v651_v10  ;;  %s13969_s14 = sld [smem:[#allocation110_spill]]  ;;  %s13970_s26 = sld [smem:[#allocation107_spill]] }
 0x2f9   :  { %s13972_s0 = sld [smem:[#allocation105_spill]]  ;;  %s13974_s28 = sld [smem:[#allocation112_spill]] }
 0x2fa   :  { %657 = vadd.xlane.f32.xlu1 %v656_v12  ;;  %s13976_s12 = sld [smem:[#allocation106_spill]]  ;;  %s13980_s25 = sld [smem:[#allocation92_spill]] }
 0x381   :  { %v618_v13 = vpop.xlane.xlu0 %617 }
 0x382   :  { %v619_v14 = vadd.f32 1e-08, %v618_v13 }
 0x383   :  { %v623_v17 = vpop.xlane.xlu1 %622 }
 0x384   :  { %10130 = vrcp.f32 %v619_v14 }
 0x385   :  { %v653_v15 = vpop.xlane.xlu0 %652 }
 0x386   :  { %v654_v16 = vadd.f32 1e-08, %v653_v15 }
 0x387   :  { %v658_v20 = vpop.xlane.xlu1 %657 }
 0x388   :  { %10132 = vrcp.f32 %v654_v16 }
 0x38e   :  { %v10131_v18 = vpop.eup %10130 }
 0x38f   :  { %v11668_v19 = vmul.f32 %v10131_v18, %v623_v17 }
 0x391   :  { %13920 = vst [vmem:[#allocation113_spill] sm:$0xff] %v11668_v19  ;;  %v626_v21 = vsub.f32 %v604_v3, %v11668_v19 }
 0x392   :  { %v10133_v22 = vpop.eup %10132 }
 0x393   :  { %v11671_v23 = vmul.f32 %v10133_v22, %v658_v20  ;;  %v627_v24 = vmul.f32 %v626_v21, %v626_v21 }
 0x395   :  { %13921 = vst [vmem:[#allocation114_spill] sm:$0xff] %v11671_v23  ;;  %v661_v25 = vsub.f32 %v605_v4, %v11671_v23  ;;  %v628_v26 = vmul.f32 %v11655_v5, %v627_v24  ;;  %v683_v4 = vld [vmem:[#allocation2 + $0x10] sm:$0x3f]  ;;  %v9023_v24 = vadd.s32 4294967295, %v11649_v2  ;;  %v13939_v23 = vlaneseq }
 0x397   :  { %v629_v27 = vsel %vm615_vm2, %v628_v26, 0.0  ;;  %v662_v28 = vmul.f32 %v661_v25, %v661_v25 }
 0x398   :  { %630 = vadd.xlane.f32.xlu0 %v629_v27 }
 0x399   :  { %v663_v29 = vmul.f32 %v11660_v7, %v662_v28 }
 0x39b   :  { %v664_v30 = vsel %vm615_vm2, %v663_v29, 0.0 }
 0x39c   :  { %665 = vadd.xlane.f32.xlu1 %v664_v30 }
 0x425   :  { %v631_v38 = vpop.xlane.xlu0 %630 }
 0x426   :  { %v632_v39 = vmul.f32 %v10131_v18, %v631_v38  ;;  %v9019_v38 = vsel %vm784_vm14, 1.0, %v13836_v1 }
 0x428   :  { %v633_v40 = vadd.f32 1e-08, %v632_v39 }
 0x429   :  { %v666_v41 = vpop.xlane.xlu1 %665 }
 0x42a   :  { %10134 = vrsqrt.f32 %v633_v40  ;;  %v667_v42 = vmul.f32 %v10133_v22, %v666_v41  ;;  %vm636_vm8 = vcmp.eq.f32.partialorder %v633_v40, inf  ;;  %v639_v46 = vand.u32 2147483648, %v633_v40 }
 0x42b   :  { %vm638_vm9 = vcmp.eq.f32.partialorder %v633_v40, 0.0  ;;  %v11748_v22 = vand.u32 127, %v13840_v0 }
 0x42c   :  { %v668_v43 = vadd.f32 1e-08, %v667_v42 }
 0x42d   :  { %vm831_vm15 = vcmp.eq.s32.totalorder %v11748_v22, %v9023_v24 }
 0x42e   :  { %10136 = vrsqrt.f32 %v668_v43  ;;  %vm671_vm10 = vcmp.eq.f32.partialorder %v668_v43, inf  ;;  %v674_v51 = vand.u32 2147483648, %v668_v43  ;;  %vm673_vm11 = vcmp.eq.f32.partialorder %v668_v43, 0.0 }
 0x42f   :  { %v9026_v39 = vsel %vm831_vm15, 1.0, %v13836_v1 }
 0x434   :  { %v10135_v44 = vpop.eup %10134 }
 0x435   :  { %v635_v45 = vmul.f32 %v10135_v44, %v633_v40 }
 0x437   :  { %v637_v47 = vsel %vm636_vm8, %v633_v40, %v635_v45  ;;  %v11774_v40 = vadd.s32 16, %v11649_v2  ;;  %vm1579_vm8 = vcmask 15360  }
 0x438   :  { %v11689_v48 = vsel %vm638_vm9, %v639_v46, %v637_v47  ;;  %v10137_v49 = vpop.eup %10136 }
 0x439   :  { %13923 = vst [vmem:[#allocation115_spill] sm:$0xff] %v11689_v48  ;;  %10138 = vrcp.f32 %v11689_v48  ;;  %v670_v50 = vmul.f32 %v10137_v49, %v668_v43  ;;  %v9025_v49 = vadd.s32 4294967295, %v11774_v40 }
 0x43b   :  { %v672_v52 = vsel %vm671_vm10, %v668_v43, %v670_v50  ;;  %v11781_v43 = vmul.f32 %v9026_v39, %v9019_v38  ;;  %vm833_vm5 = vcmp.eq.s32.totalorder %v11748_v22, %v9025_v49 }
 0x43c   :  { %v11692_v53 = vsel %vm673_vm11, %v674_v51, %v672_v52  ;;  %v11801_v51 = vsel %vm833_vm5, 1.0, %v13836_v1  ;;  %v1478_v52 = vld [vmem:[%s13928_s2] sm:$0xff] }
 0x43d   :  { %13925 = vst [vmem:[#allocation116_spill] sm:$0xff] %v11692_v53  ;;  %10140 = vrcp.f32 %v11692_v53  ;;  %13927 = vst [vmem:[#allocation118_spill] sm:$0xff] %v11781_v43 }
 0x43e   :  { %13930 = vst [vmem:[#allocation120_spill] sm:$0xff] %v11801_v51 }
 0x443   :  { %v10139_v54 = vpop.eup %10138 }
 0x444   :  { %v642_v55 = vmul.f32 %v10139_v54, %v626_v21  ;;  %v1479_v54 = vld [vmem:[%s13928_s2 + $0x8] sm:$0xff] }
 0x446   :  { %v643_v56 = vmul.f32 %v11655_v5, %v642_v55  ;;  %v1159_v5 = vld [vmem:[%s13922_s20 + $0x10] sm:$0xff]  ;;  %v9847_v55 = vpack.c.bf16 %v1479_v54, %v1478_v52  ;;  %s13981_s20 = sld [smem:[#allocation94_spill]] }
 0x447   :  { %v10141_v57 = vpop.eup %10140  ;;  %v9835_v8 = vpack.c.bf16 %v1160_v6, %v1159_v5 }
 0x448   :  { %644 = vst.msk [vmem:[#allocation2] sm:$0xf] %vm615_vm2, %v643_v56  ;;  %v677_v58 = vmul.f32 %v10141_v57, %v661_v25  ;;  %v11752_v25 = vadd.s32 8, %v11649_v2  ;;  %v1480_v56 = vld [vmem:[%s13928_s2 + $0x10] sm:$0xff]  ;;  %v1481_v57 = vld [vmem:[%s13928_s2 + $0x18] sm:$0xff] }
 0x449   :  { %9836 = vmatpush3.bf16.msra.mxu1 %v9835_v8  ;;  %v9076_v8 = vld [vmem:[#allocation24] ss:$0 sm:$0xff] }
 0x44a   :  { %v678_v61 = vmul.f32 %v11660_v7, %v677_v58  ;;  %v1253_v7 = vld [vmem:[%s13924_s1 + $0x10] sm:$0xff]  ;;  %9843 = vmatprep.subr.bf16.mxu1 %v13838_v36  ;;  %v9024_v30 = vadd.s32 4294967295, %v11752_v25  ;;  %vm803_vm0 = vcmp.ne.s32.totalorder %v11752_v25, 11  ;;  %v9850_v58 = vpack.c.bf16 %v1481_v57, %v1480_v56 }
 0x44b   :  { %v9841_v10 = vpack.c.bf16 %v1254_v9, %v1253_v7  ;;  %v9021_v46 = vsel %vm803_vm0, 1.0, %v13836_v1  ;;  %vm862_vm5 = vcmp.eq.s32.totalorder %v11748_v22, %v11752_v25 }
 0x44c   :  { %679 = vst.msk [vmem:[#allocation2 + $0xb] sm:$0xf] %vm615_vm2, %v678_v61  ;;  %vm832_vm1 = vcmp.eq.s32.totalorder %v11748_v22, %v9024_v30  ;;  %v11817_v61 = vsub.s32 0, %v11649_v2 }
 0x44d   :  { %v9027_v47 = vsel %vm832_vm1, 1.0, %v13836_v1  ;;  %vm860_vm1 = vcmp.eq.s32.totalorder %v11748_v22, %v11649_v2 }
 0x44e   :  { %v11790_v50 = vmul.f32 %v9027_v47, %v9021_v46 }
 0x44f   :  { %v681_v63 = vld [vmem:[#allocation2] sm:$0xff] }
 0x450   :  { %9430 = vmatmul.mubr.msk.f32.vlgmr.msra.gmra.mrb[0].mxu0 %vm692_vm12, %v681_v63  ;;  %13929 = vst [vmem:[#allocation119_spill] sm:$0xff] %v11790_v50 }
 0x451   :  { %9432 = vmatprep.mubr.msk.f32.mxu0 %vm11202_vm7, %v13836_v1  ;;  %9839 = vmatpush3.bf16.msra.mxu0 %v9838_v62  ;;  %v1335_v62 = vld [vmem:[#allocation25] sm:$0x3] }
 0x452   :  { %9840 = vmatprep.subr.bf16.mxu0 %v13838_v36  ;;  %v1433_v63 = vrot.slane %v1335_v62, %v11814_v60 }
 0x453   :  { %v682_v3 = vld [vmem:[#allocation2 + $0x8] sm:$0xff] }
 0x454   :  { %9433 = vmatmul.mubr.msk.f32.gmra.mrb[2].mxu0 %vm692_vm12, %v682_v3  ;;  %v1440_v3 = vrot.slane %v1335_v62, %v11817_v61 }
 0x455   :  { %9435 = vmatprep.mubr.msk.f32.mxu0 %vm11202_vm7, %v13836_v1  ;;  %9842 = vmatpush3.bf16.msra.mxu0 %v9841_v10 }
 0x456   :  { %9846 = vmatprep.subr.bf16.mxu0 %v13838_v36 }
 0x458   :  { %9436 = vmatmul.mubr.msk.f32.gmra.mrb[4].mxu0 %vm692_vm12, %v683_v4 }
 0x459   :  { %9463 = vmatprep.mubr.msk.f32.mxu0 %vm11202_vm7, %v13836_v1 }
 0x523   :  { %v768_v12 = vpop.f32.mrb[0].mxu0 }
 0x524   :  { %v11717_v13 = vadd.f32 %v9015_v11, %v768_v12  ;;  %v9431_v14 = vpop.f32.mrb[1].mxu0 }
 0x526   :  { %9447 = vmatmul.mubr.msk.f32.vlgmr.msra.gmra.mrb[0].mxu1 %vm1161_vm13, %v11717_v13  ;;  %9464 = vmatmul.mubr.msk.f32.vlgmr.msra.gmra.mrb[6].mxu0 %vm1161_vm13, %v11717_v13 }
 0x527   :  { %9449 = vmatprep.mubr.msk.f32.mxu1 %vm11202_vm7, %v13836_v1  ;;  %9466 = vmatprep.mubr.msk.f32.mxu0 %vm11202_vm7, %v13836_v1  ;;  %v773_v15 = vpop.f32.mrb[2].mxu0 }
 0x528   :  { %v11727_v16 = vadd.f32 %v9015_v11, %v773_v15  ;;  %v9434_v17 = vpop.f32.mrb[3].mxu0  ;;  %9848 = vmatpush3.bf16.msra.mxu0 %v9847_v55 }
 0x529   :  { %9849 = vmatprep.subr.bf16.mxu0 %v13838_v36 }
 0x52a   :  { %9450 = vmatmul.mubr.msk.f32.gmra.mrb[2].mxu1 %vm1161_vm13, %v11727_v16  ;;  %9467 = vmatmul.mubr.msk.f32.gmra.mrb[8].mxu0 %vm1161_vm13, %v11727_v16 }
 0x52b   :  { %v778_v18 = vpop.f32.mrb[4].mxu0  ;;  %9452 = vmatprep.mubr.msk.f32.mxu1 %vm11202_vm7, %v13836_v1  ;;  %9469 = vmatprep.mubr.msk.f32.mxu0 %vm11202_vm7, %v13836_v1 }
 0x52c   :  { %v11737_v20 = vadd.f32 %v9015_v11, %v778_v18  ;;  %v9437_v21 = vpop.f32.mrb[5].mxu0  ;;  %9851 = vmatpush3.bf16.msra.mxu0 %v9850_v58 }
 0x52e   :  { %13926 = vst [vmem:[#allocation117_spill] sm:$0xff] %v11737_v20  ;;  %9453 = vmatmul.mubr.msk.f32.gmra.mrb[4].mxu1 %vm1161_vm13, %v11737_v20  ;;  %9470 = vmatmul.mubr.msk.f32.gmra.mrb[10].mxu0 %vm1161_vm13, %v11737_v20 }
 0x52f   :  { %9478 = vmatprep.mubr.msk.f32.mxu1 %vm11202_vm7, %v13836_v1  ;;  %9495 = vmatprep.mubr.msk.f32.mxu0 %vm11202_vm7, %v13836_v1 }
 0x5f9   :  { %v11754_v26 = vpop.f32.mrb[0].mxu1  ;;  %v11756_v27 = vpop.f32.mrb[6].mxu0 }
 0x5fa   :  { %v9448_v28 = vpop.f32.mrb[1].mxu1  ;;  %v9465_v29 = vpop.f32.mrb[7].mxu0  ;;  %v1434_v5 = vmul.f32 %v1433_v63, %v11754_v26 }
 0x5fd   :  { %v11761_v31 = vpop.f32.mrb[2].mxu1  ;;  %v11763_v32 = vpop.f32.mrb[8].mxu0 }
 0x5fe   :  { %v9844_v33 = vpack.c.bf16 %v11761_v31, %v11754_v26  ;;  %v9875_v34 = vpack.c.bf16 %v11763_v32, %v11756_v27  ;;  %v9451_v35 = vpop.f32.mrb[3].mxu1  ;;  %v9468_v37 = vpop.f32.mrb[9].mxu0  ;;  %v1435_v12 = vmul.f32 %v1433_v63, %v11761_v31 }
 0x600   :  { %9845 = vmatpush3.bf16.msra.mxu1 %v9844_v33 }
 0x601   :  { %v11776_v41 = vpop.f32.mrb[4].mxu1  ;;  %v11778_v42 = vpop.f32.mrb[10].mxu0  ;;  %9476 = vmatprep.subr.mxu1 %v13836_v1 }
 0x602   :  { %v9454_v44 = vpop.f32.mrb[5].mxu1  ;;  %v9471_v45 = vpop.f32.mrb[11].mxu0  ;;  %v1436_v28 = vmul.f32 %v1433_v63, %v11776_v41 }
 0x604   :  { %9477 = vmatpush3.msk.msra.mxu1 %vm1346_vm3, %v11776_v41 }
 0x605   :  { %9479 = vmatmul.mubr.msk.f32.vlgmr.msra.gmra.mrb[6].mxu1 %vm1336_vm4, %v11781_v43  ;;  %9504 = vmatprep.subr.mxu1 %v13836_v1 }
 0x606   :  { %9481 = vmatprep.mubr.msk.f32.mxu1 %vm11202_vm7, %v13836_v1  ;;  %9505 = vmatpush3.msk.msra.mxu1 %vm1589_vm6, %v1571_v59  ;;  %v9105_v59 = vmul.f32 -1.442695, %v11754_v26 }
 0x609   :  { %9482 = vmatmul.mubr.msk.f32.gmra.mrb[8].mxu1 %vm1336_vm4, %v11790_v50 }
 0x60a   :  { %9484 = vmatprep.mubr.msk.f32.mxu1 %vm11202_vm7, %v13836_v1 }
 0x60d   :  { %9485 = vmatmul.mubr.msk.f32.gmra.mrb[10].mxu1 %vm1336_vm4, %v11801_v51 }
 0x60e   :  { %9506 = vmatprep.mubr.msk.f32.mxu1 %vm11202_vm7, %v13836_v1 }
 0x6d8   :  { %v1416_v4 = vpop.f32.mrb[6].mxu1 }
 0x6d9   :  { %v1441_v6 = vmul.f32 %v1440_v3, %v1416_v4  ;;  %v9480_v7 = vpop.f32.mrb[7].mxu1 }
 0x6db   :  { %v1444_v9 = vadd.f32 %v1441_v6, %v1434_v5 }
 0x6dc   :  { %v1421_v10 = vpop.f32.mrb[8].mxu1 }
 0x6dd   :  { %v1454_v11 = vadd.f32 %v9076_v8, %v1444_v9  ;;  %v1442_v14 = vmul.f32 %v1440_v3, %v1421_v10  ;;  %v9483_v15 = vpop.f32.mrb[9].mxu1 }
 0x6de   :  { %v1037_v15 = vadd.s32 160, %v11752_v25 }
 0x6df   :  { %v9077_v17 = vmul.f32 -1.442695, %v1454_v11  ;;  %v1445_v18 = vadd.f32 %v1442_v14, %v1435_v12  ;;  %v1001_v12 = vadd.s32 128, %v11752_v25  ;;  %v1036_v14 = vadd.s32 160, %v11649_v2 }
 0x6e0   :  { %v1426_v21 = vpop.f32.mrb[10].mxu1 }
 0x6e1   :  { %10142 = vpow2.f32 %v9077_v17  ;;  %v1455_v24 = vadd.f32 %v9076_v8, %v1445_v18  ;;  %v1443_v29 = vmul.f32 %v1440_v3, %v1426_v21  ;;  %v9486_v30 = vpop.f32.mrb[11].mxu1  ;;  %v892_v17 = vadd.s32 32, %v11649_v2 }
 0x6e2   :  { %v893_v18 = vadd.s32 32, %v11752_v25  ;;  %v1072_v21 = vadd.s32 192, %v11649_v2 }
 0x6e3   :  { %v9078_v33 = vmul.f32 -1.442695, %v1455_v24  ;;  %v1446_v35 = vadd.f32 %v1443_v29, %v1436_v28 }
 0x6e5   :  { %10144 = vpow2.f32 %v9078_v33  ;;  %v1456_v37 = vadd.f32 %v9076_v8, %v1446_v35  ;;  %v1073_v35 = vadd.s32 192, %v11752_v25 }
 0x6e7   :  { %v9079_v38 = vmul.f32 -1.442695, %v1456_v37 }
 0x6e9   :  { %10146 = vpow2.f32 %v9079_v38 }
 0x6eb   :  { %v10143_v39 = vpop.eup %10142 }
 0x6ec   :  { %v1466_v44 = vadd.f32 1.0, %v10143_v39  ;;  %v1108_v39 = vadd.s32 224, %v11649_v2 }
 0x6ee   :  { %10148 = vrcp.f32 %v1466_v44  ;;  %v1109_v44 = vadd.s32 224, %v11752_v25 }
 0x6ef   :  { %v10145_v45 = vpop.eup %10144 }
 0x6f0   :  { %v1467_v46 = vadd.f32 1.0, %v10145_v45 }
 0x6f2   :  { %10150 = vrcp.f32 %v1467_v46 }
 0x6f3   :  { %v10147_v47 = vpop.eup %10146 }
 0x6f4   :  { %v1468_v49 = vadd.f32 1.0, %v10147_v47  ;;  %v9032_v47 = vsel %vm860_vm1, 1.0, %v13836_v1 }
 0x6f6   :  { %10152 = vrcp.f32 %v1468_v49 }
 0x6f7   :  { %10154 = vpow2.f32 %v9105_v59 }
 0x6f8   :  { %v10149_v52 = vpop.eup %10148 }
 0x6f9   :  { %v11824_v54 = vmul.f32 %v10149_v52, %v1454_v11  ;;  %v11859_v11 = vadd.s32 128, %v11748_v22 }
 0x6fb   :  { %9496 = vmatmul.mubr.msk.f32.vlgmr.msra.gmra.mrb[12].mxu0 %vm1161_vm13, %v11824_v54  ;;  %vm1007_vm10 = vcmp.eq.s32.totalorder %v11859_v11, %v1001_v12  ;;  %vm1041_vm11 = vcmp.eq.s32.totalorder %v11859_v11, %v1036_v14  ;;  %vm1043_vm14 = vcmp.eq.s32.totalorder %v11859_v11, %v1037_v15  ;;  %vm1077_vm15 = vcmp.eq.s32.totalorder %v11859_v11, %v1072_v21 }
 0x6fc   :  { %v10151_v55 = vpop.eup %10150  ;;  %9498 = vmatprep.mubr.msk.f32.mxu0 %vm11202_vm7, %v13836_v1  ;;  %v9049_v28 = vsel %vm1007_vm10, 1.0, %v13836_v1  ;;  %v9052_v29 = vsel %vm1041_vm11, 1.0, %v13836_v1  ;;  %v9053_v30 = vsel %vm1043_vm14, 1.0, %v13836_v1  ;;  %v9056_v38 = vsel %vm1077_vm15, 1.0, %v13836_v1 }
 0x6fd   :  { %v11830_v56 = vmul.f32 %v10151_v55, %v1455_v24  ;;  %vm1079_vm0 = vcmp.eq.s32.totalorder %v11859_v11, %v1073_v35  ;;  %vm1115_vm10 = vcmp.eq.s32.totalorder %v11859_v11, %v1109_v44  ;;  %vm896_vm11 = vcmp.eq.s32.totalorder %v11748_v22, %v892_v17 }
 0x6fe   :  { %v9057_v46 = vsel %vm1079_vm0, 1.0, %v13836_v1  ;;  %v9061_v55 = vsel %vm1115_vm10, 1.0, %v13836_v1  ;;  %vm898_vm14 = vcmp.eq.s32.totalorder %v11748_v22, %v893_v18  ;;  %v858_v15 = vadd.s32 24, %v11649_v2 }
 0x6ff   :  { %9499 = vmatmul.mubr.msk.f32.gmra.mrb[14].mxu0 %vm1161_vm13, %v11830_v56  ;;  %v1002_v21 = vadd.s32 128, %v11774_v40 }
 0x700   :  { %v10153_v57 = vpop.eup %10152  ;;  %9501 = vmatprep.mubr.msk.f32.mxu0 %vm11202_vm7, %v13836_v1  ;;  %v1039_v35 = vadd.s32 160, %v858_v15 }
 0x701   :  { %v11836_v58 = vmul.f32 %v10153_v57, %v1456_v37  ;;  %v10155_v62 = vpop.eup %10154  ;;  %v1067_v37 = vadd.f32 %v9053_v30, %v9049_v28  ;;  %v9033_v57 = vsel %vm862_vm5, 1.0, %v13836_v1  ;;  %v1038_v30 = vadd.s32 160, %v11774_v40 }
 0x702   :  { %v2885_v63 = vadd.f32 1.0, %v10155_v62  ;;  %v928_v62 = vadd.s32 64, %v11649_v2 }
 0x703   :  { %9502 = vmatmul.mubr.msk.f32.gmra.mrb[16].mxu0 %vm1161_vm13, %v11836_v58  ;;  %v1103_v49 = vadd.f32 %v9057_v46, %v1067_v37  ;;  %v1074_v37 = vadd.s32 192, %v11774_v40 }
 0x704   :  { %1777 = vmatprep.mubr.f32.mxu0 %v13836_v1  ;;  %10156 = vrcp.f32 %v2885_v63  ;;  %vm932_vm15 = vcmp.eq.s32.totalorder %v11748_v22, %v928_v62 }
 0x705   :  { %v1139_v63 = vadd.f32 %v9061_v55, %v1103_v49 }
 0x70e   :  { %v10157_v5 = vpop.eup %10156 }
 0x70f   :  { %v2894_v8 = vmul.f32 %v10157_v5, %v11754_v26  ;;  %v1000_v26 = vadd.s32 128, %v11649_v2  ;;  %v929_v5 = vadd.s32 64, %v11752_v25 }
 0x711   :  { %vm1005_vm9 = vcmp.eq.s32.totalorder %v11859_v11, %v1000_v26  ;;  %vm934_vm0 = vcmp.eq.s32.totalorder %v11748_v22, %v929_v5  ;;  %v965_v26 = vadd.s32 96, %v11752_v25 }
 0x712   :  { %v9048_v24 = vsel %vm1005_vm9, 1.0, %v13836_v1  ;;  %vm1113_vm9 = vcmp.eq.s32.totalorder %v11859_v11, %v1108_v39  ;;  %v9041_v12 = vsel %vm934_vm0, 1.0, %v13836_v1  ;;  %v1075_v39 = vadd.s32 192, %v858_v15 }
 0x713   :  { %v1065_v33 = vadd.f32 %v9052_v29, %v9048_v24  ;;  %v9060_v52 = vsel %vm1113_vm9, 1.0, %v13836_v1  ;;  %vm970_vm5 = vcmp.eq.s32.totalorder %v11748_v22, %v965_v26  ;;  %v1003_v29 = vadd.s32 128, %v858_v15 }
 0x714   :  { %v9045_v24 = vsel %vm970_vm5, 1.0, %v13836_v1  ;;  %vm1009_vm9 = vcmp.eq.s32.totalorder %v11859_v11, %v1002_v21  ;;  %vm1083_vm0 = vcmp.eq.s32.totalorder %v11859_v11, %v1075_v39  ;;  %vm866_vm5 = vcmp.eq.s32.totalorder %v11748_v22, %v858_v15 }
 0x715   :  { %v1101_v45 = vadd.f32 %v9056_v38, %v1065_v33  ;;  %vm1011_vm10 = vcmp.eq.s32.totalorder %v11859_v11, %v1003_v29  ;;  %v9050_v38 = vsel %vm1009_vm9, 1.0, %v13836_v1  ;;  %v9035_v5 = vsel %vm866_vm5, 1.0, %v13836_v1 }
 0x717   :  { %v1137_v59 = vadd.f32 %v9060_v52, %v1101_v45  ;;  %v9051_v45 = vsel %vm1011_vm10, 1.0, %v13836_v1 }
 0x7ce   :  { %v1557_v3 = vpop.f32.mrb[12].mxu0 }
 0x7cf   :  { %1920 = vrot.lane.b32.xlu0 %v1557_v3, %s11204_s7  ;;  %v9497_v4 = vpop.f32.mrb[13].mxu0  ;;  %9507 = vmatmul.mubr.msk.f32.vlgmr.msra.gmra.mrb[12].mxu1 %vm1579_vm8, %v1557_v3 }
 0x7d0   :  { %9509 = vmatprep.mubr.msk.f32.mxu1 %vm11202_vm7, %v13836_v1  ;;  %v9037_v4 = vsel %vm898_vm14, 1.0, %v13836_v1  ;;  %vm1047_vm14 = vcmp.eq.s32.totalorder %v11859_v11, %v1039_v35 }
 0x7d2   :  { %v1562_v6 = vpop.f32.mrb[14].mxu0 }
 0x7d3   :  { %2683 = vrot.lane.b32.xlu0 %v1562_v6, %s11205_s19  ;;  %1922 = vrot.lane.b32.xlu1 %v1562_v6, %s11204_s7  ;;  %v9500_v7 = vpop.f32.mrb[15].mxu0 }
 0x7d4   :  { %9510 = vmatmul.mubr.msk.f32.gmra.mrb[14].mxu1 %vm1579_vm8, %v1562_v6  ;;  %v922_v7 = vadd.f32 %v9037_v4, %v9033_v57  ;;  %v9059_v57 = vsel %vm1083_vm0, 1.0, %v13836_v1 }
 0x7d5   :  { %9512 = vmatprep.mubr.msk.f32.mxu1 %vm11202_vm7, %v13836_v1 }
 0x7d6   :  { %v1567_v9 = vpop.f32.mrb[16].mxu0  ;;  %v958_v17 = vadd.f32 %v9041_v12, %v922_v7  ;;  %v894_v7 = vadd.s32 32, %v11774_v40  ;;  %v930_v12 = vadd.s32 64, %v11774_v40 }
 0x7d7   :  { %2900 = vrot.lane.b32.xlu0 %v2894_v8, %s11206_s4  ;;  %1924 = vrot.lane.b32.xlu1 %v1567_v9, %s11204_s7  ;;  %v9503_v10 = vpop.f32.mrb[17].mxu0  ;;  %v964_v8 = vadd.s32 96, %v11649_v2 }
 0x7d8   :  { %9513 = vmatmul.mubr.msk.f32.gmra.mrb[16].mxu1 %vm1579_vm8, %v1567_v9  ;;  %v9040_v10 = vsel %vm932_vm15, 1.0, %v13836_v1  ;;  %v994_v33 = vadd.f32 %v9045_v24, %v958_v17  ;;  %vm1081_vm15 = vcmp.eq.s32.totalorder %v11859_v11, %v1074_v37  ;;  %v967_v37 = vadd.s32 96, %v858_v15 }
 0x7d9   :  { %1901 = vmatprep.mubr.f32.mxu1 %v13836_v1  ;;  %vm968_vm1 = vcmp.eq.s32.totalorder %v11748_v22, %v964_v8  ;;  %v9058_v55 = vsel %vm1081_vm15, 1.0, %v13836_v1  ;;  %v895_v8 = vadd.s32 32, %v858_v15  ;;  %vm936_vm15 = vcmp.eq.s32.totalorder %v11748_v22, %v930_v12 }
 0x7da   :  { %v9044_v18 = vsel %vm968_vm1, 1.0, %v13836_v1  ;;  %vm864_vm1 = vcmp.eq.s32.totalorder %v11748_v22, %v11774_v40  ;;  %vm974_vm5 = vcmp.eq.s32.totalorder %v11748_v22, %v967_v37 }
 0x7db   :  { %2681 = vrot.lane.b32.xlu1 %v1557_v3, %s11205_s19  ;;  %v9036_v3 = vsel %vm896_vm11, 1.0, %v13836_v1  ;;  %vm1045_vm11 = vcmp.eq.s32.totalorder %v11859_v11, %v1038_v30  ;;  %v9034_v4 = vsel %vm864_vm1, 1.0, %v13836_v1 }
 0x7dc   :  { %v920_v6 = vadd.f32 %v9036_v3, %v9032_v47  ;;  %v9054_v46 = vsel %vm1045_vm11, 1.0, %v13836_v1  ;;  %v9055_v47 = vsel %vm1047_vm14, 1.0, %v13836_v1  ;;  %vm900_vm11 = vcmp.eq.s32.totalorder %v11748_v22, %v894_v7 }
 0x7dd   :  { %v1069_v49 = vadd.f32 %v9054_v46, %v9050_v38  ;;  %v1071_v52 = vadd.f32 %v9055_v47, %v9051_v45  ;;  %vm902_vm14 = vcmp.eq.s32.totalorder %v11748_v22, %v895_v8  ;;  %v9038_v21 = vsel %vm900_vm11, 1.0, %v13836_v1 }
 0x7de   :  { %v956_v14 = vadd.f32 %v9040_v10, %v920_v6  ;;  %v9039_v24 = vsel %vm902_vm14, 1.0, %v13836_v1  ;;  %v924_v29 = vadd.f32 %v9038_v21, %v9034_v4  ;;  %v1144_v38 = vmul.u32 32, %v11649_v2 }
 0x7df   :  { %2685 = vrot.lane.b32.xlu1 %v1567_v9, %s11205_s19  ;;  %v11901_v9 = vpack.c.bf16 %v1139_v63, %v1137_v59  ;;  %v1110_v59 = vadd.s32 224, %v11774_v40  ;;  %v1105_v62 = vadd.f32 %v9058_v55, %v1069_v49  ;;  %v1111_v63 = vadd.s32 224, %v858_v15 }
 0x7e0   :  { %v992_v28 = vadd.f32 %v9044_v18, %v956_v14  ;;  %v1107_v3 = vadd.f32 %v9059_v57, %v1071_v52  ;;  %v931_v14 = vadd.s32 64, %v858_v15  ;;  %v966_v18 = vadd.s32 96, %v11774_v40 }
 0x7e1   :  { %9853 = vmatprep.subr.bf16.mxu0 %v11901_v9  ;;  %9861 = vmatprep.subr.bf16.mxu1 %v11901_v9  ;;  %vm1117_vm9 = vcmp.eq.s32.totalorder %v11859_v11, %v1110_v59  ;;  %vm1119_vm10 = vcmp.eq.s32.totalorder %v11859_v11, %v1111_v63  ;;  %v926_v30 = vadd.f32 %v9039_v24, %v9035_v5  ;;  %v9047_v49 = vsel %vm974_vm5, 1.0, %v13836_v1 }
 0x7e2   :  { %v11921_v44 = vpack.c.bf16 %v994_v33, %v992_v28  ;;  %v9062_v6 = vsel %vm1117_vm9, 1.0, %v13836_v1  ;;  %v9063_v10 = vsel %vm1119_vm10, 1.0, %v13836_v1  ;;  %vm938_vm0 = vcmp.eq.s32.totalorder %v11748_v22, %v931_v14 }
 0x7e3   :  { %v1141_v26 = vadd.f32 %v9062_v6, %v1105_v62  ;;  %v1143_v17 = vadd.f32 %v9063_v10, %v1107_v3  ;;  %v9042_v33 = vsel %vm936_vm15, 1.0, %v13836_v1  ;;  %v9043_v35 = vsel %vm938_vm0, 1.0, %v13836_v1 }
 0x7e4   :  { %9855 = vmatpush1.bf16.msra.mxu0 %v11921_v44  ;;  %9863 = vmatpush1.bf16.msra.mxu1 %v11921_v44  ;;  %vm972_vm1 = vcmp.eq.s32.totalorder %v11748_v22, %v966_v18  ;;  %v960_v39 = vadd.f32 %v9042_v33, %v924_v29  ;;  %v962_v45 = vadd.f32 %v9043_v35, %v926_v30  ;;  %v13834_v59 = vmov 1.0  }
 0x7e5   :  { %v11952_v28 = vpack.c.bf16 %v1143_v17, %v1141_v26  ;;  %v9046_v46 = vsel %vm972_vm1, 1.0, %v13836_v1  ;;  %v1146_v47 = vsub.s32 %v11859_v11, %v1144_v38  ;;  %v9083_v11 = vld [vmem:[#allocation27] ss:$0 sm:$0xff]  ;;  %vm794_vm5 = vcmp.ne.s32.totalorder %v11752_v25, 10 }
 0x7e6   :  { %v996_v52 = vadd.f32 %v9046_v46, %v960_v39  ;;  %v998_v15 = vadd.f32 %v9047_v49, %v962_v45  ;;  %v1145_v46 = vsub.s32 %v11748_v22, %v1144_v38 }
 0x7e7   :  { %9857 = vmatprep.subr.bf16.mxu0 %v11952_v28  ;;  %9865 = vmatprep.subr.bf16.mxu1 %v11952_v28  ;;  %vm1148_vm9 = vcmp.ge.s32.totalorder %v1146_v47, 0  ;;  %vm1150_vm10 = vcmp.lt.s32.totalorder %v1146_v47, 32 }
 0x7e8   :  { %v11964_v55 = vpack.c.bf16 %v998_v15, %v996_v52  ;;  %vm11966_vm11 = vmand %vm1148_vm9, %vm1150_vm10  ;;  %vm1147_vm14 = vcmp.ge.s32.totalorder %v1145_v46, 0  ;;  %vm1149_vm15 = vcmp.lt.s32.totalorder %v1145_v46, 32  ;;  %vm816_vm10 = vcmp.ne.s32.totalorder %v11774_v40, 21 }
 0x7e9   :  { %vm11979_vm0 = vmand %vm1147_vm14, %vm1149_vm15  ;;  %vm12119_vm15 = vcmp.lt.s32.totalorder %v13939_v23, 256 }
 0x7ea   :  { %9859 = vmatpush1.bf16.msra.mxu0 %v11964_v55  ;;  %9867 = vmatpush1.bf16.msra.mxu1 %v11964_v55 }
 0x7eb   :  { %9094 = vmatprep.subr.msk.mxu0 %vm11966_vm11, %v13834_v59  ;;  %9099 = vmatprep.subr.msk.mxu1 %vm11966_vm11, %v13834_v59 }
 0x845   :  { %v1923_v38 = vpop.permute.xlu1 %1922 }
 0x8a2   :  { %v1659_v62 = vpop.f32.mrb[12].mxu1 }
 0x8a3   :  { %v1660_v63 = vadd.f32 %v9083_v11, %v1659_v62  ;;  %v9508_v3 = vpop.f32.mrb[13].mxu1 }
 0x8a5   :  { %v1676_v4 = vand.u32 2147483647, %v1660_v63  ;;  %v1673_v52 = vmax.f32 %v1660_v63, 0.0 }
 0x8a7   :  { %v1679_v5 = vsub.f32 0.0, %v1676_v4  ;;  %v1664_v6 = vpop.f32.mrb[14].mxu1 }
 0x8a8   :  { %v1665_v7 = vadd.f32 %v9083_v11, %v1664_v6  ;;  %v9511_v8 = vpop.f32.mrb[15].mxu1 }
 0x8a9   :  { %v1682_v10 = vmul.f32 1.442695, %v1679_v5 }
 0x8aa   :  { %v1677_v26 = vand.u32 2147483647, %v1665_v7  ;;  %v1674_v5 = vmax.f32 %v1665_v7, 0.0 }
 0x8ab   :  { %10158 = vpow2.f32 %v1682_v10  ;;  %v1669_v12 = vpop.f32.mrb[16].mxu1 }
 0x8ac   :  { %v1680_v14 = vsub.f32 0.0, %v1677_v26  ;;  %v1670_v17 = vadd.f32 %v9083_v11, %v1669_v12  ;;  %v9514_v18 = vpop.f32.mrb[17].mxu1 }
 0x8ae   :  { %v1684_v21 = vmul.f32 1.442695, %v1680_v14  ;;  %v1678_v24 = vand.u32 2147483647, %v1670_v17  ;;  %v1675_v10 = vmax.f32 %v1670_v17, 0.0  ;;  %v1925_v14 = vpop.permute.xlu1 %1924  ;;  %v1921_v17 = vpop.permute.xlu0 %1920 }
 0x8b0   :  { %10160 = vpow2.f32 %v1684_v21  ;;  %v1681_v29 = vsub.f32 0.0, %v1678_v24  ;;  %v843_v24 = vadd.s32 1, %v11649_v2 }
 0x8b2   :  { %v1686_v30 = vmul.f32 1.442695, %v1681_v29  ;;  %v2682_v21 = vpop.permute.xlu1 %2681  ;;  %v844_v29 = vadd.s32 1, %v11752_v25  ;;  %vm846_vm1 = vcmp.eq.s32.totalorder %v11748_v22, %v843_v24  ;;  %v9020_v25 = vsel %vm794_vm5, 1.0, %v13836_v1 }
 0x8b4   :  { %10162 = vpow2.f32 %v1686_v30  ;;  %v2684_v30 = vpop.permute.xlu0 %2683  ;;  %vm847_vm9 = vcmp.eq.s32.totalorder %v11748_v22, %v844_v29 }
 0x8b5   :  { %v10159_v33 = vpop.eup %10158 }
 0x8b6   :  { %v1688_v35 = vadd.f32 1.0, %v10159_v33  ;;  %v2686_v33 = vpop.permute.xlu1 %2685 }
 0x8b8   :  { %10164 = vlog2.f32 %v1688_v35  ;;  %v12034_v35 = vsel %vm846_vm1, 1.0, %v13836_v1  ;;  %vm4660_vm1 = vcmask 259072  }
 0x8b9   :  { %13936 = vst [vmem:[#allocation122_spill] sm:$0xff] %v12034_v35 }
 0x8ba   :  { %v10161_v37 = vpop.eup %10160 }
 0x8bb   :  { %v1689_v39 = vadd.f32 1.0, %v10161_v37  ;;  %v9030_v37 = vsel %vm847_vm9, 1.0, %v13836_v1 }
 0x8bd   :  { %10166 = vlog2.f32 %v1689_v39  ;;  %v12042_v39 = vmul.f32 %v9030_v37, %v9020_v25 }
 0x8be   :  { %v10163_v45 = vpop.eup %10162 }
 0x8bf   :  { %v1690_v47 = vadd.f32 1.0, %v10163_v45  ;;  %13937 = vst [vmem:[#allocation123_spill] sm:$0xff] %v12042_v39  ;;  %v9022_v45 = vsel %vm816_vm10, 1.0, %v13836_v1 }
 0x8c1   :  { %10168 = vlog2.f32 %v1690_v47 }
 0x8c2   :  { %v10165_v49 = vpop.eup %10164 }
 0x8c3   :  { %v1692_v15 = vmul.f32 0.6931472, %v10165_v49 }
 0x8c5   :  { %v1697_v11 = vadd.f32 %v1692_v15, %v1673_v52 }
 0x8c7   :  { %v10167_v3 = vpop.eup %10166  ;;  %v1825_v4 = vmul.f32 %v1697_v11, %v11824_v54  ;;  %9088 = vmatmul.mubr.msk.f32.vlgmr.msra.gmra.mrb[18].mxu0 %vm1161_vm13, %v1697_v11 }
 0x8c8   :  { %v1694_v6 = vmul.f32 0.6931472, %v10167_v3  ;;  %1783 = vmatprep.mubr.f32.mxu0 %v13836_v1  ;;  %9095 = vmatpush1.msk.msra.mxu0 %vm11979_vm0, %v13834_v59 }
 0x8c9   :  { %9091 = vmatmul.mubr.msk.f32.vlgmr.msra.gmra.mrb[18].mxu1 %vm1161_vm13, %v1825_v4  ;;  %9868 = vmatprep.subr.bf16.mxu0 %v13838_v36 }
 0x8ca   :  { %v1698_v63 = vadd.f32 %v1694_v6, %v1674_v5  ;;  %1907 = vmatprep.mubr.f32.mxu1 %v13836_v1  ;;  %9100 = vmatpush1.msk.msra.mxu1 %vm11979_vm0, %v13834_v59 }
 0x8cb   :  { %v10169_v7 = vpop.eup %10168  ;;  %9874 = vmatprep.subr.bf16.mxu1 %v13838_v36 }
 0x8cc   :  { %v1826_v8 = vmul.f32 %v1698_v63, %v11830_v56  ;;  %v1696_v26 = vmul.f32 0.6931472, %v10169_v7  ;;  %9089 = vmatmul.mubr.msk.f32.gmra.mrb[20].mxu0 %vm1161_vm13, %v1698_v63 }
 0x8cd   :  { %1789 = vmatprep.mubr.f32.mxu0 %v13836_v1 }
 0x8ce   :  { %v1699_v12 = vadd.f32 %v1696_v26, %v1675_v10  ;;  %9092 = vmatmul.mubr.msk.f32.gmra.mrb[20].mxu1 %vm1161_vm13, %v1826_v8 }
 0x8cf   :  { %1913 = vmatprep.mubr.f32.mxu1 %v13836_v1 }
 0x8d0   :  { %v1827_v18 = vmul.f32 %v1699_v12, %v11836_v58  ;;  %9090 = vmatmul.mubr.msk.f32.gmra.mrb[22].mxu0 %vm1161_vm13, %v1699_v12 }
 0x8d1   :  { %1996 = vmatprep.mubr.f32.mxu0 %v13836_v1 }
 0x8d2   :  { %9093 = vmatmul.mubr.msk.f32.gmra.mrb[22].mxu1 %vm1161_vm13, %v1827_v18 }
 0x8d3   :  { %2757 = vmatprep.mubr.f32.mxu1 %v13836_v1 }
 0x8d4   :  { %9096 = vmatmul.mubr.msk.f32.vlgmr.msra.gmra.mrb[24].mxu0 %vm692_vm12, %v1921_v17 }
 0x8d5   :  { %2002 = vmatprep.mubr.f32.mxu0 %v13836_v1 }
 0x8d6   :  { %9101 = vmatmul.mubr.msk.f32.vlgmr.msra.gmra.mrb[24].mxu1 %vm692_vm12, %v2682_v21 }
 0x8d7   :  { %9876 = vmatpush3.bf16.msra.mxu1 %v9875_v34  ;;  %2763 = vmatprep.mubr.f32.mxu1 %v13836_v1  ;;  %v845_v34 = vadd.s32 1, %v11774_v40 }
 0x8d8   :  { %9097 = vmatmul.mubr.msk.f32.gmra.mrb[26].mxu0 %vm692_vm12, %v1923_v38  ;;  %9536 = vmatprep.subr.mxu1 %v13836_v1 }
 0x8d9   :  { %2008 = vmatprep.mubr.f32.mxu0 %v13836_v1  ;;  %vm848_vm14 = vcmp.eq.s32.totalorder %v11748_v22, %v845_v34  ;;  %v1700_v22 = vld [vmem:[#allocation21] sm:$0x3]  ;;  %v11208_v34 = vmov 1966171168  }
 0x8da   :  { %9102 = vmatmul.mubr.msk.f32.gmra.mrb[26].mxu1 %vm692_vm12, %v2684_v30  ;;  %v9031_v46 = vsel %vm848_vm14, 1.0, %v13836_v1  ;;  %v1701_v40 = vmul.f32 1.442695, %v1700_v22 }
 0x8db   :  { %9537 = vmatpush3.msk.msra.mxu1 %vm1346_vm3, %v11778_v42  ;;  %2769 = vmatprep.mubr.f32.mxu1 %v13836_v1  ;;  %v12050_v47 = vmul.f32 %v9031_v46, %v9022_v45 }
 0x8dc   :  { %9098 = vmatmul.mubr.msk.f32.gmra.mrb[28].mxu0 %vm692_vm12, %v1925_v14  ;;  %9564 = vmatprep.subr.mxu1 %v13836_v1  ;;  %10170 = vpow2.f32 %v1701_v40 }
 0x8dd   :  { %9523 = vmatprep.mubr.msk.f32.mxu0 %vm11202_vm7, %v13836_v1  ;;  %13938 = vst [vmem:[#allocation124_spill] sm:$0xff] %v12050_v47 }
 0x8de   :  { %9103 = vmatmul.mubr.msk.f32.gmra.mrb[28].mxu1 %vm692_vm12, %v2686_v33  ;;  %v2029_v33 = vunpack.c.l.s4 %v11208_v34 }
 0x8df   :  { %9538 = vmatprep.mubr.msk.f32.mxu1 %vm11202_vm7, %v13836_v1 }
 0x8e2   :  { %9539 = vmatmul.mubr.msk.f32.vlgmr.msra.gmra.mrb[30].mxu1 %vm1336_vm4, %v12034_v35 }
 0x8e3   :  { %9541 = vmatprep.mubr.msk.f32.mxu1 %vm11202_vm7, %v13836_v1 }
 0x8e6   :  { %9542 = vmatmul.mubr.msk.f32.gmra.mrb[32].mxu1 %vm1336_vm4, %v12042_v39  ;;  %v10171_v49 = vpop.eup %10170 }
 0x8e7   :  { %9544 = vmatprep.mubr.msk.f32.mxu1 %vm11202_vm7, %v13836_v1  ;;  %v1703_v52 = vsub.f32 0.0, %v10171_v49  ;;  %v2030_v49 = vunpack.c.0.s8 %v2029_v33 }
 0x8e9   :  { %v12059_v15 = vrot.slane %v1703_v52, %v11817_v61  ;;  %v12062_v11 = vrot.slane %v1703_v52, %v11814_v60 }
 0x8ea   :  { %9545 = vmatmul.mubr.msk.f32.gmra.mrb[34].mxu1 %vm1336_vm4, %v12050_v47 }
 0x8eb   :  { %9566 = vmatprep.mubr.msk.f32.mxu1 %vm11202_vm7, %v13836_v1 }
 0x99a   :  { %v1779_v3 = vpop.f32.mrb[18].mxu0 }
 0x99b   :  { %v1807_v4 = vmul.f32 %v12059_v15, %v1779_v3  ;;  %v1781_v5 = vpop.f32.mrb[19].mxu0 }
 0x99c   :  { %v1808_v6 = vmul.f32 %v12062_v11, %v1781_v5  ;;  %v1903_v38 = vpop.f32.mrb[18].mxu1 }
 0x99d   :  { %v1813_v63 = vmul.f32 1.442695, %v1807_v4  ;;  %v1905_v7 = vpop.f32.mrb[19].mxu1 }
 0x99e   :  { %v1815_v8 = vmul.f32 1.442695, %v1808_v6 }
 0x99f   :  { %10172 = vpow2.f32 %v1813_v63  ;;  %v1785_v10 = vpop.f32.mrb[20].mxu0 }
 0x9a0   :  { %10174 = vpow2.f32 %v1815_v8  ;;  %v1809_v26 = vmul.f32 %v12059_v15, %v1785_v10  ;;  %v1787_v12 = vpop.f32.mrb[21].mxu0 }
 0x9a1   :  { %v1810_v14 = vmul.f32 %v12062_v11, %v1787_v12  ;;  %v1909_v18 = vpop.f32.mrb[20].mxu1  ;;  %v12090_v12 = vsub.s32 %v2030_v49, %v11649_v2 }
 0x9a2   :  { %v1817_v17 = vmul.f32 1.442695, %v1809_v26  ;;  %v1911_v21 = vpop.f32.mrb[21].mxu1 }
 0x9a3   :  { %v1819_v24 = vmul.f32 1.442695, %v1810_v14  ;;  %v12068_v29 = vpop.f32.mrb[22].mxu0 }
 0x9a4   :  { %10176 = vpow2.f32 %v1817_v17  ;;  %v12070_v30 = vpop.f32.mrb[23].mxu0 }
 0x9a5   :  { %10178 = vpow2.f32 %v1819_v24  ;;  %v1915_v25 = vpop.f32.mrb[22].mxu1  ;;  %v3005_v24 = vld [vmem:[#allocation34] sm:$0x3] }
 0x9a6   :  { %v1917_v37 = vpop.f32.mrb[23].mxu1  ;;  %v12109_v59 = vrot.slane %v3005_v24, %v11814_v60 }
 0x9a7   :  { %v1998_v45 = vpop.f32.mrb[24].mxu0 }
 0x9a8   :  { %v12072_v46 = vmul.f32 %v1998_v45, %v1903_v38  ;;  %v2000_v22 = vpop.f32.mrb[25].mxu0  ;;  %v3102_v48 = vmul.f32 %v12109_v59, %v11756_v27 }
 0x9a9   :  { %v12074_v40 = vpop.eup %10172  ;;  %v12076_v52 = vmul.f32 %v2000_v22, %v1905_v7  ;;  %v12078_v3 = vpop.f32.mrb[24].mxu1 }
 0x9aa   :  { %v12080_v4 = vpop.eup %10174  ;;  %v2021_v5 = vmul.f32 0.0, %v12074_v40  ;;  %v12083_v6 = vpop.f32.mrb[25].mxu1 }
 0x9ab   :  { %v2022_v63 = vmul.f32 0.0, %v12080_v4  ;;  %v2004_v8 = vpop.f32.mrb[26].mxu0 }
 0x9ac   :  { %v2023_v38 = vadd.f32 %v2021_v5, %v12072_v46  ;;  %v12087_v10 = vmul.f32 %v2004_v8, %v1909_v18  ;;  %v2006_v26 = vpop.f32.mrb[27].mxu0 }
 0x9ad   :  { %v2024_v7 = vadd.f32 %v2022_v63, %v12076_v52  ;;  %v12093_v14 = vmul.f32 %v2006_v26, %v1911_v21  ;;  %v12095_v17 = vpop.f32.mrb[26].mxu1 }
 0x9ae   :  { %v12097_v34 = vpop.eup %10176  ;;  %v2049_v33 = vrot.slane %v2023_v38, 7  ;;  %v12099_v45 = vpop.f32.mrb[27].mxu1 }
 0x9af   :  { %v12101_v22 = vpop.eup %10178  ;;  %v2027_v18 = vcombine.low %v2023_v38, %v2024_v7  ;;  %v2050_v5 = vrot.slane %v2024_v7, 7  ;;  %v2349_v8 = vmul.f32 0.0, %v12097_v34  ;;  %v2010_v2 = vpop.f32.mrb[28].mxu0 }
 0x9b0   :  { %v2053_v49 = vmul.f32 %v12074_v40, %v2049_v33  ;;  %v2350_v21 = vmul.f32 0.0, %v12101_v22  ;;  %v12106_v63 = vmul.f32 %v2010_v2, %v1915_v25  ;;  %v2012_v26 = vpop.f32.mrb[29].mxu0 }
 0x9b1   :  { %v2034_v1 = vrot.slane %v2027_v18, %v12090_v12  ;;  %v2054_v36 = vmul.f32 %v12080_v4, %v2050_v5  ;;  %v2351_v38 = vadd.f32 %v2349_v8, %v12087_v10  ;;  %v12114_v7 = vmul.f32 %v2012_v26, %v1917_v37  ;;  %v12116_v0 = vpop.f32.mrb[28].mxu1 }
 0x9b2   :  { %v2055_v25 = vadd.f32 %v2053_v49, %v12072_v46  ;;  %v2352_v2 = vadd.f32 %v2350_v21, %v12093_v14  ;;  %v12125_v53 = vpop.f32.mrb[29].mxu1  ;;  %v12128_v18 = vrot.slane %v3005_v24, %v11817_v61 }
 0x9b3   :  { %v2041_v5 = vrot.slane %v2034_v1, %v12090_v12  ;;  %v2056_v37 = vadd.f32 %v2054_v36, %v12076_v52  ;;  %v2376_v8 = vrot.slane %v2351_v38, 7  ;;  %v3103_v1 = vmul.f32 %v12109_v59, %v11763_v32 }
 0x9b4   :  { %v2079_v26 = vrot.slane %v2055_v25, 7  ;;  %v2355_v19 = vcombine.low %v2351_v38, %v2352_v2  ;;  %v2377_v23 = vrot.slane %v2352_v2, 7 }
 0x9b5   :  { %2047 = vst.msk [vmem:[#allocation3] ss:$8 sm:$0x3] %vm12119_vm15, %v2041_v5  ;;  %v2059_v49 = vcombine.low %v2055_v25, %v2056_v37  ;;  %v2080_v21 = vrot.slane %v2056_v37, 7  ;;  %v2380_v47 = vmul.f32 %v12097_v34, %v2376_v8  ;;  %v3084_v24 = vpop.f32.mrb[30].mxu1  ;;  %v1811_v5 = vmul.f32 %v12059_v15, %v12068_v29 }
 0x9b6   :  { %v2083_v36 = vmul.f32 %v12074_v40, %v2079_v26  ;;  %v2362_v39 = vrot.slane %v2355_v19, %v12090_v12  ;;  %v2381_v38 = vmul.f32 %v12101_v22, %v2377_v23  ;;  %v3109_v2 = vmul.f32 %v12128_v18, %v3084_v24  ;;  %v9540_v35 = vpop.f32.mrb[31].mxu1 }
 0x9b7   :  { %v2066_v25 = vrot.slane %v2059_v49, %v12090_v12  ;;  %v2084_v37 = vmul.f32 %v12080_v4, %v2080_v21  ;;  %v2382_v8 = vadd.f32 %v2380_v47, %v12087_v10  ;;  %v1812_v23 = vmul.f32 %v12062_v11, %v12070_v30 }
 0x9b8   :  { %v2085_v51 = vadd.f32 %v2083_v36, %v12072_v46  ;;  %v2363_v50 = vcombine.high %v2362_v39, %v2362_v39  ;;  %v2383_v26 = vadd.f32 %v2381_v38, %v12093_v14  ;;  %v12150_v19 = vadd.f32 %v3109_v2, %v3102_v48 }
 0x9b9   :  { %v2067_v35 = vcombine.high %v2066_v25, %v2066_v25  ;;  %v2086_v24 = vadd.f32 %v2084_v37, %v12076_v52  ;;  %v2405_v15 = vrot.slane %v2382_v8, 7  ;;  %v3089_v29 = vpop.f32.mrb[32].mxu1  ;;  %v1821_v37 = vmul.f32 1.442695, %v1811_v5 }
 0x9ba   :  { %v2109_v49 = vrot.slane %v2085_v51, 7  ;;  %v2370_v21 = vrot.slane %v2363_v50, %v12090_v12  ;;  %v2386_v43 = vcombine.high %v2382_v8, %v2383_v26  ;;  %v2406_v47 = vrot.slane %v2383_v26, 7  ;;  %v9543_v20 = vpop.f32.mrb[33].mxu1 }
 0x9bb   :  { %v2074_v39 = vrot.slane %v2067_v35, %v12090_v12  ;;  %v2089_v36 = vcombine.low %v2085_v51, %v2086_v24  ;;  %v2110_v38 = vrot.slane %v2086_v24, 7  ;;  %v2409_v48 = vmul.f32 %v12097_v34, %v2405_v15 }
 0x9bc   :  { %v2113_v2 = vmul.f32 %v12074_v40, %v2109_v49  ;;  %v2371_v11 = vcombine.high %v2370_v21, %v2370_v21  ;;  %v2393_v30 = vrot.slane %v2386_v43, %v12090_v12  ;;  %v2410_v25 = vmul.f32 %v12101_v22, %v2406_v47 }
 0x9bd   :  { %2077 = vst.msk [vmem:[#allocation3 + $0x1] ss:$8 sm:$0x3] %vm12119_vm15, %v2074_v39  ;;  %v2096_v50 = vrot.slane %v2089_v36, %v12090_v12  ;;  %v2114_v20 = vmul.f32 %v12080_v4, %v2110_v38  ;;  %v2411_v51 = vadd.f32 %v2409_v48, %v12087_v10  ;;  %v3094_v8 = vpop.f32.mrb[34].mxu1  ;;  %v3110_v5 = vmul.f32 %v12128_v18, %v3089_v29 }
 0x9be   :  { %v2115_v26 = vadd.f32 %v2113_v2, %v12072_v46  ;;  %2374 = vst.msk [vmem:[#allocation3 + $0x13] ss:$8 sm:$0x3] %vm12119_vm15, %v2371_v11  ;;  %v2400_v43 = vrot.slane %v2393_v30, %v12090_v12  ;;  %v2412_v35 = vadd.f32 %v2410_v25, %v12093_v14  ;;  %v9546_v24 = vpop.f32.mrb[35].mxu1  ;;  %v1823_v15 = vmul.f32 1.442695, %v1812_v23 }
 0x9bf   :  { %v2103_v49 = vrot.slane %v2096_v50, %v12090_v12  ;;  %v2116_v21 = vadd.f32 %v2114_v20, %v12076_v52  ;;  %v2435_v47 = vrot.slane %v2411_v51, 7  ;;  %v12176_v48 = vadd.f32 %v3110_v5, %v3103_v1 }
 0x9c0   :  { %v2140_v39 = vrot.slane %v2115_v26, 7  ;;  %2403 = vst.msk [vmem:[#allocation3 + $0x14] ss:$8 sm:$0x3] %vm12119_vm15, %v2400_v43  ;;  %v2415_v36 = vcombine.high %v2411_v51, %v2412_v35  ;;  %v2436_v38 = vrot.slane %v2412_v35, 7  ;;  %10180 = vpow2.f32 %v1821_v37 }
 0x9c1   :  { %v2104_v2 = vcombine.high %v2103_v49, %v2103_v49  ;;  %v2119_v11 = vcombine.low %v2115_v26, %v2116_v21  ;;  %v2141_v30 = vrot.slane %v2116_v21, 7  ;;  %v2439_v29 = vmul.f32 %v12097_v34, %v2435_v47 }
 0x9c2   :  { %v2144_v23 = vmul.f32 %v12074_v40, %v2140_v39  ;;  %v2422_v25 = vrot.slane %v2415_v36, %v12090_v12  ;;  %v2440_v50 = vmul.f32 %v12101_v22, %v2436_v38  ;;  %10182 = vpow2.f32 %v1823_v15 }
 0x9c3   :  { %2107 = vst.msk [vmem:[#allocation3 + $0x2] ss:$8 sm:$0x3] %vm12119_vm15, %v2104_v2  ;;  %v2126_v20 = vrot.slane %v2119_v11, %v12090_v12  ;;  %v2145_v1 = vmul.f32 %v12080_v4, %v2141_v30  ;;  %v2441_v51 = vadd.f32 %v2439_v29, %v12087_v10  ;;  %v3111_v15 = vmul.f32 %v12128_v18, %v3094_v8 }
 0x9c4   :  { %v2146_v26 = vadd.f32 %v2144_v23, %v12072_v46  ;;  %v2423_v43 = vcombine.high %v2422_v25, %v2422_v25  ;;  %v2442_v37 = vadd.f32 %v2440_v50, %v12093_v14  ;;  %v3104_v8 = vmul.f32 %v12109_v59, %v11778_v42 }
 0x9c5   :  { %v2127_v35 = vcombine.high %v2126_v20, %v2126_v20  ;;  %v2147_v5 = vadd.f32 %v2145_v1, %v12076_v52  ;;  %v2465_v24 = vrot.slane %v2441_v51, 7 }
 0x9c6   :  { %v2169_v49 = vrot.slane %v2146_v26, 7  ;;  %v2430_v21 = vrot.slane %v2423_v43, %v12090_v12  ;;  %v2445_v47 = vcombine.high %v2441_v51, %v2442_v37  ;;  %v2466_v39 = vrot.slane %v2442_v37, 7 }
 0x9c7   :  { %v2134_v36 = vrot.slane %v2127_v35, %v12090_v12  ;;  %v2150_v38 = vcombine.high %v2146_v26, %v2147_v5  ;;  %v2170_v2 = vrot.slane %v2147_v5, 7  ;;  %v2469_v11 = vmul.f32 %v12097_v34, %v2465_v24 }
 0x9c8   :  { %v2173_v30 = vmul.f32 %v12074_v40, %v2169_v49  ;;  %2433 = vst.msk [vmem:[#allocation3 + $0x15] ss:$8 sm:$0x3] %vm12119_vm15, %v2430_v21  ;;  %v2452_v29 = vrot.slane %v2445_v47, %v12090_v12  ;;  %v2470_v18 = vmul.f32 %v12101_v22, %v2466_v39  ;;  %v12207_v43 = vadd.f32 %v3111_v15, %v3104_v8 }
 0x9c9   :  { %v2135_v23 = vcombine.high %v2134_v36, %v2134_v36  ;;  %v2157_v25 = vrot.slane %v2150_v38, %v12090_v12  ;;  %v2174_v50 = vmul.f32 %v12080_v4, %v2170_v2  ;;  %v2471_v20 = vadd.f32 %v2469_v11, %v12087_v10 }
 0x9ca   :  { %v2175_v1 = vadd.f32 %v2173_v30, %v12072_v46  ;;  %v2459_v51 = vrot.slane %v2452_v29, %v12090_v12  ;;  %v2472_v26 = vadd.f32 %v2470_v18, %v12093_v14  ;;  %v12213_v5 = vpop.eup %10180 }
 0x9cb   :  { %2138 = vst.msk [vmem:[#allocation3 + $0x3] ss:$8 sm:$0x3] %vm12119_vm15, %v2135_v23  ;;  %v2164_v59 = vrot.slane %v2157_v25, %v12090_v12  ;;  %v2176_v37 = vadd.f32 %v2174_v50, %v12076_v52  ;;  %v2496_v35 = vrot.slane %v2471_v20, 7 }
 0x9cc   :  { %v2199_v24 = vrot.slane %v2175_v1, 7  ;;  %v2460_v49 = vcombine.high %v2459_v51, %v2459_v51  ;;  %v2475_v21 = vcombine.high %v2471_v20, %v2472_v26  ;;  %v2497_v47 = vrot.slane %v2472_v26, 7  ;;  %v12215_v39 = vpop.eup %10182 }
 0x9cd   :  { %2167 = vst.msk [vmem:[#allocation3 + $0x4] ss:$8 sm:$0x3] %vm12119_vm15, %v2164_v59  ;;  %v2179_v15 = vcombine.high %v2175_v1, %v2176_v37  ;;  %v2200_v36 = vrot.slane %v2176_v37, 7  ;;  %v2500_v38 = vmul.f32 %v12213_v5, %v2496_v35 }
 0x9ce   :  { %v2203_v2 = vmul.f32 %v12074_v40, %v2199_v24  ;;  %2463 = vst.msk [vmem:[#allocation3 + $0x16] ss:$8 sm:$0x3] %vm12119_vm15, %v2460_v49  ;;  %v2482_v11 = vrot.slane %v2475_v21, %v12090_v12  ;;  %v2501_v30 = vmul.f32 %v12215_v39, %v2497_v47 }
 0x9cf   :  { %v2186_v29 = vrot.slane %v2179_v15, %v12090_v12  ;;  %v2204_v18 = vmul.f32 %v12080_v4, %v2200_v36  ;;  %v2502_v8 = vadd.f32 %v2500_v38, %v12106_v63 }
 0x9d0   :  { %v2205_v23 = vadd.f32 %v2203_v2, %v12072_v46  ;;  %v2483_v25 = vcombine.high %v2482_v11, %v2482_v11  ;;  %v2503_v50 = vadd.f32 %v2501_v30, %v12114_v7 }
 0x9d1   :  { %v2187_v20 = vcombine.high %v2186_v29, %v2186_v29  ;;  %v2206_v1 = vadd.f32 %v2204_v18, %v12076_v52  ;;  %v2525_v51 = vrot.slane %v2502_v8, 7 }
 0x9d2   :  { %v2229_v26 = vrot.slane %v2205_v23, 7  ;;  %v2490_v59 = vrot.slane %v2483_v25, %v12090_v12  ;;  %v2506_v37 = vcombine.low %v2502_v8, %v2503_v50  ;;  %v2526_v35 = vrot.slane %v2503_v50, 7 }
 0x9d3   :  { %v2194_v24 = vrot.slane %v2187_v20, %v12090_v12  ;;  %v2209_v49 = vcombine.high %v2205_v23, %v2206_v1  ;;  %v2230_v21 = vrot.slane %v2206_v1, 7  ;;  %v2529_v47 = vmul.f32 %v12213_v5, %v2525_v51 }
 0x9d4   :  { %v2233_v15 = vmul.f32 %v12074_v40, %v2229_v26  ;;  %v2491_v36 = vcombine.high %v2490_v59, %v2490_v59  ;;  %v2513_v38 = vrot.slane %v2506_v37, %v12090_v12  ;;  %v2530_v2 = vmul.f32 %v12215_v39, %v2526_v35 }
 0x9d5   :  { %2197 = vst.msk [vmem:[#allocation3 + $0x5] ss:$8 sm:$0x3] %vm12119_vm15, %v2194_v24  ;;  %v2216_v11 = vrot.slane %v2209_v49, %v12090_v12  ;;  %v2234_v30 = vmul.f32 %v12080_v4, %v2230_v21  ;;  %v2531_v29 = vadd.f32 %v2529_v47, %v12106_v63 }
 0x9d6   :  { %v2235_v18 = vadd.f32 %v2233_v15, %v12072_v46  ;;  %2494 = vst.msk [vmem:[#allocation3 + $0x17] ss:$8 sm:$0x3] %vm12119_vm15, %v2491_v36  ;;  %v2520_v40 = vrot.slane %v2513_v38, %v12090_v12  ;;  %v2532_v8 = vadd.f32 %v2530_v2, %v12114_v7 }
 0x9d7   :  { %v2223_v23 = vrot.slane %v2216_v11, %v12090_v12  ;;  %v2236_v25 = vadd.f32 %v2234_v30, %v12076_v52  ;;  %v2555_v50 = vrot.slane %v2531_v29, 7 }
 0x9d8   :  { %v2260_v20 = vrot.slane %v2235_v18, 7  ;;  %2523 = vst.msk [vmem:[#allocation3 + $0x20] ss:$8 sm:$0x3] %vm12119_vm15, %v2520_v40  ;;  %v2535_v4 = vcombine.low %v2531_v29, %v2532_v8  ;;  %v2556_v1 = vrot.slane %v2532_v8, 7 }
 0x9d9   :  { %v2224_v51 = vcombine.high %v2223_v23, %v2223_v23  ;;  %v2239_v46 = vcombine.high %v2235_v18, %v2236_v25  ;;  %v2261_v26 = vrot.slane %v2236_v25, 7  ;;  %v2559_v59 = vmul.f32 %v12213_v5, %v2555_v50 }
 0x9da   :  { %v2264_v37 = vmul.f32 %v12097_v34, %v2260_v20  ;;  %v2542_v35 = vrot.slane %v2535_v4, %v12090_v12  ;;  %v2560_v24 = vmul.f32 %v12215_v39, %v2556_v1 }
 0x9db   :  { %2227 = vst.msk [vmem:[#allocation3 + $0x6] ss:$8 sm:$0x3] %vm12119_vm15, %v2224_v51  ;;  %v2246_v52 = vrot.slane %v2239_v46, %v12090_v12  ;;  %v2265_v49 = vmul.f32 %v12101_v22, %v2261_v26  ;;  %v2561_v21 = vadd.f32 %v2559_v59, %v12106_v63 }
 0x9dc   :  { %v2266_v47 = vadd.f32 %v2264_v37, %v12087_v10  ;;  %v2543_v15 = vcombine.high %v2542_v35, %v2542_v35  ;;  %v2562_v36 = vadd.f32 %v2560_v24, %v12114_v7 }
 0x9dd   :  { %v2247_v38 = vcombine.high %v2246_v52, %v2246_v52  ;;  %v2267_v2 = vadd.f32 %v2265_v49, %v12093_v14  ;;  %v2585_v11 = vrot.slane %v2561_v21, 7 }
 0x9de   :  { %v2289_v30 = vrot.slane %v2266_v47, 7  ;;  %v2550_v29 = vrot.slane %v2543_v15, %v12090_v12  ;;  %v2565_v18 = vcombine.low %v2561_v21, %v2562_v36  ;;  %v2586_v40 = vrot.slane %v2562_v36, 7 }
 0x9df   :  { %v2254_v8 = vrot.slane %v2247_v38, %v12090_v12  ;;  %v2270_v23 = vcombine.low %v2266_v47, %v2267_v2  ;;  %v2290_v25 = vrot.slane %v2267_v2, 7  ;;  %v2589_v50 = vmul.f32 %v12213_v5, %v2585_v11 }
 0x9e0   :  { %v2293_v20 = vmul.f32 %v12097_v34, %v2289_v30  ;;  %2553 = vst.msk [vmem:[#allocation3 + $0x21] ss:$8 sm:$0x3] %vm12119_vm15, %v2550_v29  ;;  %v2572_v4 = vrot.slane %v2565_v18, %v12090_v12  ;;  %v2590_v1 = vmul.f32 %v12215_v39, %v2586_v40 }
 0x9e1   :  { %v2255_v51 = vcombine.high %v2254_v8, %v2254_v8  ;;  %v2277_v46 = vrot.slane %v2270_v23, %v12090_v12  ;;  %v2294_v26 = vmul.f32 %v12101_v22, %v2290_v25  ;;  %v2591_v59 = vadd.f32 %v2589_v50, %v12106_v63 }
 0x9e2   :  { %v2295_v37 = vadd.f32 %v2293_v20, %v12087_v10  ;;  %v2579_v35 = vrot.slane %v2572_v4, %v12090_v12  ;;  %v2592_v24 = vadd.f32 %v2590_v1, %v12114_v7  ;;  %v2912_v1 = vld [vmem:[%s13942_s8] sm:$0xff] }
 0x9e3   :  { %2258 = vst.msk [vmem:[#allocation3 + $0x7] ss:$8 sm:$0x3] %vm12119_vm15, %v2255_v51  ;;  %v2284_v52 = vrot.slane %v2277_v46, %v12090_v12  ;;  %v2296_v49 = vadd.f32 %v2294_v26, %v12093_v14  ;;  %v2616_v21 = vrot.slane %v2591_v59, 7 }
 0x9e4   :  { %v2319_v47 = vrot.slane %v2295_v37, 7  ;;  %v2580_v15 = vcombine.high %v2579_v35, %v2579_v35  ;;  %v2595_v36 = vcombine.low %v2591_v59, %v2592_v24  ;;  %v2617_v38 = vrot.slane %v2592_v24, 7 }
 0x9e5   :  { %2287 = vst.msk [vmem:[#allocation3 + $0x10] ss:$8 sm:$0x3] %vm12119_vm15, %v2284_v52  ;;  %v2299_v2 = vcombine.low %v2295_v37, %v2296_v49  ;;  %v2320_v11 = vrot.slane %v2296_v49, 7  ;;  %v2620_v30 = vmul.f32 %v12213_v5, %v2616_v21 }
 0x9e6   :  { %v2323_v29 = vmul.f32 %v12097_v34, %v2319_v47  ;;  %2583 = vst.msk [vmem:[#allocation3 + $0x22] ss:$8 sm:$0x3] %vm12119_vm15, %v2580_v15  ;;  %v2602_v18 = vrot.slane %v2595_v36, %v12090_v12  ;;  %v2621_v40 = vmul.f32 %v12215_v39, %v2617_v38  ;;  %v2913_v34 = vld [vmem:[%s13942_s8 + $0x8] sm:$0xff]  ;;  %v13943_v38 = vmov 0.0|0.0  }
 0x9e7   :  { %v2306_v8 = vrot.slane %v2299_v2, %v12090_v12  ;;  %v2324_v23 = vmul.f32 %v12101_v22, %v2320_v11  ;;  %v2622_v25 = vadd.f32 %v2620_v30, %v12106_v63  ;;  %v9869_v59 = vpack.c.bf16 %v2913_v34, %v2912_v1 }
 0x9e8   :  { %v2325_v50 = vadd.f32 %v2323_v29, %v12087_v10  ;;  %v2603_v20 = vcombine.high %v2602_v18, %v2602_v18  ;;  %v2623_v4 = vadd.f32 %v2621_v40, %v12114_v7  ;;  %v2914_v18 = vld [vmem:[%s13942_s8 + $0x10] sm:$0xff]  ;;  %v2915_v40 = vld [vmem:[%s13942_s8 + $0x18] sm:$0xff] }
 0x9e9   :  { %v2307_v51 = vcombine.high %v2306_v8, %v2306_v8  ;;  %v2326_v46 = vadd.f32 %v2324_v23, %v12093_v14  ;;  %v2645_v26 = vrot.slane %v2622_v25, 7  ;;  %9870 = vmatpush3.bf16.msra.mxu0 %v9869_v59 }
 0x9ea   :  { %v2675_v37 = vld [vmem:[#allocation3] sm:$0xff]  ;;  %v2610_v35 = vrot.slane %v2603_v20, %v12090_v12  ;;  %v2626_v24 = vcombine.high %v2622_v25, %v2623_v4  ;;  %v2646_v52 = vrot.slane %v2623_v4, 7  ;;  %v2676_v21 = vld [vmem:[#allocation3 + $0x8] sm:$0xff]  ;;  %9871 = vmatprep.subr.bf16.mxu0 %v13943_v38  ;;  %v9107_v25 = vmul.f32 -1.442695, %v11776_v41 }
 0x9eb   :  { %v12299_v22 = vmul.f32 %v12078_v3, %v2675_v37  ;;  %v2314_v10 = vrot.slane %v2307_v51, %v12090_v12  ;;  %v2329_v49 = vcombine.low %v2325_v50, %v2326_v46  ;;  %v2649_v47 = vmul.f32 %v12213_v5, %v2645_v26 }
 0x9ec   :  { %v2611_v15 = vcombine.high %v2610_v35, %v2610_v35  ;;  %v2633_v14 = vrot.slane %v2626_v24, %v12090_v12  ;;  %v2650_v36 = vmul.f32 %v12215_v39, %v2646_v52  ;;  %v12319_v11 = vmul.f32 %v12083_v6, %v2676_v21  ;;  %v2901_v21 = vpop.permute.xlu0 %2900 }
 0x9ed   :  { %2317 = vst.msk [vmem:[#allocation3 + $0x11] ss:$8 sm:$0x3] %vm12119_vm15, %v2314_v10  ;;  %v2336_v3 = vrot.slane %v2329_v49, %v12090_v12  ;;  %2810 = vrot.lane.b32.xlu1 %v12299_v22, %s11209_s10  ;;  %2798 = vrot.lane.b32.xlu0 %v12299_v22, %s11206_s4  ;;  %v2651_v5 = vadd.f32 %v2649_v47, %v12106_v63  ;;  %v9106_v63 = vmul.f32 -1.442695, %v11761_v31 }
 0x9ee   :  { %2614 = vst.msk [vmem:[#allocation3 + $0x23] ss:$8 sm:$0x3] %vm12119_vm15, %v2611_v15  ;;  %v2640_v39 = vrot.slane %v2633_v14, %v12090_v12  ;;  %v2652_v2 = vadd.f32 %v2650_v36, %v12114_v7  ;;  %v9872_v6 = vpack.c.bf16 %v2915_v40, %v2914_v18  ;;  %v3239_v10 = vld [vmem:[%s13944_s30] sm:$0x3] }
 0x9ef   :  { %v2343_v30 = vrot.slane %v2336_v3, %v12090_v12  ;;  %10184 = vpow2.f32 %v9106_v63  ;;  %9565 = vmatpush3.msk.msra.mxu1 %vm1589_vm6, %v3239_v10  ;;  %v9104_v49 = vld [vmem:[#allocation22] ss:$0 sm:$0xff] }
 0x9f0   :  { %2643 = vst.msk [vmem:[#allocation3 + $0x24] ss:$8 sm:$0x3] %vm12119_vm15, %v2640_v39  ;;  %v2655_v29 = vcombine.high %v2651_v5, %v2652_v2  ;;  %9873 = vmatpush3.bf16.msra.mxu0 %v9872_v6  ;;  %10186 = vpow2.f32 %v9107_v25  ;;  %9892 = vmatprep.subr.bf16.mxu1 %v11901_v9  ;;  %v2789_v47 = vmul.f32 %v9104_v49, %v11824_v54  ;;  %v9115_v2 = vld [vmem:[#allocation33] ss:$0 sm:$0xff]  ;;  %v3146_v63 = vld [vmem:[%s13945_s15] sm:$0xff] }
 0x9f1   :  { %v2344_v8 = vcombine.high %v2343_v30, %v2343_v30  ;;  %2822 = vrot.lane.b32.xlu1 %v12299_v22, %s11210_s11  ;;  %2864 = vrot.lane.b32.xlu0 %v12319_v11, %s11210_s11  ;;  %v2791_v10 = vmul.f32 %v9104_v49, %v11836_v58 }
 0x9f2   :  { %v2662_v7 = vrot.slane %v2655_v29, %v12090_v12  ;;  %9877 = vmatprep.subr.bf16.mxu0 %v13943_v38  ;;  %v2792_v15 = vadd.f32 %v2789_v47, %v12299_v22  ;;  %v12390_v29 = vadd.f32 %v9115_v2, %v12150_v19  ;;  %v2790_v19 = vmul.f32 %v9104_v49, %v11830_v56 }
 0x9f3   :  { %2347 = vst.msk [vmem:[#allocation3 + $0x12] ss:$8 sm:$0x3] %vm12119_vm15, %v2344_v8  ;;  %v3147_v8 = vld [vmem:[%s13945_s15 + $0x8] sm:$0xff] }
 0x9f4   :  { %v2663_v23 = vcombine.high %v2662_v7, %v2662_v7  ;;  %v9116_v6 = vmul.f32 -1.442695, %v12390_v29  ;;  %v12396_v7 = vadd.f32 %v9115_v2, %v12176_v48 }
 0x9f5   :  { %2840 = vrot.lane.b32.xlu1 %v12319_v11, %s11206_s4 }
 0x9f6   :  { %v2670_v50 = vrot.slane %v2663_v23, %v12090_v12 }
 0x9f8   :  { %2673 = vst.msk [vmem:[#allocation3 + $0x25] ss:$8 sm:$0x3] %vm12119_vm15, %v2670_v50  ;;  %v9878_v50 = vpack.c.bf16 %v3147_v8, %v3146_v63 }
 0x9f9   :  { %2852 = vrot.lane.b32.xlu1 %v12319_v11, %s11209_s10  ;;  %v10185_v51 = vpop.eup %10184 }
 0x9fa   :  { %v2677_v20 = vld [vmem:[#allocation3 + $0x10] sm:$0xff]  ;;  %v2678_v4 = vld [vmem:[#allocation3 + $0x18] sm:$0xff]  ;;  %v2886_v26 = vadd.f32 1.0, %v10185_v51  ;;  %v3149_v51 = vld [vmem:[%s13945_s15 + $0x18] sm:$0xff] }
 0x9fb   :  { %v12344_v1 = vmul.f32 %v12095_v17, %v2677_v20  ;;  %v12347_v34 = vmul.f32 %v12099_v45, %v2678_v4  ;;  %v10187_v17 = vpop.eup %10186  ;;  %v3148_v4 = vld [vmem:[%s13945_s15 + $0x10] sm:$0xff] }
 0x9fc   :  { %10188 = vrcp.f32 %v2886_v26  ;;  %v2887_v37 = vadd.f32 1.0, %v10187_v17  ;;  %v12403_v26 = vadd.f32 %v9115_v2, %v12207_v43 }
 0x9fd   :  { %2842 = vrot.lane.b32.xlu1 %v12347_v34, %s11206_s4  ;;  %2800 = vrot.lane.b32.xlu0 %v12344_v1, %s11206_s4  ;;  %v2793_v17 = vadd.f32 %v2790_v19, %v12344_v1 }
 0x9fe   :  { %10190 = vrcp.f32 %v2887_v37  ;;  %v13946_v37 = vmov 0.0  }
 0x9ff   :  { %v2679_v46 = vld [vmem:[#allocation3 + $0x20] sm:$0x3f]  ;;  %v2680_v45 = vld [vmem:[#allocation3 + $0x28] sm:$0x3f]  ;;  %10192 = vpow2.f32 %v9116_v6 }
 0xa00   :  { %v12358_v59 = vmul.f32 %v12116_v0, %v2679_v46  ;;  %v12365_v35 = vmul.f32 %v12125_v53, %v2680_v45  ;;  %v9117_v46 = vmul.f32 -1.442695, %v12396_v7 }
 0xa01   :  { %2854 = vrot.lane.b32.xlu1 %v12347_v34, %s11209_s10  ;;  %2812 = vrot.lane.b32.xlu0 %v12344_v1, %s11209_s10 }
 0xa02   :  { %10194 = vpow2.f32 %v9117_v46 }
 0xa05   :  { %2824 = vrot.lane.b32.xlu0 %v12344_v1, %s11210_s11  ;;  %2802 = vrot.lane.b32.xlu1 %v12358_v59, %s11206_s4 }
 0xa06   :  { %v10189_v0 = vpop.eup %10188 }
 0xa07   :  { %v2895_v53 = vmul.f32 %v10189_v0, %v11761_v31  ;;  %v9881_v0 = vpack.c.bf16 %v3149_v51, %v3148_v4 }
 0xa08   :  { %v10191_v24 = vpop.eup %10190 }
 0xa09   :  { %2814 = vrot.lane.b32.xlu0 %v12358_v59, %s11209_s10  ;;  %2844 = vrot.lane.b32.xlu1 %v12365_v35, %s11206_s4  ;;  %v2896_v52 = vmul.f32 %v10191_v24, %v11776_v41 }
 0xa0d   :  { %2826 = vrot.lane.b32.xlu0 %v12358_v59, %s11210_s11  ;;  %2856 = vrot.lane.b32.xlu1 %v12365_v35, %s11209_s10 }
 0xa11   :  { %2866 = vrot.lane.b32.xlu0 %v12347_v34, %s11210_s11  ;;  %2868 = vrot.lane.b32.xlu1 %v12365_v35, %s11210_s11 }
 0xa15   :  { %2902 = vrot.lane.b32.xlu0 %v2895_v53, %s11206_s4  ;;  %v9118_v53 = vmul.f32 -1.442695, %v12403_v26 }
 0xa17   :  { %10196 = vpow2.f32 %v9118_v53  ;;  %v9122_v53 = vld [vmem:[#allocation36] ss:$0 sm:$0xff] }
 0xa19   :  { %2904 = vrot.lane.b32.xlu0 %v2896_v52, %s11206_s4 }
 0xa5f   :  { %v2811_v31 = vpop.permute.xlu1 %2810  ;;  %v2799_v14 = vpop.permute.xlu0 %2798 }
 0xa60   :  { %v2807_v36 = vadd.f32 %v2799_v14, %v2792_v15  ;;  %v10193_v15 = vpop.eup %10192 }
 0xa62   :  { %v2819_v3 = vadd.f32 %v2811_v31, %v2807_v36 }
 0xa63   :  { %v2823_v41 = vpop.permute.xlu1 %2822  ;;  %v2865_v18 = vpop.permute.xlu0 %2864 }
 0xa64   :  { %v2831_v5 = vadd.f32 %v2823_v41, %v2819_v3  ;;  %v3134_v41 = vadd.f32 1.0, %v10193_v15 }
 0xa66   :  { %v2834_v39 = vadd.f32 %v2831_v5, %v12319_v11  ;;  %10198 = vrcp.f32 %v3134_v41 }
 0xa67   :  { %v2841_v30 = vpop.permute.xlu1 %2840 }
 0xa68   :  { %v2849_v54 = vadd.f32 %v2841_v30, %v2834_v39  ;;  %v10195_v39 = vpop.eup %10194 }
 0xa69   :  { %v3135_v58 = vadd.f32 1.0, %v10195_v39 }
 0xa6b   :  { %v2853_v40 = vpop.permute.xlu1 %2852  ;;  %10200 = vrcp.f32 %v3135_v58 }
 0xa6c   :  { %v2861_v22 = vadd.f32 %v2853_v40, %v2849_v54  ;;  %v10197_v40 = vpop.eup %10196 }
 0xa6e   :  { %v2873_v23 = vadd.f32 %v2865_v18, %v2861_v22 }
 0xa6f   :  { %v2843_v11 = vpop.permute.xlu1 %2842  ;;  %v2801_v25 = vpop.permute.xlu0 %2800 }
 0xa70   :  { %v2909_v20 = vmul.f32 %v2901_v21, %v2873_v23  ;;  %v2808_v56 = vadd.f32 %v2801_v25, %v2793_v17  ;;  %v2794_v21 = vadd.f32 %v2791_v10, %v12358_v59  ;;  %v13947_v17 = vmov 1.0  }
 0xa72   :  { %9524 = vmatmul.mubr.msk.f32.vlgmr.msra.gmra.mrb[30].mxu0 %vm1161_vm13, %v2909_v20  ;;  %v10199_v20 = vpop.eup %10198 }
 0xa73   :  { %v2855_v48 = vpop.permute.xlu1 %2854  ;;  %v2813_v45 = vpop.permute.xlu0 %2812  ;;  %9526 = vmatprep.mubr.msk.f32.mxu0 %vm11202_vm7, %v13946_v37  ;;  %9879 = vmatpush3.bf16.msra.mxu0 %v9878_v50  ;;  %v12423_v19 = vmul.f32 %v10199_v20, %v12390_v29 }
 0xa74   :  { %9880 = vmatprep.subr.bf16.mxu0 %v13943_v38  ;;  %v2820_v24 = vadd.f32 %v2813_v45, %v2808_v56 }
 0xa75   :  { %v10201_v4 = vpop.eup %10200 }
 0xa76   :  { %v12431_v51 = vmul.f32 %v10201_v4, %v12396_v7 }
 0xa77   :  { %v2825_v43 = vpop.permute.xlu0 %2824  ;;  %v2803_v52 = vpop.permute.xlu1 %2802  ;;  %9882 = vmatpush3.bf16.msra.mxu0 %v9881_v0 }
 0xa78   :  { %v2832_v1 = vadd.f32 %v2825_v43, %v2820_v24  ;;  %9884 = vmatprep.subr.bf16.mxu0 %v11901_v9  ;;  %v2809_v14 = vadd.f32 %v2803_v52, %v2794_v21 }
 0xa7a   :  { %v2835_v31 = vadd.f32 %v2832_v1, %v12347_v34  ;;  %v3136_v34 = vadd.f32 1.0, %v10197_v40 }
 0xa7b   :  { %v2815_v47 = vpop.permute.xlu0 %2814  ;;  %v2845_v36 = vpop.permute.xlu1 %2844 }
 0xa7c   :  { %v2821_v3 = vadd.f32 %v2815_v47, %v2809_v14  ;;  %v2850_v30 = vadd.f32 %v2843_v11, %v2835_v31  ;;  %10202 = vrcp.f32 %v3136_v34 }
 0xa7e   :  { %v2862_v22 = vadd.f32 %v2855_v48, %v2850_v30 }
 0xa7f   :  { %v2827_v5 = vpop.permute.xlu0 %2826  ;;  %v2857_v49 = vpop.permute.xlu1 %2856 }
 0xa80   :  { %v2833_v2 = vadd.f32 %v2827_v5, %v2821_v3 }
 0xa82   :  { %v2836_v54 = vadd.f32 %v2833_v2, %v12365_v35 }
 0xa83   :  { %v2867_v18 = vpop.permute.xlu0 %2866  ;;  %v2869_v25 = vpop.permute.xlu1 %2868 }
 0xa84   :  { %v2851_v59 = vadd.f32 %v2845_v36, %v2836_v54  ;;  %v2874_v8 = vadd.f32 %v2867_v18, %v2862_v22 }
 0xa86   :  { %v2863_v63 = vadd.f32 %v2857_v49, %v2851_v59  ;;  %v10203_v46 = vpop.eup %10202 }
 0xa87   :  { %v2903_v6 = vpop.permute.xlu0 %2902  ;;  %v12440_v29 = vmul.f32 %v10203_v46, %v12403_v26 }
 0xa88   :  { %v2910_v23 = vmul.f32 %v2903_v6, %v2874_v8  ;;  %v2875_v50 = vadd.f32 %v2869_v25, %v2863_v63 }
 0xa8a   :  { %9527 = vmatmul.mubr.msk.f32.gmra.mrb[32].mxu0 %vm1161_vm13, %v2910_v23 }
 0xa8b   :  { %v2905_v11 = vpop.permute.xlu0 %2904  ;;  %9529 = vmatprep.mubr.msk.f32.mxu0 %vm11202_vm7, %v13946_v37 }
 0xa8c   :  { %v2911_v35 = vmul.f32 %v2905_v11, %v2875_v50 }
 0xa8e   :  { %9530 = vmatmul.mubr.msk.f32.gmra.mrb[34].mxu0 %vm1161_vm13, %v2911_v35 }
 0xa8f   :  { %9555 = vmatprep.mubr.msk.f32.mxu0 %vm11202_vm7, %v13946_v37 }
 0xa92   :  { %9556 = vmatmul.mubr.msk.f32.vlgmr.msra.gmra.mrb[36].mxu0 %vm1161_vm13, %v12423_v19 }
 0xa93   :  { %9558 = vmatprep.mubr.msk.f32.mxu0 %vm11202_vm7, %v13946_v37  ;;  %9886 = vmatpush1.bf16.msra.mxu0 %v11921_v44 }
 0xa94   :  { %9888 = vmatprep.subr.bf16.mxu0 %v11952_v28 }
 0xa96   :  { %9559 = vmatmul.mubr.msk.f32.gmra.mrb[38].mxu0 %vm1161_vm13, %v12431_v51 }
 0xa97   :  { %9561 = vmatprep.mubr.msk.f32.mxu0 %vm11202_vm7, %v13946_v37  ;;  %9890 = vmatpush1.bf16.msra.mxu0 %v11964_v55 }
 0xa98   :  { %9133 = vmatprep.subr.msk.mxu0 %vm11966_vm11, %v13947_v17 }
 0xa9a   :  { %9562 = vmatmul.mubr.msk.f32.gmra.mrb[40].mxu0 %vm1161_vm13, %v12440_v29 }
 0xa9b   :  { %3443 = vmatprep.mubr.f32.mxu0 %v13946_v37 }
 0xb65   :  { %v3225_v7 = vpop.f32.mrb[36].mxu0 }
 0xb66   :  { %3586 = vrot.lane.b32.xlu1 %v3225_v7, %s11204_s7  ;;  %v9557_v48 = vpop.f32.mrb[37].mxu0  ;;  %9567 = vmatmul.mubr.msk.f32.vlgmr.msra.gmra.mrb[36].mxu1 %vm1579_vm8, %v3225_v7 }
 0xb67   :  { %9569 = vmatprep.mubr.msk.f32.mxu1 %vm11202_vm7, %v13946_v37  ;;  %9894 = vmatpush1.bf16.msra.mxu1 %v11921_v44 }
 0xb68   :  { %9896 = vmatprep.subr.bf16.mxu1 %v11952_v28 }
 0xb69   :  { %v3230_v26 = vpop.f32.mrb[38].mxu0 }
 0xb6a   :  { %3588 = vrot.lane.b32.xlu0 %v3230_v26, %s11204_s7  ;;  %v9560_v45 = vpop.f32.mrb[39].mxu0  ;;  %9570 = vmatmul.mubr.msk.f32.gmra.mrb[38].mxu1 %vm1579_vm8, %v3230_v26 }
 0xb6b   :  { %9572 = vmatprep.mubr.msk.f32.mxu1 %vm11202_vm7, %v13946_v37  ;;  %9898 = vmatpush1.bf16.msra.mxu1 %v11964_v55 }
 0xb6c   :  { %9138 = vmatprep.subr.msk.mxu1 %vm11966_vm11, %v13947_v17 }
 0xb6d   :  { %v3235_v0 = vpop.f32.mrb[40].mxu0 }
 0xb6e   :  { %4322 = vrot.lane.b32.xlu0 %v3225_v7, %s11205_s19  ;;  %3590 = vrot.lane.b32.xlu1 %v3235_v0, %s11204_s7  ;;  %v9563_v56 = vpop.f32.mrb[41].mxu0 }
 0xb6f   :  { %9573 = vmatmul.mubr.msk.f32.gmra.mrb[40].mxu1 %vm1579_vm8, %v3235_v0 }
 0xb70   :  { %3567 = vmatprep.mubr.f32.mxu1 %v13946_v37 }
 0xb72   :  { %4326 = vrot.lane.b32.xlu0 %v3235_v0, %s11205_s19  ;;  %4324 = vrot.lane.b32.xlu1 %v3230_v26, %s11205_s19 }
 0xbd8   :  { %v3587_v26 = vpop.permute.xlu1 %3586 }
 0xbdc   :  { %v3589_v45 = vpop.permute.xlu0 %3588 }
 0xbe0   :  { %v3591_v56 = vpop.permute.xlu1 %3590 }
 0xc39   :  { %v3325_v24 = vpop.f32.mrb[36].mxu1 }
 0xc3a   :  { %v3326_v43 = vadd.f32 %v9122_v53, %v3325_v24  ;;  %v9568_v52 = vpop.f32.mrb[37].mxu1  ;;  %v4325_v24 = vpop.permute.xlu1 %4324 }
 0xc3b   :  { %v3366_v52 = vld [vmem:[#allocation30] sm:$0x3] }
 0xc3c   :  { %v3342_v1 = vand.u32 2147483647, %v3326_v43  ;;  %v3339_v8 = vmax.f32 %v3326_v43, 0.0 }
 0xc3d   :  { %v3330_v10 = vpop.f32.mrb[38].mxu1 }
 0xc3e   :  { %v3345_v21 = vsub.f32 0.0, %v3342_v1  ;;  %v3331_v47 = vadd.f32 %v9122_v53, %v3330_v10  ;;  %v9571_v15 = vpop.f32.mrb[39].mxu1  ;;  %v3367_v1 = vmul.f32 1.442695, %v3366_v52 }
 0xc40   :  { %v3348_v31 = vmul.f32 1.442695, %v3345_v21  ;;  %v3343_v14 = vand.u32 2147483647, %v3331_v47  ;;  %v3340_v50 = vmax.f32 %v3331_v47, 0.0 }
 0xc42   :  { %10204 = vpow2.f32 %v3348_v31  ;;  %v3346_v36 = vsub.f32 0.0, %v3343_v14  ;;  %v3335_v3 = vpop.f32.mrb[40].mxu1 }
 0xc43   :  { %v3336_v41 = vadd.f32 %v9122_v53, %v3335_v3  ;;  %v9574_v5 = vpop.f32.mrb[41].mxu1  ;;  %v4323_v53 = vpop.permute.xlu0 %4322 }
 0xc44   :  { %v3350_v39 = vmul.f32 1.442695, %v3346_v36 }
 0xc45   :  { %v3344_v2 = vand.u32 2147483647, %v3336_v41  ;;  %v3341_v46 = vmax.f32 %v3336_v41, 0.0 }
 0xc46   :  { %10206 = vpow2.f32 %v3350_v39 }
 0xc47   :  { %v3347_v30 = vsub.f32 0.0, %v3344_v2  ;;  %v4327_v43 = vpop.permute.xlu0 %4326 }
 0xc49   :  { %v3352_v54 = vmul.f32 1.442695, %v3347_v30 }
 0xc4b   :  { %10208 = vpow2.f32 %v3352_v54 }
 0xc4c   :  { %v10205_v58 = vpop.eup %10204 }
 0xc4d   :  { %v3354_v49 = vadd.f32 1.0, %v10205_v58 }
 0xc4f   :  { %10210 = vlog2.f32 %v3354_v49 }
 0xc50   :  { %v10207_v18 = vpop.eup %10206 }
 0xc51   :  { %v3355_v40 = vadd.f32 1.0, %v10207_v18 }
 0xc53   :  { %10212 = vlog2.f32 %v3355_v40 }
 0xc55   :  { %v10209_v59 = vpop.eup %10208 }
 0xc56   :  { %v3356_v22 = vadd.f32 1.0, %v10209_v59 }
 0xc58   :  { %10214 = vlog2.f32 %v3356_v22 }
 0xc59   :  { %v10211_v63 = vpop.eup %10210  ;;  %10216 = vpow2.f32 %v3367_v1 }
 0xc5a   :  { %v3358_v34 = vmul.f32 0.6931472, %v10211_v63 }
 0xc5c   :  { %v3363_v6 = vadd.f32 %v3358_v34, %v3339_v8 }
 0xc5d   :  { %v10213_v23 = vpop.eup %10212 }
 0xc5e   :  { %v3491_v25 = vmul.f32 %v3363_v6, %v12423_v19  ;;  %v3360_v11 = vmul.f32 0.6931472, %v10213_v23  ;;  %9127 = vmatmul.mubr.msk.f32.vlgmr.msra.gmra.mrb[42].mxu0 %vm1161_vm13, %v3363_v6 }
 0xc5f   :  { %3449 = vmatprep.mubr.f32.mxu0 %v13946_v37  ;;  %9134 = vmatpush1.msk.msra.mxu0 %vm11979_vm0, %v13947_v17 }
 0xc60   :  { %v3364_v35 = vadd.f32 %v3360_v11, %v3340_v50  ;;  %9130 = vmatmul.mubr.msk.f32.vlgmr.msra.gmra.mrb[42].mxu1 %vm1161_vm13, %v3491_v25  ;;  %9899 = vmatprep.subr.bf16.mxu0 %v13943_v38 }
 0xc61   :  { %3573 = vmatprep.mubr.f32.mxu1 %v13946_v37  ;;  %9139 = vmatpush1.msk.msra.mxu1 %vm11979_vm0, %v13947_v17 }
 0xc62   :  { %v10215_v20 = vpop.eup %10214  ;;  %v3492_v4 = vmul.f32 %v3364_v35, %v12431_v51  ;;  %9128 = vmatmul.mubr.msk.f32.gmra.mrb[44].mxu0 %vm1161_vm13, %v3364_v35  ;;  %9905 = vmatprep.subr.bf16.mxu1 %v13943_v38 }
 0xc63   :  { %v3362_v7 = vmul.f32 0.6931472, %v10215_v20  ;;  %3455 = vmatprep.mubr.f32.mxu0 %v13946_v37  ;;  %v10217_v10 = vpop.eup %10216 }
 0xc64   :  { %9131 = vmatmul.mubr.msk.f32.gmra.mrb[44].mxu1 %vm1161_vm13, %v3492_v4  ;;  %v3369_v21 = vsub.f32 0.0, %v10217_v10 }
 0xc65   :  { %v3365_v48 = vadd.f32 %v3362_v7, %v3341_v46  ;;  %3579 = vmatprep.mubr.f32.mxu1 %v13946_v37 }
 0xc66   :  { %v3466_v14 = vrot.slane %v3369_v21, %v11817_v61  ;;  %v3470_v3 = vrot.slane %v3369_v21, %v11814_v60 }
 0xc67   :  { %v3493_v0 = vmul.f32 %v3365_v48, %v12440_v29  ;;  %9129 = vmatmul.mubr.msk.f32.gmra.mrb[46].mxu0 %vm1161_vm13, %v3365_v48 }
 0xc68   :  { %3662 = vmatprep.mubr.f32.mxu0 %v13946_v37 }
 0xc69   :  { %9132 = vmatmul.mubr.msk.f32.gmra.mrb[46].mxu1 %vm1161_vm13, %v3493_v0 }
 0xc6a   :  { %4398 = vmatprep.mubr.f32.mxu1 %v13946_v37 }
 0xc6b   :  { %9135 = vmatmul.mubr.msk.f32.vlgmr.msra.gmra.mrb[48].mxu0 %vm692_vm12, %v3587_v26 }
 0xc6c   :  { %3668 = vmatprep.mubr.f32.mxu0 %v13946_v37 }
 0xc6d   :  { %9140 = vmatmul.mubr.msk.f32.vlgmr.msra.gmra.mrb[48].mxu1 %vm692_vm12, %v4323_v53 }
 0xc6e   :  { %4404 = vmatprep.mubr.f32.mxu1 %v13946_v37 }
 0xc6f   :  { %9136 = vmatmul.mubr.msk.f32.gmra.mrb[50].mxu0 %vm692_vm12, %v3589_v45 }
 0xc70   :  { %3674 = vmatprep.mubr.f32.mxu0 %v13946_v37 }
 0xc71   :  { %9141 = vmatmul.mubr.msk.f32.gmra.mrb[50].mxu1 %vm692_vm12, %v4325_v24 }
 0xc72   :  { %4410 = vmatprep.mubr.f32.mxu1 %v13946_v37 }
 0xc73   :  { %9137 = vmatmul.mubr.msk.f32.gmra.mrb[52].mxu0 %vm692_vm12, %v3591_v56 }
 0xc74   :  { %9583 = vmatprep.mubr.msk.f32.mxu0 %vm11202_vm7, %v13946_v37 }
 0xc75   :  { %9142 = vmatmul.mubr.msk.f32.gmra.mrb[52].mxu1 %vm692_vm12, %v4327_v43 }
 0xc76   :  { %9600 = vmatprep.mubr.msk.f32.mxu1 %vm11202_vm7, %v13946_v37 }
 0xd31   :  { %v3445_v47 = vpop.f32.mrb[42].mxu0 }
 0xd32   :  { %v3447_v15 = vpop.f32.mrb[43].mxu0  ;;  %v3473_v26 = vmul.f32 %v3466_v14, %v3445_v47 }
 0xd33   :  { %v3569_v31 = vpop.f32.mrb[42].mxu1  ;;  %v3474_v53 = vmul.f32 %v3470_v3, %v3447_v15 }
 0xd34   :  { %v3571_v36 = vpop.f32.mrb[43].mxu1  ;;  %v3479_v47 = vmul.f32 1.442695, %v3473_v26 }
 0xd35   :  { %v3451_v41 = vpop.f32.mrb[44].mxu0 }
 0xd36   :  { %v3475_v5 = vmul.f32 %v3466_v14, %v3451_v41  ;;  %v3453_v39 = vpop.f32.mrb[45].mxu0 }
 0xd37   :  { %v3476_v2 = vmul.f32 %v3470_v3, %v3453_v39  ;;  %v3575_v30 = vpop.f32.mrb[44].mxu1 }
 0xd38   :  { %v3483_v54 = vmul.f32 1.442695, %v3475_v5  ;;  %v3577_v58 = vpop.f32.mrb[45].mxu1 }
 0xd39   :  { %v3485_v49 = vmul.f32 1.442695, %v3476_v2 }
 0xd3a   :  { %10218 = vpow2.f32 %v3483_v54  ;;  %v3457_v18 = vpop.f32.mrb[46].mxu0 }
 0xd3b   :  { %10220 = vpow2.f32 %v3485_v49  ;;  %v3477_v40 = vmul.f32 %v3466_v14, %v3457_v18  ;;  %v3459_v59 = vpop.f32.mrb[47].mxu0 }
 0xd3c   :  { %v3478_v22 = vmul.f32 %v3470_v3, %v3459_v59  ;;  %v3581_v63 = vpop.f32.mrb[46].mxu1  ;;  %v3481_v3 = vmul.f32 1.442695, %v3474_v53 }
 0xd3d   :  { %v3487_v8 = vmul.f32 1.442695, %v3477_v40  ;;  %v3583_v34 = vpop.f32.mrb[47].mxu1 }
 0xd3e   :  { %v3489_v6 = vmul.f32 1.442695, %v3478_v22  ;;  %v3664_v23 = vpop.f32.mrb[48].mxu0 }
 0xd3f   :  { %10222 = vpow2.f32 %v3487_v8  ;;  %v12507_v25 = vmul.f32 %v3664_v23, %v3569_v31  ;;  %v3666_v50 = vpop.f32.mrb[49].mxu0 }
 0xd40   :  { %10224 = vpow2.f32 %v3489_v6  ;;  %v12509_v11 = vmul.f32 %v3666_v50, %v3571_v36  ;;  %v12511_v35 = vpop.f32.mrb[48].mxu1 }
 0xd41   :  { %v12513_v20 = vpop.f32.mrb[49].mxu1  ;;  %10226 = vpow2.f32 %v3479_v47 }
 0xd42   :  { %v3670_v4 = vpop.f32.mrb[50].mxu0  ;;  %10228 = vpow2.f32 %v3481_v3 }
 0xd43   :  { %v12515_v46 = vmul.f32 %v3670_v4, %v3575_v30  ;;  %v3672_v7 = vpop.f32.mrb[51].mxu0 }
 0xd44   :  { %v12517_v48 = vpop.eup %10218  ;;  %v12519_v45 = vmul.f32 %v3672_v7, %v3577_v58  ;;  %v12521_v0 = vpop.f32.mrb[50].mxu1 }
 0xd45   :  { %v12523_v56 = vpop.eup %10220  ;;  %v3687_v24 = vmul.f32 0.0, %v12517_v48  ;;  %v12526_v43 = vpop.f32.mrb[51].mxu1 }
 0xd46   :  { %v3688_v52 = vmul.f32 0.0, %v12523_v56  ;;  %v3676_v1 = vpop.f32.mrb[52].mxu0 }
 0xd47   :  { %v3689_v10 = vadd.f32 %v3687_v24, %v12515_v46  ;;  %v12530_v21 = vmul.f32 %v3676_v1, %v3581_v63  ;;  %v3678_v31 = vpop.f32.mrb[53].mxu0 }
 0xd48   :  { %v3690_v14 = vadd.f32 %v3688_v52, %v12519_v45  ;;  %v12533_v36 = vmul.f32 %v3678_v31, %v3583_v34  ;;  %v12535_v41 = vpop.f32.mrb[52].mxu1 }
 0xd49   :  { %v12537_v15 = vpop.eup %10222  ;;  %v3712_v5 = vrot.slane %v3689_v10, 1  ;;  %v12539_v39 = vpop.f32.mrb[53].mxu1 }
 0xd4a   :  { %v12541_v2 = vpop.eup %10224  ;;  %v3693_v30 = vcombine.low %v3689_v10, %v3690_v14  ;;  %v3713_v54 = vrot.slane %v3690_v14, 1  ;;  %v4001_v58 = vmul.f32 0.0, %v12537_v15 }
 0xd4b   :  { %v3716_v49 = vmul.f32 %v12517_v48, %v3712_v5  ;;  %v4002_v18 = vmul.f32 0.0, %v12541_v2 }
 0xd4c   :  { %v3700_v40 = vrot.slane %v3693_v30, %v12090_v12  ;;  %v3717_v59 = vmul.f32 %v12523_v56, %v3713_v54  ;;  %v4003_v22 = vadd.f32 %v4001_v58, %v12530_v21 }
 0xd4d   :  { %v3718_v63 = vadd.f32 %v3716_v49, %v12515_v46  ;;  %v4004_v8 = vadd.f32 %v4002_v18, %v12533_v36 }
 0xd4e   :  { %v3707_v34 = vrot.slane %v3700_v40, %v12090_v12  ;;  %v3719_v6 = vadd.f32 %v3717_v59, %v12519_v45  ;;  %v4026_v23 = vrot.slane %v4003_v22, 1 }
 0xd4f   :  { %v3741_v50 = vrot.slane %v3718_v63, 1  ;;  %v4007_v4 = vcombine.high %v4003_v22, %v4004_v8  ;;  %v4027_v7 = vrot.slane %v4004_v8, 1  ;;  %v12566_v8 = vpop.eup %10226 }
 0xd50   :  { %v3708_v26 = vcombine.high %v3707_v34, %v3707_v34  ;;  %v3722_v53 = vcombine.low %v3718_v63, %v3719_v6  ;;  %v3742_v24 = vrot.slane %v3719_v6, 1  ;;  %v4030_v52 = vmul.f32 %v12537_v15, %v4026_v23 }
 0xd51   :  { %v3745_v1 = vmul.f32 %v12517_v48, %v3741_v50  ;;  %v4014_v10 = vrot.slane %v4007_v4, %v12090_v12  ;;  %v4031_v31 = vmul.f32 %v12541_v2, %v4027_v7  ;;  %v12570_v4 = vpop.eup %10228 }
 0xd52   :  { %3710 = vst.msk [vmem:[#allocation3 + $0x12] ss:$8 sm:$0x3] %vm12119_vm15, %v3708_v26  ;;  %v3729_v47 = vrot.slane %v3722_v53, %v12090_v12  ;;  %v3746_v14 = vmul.f32 %v12523_v56, %v3742_v24  ;;  %v4032_v3 = vadd.f32 %v4030_v52, %v12530_v21 }
 0xd53   :  { %v3747_v5 = vadd.f32 %v3745_v1, %v12515_v46  ;;  %v4015_v30 = vcombine.high %v4014_v10, %v4014_v10  ;;  %v4033_v54 = vadd.f32 %v4031_v31, %v12533_v36 }
 0xd54   :  { %v3730_v58 = vcombine.high %v3729_v47, %v3729_v47  ;;  %v3748_v49 = vadd.f32 %v3746_v14, %v12519_v45  ;;  %v4054_v18 = vrot.slane %v4032_v3, 1 }
 0xd55   :  { %v3769_v40 = vrot.slane %v3747_v5, 1  ;;  %v4022_v59 = vrot.slane %v4015_v30, %v12090_v12  ;;  %v4036_v22 = vcombine.high %v4032_v3, %v4033_v54  ;;  %v4055_v63 = vrot.slane %v4033_v54, 1 }
 0xd56   :  { %v3737_v34 = vrot.slane %v3730_v58, %v12090_v12  ;;  %v3751_v6 = vcombine.low %v3747_v5, %v3748_v49  ;;  %v3770_v23 = vrot.slane %v3748_v49, 1  ;;  %v4058_v50 = vmul.f32 %v12537_v15, %v4054_v18 }
 0xd57   :  { %v3773_v7 = vmul.f32 %v12566_v8, %v3769_v40  ;;  %4024 = vst.msk [vmem:[#allocation3 + $0x25] ss:$8 sm:$0x3] %vm12119_vm15, %v4022_v59  ;;  %v4043_v26 = vrot.slane %v4036_v22, %v12090_v12  ;;  %v4059_v53 = vmul.f32 %v12541_v2, %v4055_v63 }
 0xd58   :  { %3739 = vst.msk [vmem:[#allocation3 + $0x11] ss:$8 sm:$0x3] %vm12119_vm15, %v3737_v34  ;;  %v3758_v24 = vrot.slane %v3751_v6, %v12090_v12  ;;  %v3774_v52 = vmul.f32 %v12570_v4, %v3770_v23  ;;  %v4060_v1 = vadd.f32 %v4058_v50, %v12530_v21 }
 0xd59   :  { %v3775_v10 = vadd.f32 %v3773_v7, %v12507_v25  ;;  %v4050_v31 = vrot.slane %v4043_v26, %v12090_v12  ;;  %v4061_v47 = vadd.f32 %v4059_v53, %v12533_v36 }
 0xd5a   :  { %v3765_v14 = vrot.slane %v3758_v24, %v12090_v12  ;;  %v3776_v3 = vadd.f32 %v3774_v52, %v12509_v11  ;;  %v4084_v5 = vrot.slane %v4060_v1, 1 }
 0xd5b   :  { %v3799_v30 = vrot.slane %v3775_v10, 1  ;;  %4052 = vst.msk [vmem:[#allocation3 + $0x24] ss:$8 sm:$0x3] %vm12119_vm15, %v4050_v31  ;;  %v4064_v54 = vcombine.low %v4060_v1, %v4061_v47  ;;  %v4085_v58 = vrot.slane %v4061_v47, 1 }
 0xd5c   :  { %3767 = vst.msk [vmem:[#allocation3 + $0x10] ss:$8 sm:$0x3] %vm12119_vm15, %v3765_v14  ;;  %v3779_v49 = vcombine.high %v3775_v10, %v3776_v3  ;;  %v3800_v18 = vrot.slane %v3776_v3, 1  ;;  %v4088_v40 = vmul.f32 %v12537_v15, %v4084_v5 }
 0xd5d   :  { %v3803_v59 = vmul.f32 %v12566_v8, %v3799_v30  ;;  %v4071_v22 = vrot.slane %v4064_v54, %v12090_v12  ;;  %v4089_v63 = vmul.f32 %v12541_v2, %v4085_v58 }
 0xd5e   :  { %v3786_v34 = vrot.slane %v3779_v49, %v12090_v12  ;;  %v3804_v6 = vmul.f32 %v12570_v4, %v3800_v18  ;;  %v4090_v23 = vadd.f32 %v4088_v40, %v12530_v21 }
 0xd5f   :  { %v3805_v50 = vadd.f32 %v3803_v59, %v12507_v25  ;;  %v4072_v7 = vcombine.high %v4071_v22, %v4071_v22  ;;  %v4091_v26 = vadd.f32 %v4089_v63, %v12533_v36 }
 0xd60   :  { %v3787_v53 = vcombine.high %v3786_v34, %v3786_v34  ;;  %v3806_v24 = vadd.f32 %v3804_v6, %v12509_v11  ;;  %v4113_v52 = vrot.slane %v4090_v23, 1 }
 0xd61   :  { %v3828_v1 = vrot.slane %v3805_v50, 1  ;;  %v4079_v10 = vrot.slane %v4072_v7, %v12090_v12  ;;  %v4094_v31 = vcombine.low %v4090_v23, %v4091_v26  ;;  %v4114_v47 = vrot.slane %v4091_v26, 1 }
 0xd62   :  { %v3794_v14 = vrot.slane %v3787_v53, %v12090_v12  ;;  %v3809_v3 = vcombine.high %v3805_v50, %v3806_v24  ;;  %v3829_v5 = vrot.slane %v3806_v24, 1  ;;  %v4117_v30 = vmul.f32 %v12537_v15, %v4113_v52 }
 0xd63   :  { %v3832_v54 = vmul.f32 %v12566_v8, %v3828_v1  ;;  %v4080_v58 = vcombine.high %v4079_v10, %v4079_v10  ;;  %v4101_v49 = vrot.slane %v4094_v31, %v12090_v12  ;;  %v4118_v18 = vmul.f32 %v12541_v2, %v4114_v47 }
 0xd64   :  { %v3795_v40 = vcombine.high %v3794_v14, %v3794_v14  ;;  %v3816_v59 = vrot.slane %v3809_v3, %v12090_v12  ;;  %v3833_v22 = vmul.f32 %v12570_v4, %v3829_v5  ;;  %v4119_v63 = vadd.f32 %v4117_v30, %v12530_v21 }
 0xd65   :  { %v3834_v34 = vadd.f32 %v3832_v54, %v12507_v25  ;;  %4082 = vst.msk [vmem:[#allocation3 + $0x23] ss:$8 sm:$0x3] %vm12119_vm15, %v4080_v58  ;;  %v4108_v6 = vrot.slane %v4101_v49, %v12090_v12  ;;  %v4120_v23 = vadd.f32 %v4118_v18, %v12533_v36 }
 0xd66   :  { %3797 = vst.msk [vmem:[#allocation3 + $0x7] ss:$8 sm:$0x3] %vm12119_vm15, %v3795_v40  ;;  %v3823_v50 = vrot.slane %v3816_v59, %v12090_v12  ;;  %v3835_v7 = vadd.f32 %v3833_v22, %v12509_v11  ;;  %v4142_v26 = vrot.slane %v4119_v63, 1 }
 0xd67   :  { %v3857_v53 = vrot.slane %v3834_v34, 1  ;;  %v4109_v24 = vcombine.high %v4108_v6, %v4108_v6  ;;  %v4123_v52 = vcombine.low %v4119_v63, %v4120_v23  ;;  %v4143_v1 = vrot.slane %v4120_v23, 1 }
 0xd68   :  { %v3824_v10 = vcombine.high %v3823_v50, %v3823_v50  ;;  %v3838_v31 = vcombine.high %v3834_v34, %v3835_v7  ;;  %v3858_v47 = vrot.slane %v3835_v7, 1  ;;  %v4146_v14 = vmul.f32 %v12537_v15, %v4142_v26 }
 0xd69   :  { %v3861_v3 = vmul.f32 %v12566_v8, %v3857_v53  ;;  %4111 = vst.msk [vmem:[#allocation3 + $0x22] ss:$8 sm:$0x3] %vm12119_vm15, %v4109_v24  ;;  %v4130_v5 = vrot.slane %v4123_v52, %v12090_v12  ;;  %v4147_v30 = vmul.f32 %v12541_v2, %v4143_v1 }
 0xd6a   :  { %3826 = vst.msk [vmem:[#allocation3 + $0x6] ss:$8 sm:$0x3] %vm12119_vm15, %v3824_v10  ;;  %v3845_v54 = vrot.slane %v3838_v31, %v12090_v12  ;;  %v3862_v58 = vmul.f32 %v12570_v4, %v3858_v47  ;;  %v4148_v49 = vadd.f32 %v4146_v14, %v12530_v21 }
 0xd6b   :  { %v3863_v15 = vadd.f32 %v3861_v3, %v12507_v25  ;;  %v4131_v18 = vcombine.high %v4130_v5, %v4130_v5  ;;  %v4149_v40 = vadd.f32 %v4147_v30, %v12533_v36 }
 0xd6c   :  { %v3846_v59 = vcombine.high %v3845_v54, %v3845_v54  ;;  %v3864_v22 = vadd.f32 %v3862_v58, %v12509_v11  ;;  %v4170_v63 = vrot.slane %v4148_v49, 1 }
 0xd6d   :  { %v3885_v34 = vrot.slane %v3863_v15, 1  ;;  %v4138_v2 = vrot.slane %v4131_v18, %v12090_v12  ;;  %v4152_v6 = vcombine.low %v4148_v49, %v4149_v40  ;;  %v4171_v23 = vrot.slane %v4149_v40, 1 }
 0xd6e   :  { %v3853_v50 = vrot.slane %v3846_v59, %v12090_v12  ;;  %v3867_v7 = vcombine.high %v3863_v15, %v3864_v22  ;;  %v3886_v26 = vrot.slane %v3864_v22, 1  ;;  %v4174_v21 = vmul.f32 %v12517_v48, %v4170_v63 }
 0xd6f   :  { %v3889_v53 = vmul.f32 %v12566_v8, %v3885_v34  ;;  %4140 = vst.msk [vmem:[#allocation3 + $0x21] ss:$8 sm:$0x3] %vm12119_vm15, %v4138_v2  ;;  %v4159_v36 = vrot.slane %v4152_v6, %v12090_v12  ;;  %v4175_v24 = vmul.f32 %v12523_v56, %v4171_v23 }
 0xd70   :  { %3855 = vst.msk [vmem:[#allocation3 + $0x5] ss:$8 sm:$0x3] %vm12119_vm15, %v3853_v50  ;;  %v3874_v52 = vrot.slane %v3867_v7, %v12090_v12  ;;  %v3890_v1 = vmul.f32 %v12570_v4, %v3886_v26  ;;  %v4176_v10 = vadd.f32 %v4174_v21, %v12515_v46 }
 0xd71   :  { %v3891_v31 = vadd.f32 %v3889_v53, %v12507_v25  ;;  %v4166_v47 = vrot.slane %v4159_v36, %v12090_v12  ;;  %v4177_v14 = vadd.f32 %v4175_v24, %v12519_v45 }
 0xd72   :  { %v3881_v3 = vrot.slane %v3874_v52, %v12090_v12  ;;  %v3892_v5 = vadd.f32 %v3890_v1, %v12509_v11  ;;  %v4200_v30 = vrot.slane %v4176_v10, 1 }
 0xd73   :  { %v3915_v54 = vrot.slane %v3891_v31, 1  ;;  %4168 = vst.msk [vmem:[#allocation3 + $0x20] ss:$8 sm:$0x3] %vm12119_vm15, %v4166_v47  ;;  %v4180_v58 = vcombine.high %v4176_v10, %v4177_v14  ;;  %v4201_v49 = vrot.slane %v4177_v14, 1 }
 0xd74   :  { %3883 = vst.msk [vmem:[#allocation3 + $0x4] ss:$8 sm:$0x3] %vm12119_vm15, %v3881_v3  ;;  %v3895_v15 = vcombine.low %v3891_v31, %v3892_v5  ;;  %v3916_v18 = vrot.slane %v3892_v5, 1  ;;  %v4204_v40 = vmul.f32 %v12517_v48, %v4200_v30 }
 0xd75   :  { %v3919_v59 = vmul.f32 %v12566_v8, %v3915_v54  ;;  %v4187_v22 = vrot.slane %v4180_v58, %v12090_v12  ;;  %v4205_v63 = vmul.f32 %v12523_v56, %v4201_v49 }
 0xd76   :  { %v3902_v34 = vrot.slane %v3895_v15, %v12090_v12  ;;  %v3920_v2 = vmul.f32 %v12570_v4, %v3916_v18  ;;  %v4206_v6 = vadd.f32 %v4204_v40, %v12515_v46 }
 0xd77   :  { %v3921_v23 = vadd.f32 %v3919_v59, %v12507_v25  ;;  %v4188_v50 = vcombine.high %v4187_v22, %v4187_v22  ;;  %v4207_v7 = vadd.f32 %v4205_v63, %v12519_v45 }
 0xd78   :  { %v3903_v26 = vcombine.high %v3902_v34, %v3902_v34  ;;  %v3922_v21 = vadd.f32 %v3920_v2, %v12509_v11  ;;  %v4229_v53 = vrot.slane %v4206_v6, 1 }
 0xd79   :  { %v3944_v36 = vrot.slane %v3921_v23, 1  ;;  %v4195_v24 = vrot.slane %v4188_v50, %v12090_v12  ;;  %v4210_v52 = vcombine.high %v4206_v6, %v4207_v7  ;;  %v4230_v1 = vrot.slane %v4207_v7, 1 }
 0xd7a   :  { %v3910_v10 = vrot.slane %v3903_v26, %v12090_v12  ;;  %v3925_v31 = vcombine.low %v3921_v23, %v3922_v21  ;;  %v3945_v47 = vrot.slane %v3922_v21, 1  ;;  %v4233_v14 = vmul.f32 %v12517_v48, %v4229_v53  ;;  %v4320_v3 = vld [vmem:[#allocation3 + $0x20] sm:$0x3f] }
 0xd7b   :  { %v3948_v5 = vmul.f32 %v12566_v8, %v3944_v36  ;;  %v4196_v30 = vcombine.high %v4195_v24, %v4195_v24  ;;  %v4217_v54 = vrot.slane %v4210_v52, %v12090_v12  ;;  %v4234_v58 = vmul.f32 %v12523_v56, %v4230_v1 }
 0xd7c   :  { %v3911_v49 = vcombine.high %v3910_v10, %v3910_v10  ;;  %v3932_v15 = vrot.slane %v3925_v31, %v12090_v12  ;;  %v3949_v18 = vmul.f32 %v12570_v4, %v3945_v47  ;;  %v4235_v40 = vadd.f32 %v4233_v14, %v12515_v46 }
 0xd7d   :  { %v3950_v59 = vadd.f32 %v3948_v5, %v12507_v25  ;;  %4198 = vst.msk [vmem:[#allocation3 + $0x17] ss:$8 sm:$0x3] %vm12119_vm15, %v4196_v30  ;;  %v4224_v22 = vrot.slane %v4217_v54, %v12090_v12  ;;  %v4236_v63 = vadd.f32 %v4234_v58, %v12519_v45  ;;  %v12680_v34 = vmul.f32 %v12535_v41, %v4320_v3 }
 0xd7e   :  { %3913 = vst.msk [vmem:[#allocation3 + $0x3] ss:$8 sm:$0x3] %vm12119_vm15, %v3911_v49  ;;  %v3939_v2 = vrot.slane %v3932_v15, %v12090_v12  ;;  %v3951_v6 = vadd.f32 %v3949_v18, %v12509_v11  ;;  %v4258_v23 = vrot.slane %v4235_v40, 1 }
 0xd7f   :  { %v3973_v50 = vrot.slane %v3950_v59, 1  ;;  %v4225_v7 = vcombine.high %v4224_v22, %v4224_v22  ;;  %v4239_v26 = vcombine.high %v4235_v40, %v4236_v63  ;;  %v4259_v21 = vrot.slane %v4236_v63, 1  ;;  %4467 = vrot.lane.b32.xlu1 %v12680_v34, %s11210_s11  ;;  %4443 = vrot.lane.b32.xlu0 %v12680_v34, %s11206_s4 }
 0xd80   :  { %v3940_v41 = vcombine.high %v3939_v2, %v3939_v2  ;;  %v3954_v53 = vcombine.low %v3950_v59, %v3951_v6  ;;  %v3974_v36 = vrot.slane %v3951_v6, 1  ;;  %v4262_v24 = vmul.f32 %v12517_v48, %v4258_v23 }
 0xd81   :  { %v3977_v52 = vmul.f32 %v12566_v8, %v3973_v50  ;;  %4227 = vst.msk [vmem:[#allocation3 + $0x16] ss:$8 sm:$0x3] %vm12119_vm15, %v4225_v7  ;;  %v4246_v1 = vrot.slane %v4239_v26, %v12090_v12  ;;  %v4263_v10 = vmul.f32 %v12523_v56, %v4259_v21 }
 0xd82   :  { %3942 = vst.msk [vmem:[#allocation3 + $0x2] ss:$8 sm:$0x3] %vm12119_vm15, %v3940_v41  ;;  %v3961_v31 = vrot.slane %v3954_v53, %v12090_v12  ;;  %v3978_v47 = vmul.f32 %v12570_v4, %v3974_v36  ;;  %v4264_v14 = vadd.f32 %v4262_v24, %v12515_v46  ;;  %v9144_v4 = vmul.f32 -1.442695, %v11756_v27  ;;  %v4553_v24 = vld [vmem:[%s13948_s3] sm:$0xff] }
 0xd83   :  { %v3979_v3 = vadd.f32 %v3977_v52, %v12507_v25  ;;  %v4247_v5 = vcombine.high %v4246_v1, %v4246_v1  ;;  %v4265_v8 = vadd.f32 %v4263_v10, %v12519_v45  ;;  %4455 = vrot.lane.b32.xlu0 %v12680_v34, %s11209_s10  ;;  %v4554_v52 = vld [vmem:[%s13948_s3 + $0x8] sm:$0xff]  ;;  %v9146_v1 = vmul.f32 -1.442695, %v11778_v42 }
 0xd84   :  { %v3962_v30 = vcombine.high %v3961_v31, %v3961_v31  ;;  %v3980_v54 = vadd.f32 %v3978_v47, %v12509_v11  ;;  %v4286_v58 = vrot.slane %v4264_v14, 1  ;;  %10230 = vpow2.f32 %v9144_v4 }
 0xd85   :  { %v4254_v49 = vrot.slane %v4247_v5, %v12090_v12  ;;  %v4268_v15 = vcombine.high %v4264_v14, %v4265_v8  ;;  %v4287_v18 = vrot.slane %v4265_v8, 1  ;;  %v9900_v10 = vpack.c.bf16 %v4554_v52, %v4553_v24  ;;  %v4556_v5 = vld [vmem:[%s13948_s3 + $0x18] sm:$0xff] }
 0xd86   :  { %v3969_v40 = vrot.slane %v3962_v30, %v12090_v12  ;;  %v3983_v59 = vcombine.low %v3979_v3, %v3980_v54  ;;  %v4290_v25 = vmul.f32 %v12517_v48, %v4286_v58  ;;  %v9145_v48 = vmul.f32 -1.442695, %v11763_v32  ;;  %v4555_v3 = vld [vmem:[%s13948_s3 + $0x10] sm:$0xff] }
 0xd87   :  { %4256 = vst.msk [vmem:[#allocation3 + $0x15] ss:$8 sm:$0x3] %vm12119_vm15, %v4254_v49  ;;  %v4275_v22 = vrot.slane %v4268_v15, %v12090_v12  ;;  %v4291_v63 = vmul.f32 %v12523_v56, %v4287_v18  ;;  %9901 = vmatpush3.bf16.msra.mxu0 %v9900_v10  ;;  %v9903_v8 = vpack.c.bf16 %v4556_v5, %v4555_v3 }
 0xd88   :  { %3971 = vst.msk [vmem:[#allocation3 + $0x1] ss:$8 sm:$0x3] %vm12119_vm15, %v3969_v40  ;;  %v3990_v11 = vrot.slane %v3983_v59, %v12090_v12  ;;  %v4292_v2 = vadd.f32 %v4290_v25, %v12515_v46  ;;  %10232 = vpow2.f32 %v9145_v48  ;;  %9902 = vmatprep.subr.bf16.mxu0 %v13943_v38  ;;  %v4321_v59 = vld [vmem:[#allocation3 + $0x28] sm:$0x3f] }
 0xd89   :  { %v4282_v6 = vrot.slane %v4275_v22, %v12090_v12  ;;  %v4293_v23 = vadd.f32 %v4291_v63, %v12519_v45  ;;  %10234 = vpow2.f32 %v9146_v1 }
 0xd8a   :  { %v3997_v50 = vrot.slane %v3990_v11, %v12090_v12 }
 0xd8b   :  { %4284 = vst.msk [vmem:[#allocation3 + $0x14] ss:$8 sm:$0x3] %vm12119_vm15, %v4282_v6  ;;  %v4296_v56 = vcombine.low %v4292_v2, %v4293_v23  ;;  %9904 = vmatpush3.bf16.msra.mxu0 %v9903_v8 }
 0xd8c   :  { %3999 = vst.msk [vmem:[#allocation3] ss:$8 sm:$0x3] %vm12119_vm15, %v3997_v50  ;;  %9911 = vmatprep.subr.bf16.mxu0 %v13943_v38 }
 0xd8d   :  { %v4303_v46 = vrot.slane %v4296_v56, %v12090_v12 }
 0xd8e   :  { %v10231_v41 = vpop.eup %10230 }
 0xd8f   :  { %v4304_v7 = vcombine.high %v4303_v46, %v4303_v46  ;;  %v4526_v31 = vadd.f32 1.0, %v10231_v41 }
 0xd91   :  { %v4311_v45 = vrot.slane %v4304_v7, %v12090_v12  ;;  %10236 = vrcp.f32 %v4526_v31 }
 0xd92   :  { %v10233_v47 = vpop.eup %10232 }
 0xd93   :  { %v4312_v26 = vcombine.high %v4311_v45, %v4311_v45  ;;  %v4316_v21 = vld [vmem:[#allocation3] sm:$0xff]  ;;  %v4317_v36 = vld [vmem:[#allocation3 + $0x8] sm:$0xff]  ;;  %v10235_v58 = vpop.eup %10234 }
 0xd94   :  { %v4417_v53 = vmul.f32 %v12511_v35, %v4316_v21  ;;  %v4418_v14 = vmul.f32 %v12513_v20, %v4317_v36  ;;  %v4527_v35 = vadd.f32 1.0, %v10233_v47  ;;  %v4528_v18 = vadd.f32 1.0, %v10235_v58 }
 0xd95   :  { %4314 = vst.msk [vmem:[#allocation3 + $0x13] ss:$8 sm:$0x3] %vm12119_vm15, %v4312_v26 }
 0xd96   :  { %4439 = vrot.lane.b32.xlu1 %v4417_v53, %s11206_s4  ;;  %4451 = vrot.lane.b32.xlu0 %v4417_v53, %s11209_s10  ;;  %10238 = vrcp.f32 %v4527_v35 }
 0xd97   :  { %10240 = vrcp.f32 %v4528_v18 }
 0xd9a   :  { %4481 = vrot.lane.b32.xlu1 %v4418_v14, %s11206_s4  ;;  %4463 = vrot.lane.b32.xlu0 %v4417_v53, %s11210_s11 }
 0xd9b   :  { %v10237_v15 = vpop.eup %10236 }
 0xd9c   :  { %v4318_v30 = vld [vmem:[#allocation3 + $0x10] sm:$0xff]  ;;  %v4319_v54 = vld [vmem:[#allocation3 + $0x18] sm:$0xff]  ;;  %v4535_v4 = vmul.f32 %v10237_v15, %v11756_v27 }
 0xd9d   :  { %v4419_v20 = vmul.f32 %v12521_v0, %v4318_v30  ;;  %v4420_v49 = vmul.f32 %v12526_v43, %v4319_v54  ;;  %v4422_v43 = vmul.f32 %v12539_v39, %v4321_v59 }
 0xd9e   :  { %4493 = vrot.lane.b32.xlu1 %v4418_v14, %s11209_s10  ;;  %4505 = vrot.lane.b32.xlu0 %v4418_v14, %s11210_s11 }
 0xda0   :  { %v10239_v40 = vpop.eup %10238 }
 0xda1   :  { %v4536_v0 = vmul.f32 %v10239_v40, %v11763_v32  ;;  %v10241_v27 = vpop.eup %10240  ;;  %v9143_v32 = vld [vmem:[#allocation31] ss:$0 sm:$0xff] }
 0xda2   :  { %4441 = vrot.lane.b32.xlu1 %v4419_v20, %s11206_s4  ;;  %4465 = vrot.lane.b32.xlu0 %v4419_v20, %s11210_s11  ;;  %v4537_v25 = vmul.f32 %v10241_v27, %v11778_v42  ;;  %v4430_v2 = vmul.f32 %v9143_v32, %v12423_v19  ;;  %v4431_v41 = vmul.f32 %v9143_v32, %v12431_v51 }
 0xda3   :  { %v4432_v1 = vmul.f32 %v9143_v32, %v12440_v29 }
 0xda4   :  { %v4433_v6 = vadd.f32 %v4430_v2, %v4417_v53  ;;  %v4434_v52 = vadd.f32 %v4431_v41, %v4419_v20 }
 0xda5   :  { %v4435_v47 = vadd.f32 %v4432_v1, %v12680_v34 }
 0xda6   :  { %4453 = vrot.lane.b32.xlu1 %v4419_v20, %s11209_s10  ;;  %4495 = vrot.lane.b32.xlu0 %v4420_v49, %s11209_s10 }
 0xdaa   :  { %4541 = vrot.lane.b32.xlu1 %v4535_v4, %s11206_s4  ;;  %4507 = vrot.lane.b32.xlu0 %v4420_v49, %s11210_s11 }
 0xdae   :  { %4483 = vrot.lane.b32.xlu1 %v4420_v49, %s11206_s4  ;;  %4543 = vrot.lane.b32.xlu0 %v4536_v0, %s11206_s4 }
 0xdb2   :  { %4485 = vrot.lane.b32.xlu1 %v4422_v43, %s11206_s4  ;;  %4509 = vrot.lane.b32.xlu0 %v4422_v43, %s11210_s11 }
 0xdb6   :  { %4497 = vrot.lane.b32.xlu1 %v4422_v43, %s11209_s10 }
 0xdba   :  { %4545 = vrot.lane.b32.xlu1 %v4537_v25, %s11206_s4 }
 0xdf1   :  { %v4444_v22 = vpop.permute.xlu0 %4443  ;;  %v4468_v63 = vpop.permute.xlu1 %4467 }
 0xdf2   :  { %v4450_v3 = vadd.f32 %v4444_v22, %v4435_v47 }
 0xdf5   :  { %v4456_v11 = vpop.permute.xlu0 %4455 }
 0xdf6   :  { %v4462_v30 = vadd.f32 %v4456_v11, %v4450_v3 }
 0xdf8   :  { %v4474_v29 = vadd.f32 %v4468_v63, %v4462_v30  ;;  %v4715_v30 = vld [vmem:[%s13950_s16 + $0x10] sm:$0xff] }
 0xdfa   :  { %v4477_v0 = vadd.f32 %v4474_v29, %v4422_v43 }
 0xe08   :  { %v4440_v23 = vpop.permute.xlu1 %4439  ;;  %v4452_v39 = vpop.permute.xlu0 %4451 }
 0xe09   :  { %v4448_v48 = vadd.f32 %v4440_v23, %v4433_v6 }
 0xe0b   :  { %v4460_v50 = vadd.f32 %v4452_v39, %v4448_v48 }
 0xe0c   :  { %v4482_v56 = vpop.permute.xlu1 %4481  ;;  %v4464_v46 = vpop.permute.xlu0 %4463 }
 0xe0d   :  { %v4472_v7 = vadd.f32 %v4464_v46, %v4460_v50 }
 0xe0f   :  { %v4475_v45 = vadd.f32 %v4472_v7, %v4418_v14  ;;  %v13949_v7 = vld [vmem:[#allocation117_spill] sm:$0xff] }
 0xe10   :  { %v4494_v26 = vpop.permute.xlu1 %4493  ;;  %v4506_v21 = vpop.permute.xlu0 %4505 }
 0xe11   :  { %v4490_v42 = vadd.f32 %v4482_v56, %v4475_v45 }
 0xe13   :  { %v4502_v19 = vadd.f32 %v4494_v26, %v4490_v42 }
 0xe14   :  { %v4442_v36 = vpop.permute.xlu1 %4441  ;;  %v4466_v24 = vpop.permute.xlu0 %4465 }
 0xe15   :  { %v4449_v53 = vadd.f32 %v4442_v36, %v4434_v52  ;;  %v4514_v5 = vadd.f32 %v4506_v21, %v4502_v19 }
 0xe18   :  { %v4454_v10 = vpop.permute.xlu1 %4453  ;;  %v4496_v31 = vpop.permute.xlu0 %4495 }
 0xe19   :  { %v4461_v35 = vadd.f32 %v4454_v10, %v4449_v53 }
 0xe1b   :  { %v4473_v14 = vadd.f32 %v4466_v24, %v4461_v35 }
 0xe1c   :  { %v4542_v8 = vpop.permute.xlu1 %4541  ;;  %v4508_v58 = vpop.permute.xlu0 %4507 }
 0xe1d   :  { %v4550_v54 = vmul.f32 %v4542_v8, %v4514_v5  ;;  %v4476_v51 = vadd.f32 %v4473_v14, %v4420_v49  ;;  %v4713_v5 = vld [vmem:[%s13950_s16] sm:$0xff]  ;;  %v4714_v14 = vld [vmem:[%s13950_s16 + $0x8] sm:$0xff] }
 0xe1e   :  { %v9906_v8 = vpack.c.bf16 %v4714_v14, %v4713_v5 }
 0xe1f   :  { %9584 = vmatmul.mubr.msk.f32.vlgmr.msra.gmra.mrb[30].mxu0 %vm1161_vm13, %v4550_v54  ;;  %v4716_v54 = vld [vmem:[%s13950_s16 + $0x18] sm:$0xff] }
 0xe20   :  { %v4484_v20 = vpop.permute.xlu1 %4483  ;;  %9586 = vmatprep.mubr.msk.f32.mxu0 %vm11202_vm7, %v13946_v37  ;;  %v4544_v4 = vpop.permute.xlu0 %4543  ;;  %9907 = vmatpush3.bf16.msra.mxu1 %v9906_v8 }
 0xe21   :  { %v4491_v15 = vadd.f32 %v4484_v20, %v4476_v51  ;;  %9908 = vmatprep.subr.bf16.mxu1 %v13943_v38  ;;  %v4816_v51 = vld [vmem:[%s13951_s18] sm:$0xff]  ;;  %v4817_v20 = vld [vmem:[%s13951_s18 + $0x8] sm:$0xff] }
 0xe22   :  { %v9912_v29 = vpack.c.bf16 %v4817_v20, %v4816_v51 }
 0xe23   :  { %v4503_v18 = vadd.f32 %v4496_v31, %v4491_v15 }
 0xe24   :  { %v4486_v34 = vpop.permute.xlu1 %4485  ;;  %v4510_v32 = vpop.permute.xlu0 %4509  ;;  %9913 = vmatpush3.bf16.msra.mxu0 %v9912_v29 }
 0xe25   :  { %v4515_v40 = vadd.f32 %v4508_v58, %v4503_v18  ;;  %v4492_v27 = vadd.f32 %v4486_v34, %v4477_v0  ;;  %v9909_v58 = vpack.c.bf16 %v4716_v54, %v4715_v30  ;;  %9914 = vmatprep.subr.bf16.mxu0 %v13943_v38 }
 0xe27   :  { %v4551_v59 = vmul.f32 %v4544_v4, %v4515_v40  ;;  %9910 = vmatpush3.bf16.msra.mxu1 %v9909_v58 }
 0xe28   :  { %v4498_v25 = vpop.permute.xlu1 %4497  ;;  %9917 = vmatprep.subr.bf16.mxu1 %v13943_v38 }
 0xe29   :  { %v4504_v22 = vadd.f32 %v4498_v25, %v4492_v27  ;;  %9587 = vmatmul.mubr.msk.f32.gmra.mrb[32].mxu0 %vm1161_vm13, %v4551_v59  ;;  %v9150_v27 = vld [vmem:[#allocation16] ss:$0 sm:$0xff] }
 0xe2a   :  { %9589 = vmatprep.mubr.msk.f32.mxu0 %vm11202_vm7, %v13946_v37 }
 0xe2b   :  { %v4516_v49 = vadd.f32 %v4510_v32, %v4504_v22  ;;  %v9151_v32 = vld [vmem:[#allocation15] ss:$0 sm:$0xff] }
 0xe2c   :  { %v4546_v11 = vpop.permute.xlu1 %4545 }
 0xe2d   :  { %v4552_v2 = vmul.f32 %v4546_v11, %v4516_v49 }
 0xe2f   :  { %9590 = vmatmul.mubr.msk.f32.gmra.mrb[34].mxu0 %vm1161_vm13, %v4552_v2 }
 0xe30   :  { %9617 = vmatprep.mubr.msk.f32.mxu0 %vm11202_vm7, %v13946_v37 }
 0xef2   :  { %v4632_v63 = vpop.f32.mrb[30].mxu0 }
 0xef3   :  { %v10009_v43 = vadd.f32 %v4632_v63, %v11717_v13  ;;  %v9585_v6 = vpop.f32.mrb[31].mxu0 }
 0xef5   :  { %v4654_v23 = vsel %vm1161_vm13, %v10009_v43, 0.0 }
 0xef6   :  { %4655 = vadd.xlane.f32.xlu0 %v4654_v23 }
 0xefc   :  { %v4637_v39 = vpop.f32.mrb[32].mxu0 }
 0xefd   :  { %v10010_v48 = vadd.f32 %v4637_v39, %v11727_v16  ;;  %v9588_v50 = vpop.f32.mrb[33].mxu0 }
 0xeff   :  { %v4657_v56 = vsel %vm1161_vm13, %v10010_v48, 0.0 }
 0xf00   :  { %4658 = vadd.xlane.f32.xlu1 %v4657_v56 }
 0xf02   :  { %v4642_v46 = vpop.f32.mrb[34].mxu0 }
 0xf03   :  { %v10011_v45 = vadd.f32 %v4642_v46, %v13949_v7  ;;  %v9591_v26 = vpop.f32.mrb[35].mxu0  ;;  %v4818_v7 = vld [vmem:[%s13951_s18 + $0x10] sm:$0xff] }
 0xf05   :  { %v4661_v21 = vsel %vm4660_vm1, %v10011_v45, 0.0 }
 0xf06   :  { %4662 = vadd.xlane.f32.xlu0 %v4661_v21  ;;  %v9152_v21 = vld [vmem:[#allocation12] ss:$0 sm:$0xff] }
 0xf83   :  { %v4656_v13 = vpop.xlane.xlu0 %4655 }
 0xf84   :  { %v4665_v42 = vmul.f32 0.03125, %v4656_v13 }
 0xf86   :  { %v4668_v41 = vsub.f32 %v10009_v43, %v4665_v42 }
 0xf88   :  { %v4671_v36 = vmul.f32 %v4668_v41, %v4668_v41 }
 0xf8a   :  { %v4674_v16 = vsel %vm1161_vm13, %v4671_v36, 0.0 }
 0xf8b   :  { %4675 = vadd.xlane.f32.xlu0 %v4674_v16 }
 0xf8d   :  { %v4659_v24 = vpop.xlane.xlu1 %4658 }
 0xf8e   :  { %v4666_v52 = vmul.f32 0.03125, %v4659_v24 }
 0xf90   :  { %v4669_v1 = vsub.f32 %v10010_v48, %v4666_v52 }
 0xf92   :  { %v4672_v19 = vmul.f32 %v4669_v1, %v4669_v1 }
 0xf93   :  { %v4663_v53 = vpop.xlane.xlu0 %4662 }
 0xf94   :  { %v4667_v10 = vmul.f32 0.03125, %v4663_v53  ;;  %v4677_v31 = vsel %vm1161_vm13, %v4672_v19, 0.0 }
 0xf95   :  { %4678 = vadd.xlane.f32.xlu0 %v4677_v31 }
 0xf96   :  { %v4670_v47 = vsub.f32 %v10011_v45, %v4667_v10  ;;  %v4819_v45 = vld [vmem:[%s13951_s18 + $0x18] sm:$0xff] }
 0xf97   :  { %v9915_v26 = vpack.c.bf16 %v4819_v45, %v4818_v7  ;;  %v5072_v7 = vld [vmem:[%s13953_s24 + $0x8] sm:$0xff]  ;;  %v4980_v45 = vld [vmem:[%s13952_s29 + $0x10] sm:$0xff] }
 0xf98   :  { %v4673_v35 = vmul.f32 %v4670_v47, %v4670_v47 }
 0xf99   :  { %9916 = vmatpush3.bf16.msra.mxu0 %v9915_v26  ;;  %v4981_v26 = vld [vmem:[%s13952_s29 + $0x18] sm:$0xff] }
 0xf9a   :  { %v4680_v3 = vsel %vm4660_vm1, %v4673_v35, 0.0  ;;  %9923 = vmatprep.subr.bf16.mxu0 %v13943_v38 }
 0xf9b   :  { %4681 = vadd.xlane.f32.xlu1 %v4680_v3 }
0x1018   :  { %v4676_v15 = vpop.xlane.xlu0 %4675 }
0x1019   :  { %v4683_v18 = vmul.f32 0.03125, %v4676_v15 }
0x101b   :  { %v4686_v4 = vadd.f32 1e-05, %v4683_v18 }
0x101d   :  { %10242 = vrsqrt.f32 %v4686_v4 }
0x1022   :  { %v4679_v34 = vpop.xlane.xlu0 %4678 }
0x1023   :  { %v4684_v40 = vmul.f32 0.03125, %v4679_v34 }
0x1025   :  { %v4687_v0 = vadd.f32 1e-05, %v4684_v40 }
0x1027   :  { %v10243_v59 = vpop.eup %10242  ;;  %10244 = vrsqrt.f32 %v4687_v0 }
0x1028   :  { %v4692_v25 = vmul.f32 %v10243_v59, %v4668_v41  ;;  %v4682_v22 = vpop.xlane.xlu1 %4681 }
0x1029   :  { %v4685_v49 = vmul.f32 0.03125, %v4682_v22 }
0x102a   :  { %v4701_v11 = vmul.f32 %v9150_v27, %v4692_v25 }
0x102b   :  { %v4688_v2 = vadd.f32 1e-05, %v4685_v49 }
0x102c   :  { %v4710_v63 = vadd.f32 %v9151_v32, %v4701_v11 }
0x102d   :  { %10246 = vrsqrt.f32 %v4688_v2 }
0x102e   :  { %9601 = vmatmul.mubr.msk.f32.vlgmr.msra.gmra.mrb[54].mxu1 %vm1161_vm13, %v4710_v63 }
0x102f   :  { %9603 = vmatprep.mubr.msk.f32.mxu1 %vm11202_vm7, %v13946_v37 }
0x1031   :  { %v10245_v43 = vpop.eup %10244 }
0x1032   :  { %v4693_v6 = vmul.f32 %v10245_v43, %v4669_v1 }
0x1034   :  { %v4702_v23 = vmul.f32 %v9150_v27, %v4693_v6 }
0x1036   :  { %v4711_v39 = vadd.f32 %v9151_v32, %v4702_v23 }
0x1037   :  { %v10247_v48 = vpop.eup %10246 }
0x1038   :  { %9604 = vmatmul.mubr.msk.f32.gmra.mrb[56].mxu1 %vm1161_vm13, %v4711_v39  ;;  %v4694_v50 = vmul.f32 %v10247_v48, %v4670_v47  ;;  %v9156_v47 = vld [vmem:[#allocation13] ss:$0 sm:$0xff]  ;;  %v4978_v48 = vld [vmem:[%s13952_s29] sm:$0xff] }
0x1039   :  { %9606 = vmatprep.mubr.msk.f32.mxu1 %vm11202_vm7, %v13946_v37 }
0x103a   :  { %v4703_v56 = vmul.f32 %v9150_v27, %v4694_v50  ;;  %v4979_v50 = vld [vmem:[%s13952_s29 + $0x8] sm:$0xff] }
0x103c   :  { %v4712_v46 = vadd.f32 %v9151_v32, %v4703_v56  ;;  %v5071_v56 = vld [vmem:[%s13953_s24] sm:$0xff] }
0x103e   :  { %9607 = vmatmul.mubr.msk.f32.gmra.mrb[58].mxu1 %vm1161_vm13, %v4712_v46 }
0x103f   :  { %9634 = vmatprep.mubr.msk.f32.mxu1 %vm11202_vm7, %v13946_v37 }
0x1101   :  { %v4799_v13 = vpop.f32.mrb[54].mxu1 }
0x1102   :  { %v4800_v42 = vadd.f32 %v9152_v21, %v4799_v13  ;;  %v9602_v41 = vpop.f32.mrb[55].mxu1  ;;  %v5073_v13 = vld [vmem:[%s13953_s24 + $0x10] sm:$0xff] }
0x1103   :  { %v9921_v41 = vpack.c.bf16 %v4981_v26, %v4980_v45  ;;  %v5290_v45 = vld [vmem:[%s13958_s9 + $0x18] sm:$0xff]  ;;  %v5380_v26 = vld [vmem:[%s13959_s17] sm:$0x3] }
0x1104   :  { %v4813_v36 = vmax.f32 %v4800_v42, 0.0  ;;  %v5074_v42 = vld [vmem:[%s13953_s24 + $0x18] sm:$0xff] }
0x1106   :  { %9618 = vmatmul.mubr.msk.f32.vlgmr.msra.gmra.mrb[54].mxu0 %vm1161_vm13, %v4813_v36  ;;  %v9927_v36 = vpack.c.bf16 %v5074_v42, %v5073_v13  ;;  %v5155_v13 = vld [vmem:[%s13963_s22] sm:$0x3] }
0x1107   :  { %9620 = vmatprep.mubr.msk.f32.mxu0 %vm11202_vm7, %v13946_v37  ;;  %v5242_v42 = vrot.slane %v5155_v13, %v11814_v60 }
0x110b   :  { %v4804_v16 = vpop.f32.mrb[56].mxu1 }
0x110c   :  { %v4805_v24 = vadd.f32 %v9152_v21, %v4804_v16  ;;  %v9605_v52 = vpop.f32.mrb[57].mxu1 }
0x110e   :  { %v4814_v1 = vmax.f32 %v4805_v24, 0.0 }
0x1110   :  { %9621 = vmatmul.mubr.msk.f32.gmra.mrb[56].mxu0 %vm1161_vm13, %v4814_v1 }
0x1111   :  { %v4809_v19 = vpop.f32.mrb[58].mxu1  ;;  %9623 = vmatprep.mubr.msk.f32.mxu0 %vm11202_vm7, %v13946_v37 }
0x1112   :  { %v4810_v53 = vadd.f32 %v9152_v21, %v4809_v19  ;;  %v9608_v10 = vpop.f32.mrb[59].mxu1  ;;  %v9924_v21 = vpack.c.bf16 %v5072_v7, %v5071_v56  ;;  %v5288_v56 = vld [vmem:[%s13958_s9 + $0x8] sm:$0xff] }
0x1114   :  { %v4815_v31 = vmax.f32 %v4810_v53, 0.0  ;;  %9925 = vmatpush3.bf16.msra.mxu0 %v9924_v21 }
0x1115   :  { %9926 = vmatprep.subr.bf16.mxu0 %v13943_v38 }
0x1116   :  { %9624 = vmatmul.mubr.msk.f32.gmra.mrb[58].mxu0 %vm1161_vm13, %v4815_v31  ;;  %v9160_v31 = vld [vmem:[#allocation19] ss:$0 sm:$0xff] }
0x1117   :  { %9651 = vmatprep.mubr.msk.f32.mxu0 %vm11202_vm7, %v13946_v37 }
0x1118   :  { %9928 = vmatpush3.bf16.msra.mxu0 %v9927_v36 }
0x1119   :  { %9932 = vmatprep.subr.bf16.mxu0 %v13943_v38 }
0x11d9   :  { %v4902_v35 = vpop.f32.mrb[54].mxu0 }
0x11da   :  { %v4903_v3 = vadd.f32 %v9156_v47, %v4902_v35  ;;  %v9619_v5 = vpop.f32.mrb[55].mxu0 }
0x11dc   :  { %v4916_v14 = vadd.f32 %v4903_v3, %v4710_v63  ;;  %v9161_v3 = vld [vmem:[#allocation18] ss:$0 sm:$0xff] }
0x11de   :  { %v4921_v8 = vsel %vm1161_vm13, %v4916_v14, 0.0 }
0x11df   :  { %4922 = vadd.xlane.f32.xlu0 %v4921_v8 }
0x11e3   :  { %v4907_v30 = vpop.f32.mrb[56].mxu0 }
0x11e4   :  { %v4908_v54 = vadd.f32 %v9156_v47, %v4907_v30  ;;  %v9622_v58 = vpop.f32.mrb[57].mxu0 }
0x11e6   :  { %v4917_v51 = vadd.f32 %v4908_v54, %v4711_v39 }
0x11e8   :  { %v4924_v20 = vsel %vm1161_vm13, %v4917_v51, 0.0 }
0x11e9   :  { %4925 = vadd.xlane.f32.xlu1 %v4924_v20  ;;  %v4912_v29 = vpop.f32.mrb[58].mxu0 }
0x11ea   :  { %v4913_v15 = vadd.f32 %v9156_v47, %v4912_v29  ;;  %v9625_v18 = vpop.f32.mrb[59].mxu0 }
0x11ec   :  { %v4918_v4 = vadd.f32 %v4913_v15, %v4712_v46  ;;  %v9918_v46 = vpack.c.bf16 %v4979_v50, %v4978_v48  ;;  %v13962_v48 = vld [vmem:[#allocation120_spill] sm:$0xff]  ;;  %v5287_v50 = vld [vmem:[%s13958_s9] sm:$0xff] }
0x11ed   :  { %v9933_v7 = vpack.c.bf16 %v5288_v56, %v5287_v50 }
0x11ee   :  { %v4927_v34 = vsel %vm4660_vm1, %v4918_v4, 0.0  ;;  %9919 = vmatpush3.bf16.msra.mxu1 %v9918_v46  ;;  %v5289_v46 = vld [vmem:[%s13958_s9 + $0x10] sm:$0xff] }
0x11ef   :  { %4928 = vadd.xlane.f32.xlu0 %v4927_v34  ;;  %9920 = vmatprep.subr.bf16.mxu1 %v13943_v38  ;;  %v9936_v21 = vpack.c.bf16 %v5290_v45, %v5289_v46 }
0x11f2   :  { %9922 = vmatpush3.bf16.msra.mxu1 %v9921_v41  ;;  %v5249_v41 = vrot.slane %v5155_v13, %v11817_v61 }
0x11f3   :  { %9929 = vmatprep.subr.bf16.mxu1 %v13943_v38 }
0x126c   :  { %v4923_v40 = vpop.xlane.xlu0 %4922 }
0x126d   :  { %v4930_v0 = vmul.f32 0.03125, %v4923_v40 }
0x126f   :  { %v4933_v59 = vsub.f32 %v4916_v14, %v4930_v0 }
0x1271   :  { %v4936_v27 = vmul.f32 %v4933_v59, %v4933_v59 }
0x1273   :  { %v4939_v25 = vsel %vm1161_vm13, %v4936_v27, 0.0 }
0x1274   :  { %4940 = vadd.xlane.f32.xlu1 %v4939_v25 }
0x1276   :  { %v4926_v22 = vpop.xlane.xlu1 %4925 }
0x1277   :  { %v4931_v32 = vmul.f32 0.03125, %v4926_v22 }
0x1279   :  { %v4934_v49 = vsub.f32 %v4917_v51, %v4931_v32 }
0x127b   :  { %v4937_v11 = vmul.f32 %v4934_v49, %v4934_v49 }
0x127c   :  { %v4929_v2 = vpop.xlane.xlu0 %4928 }
0x127d   :  { %v4932_v63 = vmul.f32 0.03125, %v4929_v2  ;;  %v4942_v43 = vsel %vm1161_vm13, %v4937_v11, 0.0 }
0x127e   :  { %4943 = vadd.xlane.f32.xlu0 %v4942_v43 }
0x127f   :  { %v4935_v6 = vsub.f32 %v4918_v4, %v4932_v63 }
0x1281   :  { %v4938_v23 = vmul.f32 %v4935_v6, %v4935_v6 }
0x1283   :  { %v4945_v39 = vsel %vm4660_vm1, %v4938_v23, 0.0  ;;  %v13960_v23 = vld [vmem:[#allocation118_spill] sm:$0xff] }
0x1284   :  { %4946 = vadd.xlane.f32.xlu1 %v4945_v39  ;;  %v13961_v39 = vld [vmem:[#allocation119_spill] sm:$0xff] }
0x1301   :  { %v4941_v16 = vpop.xlane.xlu1 %4940 }
0x1302   :  { %v4948_v24 = vmul.f32 0.03125, %v4941_v16 }
0x1304   :  { %v4951_v52 = vadd.f32 1e-05, %v4948_v24 }
0x1306   :  { %10248 = vrsqrt.f32 %v4951_v52 }
0x130b   :  { %v4944_v1 = vpop.xlane.xlu0 %4943 }
0x130c   :  { %v4949_v19 = vmul.f32 0.03125, %v4944_v1  ;;  %v9172_v1 = vld [vmem:[#allocation49] ss:$0 sm:$0xff] }
0x130e   :  { %v4952_v53 = vadd.f32 1e-05, %v4949_v19 }
0x1310   :  { %v10249_v10 = vpop.eup %10248  ;;  %10250 = vrsqrt.f32 %v4952_v53 }
0x1311   :  { %v4957_v47 = vmul.f32 %v10249_v10, %v4933_v59  ;;  %v4947_v35 = vpop.xlane.xlu1 %4946 }
0x1312   :  { %v4950_v5 = vmul.f32 0.03125, %v4947_v35 }
0x1313   :  { %v4966_v14 = vmul.f32 %v9160_v31, %v4957_v47 }
0x1314   :  { %v4953_v8 = vadd.f32 1e-05, %v4950_v5 }
0x1315   :  { %v12833_v30 = vadd.f32 %v9161_v3, %v4966_v14 }
0x1316   :  { %10252 = vrsqrt.f32 %v4953_v8 }
0x1317   :  { %13954 = vst [vmem:[#allocation117_spill] sm:$0xff] %v12833_v30  ;;  %9635 = vmatmul.mubr.msk.f32.vlgmr.msra.gmra.mrb[60].mxu1 %vm1161_vm13, %v12833_v30  ;;  %9652 = vmatmul.mubr.msk.f32.vlgmr.msra.gmra.mrb[60].mxu0 %vm1161_vm13, %v12833_v30 }
0x1318   :  { %9637 = vmatprep.mubr.msk.f32.mxu1 %vm11202_vm7, %v13946_v37  ;;  %9654 = vmatprep.mubr.msk.f32.mxu0 %vm11202_vm7, %v13946_v37 }
0x1319   :  { %9934 = vmatpush3.bf16.msra.mxu0 %v9933_v7 }
0x131a   :  { %v10251_v54 = vpop.eup %10250  ;;  %9935 = vmatprep.subr.bf16.mxu0 %v13943_v38 }
0x131b   :  { %v4958_v58 = vmul.f32 %v10251_v54, %v4934_v49 }
0x131d   :  { %v4967_v51 = vmul.f32 %v9160_v31, %v4958_v58  ;;  %9937 = vmatpush3.bf16.msra.mxu0 %v9936_v21 }
0x131e   :  { %9939 = vmatprep.subr.bf16.mxu0 %v11901_v9 }
0x131f   :  { %v12843_v20 = vadd.f32 %v9161_v3, %v4967_v51 }
0x1320   :  { %v10253_v29 = vpop.eup %10252 }
0x1321   :  { %13955 = vst [vmem:[#allocation125_spill] sm:$0xff] %v12843_v20  ;;  %9638 = vmatmul.mubr.msk.f32.gmra.mrb[62].mxu1 %vm1161_vm13, %v12843_v20  ;;  %9655 = vmatmul.mubr.msk.f32.gmra.mrb[62].mxu0 %vm1161_vm13, %v12843_v20  ;;  %v4959_v15 = vmul.f32 %v10253_v29, %v4935_v6 }
0x1322   :  { %9640 = vmatprep.mubr.msk.f32.mxu1 %vm11202_vm7, %v13946_v37  ;;  %9657 = vmatprep.mubr.msk.f32.mxu0 %vm11202_vm7, %v13946_v37 }
0x1323   :  { %v4968_v18 = vmul.f32 %v9160_v31, %v4959_v15 }
0x1325   :  { %v12853_v4 = vadd.f32 %v9161_v3, %v4968_v18 }
0x1327   :  { %13956 = vst [vmem:[#allocation126_spill] sm:$0xff] %v12853_v4  ;;  %9641 = vmatmul.mubr.msk.f32.gmra.mrb[64].mxu1 %vm1161_vm13, %v12853_v4  ;;  %9658 = vmatmul.mubr.msk.f32.gmra.mrb[64].mxu0 %vm1161_vm13, %v12853_v4 }
0x1328   :  { %9666 = vmatprep.mubr.msk.f32.mxu1 %vm11202_vm7, %v13946_v37  ;;  %9683 = vmatprep.mubr.msk.f32.mxu0 %vm11202_vm7, %v13946_v37 }
0x13ea   :  { %v12863_v34 = vpop.f32.mrb[60].mxu1  ;;  %v12865_v40 = vpop.f32.mrb[60].mxu0 }
0x13eb   :  { %v9636_v0 = vpop.f32.mrb[61].mxu1  ;;  %v9653_v59 = vpop.f32.mrb[61].mxu0  ;;  %v5243_v16 = vmul.f32 %v5242_v42, %v12863_v34  ;;  %v9201_v7 = vmul.f32 -1.442695, %v12863_v34 }
0x13f4   :  { %v12867_v27 = vpop.f32.mrb[62].mxu1  ;;  %v12869_v25 = vpop.f32.mrb[62].mxu0 }
0x13f5   :  { %13957 = vst [vmem:[#allocation127_spill] sm:$0xff] %v12869_v25  ;;  %v9930_v22 = vpack.c.bf16 %v12867_v27, %v12863_v34  ;;  %v9961_v32 = vpack.c.bf16 %v12869_v25, %v12865_v40  ;;  %v9639_v49 = vpop.f32.mrb[63].mxu1  ;;  %v9656_v11 = vpop.f32.mrb[63].mxu0  ;;  %v5244_v31 = vmul.f32 %v5242_v42, %v12867_v27 }
0x13f7   :  { %9931 = vmatpush3.bf16.msra.mxu1 %v9930_v22 }
0x13f8   :  { %9664 = vmatprep.subr.mxu1 %v13946_v37 }
0x13fa   :  { %v12876_v2 = vpop.f32.mrb[64].mxu1  ;;  %v12878_v63 = vpop.f32.mrb[64].mxu0 }
0x13fb   :  { %v9642_v43 = vpop.f32.mrb[65].mxu1  ;;  %v9659_v6 = vpop.f32.mrb[65].mxu0  ;;  %9665 = vmatpush3.msk.msra.mxu1 %vm1346_vm3, %v12876_v2  ;;  %v5245_v54 = vmul.f32 %v5242_v42, %v12876_v2 }
0x13fc   :  { %9667 = vmatmul.mubr.msk.f32.vlgmr.msra.gmra.mrb[66].mxu1 %vm1336_vm4, %v13960_v23  ;;  %9692 = vmatprep.subr.mxu1 %v13946_v37 }
0x13fd   :  { %9669 = vmatprep.mubr.msk.f32.mxu1 %vm11202_vm7, %v13946_v37  ;;  %9693 = vmatpush3.msk.msra.mxu1 %vm1589_vm6, %v5380_v26 }
0x13fe   :  { %9947 = vmatprep.subr.bf16.mxu1 %v11901_v9 }
0x1400   :  { %9670 = vmatmul.mubr.msk.f32.gmra.mrb[68].mxu1 %vm1336_vm4, %v13961_v39 }
0x1401   :  { %9672 = vmatprep.mubr.msk.f32.mxu1 %vm11202_vm7, %v13946_v37 }
0x1404   :  { %9673 = vmatmul.mubr.msk.f32.gmra.mrb[70].mxu1 %vm1336_vm4, %v13962_v48 }
0x1405   :  { %9694 = vmatprep.mubr.msk.f32.mxu1 %vm11202_vm7, %v13946_v37 }
0x14cf   :  { %v5225_v36 = vpop.f32.mrb[66].mxu1 }
0x14d0   :  { %v5250_v24 = vmul.f32 %v5249_v41, %v5225_v36  ;;  %v9668_v52 = vpop.f32.mrb[67].mxu1 }
0x14d2   :  { %v5253_v19 = vadd.f32 %v5250_v24, %v5243_v16 }
0x14d3   :  { %v5230_v53 = vpop.f32.mrb[68].mxu1 }
0x14d4   :  { %v5263_v10 = vadd.f32 %v9172_v1, %v5253_v19  ;;  %v5251_v47 = vmul.f32 %v5249_v41, %v5230_v53  ;;  %v9671_v35 = vpop.f32.mrb[69].mxu1 }
0x14d6   :  { %v9173_v3 = vmul.f32 -1.442695, %v5263_v10  ;;  %v5254_v5 = vadd.f32 %v5251_v47, %v5244_v31 }
0x14d7   :  { %v5235_v14 = vpop.f32.mrb[70].mxu1 }
0x14d8   :  { %10254 = vpow2.f32 %v9173_v3  ;;  %v5264_v8 = vadd.f32 %v9172_v1, %v5254_v5  ;;  %v5252_v58 = vmul.f32 %v5249_v41, %v5235_v14  ;;  %v9674_v51 = vpop.f32.mrb[71].mxu1 }
0x14da   :  { %v9174_v29 = vmul.f32 -1.442695, %v5264_v8  ;;  %v5255_v15 = vadd.f32 %v5252_v58, %v5245_v54 }
0x14dc   :  { %10256 = vpow2.f32 %v9174_v29  ;;  %v5265_v18 = vadd.f32 %v9172_v1, %v5255_v15 }
0x14de   :  { %v9175_v0 = vmul.f32 -1.442695, %v5265_v18 }
0x14e0   :  { %10258 = vpow2.f32 %v9175_v0 }
0x14e2   :  { %v10255_v59 = vpop.eup %10254 }
0x14e3   :  { %v5275_v22 = vadd.f32 1.0, %v10255_v59 }
0x14e5   :  { %10260 = vrcp.f32 %v5275_v22 }
0x14e6   :  { %v10257_v49 = vpop.eup %10256 }
0x14e7   :  { %v5276_v11 = vadd.f32 1.0, %v10257_v49 }
0x14e9   :  { %10262 = vrcp.f32 %v5276_v11 }
0x14ea   :  { %v10259_v43 = vpop.eup %10258 }
0x14eb   :  { %v5277_v6 = vadd.f32 1.0, %v10259_v43 }
0x14ed   :  { %10264 = vrcp.f32 %v5277_v6 }
0x14ee   :  { %10266 = vpow2.f32 %v9201_v7 }
0x14ef   :  { %v10261_v23 = vpop.eup %10260 }
0x14f0   :  { %v12910_v39 = vmul.f32 %v10261_v23, %v5263_v10 }
0x14f2   :  { %9684 = vmatmul.mubr.msk.f32.vlgmr.msra.gmra.mrb[66].mxu0 %vm1161_vm13, %v12910_v39 }
0x14f3   :  { %v10263_v48 = vpop.eup %10262  ;;  %9686 = vmatprep.mubr.msk.f32.mxu0 %vm11202_vm7, %v13946_v37  ;;  %9941 = vmatpush1.bf16.msra.mxu0 %v11921_v44 }
0x14f4   :  { %v12917_v50 = vmul.f32 %v10263_v48, %v5264_v8  ;;  %9943 = vmatprep.subr.bf16.mxu0 %v11952_v28 }
0x14f6   :  { %9687 = vmatmul.mubr.msk.f32.gmra.mrb[68].mxu0 %vm1161_vm13, %v12917_v50 }
0x14f7   :  { %v10265_v56 = vpop.eup %10264  ;;  %9689 = vmatprep.mubr.msk.f32.mxu0 %vm11202_vm7, %v13946_v37  ;;  %9945 = vmatpush1.bf16.msra.mxu0 %v11964_v55 }
0x14f8   :  { %v12925_v46 = vmul.f32 %v10265_v56, %v5265_v18  ;;  %9190 = vmatprep.subr.msk.mxu0 %vm11966_vm11, %v13947_v17  ;;  %v10267_v45 = vpop.eup %10266 }
0x14f9   :  { %v6667_v26 = vadd.f32 1.0, %v10267_v45 }
0x14fa   :  { %9690 = vmatmul.mubr.msk.f32.gmra.mrb[70].mxu0 %vm1161_vm13, %v12925_v46 }
0x14fb   :  { %5584 = vmatprep.mubr.f32.mxu0 %v13946_v37  ;;  %10268 = vrcp.f32 %v6667_v26 }
0x1505   :  { %v10269_v42 = vpop.eup %10268 }
0x1506   :  { %v6676_v16 = vmul.f32 %v10269_v42, %v12863_v34  ;;  %v9179_v34 = vld [vmem:[#allocation51] ss:$0 sm:$0xff] }
0x15c5   :  { %v5366_v21 = vpop.f32.mrb[66].mxu0 }
0x15c6   :  { %5727 = vrot.lane.b32.xlu0 %v5366_v21, %s11204_s7  ;;  %v9685_v13 = vpop.f32.mrb[67].mxu0  ;;  %9695 = vmatmul.mubr.msk.f32.vlgmr.msra.gmra.mrb[72].mxu1 %vm1579_vm8, %v5366_v21 }
0x15c7   :  { %9697 = vmatprep.mubr.msk.f32.mxu1 %vm11202_vm7, %v13946_v37  ;;  %9949 = vmatpush1.bf16.msra.mxu1 %v11921_v44 }
0x15c8   :  { %9951 = vmatprep.subr.bf16.mxu1 %v11952_v28 }
0x15c9   :  { %v5371_v41 = vpop.f32.mrb[68].mxu0 }
0x15ca   :  { %6465 = vrot.lane.b32.xlu0 %v5371_v41, %s11205_s19  ;;  %5729 = vrot.lane.b32.xlu1 %v5371_v41, %s11204_s7  ;;  %v9688_v36 = vpop.f32.mrb[69].mxu0 }
0x15cb   :  { %9698 = vmatmul.mubr.msk.f32.gmra.mrb[74].mxu1 %vm1579_vm8, %v5371_v41 }
0x15cc   :  { %9700 = vmatprep.mubr.msk.f32.mxu1 %vm11202_vm7, %v13946_v37  ;;  %9953 = vmatpush1.bf16.msra.mxu1 %v11964_v55 }
0x15cd   :  { %v5376_v24 = vpop.f32.mrb[70].mxu0  ;;  %9195 = vmatprep.subr.msk.mxu1 %vm11966_vm11, %v13947_v17 }
0x15ce   :  { %6682 = vrot.lane.b32.xlu0 %v6676_v16, %s11206_s4  ;;  %5731 = vrot.lane.b32.xlu1 %v5376_v24, %s11204_s7  ;;  %v9691_v52 = vpop.f32.mrb[71].mxu0 }
0x15cf   :  { %9701 = vmatmul.mubr.msk.f32.gmra.mrb[76].mxu1 %vm1579_vm8, %v5376_v24 }
0x15d0   :  { %5708 = vmatprep.mubr.f32.mxu1 %v13946_v37 }
0x15d2   :  { %6463 = vrot.lane.b32.xlu1 %v5366_v21, %s11205_s19 }
0x15d6   :  { %6467 = vrot.lane.b32.xlu1 %v5376_v24, %s11205_s19 }
0x163c   :  { %v5730_v42 = vpop.permute.xlu1 %5729 }
0x1699   :  { %v5466_v1 = vpop.f32.mrb[72].mxu1 }
0x169a   :  { %v5467_v19 = vadd.f32 %v9179_v34, %v5466_v1  ;;  %v9696_v53 = vpop.f32.mrb[73].mxu1  ;;  %v5732_v1 = vpop.permute.xlu1 %5731 }
0x169b   :  { %v5728_v53 = vpop.permute.xlu0 %5727 }
0x169c   :  { %v5483_v10 = vand.u32 2147483647, %v5467_v19  ;;  %v5480_v48 = vmax.f32 %v5467_v19, 0.0 }
0x169e   :  { %v5486_v31 = vsub.f32 0.0, %v5483_v10  ;;  %v5471_v47 = vpop.f32.mrb[74].mxu1  ;;  %v6464_v10 = vpop.permute.xlu1 %6463 }
0x169f   :  { %v5472_v35 = vadd.f32 %v9179_v34, %v5471_v47  ;;  %v9699_v3 = vpop.f32.mrb[75].mxu1  ;;  %v13964_v47 = vld [vmem:[#allocation122_spill] sm:$0xff] }
0x16a0   :  { %v5489_v5 = vmul.f32 1.442695, %v5486_v31  ;;  %v6466_v31 = vpop.permute.xlu0 %6465  ;;  %v13966_v3 = vld [vmem:[#allocation124_spill] sm:$0xff] }
0x16a1   :  { %v5484_v14 = vand.u32 2147483647, %v5472_v35  ;;  %v5481_v21 = vmax.f32 %v5472_v35, 0.0  ;;  %v13965_v35 = vld [vmem:[#allocation123_spill] sm:$0xff] }
0x16a2   :  { %10270 = vpow2.f32 %v5489_v5  ;;  %v5476_v8 = vpop.f32.mrb[76].mxu1  ;;  %v5507_v5 = vld [vmem:[#allocation46] sm:$0x3] }
0x16a3   :  { %v5487_v54 = vsub.f32 0.0, %v5484_v14  ;;  %v5477_v58 = vadd.f32 %v9179_v34, %v5476_v8  ;;  %v9702_v51 = vpop.f32.mrb[77].mxu1  ;;  %v5508_v14 = vmul.f32 1.442695, %v5507_v5 }
0x16a5   :  { %v5491_v29 = vmul.f32 1.442695, %v5487_v54  ;;  %v5485_v15 = vand.u32 2147483647, %v5477_v58  ;;  %v5482_v24 = vmax.f32 %v5477_v58, 0.0 }
0x16a7   :  { %10272 = vpow2.f32 %v5491_v29  ;;  %v5488_v18 = vsub.f32 0.0, %v5485_v15 }
0x16a9   :  { %v5493_v0 = vmul.f32 1.442695, %v5488_v18 }
0x16ab   :  { %10274 = vpow2.f32 %v5493_v0 }
0x16ac   :  { %v10271_v59 = vpop.eup %10270 }
0x16ad   :  { %v5495_v22 = vadd.f32 1.0, %v10271_v59 }
0x16af   :  { %10276 = vlog2.f32 %v5495_v22 }
0x16b1   :  { %v10273_v49 = vpop.eup %10272 }
0x16b2   :  { %v5496_v11 = vadd.f32 1.0, %v10273_v49 }
0x16b4   :  { %10278 = vlog2.f32 %v5496_v11 }
0x16b5   :  { %v10275_v43 = vpop.eup %10274 }
0x16b6   :  { %v5497_v6 = vadd.f32 1.0, %v10275_v43 }
0x16b8   :  { %10280 = vlog2.f32 %v5497_v6 }
0x16b9   :  { %v10277_v23 = vpop.eup %10276  ;;  %10282 = vpow2.f32 %v5508_v14 }
0x16ba   :  { %v5499_v56 = vmul.f32 0.6931472, %v10277_v23 }
0x16bc   :  { %v5504_v7 = vadd.f32 %v5499_v56, %v5480_v48 }
0x16be   :  { %v10279_v45 = vpop.eup %10278  ;;  %v5632_v26 = vmul.f32 %v5504_v7, %v12910_v39  ;;  %9184 = vmatmul.mubr.msk.f32.vlgmr.msra.gmra.mrb[72].mxu0 %vm1161_vm13, %v5504_v7 }
0x16bf   :  { %v5501_v13 = vmul.f32 0.6931472, %v10279_v45  ;;  %5590 = vmatprep.mubr.f32.mxu0 %v13946_v37  ;;  %9191 = vmatpush1.msk.msra.mxu0 %vm11979_vm0, %v13947_v17 }
0x16c0   :  { %9187 = vmatmul.mubr.msk.f32.vlgmr.msra.gmra.mrb[78].mxu1 %vm1161_vm13, %v5632_v26  ;;  %9954 = vmatprep.subr.bf16.mxu0 %v13943_v38 }
0x16c1   :  { %v5505_v41 = vadd.f32 %v5501_v13, %v5481_v21  ;;  %5714 = vmatprep.mubr.f32.mxu1 %v13946_v37  ;;  %9196 = vmatpush1.msk.msra.mxu1 %vm11979_vm0, %v13947_v17 }
0x16c2   :  { %v10281_v36 = vpop.eup %10280  ;;  %9960 = vmatprep.subr.bf16.mxu1 %v13943_v38 }
0x16c3   :  { %v5633_v16 = vmul.f32 %v5505_v41, %v12917_v50  ;;  %v5503_v52 = vmul.f32 0.6931472, %v10281_v36  ;;  %9185 = vmatmul.mubr.msk.f32.gmra.mrb[74].mxu0 %vm1161_vm13, %v5505_v41  ;;  %v10283_v8 = vpop.eup %10282 }
0x16c4   :  { %5596 = vmatprep.mubr.f32.mxu0 %v13946_v37  ;;  %v5510_v54 = vsub.f32 0.0, %v10283_v8 }
0x16c5   :  { %v5506_v34 = vadd.f32 %v5503_v52, %v5482_v24  ;;  %9188 = vmatmul.mubr.msk.f32.gmra.mrb[80].mxu1 %vm1161_vm13, %v5633_v16 }
0x16c6   :  { %5720 = vmatprep.mubr.f32.mxu1 %v13946_v37  ;;  %v13013_v58 = vrot.slane %v5510_v54, %v11817_v61  ;;  %v13016_v51 = vrot.slane %v5510_v54, %v11814_v60  ;;  %v6787_v54 = vld [vmem:[%s13967_s23] sm:$0x3] }
0x16c7   :  { %v5634_v19 = vmul.f32 %v5506_v34, %v12925_v46  ;;  %9186 = vmatmul.mubr.msk.f32.gmra.mrb[76].mxu0 %vm1161_vm13, %v5506_v34 }
0x16c8   :  { %5803 = vmatprep.mubr.f32.mxu0 %v13946_v37 }
0x16c9   :  { %9189 = vmatmul.mubr.msk.f32.gmra.mrb[82].mxu1 %vm1161_vm13, %v5634_v19 }
0x16ca   :  { %6539 = vmatprep.mubr.f32.mxu1 %v13946_v37 }
0x16cb   :  { %9192 = vmatmul.mubr.msk.f32.vlgmr.msra.gmra.mrb[78].mxu0 %vm692_vm12, %v5728_v53 }
0x16cc   :  { %5809 = vmatprep.mubr.f32.mxu0 %v13946_v37 }
0x16cd   :  { %9197 = vmatmul.mubr.msk.f32.vlgmr.msra.gmra.mrb[84].mxu1 %vm692_vm12, %v6464_v10 }
0x16ce   :  { %9962 = vmatpush3.bf16.msra.mxu1 %v9961_v32  ;;  %6545 = vmatprep.mubr.f32.mxu1 %v13946_v37  ;;  %v6468_v32 = vpop.permute.xlu1 %6467 }
0x16cf   :  { %9193 = vmatmul.mubr.msk.f32.gmra.mrb[80].mxu0 %vm692_vm12, %v5730_v42  ;;  %9724 = vmatprep.subr.mxu1 %v13946_v37 }
0x16d0   :  { %5815 = vmatprep.mubr.f32.mxu0 %v13946_v37 }
0x16d1   :  { %9198 = vmatmul.mubr.msk.f32.gmra.mrb[86].mxu1 %vm692_vm12, %v6466_v31 }
0x16d2   :  { %9725 = vmatpush3.msk.msra.mxu1 %vm1346_vm3, %v12878_v63  ;;  %6551 = vmatprep.mubr.f32.mxu1 %v13946_v37 }
0x16d3   :  { %9194 = vmatmul.mubr.msk.f32.gmra.mrb[82].mxu0 %vm692_vm12, %v5732_v1  ;;  %9752 = vmatprep.subr.mxu1 %v13946_v37 }
0x16d4   :  { %9711 = vmatprep.mubr.msk.f32.mxu0 %vm11202_vm7, %v13946_v37 }
0x16d5   :  { %9199 = vmatmul.mubr.msk.f32.gmra.mrb[88].mxu1 %vm692_vm12, %v6468_v32 }
0x16d6   :  { %9726 = vmatprep.mubr.msk.f32.mxu1 %vm11202_vm7, %v13946_v37 }
0x16d9   :  { %9727 = vmatmul.mubr.msk.f32.vlgmr.msra.gmra.mrb[90].mxu1 %vm1336_vm4, %v13964_v47 }
0x16da   :  { %9729 = vmatprep.mubr.msk.f32.mxu1 %vm11202_vm7, %v13946_v37 }
0x16dd   :  { %9730 = vmatmul.mubr.msk.f32.gmra.mrb[92].mxu1 %vm1336_vm4, %v13965_v35 }
0x16de   :  { %9732 = vmatprep.mubr.msk.f32.mxu1 %vm11202_vm7, %v13946_v37 }
0x16e1   :  { %9733 = vmatmul.mubr.msk.f32.gmra.mrb[94].mxu1 %vm1336_vm4, %v13966_v3 }
0x16e2   :  { %9754 = vmatprep.mubr.msk.f32.mxu1 %vm11202_vm7, %v13946_v37 }
0x1791   :  { %v5586_v29 = vpop.f32.mrb[72].mxu0 }
0x1792   :  { %v5614_v15 = vmul.f32 %v13013_v58, %v5586_v29  ;;  %v5588_v18 = vpop.f32.mrb[73].mxu0 }
0x1793   :  { %v5615_v0 = vmul.f32 %v13016_v51, %v5588_v18  ;;  %v5710_v59 = vpop.f32.mrb[78].mxu1 }
0x1794   :  { %v5620_v22 = vmul.f32 1.442695, %v5614_v15  ;;  %v5712_v49 = vpop.f32.mrb[79].mxu1 }
0x1795   :  { %v5622_v11 = vmul.f32 1.442695, %v5615_v0 }
0x1796   :  { %10284 = vpow2.f32 %v5620_v22  ;;  %v5592_v43 = vpop.f32.mrb[74].mxu0 }
0x1797   :  { %10286 = vpow2.f32 %v5622_v11  ;;  %v5616_v6 = vmul.f32 %v13013_v58, %v5592_v43  ;;  %v5594_v23 = vpop.f32.mrb[75].mxu0 }
0x1798   :  { %v5617_v48 = vmul.f32 %v13016_v51, %v5594_v23  ;;  %v5716_v56 = vpop.f32.mrb[80].mxu1 }
0x1799   :  { %v5624_v7 = vmul.f32 1.442695, %v5616_v6  ;;  %v5718_v45 = vpop.f32.mrb[81].mxu1 }
0x179a   :  { %v5626_v26 = vmul.f32 1.442695, %v5617_v48  ;;  %v13022_v21 = vpop.f32.mrb[76].mxu0 }
0x179b   :  { %10288 = vpow2.f32 %v5624_v7  ;;  %v13024_v13 = vpop.f32.mrb[77].mxu0 }
0x179c   :  { %10290 = vpow2.f32 %v5626_v26  ;;  %v5722_v42 = vpop.f32.mrb[82].mxu1 }
0x179d   :  { %v5724_v41 = vpop.f32.mrb[83].mxu1 }
0x179e   :  { %v5805_v36 = vpop.f32.mrb[78].mxu0 }
0x179f   :  { %v13026_v16 = vmul.f32 %v5805_v36, %v5710_v59  ;;  %v5807_v24 = vpop.f32.mrb[79].mxu0 }
0x17a0   :  { %v13028_v52 = vpop.eup %10284  ;;  %v13030_v34 = vmul.f32 %v5807_v24, %v5712_v49  ;;  %v13032_v1 = vpop.f32.mrb[84].mxu1 }
0x17a1   :  { %v13034_v19 = vpop.eup %10286  ;;  %v5828_v53 = vmul.f32 0.0, %v13028_v52  ;;  %v13037_v10 = vpop.f32.mrb[85].mxu1 }
0x17a2   :  { %v5829_v31 = vmul.f32 0.0, %v13034_v19  ;;  %v5811_v32 = vpop.f32.mrb[80].mxu0 }
0x17a3   :  { %v5830_v47 = vadd.f32 %v5828_v53, %v13026_v16  ;;  %v13041_v35 = vmul.f32 %v5811_v32, %v5716_v56  ;;  %v5813_v3 = vpop.f32.mrb[81].mxu0  ;;  %v13061_v56 = vrot.slane %v6787_v54, %v11814_v60  ;;  %v13075_v32 = vrot.slane %v6787_v54, %v11817_v61 }
0x17a4   :  { %v5831_v5 = vadd.f32 %v5829_v31, %v13030_v34  ;;  %v13044_v14 = vmul.f32 %v5813_v3, %v5718_v45  ;;  %v13046_v8 = vpop.f32.mrb[86].mxu1 }
0x17a5   :  { %v13049_v29 = vpop.eup %10288  ;;  %v5852_v15 = vrot.slane %v5830_v47, 7  ;;  %v13051_v18 = vpop.f32.mrb[87].mxu1 }
0x17a6   :  { %v13053_v0 = vpop.eup %10290  ;;  %v5834_v59 = vcombine.low %v5830_v47, %v5831_v5  ;;  %v5853_v22 = vrot.slane %v5831_v5, 7  ;;  %v6142_v49 = vmul.f32 0.0, %v13049_v29  ;;  %v5817_v11 = vpop.f32.mrb[82].mxu0 }
0x17a7   :  { %v5856_v43 = vmul.f32 %v13028_v52, %v5852_v15  ;;  %v6143_v6 = vmul.f32 0.0, %v13053_v0  ;;  %v13058_v23 = vmul.f32 %v5817_v11, %v5722_v42  ;;  %v5819_v48 = vpop.f32.mrb[83].mxu0 }
0x17a8   :  { %v5841_v7 = vrot.slane %v5834_v59, %v12090_v12  ;;  %v5857_v45 = vmul.f32 %v13034_v19, %v5853_v22  ;;  %v6144_v26 = vadd.f32 %v6142_v49, %v13041_v35  ;;  %v13066_v36 = vmul.f32 %v5819_v48, %v5724_v41  ;;  %v13068_v24 = vpop.f32.mrb[88].mxu1 }
0x17a9   :  { %v5858_v53 = vadd.f32 %v5856_v43, %v13026_v16  ;;  %v6145_v31 = vadd.f32 %v6143_v6, %v13044_v14  ;;  %v13072_v42 = vpop.f32.mrb[89].mxu1  ;;  %v6875_v22 = vmul.f32 %v13061_v56, %v12865_v40  ;;  %v6876_v6 = vmul.f32 %v13061_v56, %v12869_v25 }
0x17aa   :  { %v5848_v47 = vrot.slane %v5841_v7, %v12090_v12  ;;  %v5859_v3 = vadd.f32 %v5857_v45, %v13030_v34  ;;  %v6168_v5 = vrot.slane %v6144_v26, 7 }
0x17ab   :  { %v5881_v15 = vrot.slane %v5858_v53, 7  ;;  %v6148_v59 = vcombine.low %v6144_v26, %v6145_v31  ;;  %v6169_v41 = vrot.slane %v6145_v31, 7 }
0x17ac   :  { %v5862_v49 = vcombine.low %v5858_v53, %v5859_v3  ;;  %v5882_v11 = vrot.slane %v5859_v3, 7  ;;  %5850 = vst.msk [vmem:[#allocation3] ss:$8 sm:$0x3] %vm12119_vm15, %v5848_v47  ;;  %v6172_v43 = vmul.f32 %v13049_v29, %v6168_v5  ;;  %v6857_v54 = vpop.f32.mrb[90].mxu1  ;;  %v5618_v53 = vmul.f32 %v13013_v58, %v13022_v21 }
0x17ad   :  { %v5885_v48 = vmul.f32 %v13028_v52, %v5881_v15  ;;  %v6155_v7 = vrot.slane %v6148_v59, %v12090_v12  ;;  %v6173_v45 = vmul.f32 %v13053_v0, %v6169_v41  ;;  %v6882_v26 = vmul.f32 %v13075_v32, %v6857_v54  ;;  %v9728_v31 = vpop.f32.mrb[91].mxu1 }
0x17ae   :  { %v5869_v47 = vrot.slane %v5862_v49, %v12090_v12  ;;  %v5886_v3 = vmul.f32 %v13034_v19, %v5882_v11  ;;  %v6174_v5 = vadd.f32 %v6172_v43, %v13041_v35  ;;  %v5619_v41 = vmul.f32 %v13016_v51, %v13024_v13 }
0x17af   :  { %v5887_v4 = vadd.f32 %v5885_v48, %v13026_v16  ;;  %v6156_v20 = vcombine.high %v6155_v7, %v6155_v7  ;;  %v6175_v15 = vadd.f32 %v6173_v45, %v13044_v14  ;;  %v13097_v59 = vadd.f32 %v6882_v26, %v6875_v22 }
0x17b0   :  { %v5870_v54 = vcombine.high %v5869_v47, %v5869_v47  ;;  %v5888_v31 = vadd.f32 %v5886_v3, %v13030_v34  ;;  %v6196_v58 = vrot.slane %v6174_v5, 7  ;;  %v6862_v21 = vpop.f32.mrb[92].mxu1  ;;  %v5628_v3 = vmul.f32 1.442695, %v5618_v53 }
0x17b1   :  { %v5910_v49 = vrot.slane %v5887_v4, 7  ;;  %v6163_v11 = vrot.slane %v6156_v20, %v12090_v12  ;;  %v6178_v30 = vcombine.high %v6174_v5, %v6175_v15  ;;  %v6197_v43 = vrot.slane %v6175_v15, 7  ;;  %v9731_v25 = vpop.f32.mrb[93].mxu1 }
0x17b2   :  { %v5877_v48 = vrot.slane %v5870_v54, %v12090_v12  ;;  %v5891_v7 = vcombine.low %v5887_v4, %v5888_v31  ;;  %v5911_v45 = vrot.slane %v5888_v31, 7  ;;  %v6200_v22 = vmul.f32 %v13049_v29, %v6196_v58 }
0x17b3   :  { %v5914_v26 = vmul.f32 %v13028_v52, %v5910_v49  ;;  %v6164_v51 = vcombine.high %v6163_v11, %v6163_v11  ;;  %v6185_v13 = vrot.slane %v6178_v30, %v12090_v12  ;;  %v6201_v47 = vmul.f32 %v13053_v0, %v6197_v43 }
0x17b4   :  { %v5898_v60 = vrot.slane %v5891_v7, %v12090_v12  ;;  %v5915_v20 = vmul.f32 %v13034_v19, %v5911_v45  ;;  %5879 = vst.msk [vmem:[#allocation3 + $0x1] ss:$8 sm:$0x3] %vm12119_vm15, %v5877_v48  ;;  %v6202_v4 = vadd.f32 %v6200_v22, %v13041_v35  ;;  %v6867_v25 = vpop.f32.mrb[94].mxu1  ;;  %v6883_v30 = vmul.f32 %v13075_v32, %v6862_v21 }
0x17b5   :  { %v5916_v5 = vadd.f32 %v5914_v26, %v13026_v16  ;;  %v6192_v15 = vrot.slane %v6185_v13, %v12090_v12  ;;  %v6203_v54 = vadd.f32 %v6201_v47, %v13044_v14  ;;  %6166 = vst.msk [vmem:[#allocation3 + $0x13] ss:$8 sm:$0x3] %vm12119_vm15, %v6164_v51  ;;  %v9734_v53 = vpop.f32.mrb[95].mxu1  ;;  %v5630_v31 = vmul.f32 1.442695, %v5619_v41 }
0x17b6   :  { %v5905_v58 = vrot.slane %v5898_v60, %v12090_v12  ;;  %v5917_v49 = vadd.f32 %v5915_v20, %v13030_v34  ;;  %v6225_v11 = vrot.slane %v6202_v4, 7  ;;  %v13123_v45 = vadd.f32 %v6883_v30, %v6876_v6 }
0x17b7   :  { %v5940_v43 = vrot.slane %v5916_v5, 7  ;;  %v6206_v48 = vcombine.high %v6202_v4, %v6203_v54  ;;  %v6226_v7 = vrot.slane %v6203_v54, 7  ;;  %6194 = vst.msk [vmem:[#allocation3 + $0x14] ss:$8 sm:$0x3] %vm12119_vm15, %v6192_v15  ;;  %10292 = vpow2.f32 %v5628_v3 }
0x17b8   :  { %v5906_v22 = vcombine.high %v5905_v58, %v5905_v58  ;;  %v5920_v26 = vcombine.low %v5916_v5, %v5917_v49  ;;  %v5941_v51 = vrot.slane %v5917_v49, 7  ;;  %v6229_v21 = vmul.f32 %v13049_v29, %v6225_v11 }
0x17b9   :  { %v5944_v41 = vmul.f32 %v13028_v52, %v5940_v43  ;;  %v6213_v60 = vrot.slane %v6206_v48, %v12090_v12  ;;  %v6230_v13 = vmul.f32 %v13053_v0, %v6226_v7  ;;  %10294 = vpow2.f32 %v5630_v31 }
0x17ba   :  { %v5927_v47 = vrot.slane %v5920_v26, %v12090_v12  ;;  %v5945_v20 = vmul.f32 %v13034_v19, %v5941_v51  ;;  %5908 = vst.msk [vmem:[#allocation3 + $0x2] ss:$8 sm:$0x3] %vm12119_vm15, %v5906_v22  ;;  %v6231_v6 = vadd.f32 %v6229_v21, %v13041_v35  ;;  %v6884_v53 = vmul.f32 %v13075_v32, %v6867_v25 }
0x17bb   :  { %v5946_v4 = vadd.f32 %v5944_v41, %v13026_v16  ;;  %v6214_v5 = vcombine.high %v6213_v60, %v6213_v60  ;;  %v6232_v3 = vadd.f32 %v6230_v13, %v13044_v14  ;;  %v6877_v32 = vmul.f32 %v13061_v56, %v12878_v63 }
0x17bc   :  { %v5928_v15 = vcombine.high %v5927_v47, %v5927_v47  ;;  %v5947_v54 = vadd.f32 %v5945_v20, %v13030_v34  ;;  %v6254_v30 = vrot.slane %v6231_v6, 7 }
0x17bd   :  { %v5968_v31 = vrot.slane %v5946_v4, 7  ;;  %v6221_v58 = vrot.slane %v6214_v5, %v12090_v12  ;;  %v6235_v49 = vcombine.high %v6231_v6, %v6232_v3  ;;  %v6255_v11 = vrot.slane %v6232_v3, 7 }
0x17be   :  { %v5935_v43 = vrot.slane %v5928_v15, %v12090_v12  ;;  %v5950_v48 = vcombine.high %v5946_v4, %v5947_v54  ;;  %v5969_v7 = vrot.slane %v5947_v54, 7  ;;  %v6258_v22 = vmul.f32 %v13049_v29, %v6254_v30 }
0x17bf   :  { %v5972_v26 = vmul.f32 %v13028_v52, %v5968_v31  ;;  %v6242_v51 = vrot.slane %v6235_v49, %v12090_v12  ;;  %v6259_v21 = vmul.f32 %v13053_v0, %v6255_v11  ;;  %6223 = vst.msk [vmem:[#allocation3 + $0x15] ss:$8 sm:$0x3] %vm12119_vm15, %v6221_v58  ;;  %v13154_v4 = vadd.f32 %v6884_v53, %v6877_v32 }
0x17c0   :  { %v5936_v25 = vcombine.high %v5935_v43, %v5935_v43  ;;  %v5957_v41 = vrot.slane %v5950_v48, %v12090_v12  ;;  %v5973_v60 = vmul.f32 %v13034_v19, %v5969_v7  ;;  %v6260_v13 = vadd.f32 %v6258_v22, %v13041_v35 }
0x17c1   :  { %v5974_v47 = vadd.f32 %v5972_v26, %v13026_v16  ;;  %v6249_v20 = vrot.slane %v6242_v51, %v12090_v12  ;;  %v6261_v6 = vadd.f32 %v6259_v21, %v13044_v14  ;;  %v13160_v15 = vpop.eup %10292 }
0x17c2   :  { %v5964_v5 = vrot.slane %v5957_v41, %v12090_v12  ;;  %v5975_v3 = vadd.f32 %v5973_v60, %v13030_v34  ;;  %5938 = vst.msk [vmem:[#allocation3 + $0x3] ss:$8 sm:$0x3] %vm12119_vm15, %v5936_v25  ;;  %v6284_v56 = vrot.slane %v6260_v13, 7 }
0x17c3   :  { %v5997_v54 = vrot.slane %v5974_v47, 7  ;;  %v6250_v30 = vcombine.high %v6249_v20, %v6249_v20  ;;  %v6264_v31 = vcombine.high %v6260_v13, %v6261_v6  ;;  %v6285_v58 = vrot.slane %v6261_v6, 7  ;;  %v13162_v49 = vpop.eup %10294 }
0x17c4   :  { %v5978_v11 = vcombine.high %v5974_v47, %v5975_v3  ;;  %v5998_v43 = vrot.slane %v5975_v3, 7  ;;  %5966 = vst.msk [vmem:[#allocation3 + $0x4] ss:$8 sm:$0x3] %vm12119_vm15, %v5964_v5  ;;  %v6288_v53 = vmul.f32 %v13160_v15, %v6284_v56 }
0x17c5   :  { %v6001_v48 = vmul.f32 %v13028_v52, %v5997_v54  ;;  %v6271_v7 = vrot.slane %v6264_v31, %v12090_v12  ;;  %6252 = vst.msk [vmem:[#allocation3 + $0x16] ss:$8 sm:$0x3] %vm12119_vm15, %v6250_v30  ;;  %v6289_v22 = vmul.f32 %v13162_v49, %v6285_v58 }
0x17c6   :  { %v5985_v26 = vrot.slane %v5978_v11, %v12090_v12  ;;  %v6002_v51 = vmul.f32 %v13034_v19, %v5998_v43  ;;  %v6290_v21 = vadd.f32 %v6288_v53, %v13058_v23 }
0x17c7   :  { %v6003_v32 = vadd.f32 %v6001_v48, %v13026_v16  ;;  %v6272_v25 = vcombine.high %v6271_v7, %v6271_v7  ;;  %v6291_v41 = vadd.f32 %v6289_v22, %v13066_v36 }
0x17c8   :  { %v5986_v60 = vcombine.high %v5985_v26, %v5985_v26  ;;  %v6004_v13 = vadd.f32 %v6002_v51, %v13030_v34  ;;  %v6312_v47 = vrot.slane %v6290_v21, 7 }
0x17c9   :  { %v6026_v20 = vrot.slane %v6003_v32, 7  ;;  %v6279_v6 = vrot.slane %v6272_v25, %v12090_v12  ;;  %v6294_v5 = vcombine.low %v6290_v21, %v6291_v41  ;;  %v6313_v3 = vrot.slane %v6291_v41, 7 }
0x17ca   :  { %v5993_v56 = vrot.slane %v5986_v60, %v12090_v12  ;;  %v6007_v54 = vcombine.high %v6003_v32, %v6004_v13  ;;  %v6027_v30 = vrot.slane %v6004_v13, 7  ;;  %v6316_v31 = vmul.f32 %v13160_v15, %v6312_v47 }
0x17cb   :  { %v6030_v58 = vmul.f32 %v13028_v52, %v6026_v20  ;;  %v6280_v11 = vcombine.high %v6279_v6, %v6279_v6  ;;  %v6301_v43 = vrot.slane %v6294_v5, %v12090_v12  ;;  %v6317_v53 = vmul.f32 %v13162_v49, %v6313_v3 }
0x17cc   :  { %v6014_v48 = vrot.slane %v6007_v54, %v12090_v12  ;;  %v6031_v7 = vmul.f32 %v13034_v19, %v6027_v30  ;;  %5995 = vst.msk [vmem:[#allocation3 + $0x5] ss:$8 sm:$0x3] %vm12119_vm15, %v5993_v56  ;;  %v6318_v22 = vadd.f32 %v6316_v31, %v13058_v23 }
0x17cd   :  { %v6032_v26 = vadd.f32 %v6030_v58, %v13026_v16  ;;  %6282 = vst.msk [vmem:[#allocation3 + $0x17] ss:$8 sm:$0x3] %vm12119_vm15, %v6280_v11  ;;  %v6308_v52 = vrot.slane %v6301_v43, %v12090_v12  ;;  %v6319_v51 = vadd.f32 %v6317_v53, %v13066_v36 }
0x17ce   :  { %v6021_v21 = vrot.slane %v6014_v48, %v12090_v12  ;;  %v6033_v32 = vadd.f32 %v6031_v7, %v13030_v34  ;;  %v6341_v25 = vrot.slane %v6318_v22, 7 }
0x17cf   :  { %v6056_v19 = vrot.slane %v6032_v26, 7  ;;  %v6322_v41 = vcombine.low %v6318_v22, %v6319_v51  ;;  %v6342_v60 = vrot.slane %v6319_v51, 7  ;;  %6310 = vst.msk [vmem:[#allocation3 + $0x20] ss:$8 sm:$0x3] %vm12119_vm15, %v6308_v52 }
0x17d0   :  { %v6022_v13 = vcombine.high %v6021_v21, %v6021_v21  ;;  %v6036_v16 = vcombine.high %v6032_v26, %v6033_v32  ;;  %v6057_v47 = vrot.slane %v6033_v32, 7  ;;  %v6345_v20 = vmul.f32 %v13160_v15, %v6341_v25 }
0x17d1   :  { %v6060_v6 = vmul.f32 %v13049_v29, %v6056_v19  ;;  %v6329_v5 = vrot.slane %v6322_v41, %v12090_v12  ;;  %v6346_v3 = vmul.f32 %v13162_v49, %v6342_v60 }
0x17d2   :  { %v6043_v34 = vrot.slane %v6036_v16, %v12090_v12  ;;  %6024 = vst.msk [vmem:[#allocation3 + $0x6] ss:$8 sm:$0x3] %vm12119_vm15, %v6022_v13  ;;  %v6061_v56 = vmul.f32 %v13053_v0, %v6057_v47  ;;  %v6347_v54 = vadd.f32 %v6345_v20, %v13058_v23 }
0x17d3   :  { %v6062_v30 = vadd.f32 %v6060_v6, %v13041_v35  ;;  %v6330_v31 = vcombine.high %v6329_v5, %v6329_v5  ;;  %v6348_v58 = vadd.f32 %v6346_v3, %v13066_v36 }
0x17d4   :  { %v6044_v11 = vcombine.high %v6043_v34, %v6043_v34  ;;  %v6063_v43 = vadd.f32 %v6061_v56, %v13044_v14  ;;  %v6370_v53 = vrot.slane %v6347_v54, 7 }
0x17d5   :  { %v6084_v48 = vrot.slane %v6062_v30, 7  ;;  %v6337_v7 = vrot.slane %v6330_v31, %v12090_v12  ;;  %v6351_v22 = vcombine.low %v6347_v54, %v6348_v58  ;;  %v6371_v26 = vrot.slane %v6348_v58, 7 }
0x17d6   :  { %v6051_v52 = vrot.slane %v6044_v11, %v12090_v12  ;;  %v6066_v51 = vcombine.low %v6062_v30, %v6063_v43  ;;  %v6085_v21 = vrot.slane %v6063_v43, 7  ;;  %v6374_v32 = vmul.f32 %v13160_v15, %v6370_v53 }
0x17d7   :  { %v6088_v25 = vmul.f32 %v13049_v29, %v6084_v48  ;;  %v6358_v19 = vrot.slane %v6351_v22, %v12090_v12  ;;  %v6375_v41 = vmul.f32 %v13162_v49, %v6371_v26  ;;  %6339 = vst.msk [vmem:[#allocation3 + $0x21] ss:$8 sm:$0x3] %vm12119_vm15, %v6337_v7 }
0x17d8   :  { %v6052_v60 = vcombine.high %v6051_v52, %v6051_v52  ;;  %v6073_v13 = vrot.slane %v6066_v51, %v12090_v12  ;;  %v6089_v16 = vmul.f32 %v13053_v0, %v6085_v21  ;;  %v6376_v47 = vadd.f32 %v6374_v32, %v13058_v23 }
0x17d9   :  { %v6090_v20 = vadd.f32 %v6088_v25, %v13041_v35  ;;  %v6365_v6 = vrot.slane %v6358_v19, %v12090_v12  ;;  %v6377_v5 = vadd.f32 %v6375_v41, %v13066_v36  ;;  %v6694_v19 = vld [vmem:[%s13968_s6] sm:$0xff] }
0x17da   :  { %6054 = vst.msk [vmem:[#allocation3 + $0x7] ss:$8 sm:$0x3] %vm12119_vm15, %v6052_v60  ;;  %v6080_v3 = vrot.slane %v6073_v13, %v12090_v12  ;;  %v6091_v34 = vadd.f32 %v6089_v16, %v13044_v14  ;;  %v6400_v56 = vrot.slane %v6376_v47, 7 }
0x17db   :  { %v6113_v54 = vrot.slane %v6090_v20, 7  ;;  %v6366_v30 = vcombine.high %v6365_v6, %v6365_v6  ;;  %v6380_v31 = vcombine.low %v6376_v47, %v6377_v5  ;;  %v6401_v58 = vrot.slane %v6377_v5, 7 }
0x17dc   :  { %v6094_v11 = vcombine.low %v6090_v20, %v6091_v34  ;;  %v6114_v43 = vrot.slane %v6091_v34, 7  ;;  %6082 = vst.msk [vmem:[#allocation3 + $0x10] ss:$8 sm:$0x3] %vm12119_vm15, %v6080_v3  ;;  %v6404_v53 = vmul.f32 %v13160_v15, %v6400_v56 }
0x17dd   :  { %v6117_v48 = vmul.f32 %v13049_v29, %v6113_v54  ;;  %v6387_v7 = vrot.slane %v6380_v31, %v12090_v12  ;;  %v6405_v22 = vmul.f32 %v13162_v49, %v6401_v58  ;;  %6368 = vst.msk [vmem:[#allocation3 + $0x22] ss:$8 sm:$0x3] %vm12119_vm15, %v6366_v30  ;;  %v6695_v29 = vld [vmem:[%s13968_s6 + $0x8] sm:$0xff] }
0x17de   :  { %v6101_v26 = vrot.slane %v6094_v11, %v12090_v12  ;;  %v6118_v52 = vmul.f32 %v13053_v0, %v6114_v43  ;;  %v6406_v51 = vadd.f32 %v6404_v53, %v13058_v23  ;;  %v9955_v16 = vpack.c.bf16 %v6695_v29, %v6694_v19  ;;  %v6696_v53 = vld [vmem:[%s13968_s6 + $0x10] sm:$0xff] }
0x17df   :  { %v6119_v21 = vadd.f32 %v6117_v48, %v13041_v35  ;;  %v6388_v32 = vcombine.high %v6387_v7, %v6387_v7  ;;  %v6407_v25 = vadd.f32 %v6405_v22, %v13066_v36  ;;  %v6697_v48 = vld [vmem:[%s13968_s6 + $0x18] sm:$0xff] }
0x17e0   :  { %v6102_v41 = vcombine.high %v6101_v26, %v6101_v26  ;;  %v6120_v60 = vadd.f32 %v6118_v52, %v13044_v14  ;;  %v6428_v13 = vrot.slane %v6406_v51, 7  ;;  %9956 = vmatpush3.bf16.msra.mxu0 %v9955_v16  ;;  %v9203_v26 = vmul.f32 -1.442695, %v12876_v2 }
0x17e1   :  { %v6457_v47 = vld [vmem:[#allocation3] sm:$0xff]  ;;  %v6395_v20 = vrot.slane %v6388_v32, %v12090_v12  ;;  %v6410_v6 = vcombine.high %v6406_v51, %v6407_v25  ;;  %v6429_v5 = vrot.slane %v6407_v25, 7  ;;  %v6458_v34 = vld [vmem:[#allocation3 + $0x8] sm:$0xff]  ;;  %9957 = vmatprep.subr.bf16.mxu0 %v13943_v38 }
0x17e2   :  { %v13246_v0 = vmul.f32 %v13032_v1, %v6457_v47  ;;  %v6109_v35 = vrot.slane %v6102_v41, %v12090_v12  ;;  %v6123_v3 = vcombine.low %v6119_v21, %v6120_v60  ;;  %v6432_v56 = vmul.f32 %v13160_v15, %v6428_v13 }
0x17e3   :  { %v6396_v54 = vcombine.high %v6395_v20, %v6395_v20  ;;  %v6417_v14 = vrot.slane %v6410_v6, %v12090_v12  ;;  %v6433_v30 = vmul.f32 %v13162_v49, %v6429_v5  ;;  %v13266_v49 = vmul.f32 %v13037_v10, %v6458_v34  ;;  %v7012_v6 = vld [vmem:[%s13969_s14] sm:$0x3]  ;;  %v9200_v5 = vld [vmem:[#allocation48] ss:$0 sm:$0xff] }
0x17e4   :  { %v6130_v31 = vrot.slane %v6123_v3, %v12090_v12  ;;  %6111 = vst.msk [vmem:[#allocation3 + $0x11] ss:$8 sm:$0x3] %vm12119_vm15, %v6109_v35  ;;  %6592 = vrot.lane.b32.xlu1 %v13246_v0, %s11209_s10  ;;  %6580 = vrot.lane.b32.xlu0 %v13246_v0, %s11206_s4  ;;  %v6434_v1 = vadd.f32 %v6432_v56, %v13058_v23  ;;  %v9202_v23 = vmul.f32 -1.442695, %v12867_v27  ;;  %v6683_v35 = vpop.permute.xlu0 %6682 }
0x17e5   :  { %v6424_v15 = vrot.slane %v6417_v14, %v12090_v12  ;;  %v6435_v58 = vadd.f32 %v6433_v30, %v13066_v36  ;;  %6398 = vst.msk [vmem:[#allocation3 + $0x23] ss:$8 sm:$0x3] %vm12119_vm15, %v6396_v54  ;;  %v9958_v36 = vpack.c.bf16 %v6697_v48, %v6696_v53  ;;  %9753 = vmatpush3.msk.msra.mxu1 %vm1589_vm6, %v7012_v6  ;;  %v6919_v53 = vld [vmem:[%s11506_s5] sm:$0xff]  ;;  %v6920_v48 = vld [vmem:[%s11506_s5 + $0x8] sm:$0xff] }
0x17e6   :  { %v6137_v11 = vrot.slane %v6130_v31, %v12090_v12  ;;  %10296 = vpow2.f32 %v9202_v23  ;;  %9978 = vmatprep.subr.bf16.mxu1 %v11901_v9  ;;  %v6571_v3 = vmul.f32 %v9200_v5, %v12910_v39 }
0x17e7   :  { %v6438_v43 = vcombine.high %v6434_v1, %v6435_v58  ;;  %6426 = vst.msk [vmem:[#allocation3 + $0x24] ss:$8 sm:$0x3] %vm12119_vm15, %v6424_v15  ;;  %9959 = vmatpush3.bf16.msra.mxu0 %v9958_v36  ;;  %10298 = vpow2.f32 %v9203_v26  ;;  %v9211_v1 = vld [vmem:[%s13970_s26] ss:$0 sm:$0xff] }
0x17e8   :  { %v6138_v7 = vcombine.high %v6137_v11, %v6137_v11  ;;  %6604 = vrot.lane.b32.xlu1 %v13246_v0, %s11210_s11  ;;  %6646 = vrot.lane.b32.xlu0 %v13266_v49, %s11210_s11  ;;  %v13338_v58 = vadd.f32 %v9211_v1, %v13097_v59  ;;  %v6572_v59 = vmul.f32 %v9200_v5, %v12917_v50 }
0x17e9   :  { %v6445_v10 = vrot.slane %v6438_v43, %v12090_v12  ;;  %9963 = vmatprep.subr.bf16.mxu0 %v13943_v38 }
0x17ea   :  { %6140 = vst.msk [vmem:[#allocation3 + $0x12] ss:$8 sm:$0x3] %vm12119_vm15, %v6138_v7  ;;  %v9212_v23 = vmul.f32 -1.442695, %v13338_v58  ;;  %v13344_v7 = vadd.f32 %v9211_v1, %v13123_v45 }
0x17eb   :  { %v6446_v22 = vcombine.high %v6445_v10, %v6445_v10 }
0x17ec   :  { %6622 = vrot.lane.b32.xlu1 %v13266_v49, %s11206_s4 }
0x17ed   :  { %v6453_v52 = vrot.slane %v6446_v22, %v12090_v12  ;;  %v9964_v22 = vpack.c.bf16 %v6920_v48, %v6919_v53 }
0x17ef   :  { %6455 = vst.msk [vmem:[#allocation3 + $0x25] ss:$8 sm:$0x3] %vm12119_vm15, %v6453_v52  ;;  %v6921_v52 = vld [vmem:[%s11506_s5 + $0x10] sm:$0xff] }
0x17f0   :  { %6634 = vrot.lane.b32.xlu1 %v13266_v49, %s11209_s10  ;;  %v10297_v19 = vpop.eup %10296 }
0x17f1   :  { %v6459_v51 = vld [vmem:[#allocation3 + $0x10] sm:$0xff]  ;;  %v6460_v21 = vld [vmem:[#allocation3 + $0x18] sm:$0xff]  ;;  %v6668_v41 = vadd.f32 1.0, %v10297_v19  ;;  %v13351_v19 = vadd.f32 %v9211_v1, %v13154_v4 }
0x17f2   :  { %v13291_v32 = vmul.f32 %v13046_v8, %v6459_v51  ;;  %v13294_v25 = vmul.f32 %v13051_v18, %v6460_v21  ;;  %v10299_v8 = vpop.eup %10298  ;;  %v6922_v51 = vld [vmem:[%s11506_s5 + $0x18] sm:$0xff]  ;;  %v9213_v21 = vmul.f32 -1.442695, %v13344_v7  ;;  %s13971_s5 = sld [smem:[#allocation109_spill]] }
0x17f3   :  { %10300 = vrcp.f32 %v6668_v41  ;;  %v6669_v13 = vadd.f32 1.0, %v10299_v8  ;;  %v9967_v8 = vpack.c.bf16 %v6922_v51, %v6921_v52 }
0x17f4   :  { %6624 = vrot.lane.b32.xlu1 %v13294_v25, %s11206_s4  ;;  %6582 = vrot.lane.b32.xlu0 %v13291_v32, %s11206_s4 }
0x17f5   :  { %10302 = vrcp.f32 %v6669_v13 }
0x17f6   :  { %v6461_v29 = vld [vmem:[#allocation3 + $0x20] sm:$0x3f]  ;;  %v6462_v18 = vld [vmem:[#allocation3 + $0x28] sm:$0x3f]  ;;  %10304 = vpow2.f32 %v9212_v23 }
0x17f7   :  { %v13305_v60 = vmul.f32 %v13068_v24, %v6461_v29  ;;  %v13312_v16 = vmul.f32 %v13072_v42, %v6462_v18  ;;  %v6575_v29 = vadd.f32 %v6572_v59, %v13291_v32  ;;  %10306 = vpow2.f32 %v9213_v21 }
0x17f8   :  { %6636 = vrot.lane.b32.xlu1 %v13294_v25, %s11209_s10  ;;  %6594 = vrot.lane.b32.xlu0 %v13291_v32, %s11209_s10  ;;  %v9214_v18 = vmul.f32 -1.442695, %v13351_v19  ;;  %v9218_v57 = vld [vmem:[%s13971_s5] ss:$0 sm:$0xff] }
0x17fa   :  { %10308 = vpow2.f32 %v9214_v18 }
0x17fc   :  { %6606 = vrot.lane.b32.xlu0 %v13291_v32, %s11210_s11  ;;  %6584 = vrot.lane.b32.xlu1 %v13305_v60, %s11206_s4 }
0x17fd   :  { %v10301_v24 = vpop.eup %10300 }
0x17fe   :  { %v6677_v42 = vmul.f32 %v10301_v24, %v12867_v27  ;;  %v6574_v27 = vadd.f32 %v6571_v3, %v13246_v0 }
0x17ff   :  { %v10303_v47 = vpop.eup %10302 }
0x1800   :  { %6596 = vrot.lane.b32.xlu0 %v13305_v60, %s11209_s10  ;;  %6626 = vrot.lane.b32.xlu1 %v13312_v16, %s11206_s4  ;;  %v6678_v20 = vmul.f32 %v10303_v47, %v12876_v2  ;;  %v10305_v6 = vpop.eup %10304 }
0x1804   :  { %6608 = vrot.lane.b32.xlu0 %v13305_v60, %s11210_s11  ;;  %6638 = vrot.lane.b32.xlu1 %v13312_v16, %s11209_s10 }
0x1808   :  { %6648 = vrot.lane.b32.xlu0 %v13294_v25, %s11210_s11  ;;  %6650 = vrot.lane.b32.xlu1 %v13312_v16, %s11210_s11 }
0x180c   :  { %6684 = vrot.lane.b32.xlu0 %v6677_v42, %s11206_s4  ;;  %v6573_v42 = vmul.f32 %v9200_v5, %v12925_v46 }
0x180e   :  { %v6576_v47 = vadd.f32 %v6573_v42, %v13305_v60 }
0x1810   :  { %6686 = vrot.lane.b32.xlu0 %v6678_v20, %s11206_s4 }
0x1856   :  { %v6593_v34 = vpop.permute.xlu1 %6592  ;;  %v6581_v56 = vpop.permute.xlu0 %6580 }
0x1857   :  { %v6589_v54 = vadd.f32 %v6581_v56, %v6574_v27  ;;  %v6907_v56 = vadd.f32 1.0, %v10305_v6 }
0x1859   :  { %v6601_v2 = vadd.f32 %v6593_v34, %v6589_v54  ;;  %10310 = vrcp.f32 %v6907_v56 }
0x185a   :  { %v6605_v14 = vpop.permute.xlu1 %6604  ;;  %v6647_v11 = vpop.permute.xlu0 %6646 }
0x185b   :  { %v6613_v30 = vadd.f32 %v6605_v14, %v6601_v2  ;;  %v10307_v2 = vpop.eup %10306 }
0x185c   :  { %v6908_v46 = vadd.f32 1.0, %v10307_v2  ;;  %v10309_v1 = vpop.eup %10308 }
0x185d   :  { %v6616_v31 = vadd.f32 %v6613_v30, %v13266_v49 }
0x185e   :  { %v6623_v15 = vpop.permute.xlu1 %6622  ;;  %10312 = vrcp.f32 %v6908_v46 }
0x185f   :  { %v6631_v39 = vadd.f32 %v6623_v15, %v6616_v31 }
0x1862   :  { %v6635_v43 = vpop.permute.xlu1 %6634 }
0x1863   :  { %v6643_v0 = vadd.f32 %v6635_v43, %v6631_v39 }
0x1865   :  { %v6655_v36 = vadd.f32 %v6647_v11, %v6643_v0 }
0x1866   :  { %v6625_v49 = vpop.permute.xlu1 %6624  ;;  %v6583_v10 = vpop.permute.xlu0 %6582 }
0x1867   :  { %v6691_v26 = vmul.f32 %v6683_v35, %v6655_v36  ;;  %v6590_v50 = vadd.f32 %v6583_v10, %v6575_v29  ;;  %v10311_v36 = vpop.eup %10310 }
0x1868   :  { %v10313_v10 = vpop.eup %10312 }
0x1869   :  { %9712 = vmatmul.mubr.msk.f32.vlgmr.msra.gmra.mrb[84].mxu0 %vm1161_vm13, %v6691_v26 }
0x186a   :  { %v6637_v45 = vpop.permute.xlu1 %6636  ;;  %v6595_v41 = vpop.permute.xlu0 %6594  ;;  %9714 = vmatprep.mubr.msk.f32.mxu0 %vm11202_vm7, %v13946_v37  ;;  %9965 = vmatpush3.bf16.msra.mxu0 %v9964_v22  ;;  %v13379_v22 = vmul.f32 %v10313_v10, %v13344_v7  ;;  %v9240_v7 = vmul.f32 -1.442695, %v12865_v40 }
0x186b   :  { %9966 = vmatprep.subr.bf16.mxu0 %v13943_v38  ;;  %v6602_v13 = vadd.f32 %v6595_v41, %v6590_v50 }
0x186e   :  { %v6607_v4 = vpop.permute.xlu0 %6606  ;;  %v6585_v24 = vpop.permute.xlu1 %6584  ;;  %9968 = vmatpush3.bf16.msra.mxu0 %v9967_v8 }
0x186f   :  { %v6614_v32 = vadd.f32 %v6607_v4, %v6602_v13  ;;  %9970 = vmatprep.subr.bf16.mxu0 %v11901_v9  ;;  %v6591_v3 = vadd.f32 %v6585_v24, %v6576_v47 }
0x1871   :  { %v6617_v35 = vadd.f32 %v6614_v32, %v13294_v25  ;;  %v6909_v25 = vadd.f32 1.0, %v10309_v1 }
0x1872   :  { %v6597_v20 = vpop.permute.xlu0 %6596  ;;  %v6627_v27 = vpop.permute.xlu1 %6626 }
0x1873   :  { %v6603_v34 = vadd.f32 %v6597_v20, %v6591_v3  ;;  %v6632_v30 = vadd.f32 %v6625_v49, %v6617_v35  ;;  %10314 = vrcp.f32 %v6909_v25  ;;  %v13371_v49 = vmul.f32 %v10311_v36, %v13338_v58 }
0x1874   :  { %10316 = vpow2.f32 %v9240_v7 }
0x1875   :  { %v6644_v15 = vadd.f32 %v6637_v45, %v6632_v30 }
0x1876   :  { %v6609_v54 = vpop.permute.xlu0 %6608  ;;  %v6639_v9 = vpop.permute.xlu1 %6638 }
0x1877   :  { %v6615_v14 = vadd.f32 %v6609_v54, %v6603_v34 }
0x1879   :  { %v6618_v31 = vadd.f32 %v6615_v14, %v13312_v16 }
0x187a   :  { %v6649_v5 = vpop.permute.xlu0 %6648  ;;  %v6651_v53 = vpop.permute.xlu1 %6650 }
0x187b   :  { %v6633_v60 = vadd.f32 %v6627_v27, %v6618_v31  ;;  %v6656_v11 = vadd.f32 %v6649_v5, %v6644_v15 }
0x187d   :  { %v6645_v39 = vadd.f32 %v6639_v9, %v6633_v60  ;;  %v10315_v26 = vpop.eup %10314 }
0x187e   :  { %v6685_v43 = vpop.permute.xlu0 %6684  ;;  %v13388_v58 = vmul.f32 %v10315_v26, %v13351_v19  ;;  %v10317_v59 = vpop.eup %10316 }
0x187f   :  { %v6692_v0 = vmul.f32 %v6685_v43, %v6656_v11  ;;  %v6657_v48 = vadd.f32 %v6651_v53, %v6645_v39  ;;  %v8299_v52 = vadd.f32 1.0, %v10317_v59 }
0x1881   :  { %9715 = vmatmul.mubr.msk.f32.gmra.mrb[86].mxu0 %vm1161_vm13, %v6692_v0  ;;  %10318 = vrcp.f32 %v8299_v52  ;;  %v7139_v52 = vld [vmem:[%s13972_s0] sm:$0x3] }
0x1882   :  { %v6687_v23 = vpop.permute.xlu0 %6686  ;;  %9717 = vmatprep.mubr.msk.f32.mxu0 %vm11202_vm7, %v13946_v37 }
0x1883   :  { %v6693_v16 = vmul.f32 %v6687_v23, %v6657_v48 }
0x1885   :  { %9718 = vmatmul.mubr.msk.f32.gmra.mrb[88].mxu0 %vm1161_vm13, %v6693_v16 }
0x1886   :  { %9743 = vmatprep.mubr.msk.f32.mxu0 %vm11202_vm7, %v13946_v37 }
0x1889   :  { %9744 = vmatmul.mubr.msk.f32.vlgmr.msra.gmra.mrb[90].mxu0 %vm1161_vm13, %v13371_v49 }
0x188a   :  { %9746 = vmatprep.mubr.msk.f32.mxu0 %vm11202_vm7, %v13946_v37  ;;  %9972 = vmatpush1.bf16.msra.mxu0 %v11921_v44 }
0x188b   :  { %9974 = vmatprep.subr.bf16.mxu0 %v11952_v28 }
0x188d   :  { %9747 = vmatmul.mubr.msk.f32.gmra.mrb[92].mxu0 %vm1161_vm13, %v13379_v22 }
0x188e   :  { %9749 = vmatprep.mubr.msk.f32.mxu0 %vm11202_vm7, %v13946_v37  ;;  %9976 = vmatpush1.bf16.msra.mxu0 %v11964_v55 }
0x188f   :  { %9229 = vmatprep.subr.msk.mxu0 %vm11966_vm11, %v13947_v17 }
0x1891   :  { %9750 = vmatmul.mubr.msk.f32.gmra.mrb[94].mxu0 %vm1161_vm13, %v13388_v58 }
0x1892   :  { %7216 = vmatprep.mubr.f32.mxu0 %v13946_v37 }
0x195c   :  { %v6998_v51 = vpop.f32.mrb[90].mxu0 }
0x195d   :  { %7359 = vrot.lane.b32.xlu1 %v6998_v51, %s11204_s7  ;;  %v9745_v21 = vpop.f32.mrb[91].mxu0  ;;  %9755 = vmatmul.mubr.msk.f32.vlgmr.msra.gmra.mrb[96].mxu1 %vm1579_vm8, %v6998_v51 }
0x195e   :  { %9757 = vmatprep.mubr.msk.f32.mxu1 %vm11202_vm7, %v13946_v37  ;;  %9980 = vmatpush1.bf16.msra.mxu1 %v11921_v44 }
0x195f   :  { %9982 = vmatprep.subr.bf16.mxu1 %v11952_v28  ;;  %v10319_v28 = vpop.eup %10318 }
0x1960   :  { %v7003_v19 = vpop.f32.mrb[92].mxu0 }
0x1961   :  { %7361 = vrot.lane.b32.xlu0 %v7003_v19, %s11204_s7  ;;  %v9748_v29 = vpop.f32.mrb[93].mxu0  ;;  %9758 = vmatmul.mubr.msk.f32.gmra.mrb[98].mxu1 %vm1579_vm8, %v7003_v19 }
0x1962   :  { %9760 = vmatprep.mubr.msk.f32.mxu1 %vm11202_vm7, %v13946_v37  ;;  %9984 = vmatpush1.bf16.msra.mxu1 %v11964_v55  ;;  %v8308_v55 = vmul.f32 %v10319_v28, %v12865_v40 }
0x1963   :  { %9234 = vmatprep.subr.msk.mxu1 %vm11966_vm11, %v13947_v17 }
0x1964   :  { %v7008_v45 = vpop.f32.mrb[94].mxu0 }
0x1965   :  { %8095 = vrot.lane.b32.xlu0 %v6998_v51, %s11205_s19  ;;  %7363 = vrot.lane.b32.xlu1 %v7008_v45, %s11204_s7  ;;  %v9751_v44 = vpop.f32.mrb[95].mxu0  ;;  %v7140_v51 = vmul.f32 1.442695, %v7139_v52 }
0x1966   :  { %9761 = vmatmul.mubr.msk.f32.gmra.mrb[100].mxu1 %vm1579_vm8, %v7008_v45 }
0x1967   :  { %7340 = vmatprep.mubr.f32.mxu1 %v13946_v37 }
0x1969   :  { %8099 = vrot.lane.b32.xlu0 %v7008_v45, %s11205_s19  ;;  %8097 = vrot.lane.b32.xlu1 %v7003_v19, %s11205_s19 }
0x196d   :  { %8314 = vrot.lane.b32.xlu0 %v8308_v55, %s11206_s4 }
0x19cf   :  { %v7360_v36 = vpop.permute.xlu1 %7359 }
0x19d3   :  { %v7362_v10 = vpop.permute.xlu0 %7361 }
0x19d7   :  { %v8096_v26 = vpop.permute.xlu0 %8095 }
0x19db   :  { %v8100_v59 = vpop.permute.xlu0 %8099 }
0x1a30   :  { %v7098_v41 = vpop.f32.mrb[96].mxu1 }
0x1a31   :  { %v7099_v8 = vadd.f32 %v9218_v57, %v7098_v41  ;;  %v9756_v50 = vpop.f32.mrb[97].mxu1 }
0x1a33   :  { %v7115_v18 = vand.u32 2147483647, %v7099_v8  ;;  %v7112_v5 = vmax.f32 %v7099_v8, 0.0 }
0x1a34   :  { %v7103_v13 = vpop.f32.mrb[98].mxu1 }
0x1a35   :  { %v7118_v4 = vsub.f32 0.0, %v7115_v18  ;;  %v7104_v24 = vadd.f32 %v9218_v57, %v7103_v13  ;;  %v9759_v32 = vpop.f32.mrb[99].mxu1 }
0x1a37   :  { %v7121_v42 = vmul.f32 1.442695, %v7118_v4  ;;  %v7116_v47 = vand.u32 2147483647, %v7104_v24  ;;  %v7113_v11 = vmax.f32 %v7104_v24, 0.0 }
0x1a39   :  { %10320 = vpow2.f32 %v7121_v42  ;;  %v7119_v20 = vsub.f32 0.0, %v7116_v47  ;;  %v7108_v6 = vpop.f32.mrb[100].mxu1 }
0x1a3a   :  { %v7109_v35 = vadd.f32 %v9218_v57, %v7108_v6  ;;  %v9762_v3 = vpop.f32.mrb[101].mxu1  ;;  %v13973_v57 = vld [vmem:[#allocation121_spill] sm:$0xff] }
0x1a3b   :  { %v7123_v27 = vmul.f32 1.442695, %v7119_v20 }
0x1a3c   :  { %v7117_v40 = vand.u32 2147483647, %v7109_v35  ;;  %v7114_v48 = vmax.f32 %v7109_v35, 0.0 }
0x1a3d   :  { %10322 = vpow2.f32 %v7123_v27 }
0x1a3e   :  { %v7120_v34 = vsub.f32 0.0, %v7117_v40 }
0x1a40   :  { %v7125_v56 = vmul.f32 1.442695, %v7120_v34 }
0x1a42   :  { %10324 = vpow2.f32 %v7125_v56 }
0x1a43   :  { %v10321_v54 = vpop.eup %10320 }
0x1a44   :  { %v7127_v2 = vadd.f32 1.0, %v10321_v54 }
0x1a46   :  { %10326 = vlog2.f32 %v7127_v2 }
0x1a47   :  { %v10323_v14 = vpop.eup %10322 }
0x1a48   :  { %v7128_v30 = vadd.f32 1.0, %v10323_v14 }
0x1a4a   :  { %10328 = vlog2.f32 %v7128_v30 }
0x1a4c   :  { %v10325_v31 = vpop.eup %10324 }
0x1a4d   :  { %v7129_v46 = vadd.f32 1.0, %v10325_v31 }
0x1a4f   :  { %10330 = vlog2.f32 %v7129_v46 }
0x1a50   :  { %v10327_v9 = vpop.eup %10326  ;;  %10332 = vpow2.f32 %v7140_v51 }
0x1a51   :  { %v7131_v1 = vmul.f32 0.6931472, %v10327_v9 }
0x1a53   :  { %v7136_v60 = vadd.f32 %v7131_v1, %v7112_v5 }
0x1a54   :  { %v10329_v15 = vpop.eup %10328 }
0x1a55   :  { %v7264_v39 = vmul.f32 %v7136_v60, %v13371_v49  ;;  %v7133_v25 = vmul.f32 0.6931472, %v10329_v15  ;;  %9223 = vmatmul.mubr.msk.f32.vlgmr.msra.gmra.mrb[96].mxu0 %vm1161_vm13, %v7136_v60 }
0x1a56   :  { %7222 = vmatprep.mubr.f32.mxu0 %v13946_v37  ;;  %9230 = vmatpush1.msk.msra.mxu0 %vm11979_vm0, %v13947_v17 }
0x1a57   :  { %v7137_v43 = vadd.f32 %v7133_v25, %v7113_v11  ;;  %9226 = vmatmul.mubr.msk.f32.vlgmr.msra.gmra.mrb[102].mxu1 %vm1161_vm13, %v7264_v39  ;;  %9985 = vmatprep.subr.bf16.mxu0 %v13943_v38 }
0x1a58   :  { %7346 = vmatprep.mubr.f32.mxu1 %v13946_v37  ;;  %9235 = vmatpush1.msk.msra.mxu1 %vm11979_vm0, %v13947_v17  ;;  %v7364_v17 = vpop.permute.xlu1 %7363 }
0x1a59   :  { %v10331_v0 = vpop.eup %10330  ;;  %v7265_v53 = vmul.f32 %v7137_v43, %v13379_v22  ;;  %9224 = vmatmul.mubr.msk.f32.gmra.mrb[98].mxu0 %vm1161_vm13, %v7137_v43  ;;  %9991 = vmatprep.subr.bf16.mxu1 %v13943_v38 }
0x1a5a   :  { %v7135_v23 = vmul.f32 0.6931472, %v10331_v0  ;;  %7228 = vmatprep.mubr.f32.mxu0 %v13946_v37  ;;  %v10333_v21 = vpop.eup %10332 }
0x1a5b   :  { %9227 = vmatmul.mubr.msk.f32.gmra.mrb[104].mxu1 %vm1161_vm13, %v7265_v53  ;;  %v7142_v19 = vsub.f32 0.0, %v10333_v21 }
0x1a5c   :  { %v7138_v16 = vadd.f32 %v7135_v23, %v7114_v48  ;;  %7352 = vmatprep.mubr.f32.mxu1 %v13946_v37  ;;  %v8098_v7 = vpop.permute.xlu1 %8097 }
0x1a5d   :  { %v7239_v28 = vrot.slane %v7142_v19, %v11817_v61  ;;  %v7243_v41 = vrot.slane %v7142_v19, %v13973_v57 }
0x1a5e   :  { %v7266_v62 = vmul.f32 %v7138_v16, %v13388_v58  ;;  %9225 = vmatmul.mubr.msk.f32.gmra.mrb[100].mxu0 %vm1161_vm13, %v7138_v16 }
0x1a5f   :  { %7435 = vmatprep.mubr.f32.mxu0 %v13946_v37 }
0x1a60   :  { %9228 = vmatmul.mubr.msk.f32.gmra.mrb[106].mxu1 %vm1161_vm13, %v7266_v62 }
0x1a61   :  { %8171 = vmatprep.mubr.f32.mxu1 %v13946_v37 }
0x1a62   :  { %9231 = vmatmul.mubr.msk.f32.vlgmr.msra.gmra.mrb[102].mxu0 %vm692_vm12, %v7360_v36 }
0x1a63   :  { %7441 = vmatprep.mubr.f32.mxu0 %v13946_v37 }
0x1a64   :  { %9236 = vmatmul.mubr.msk.f32.vlgmr.msra.gmra.mrb[108].mxu1 %vm692_vm12, %v8096_v26 }
0x1a65   :  { %8177 = vmatprep.mubr.f32.mxu1 %v13946_v37 }
0x1a66   :  { %9232 = vmatmul.mubr.msk.f32.gmra.mrb[104].mxu0 %vm692_vm12, %v7362_v10 }
0x1a67   :  { %7447 = vmatprep.mubr.f32.mxu0 %v13946_v37 }
0x1a68   :  { %9237 = vmatmul.mubr.msk.f32.gmra.mrb[110].mxu1 %vm692_vm12, %v8098_v7 }
0x1a69   :  { %8183 = vmatprep.mubr.f32.mxu1 %v13946_v37 }
0x1a6a   :  { %9233 = vmatmul.mubr.msk.f32.gmra.mrb[106].mxu0 %vm692_vm12, %v7364_v17 }
0x1a6b   :  { %9771 = vmatprep.mubr.msk.f32.mxu0 %vm11202_vm7, %v13946_v37 }
0x1a6c   :  { %9238 = vmatmul.mubr.msk.f32.gmra.mrb[112].mxu1 %vm692_vm12, %v8100_v59 }
0x1a6d   :  { %9788 = vmatprep.mubr.msk.f32.mxu1 %vm11202_vm7, %v13946_v37 }
0x1b28   :  { %v7218_v29 = vpop.f32.mrb[96].mxu0 }
0x1b29   :  { %v7220_v45 = vpop.f32.mrb[97].mxu0  ;;  %v7246_v1 = vmul.f32 %v7239_v28, %v7218_v29 }
0x1b2a   :  { %v7342_v44 = vpop.f32.mrb[102].mxu1  ;;  %v7247_v11 = vmul.f32 %v7243_v41, %v7220_v45 }
0x1b2b   :  { %v7344_v55 = vpop.f32.mrb[103].mxu1  ;;  %v7252_v36 = vmul.f32 1.442695, %v7246_v1 }
0x1b2c   :  { %v7224_v8 = vpop.f32.mrb[98].mxu0  ;;  %v7254_v7 = vmul.f32 1.442695, %v7247_v11 }
0x1b2d   :  { %v7248_v50 = vmul.f32 %v7239_v28, %v7224_v8  ;;  %v7226_v18 = vpop.f32.mrb[99].mxu0 }
0x1b2e   :  { %v7249_v13 = vmul.f32 %v7243_v41, %v7226_v18  ;;  %v7348_v4 = vpop.f32.mrb[104].mxu1 }
0x1b2f   :  { %v7256_v24 = vmul.f32 1.442695, %v7248_v50  ;;  %v7350_v32 = vpop.f32.mrb[105].mxu1 }
0x1b30   :  { %v7258_v42 = vmul.f32 1.442695, %v7249_v13 }
0x1b31   :  { %10334 = vpow2.f32 %v7256_v24  ;;  %v7230_v47 = vpop.f32.mrb[100].mxu0 }
0x1b32   :  { %10336 = vpow2.f32 %v7258_v42  ;;  %v7250_v20 = vmul.f32 %v7239_v28, %v7230_v47  ;;  %v7232_v6 = vpop.f32.mrb[101].mxu0 }
0x1b33   :  { %v7251_v35 = vmul.f32 %v7243_v41, %v7232_v6  ;;  %v7354_v3 = vpop.f32.mrb[106].mxu1 }
0x1b34   :  { %v7260_v27 = vmul.f32 1.442695, %v7250_v20  ;;  %v7356_v61 = vpop.f32.mrb[107].mxu1 }
0x1b35   :  { %v7262_v40 = vmul.f32 1.442695, %v7251_v35  ;;  %v7437_v34 = vpop.f32.mrb[102].mxu0 }
0x1b36   :  { %10338 = vpow2.f32 %v7260_v27  ;;  %v13460_v56 = vmul.f32 %v7437_v34, %v7342_v44  ;;  %v7439_v54 = vpop.f32.mrb[103].mxu0 }
0x1b37   :  { %10340 = vpow2.f32 %v7262_v40  ;;  %v13462_v2 = vmul.f32 %v7439_v54, %v7344_v55  ;;  %v13464_v14 = vpop.f32.mrb[108].mxu1 }
0x1b38   :  { %v13466_v30 = vpop.f32.mrb[109].mxu1  ;;  %10342 = vpow2.f32 %v7252_v36 }
0x1b39   :  { %v7443_v31 = vpop.f32.mrb[104].mxu0  ;;  %10344 = vpow2.f32 %v7254_v7 }
0x1b3a   :  { %v13468_v46 = vmul.f32 %v7443_v31, %v7348_v4  ;;  %v7445_v9 = vpop.f32.mrb[105].mxu0 }
0x1b3b   :  { %v13470_v5 = vpop.eup %10334  ;;  %v13472_v60 = vmul.f32 %v7445_v9, %v7350_v32  ;;  %v13474_v15 = vpop.f32.mrb[110].mxu1 }
0x1b3c   :  { %v13476_v39 = vpop.eup %10336  ;;  %v7460_v25 = vmul.f32 0.0, %v13470_v5  ;;  %v13479_v43 = vpop.f32.mrb[111].mxu1 }
0x1b3d   :  { %v7461_v0 = vmul.f32 0.0, %v13476_v39  ;;  %v7449_v53 = vpop.f32.mrb[106].mxu0 }
0x1b3e   :  { %v7462_v48 = vadd.f32 %v7460_v25, %v13468_v46  ;;  %v13483_v23 = vmul.f32 %v7449_v53, %v7354_v3  ;;  %v7451_v16 = vpop.f32.mrb[107].mxu0 }
0x1b3f   :  { %v7463_v10 = vadd.f32 %v7461_v0, %v13472_v60  ;;  %v13486_v62 = vmul.f32 %v7451_v16, %v7356_v61  ;;  %v13488_v17 = vpop.f32.mrb[112].mxu1 }
0x1b40   :  { %v13490_v26 = vpop.eup %10338  ;;  %v7485_v59 = vrot.slane %v7462_v48, 1  ;;  %v13492_v52 = vpop.f32.mrb[113].mxu1 }
0x1b41   :  { %v13494_v51 = vpop.eup %10340  ;;  %v7466_v21 = vcombine.low %v7462_v48, %v7463_v10  ;;  %v7486_v19 = vrot.slane %v7463_v10, 1  ;;  %v7774_v29 = vmul.f32 0.0, %v13490_v26 }
0x1b42   :  { %v7489_v45 = vmul.f32 %v13470_v5, %v7485_v59  ;;  %v7775_v44 = vmul.f32 0.0, %v13494_v51  ;;  %v13519_v36 = vpop.eup %10342 }
0x1b43   :  { %v7473_v28 = vrot.slane %v7466_v21, %v12090_v12  ;;  %v7490_v55 = vmul.f32 %v13476_v39, %v7486_v19  ;;  %v7776_v57 = vadd.f32 %v7774_v29, %v13483_v23  ;;  %v13523_v19 = vpop.eup %10344 }
0x1b44   :  { %v7491_v41 = vadd.f32 %v7489_v45, %v13468_v46  ;;  %v7777_v8 = vadd.f32 %v7775_v44, %v13486_v62 }
0x1b45   :  { %v7480_v50 = vrot.slane %v7473_v28, %v12090_v12  ;;  %v7492_v18 = vadd.f32 %v7490_v55, %v13472_v60  ;;  %v7799_v13 = vrot.slane %v7776_v57, 1 }
0x1b46   :  { %v7514_v4 = vrot.slane %v7491_v41, 1  ;;  %v7780_v24 = vcombine.high %v7776_v57, %v7777_v8  ;;  %v7800_v32 = vrot.slane %v7777_v8, 1 }
0x1b47   :  { %v7481_v42 = vcombine.high %v7480_v50, %v7480_v50  ;;  %v7495_v47 = vcombine.low %v7491_v41, %v7492_v18  ;;  %v7515_v20 = vrot.slane %v7492_v18, 1  ;;  %v7803_v6 = vmul.f32 %v13490_v26, %v7799_v13 }
0x1b48   :  { %v7518_v35 = vmul.f32 %v13470_v5, %v7514_v4  ;;  %v7787_v3 = vrot.slane %v7780_v24, %v12090_v12  ;;  %v7804_v27 = vmul.f32 %v13494_v51, %v7800_v32 }
0x1b49   :  { %v7502_v61 = vrot.slane %v7495_v47, %v12090_v12  ;;  %v7519_v40 = vmul.f32 %v13476_v39, %v7515_v20  ;;  %7483 = vst.msk [vmem:[#allocation3 + $0x12] ss:$8 sm:$0x3] %vm12119_vm15, %v7481_v42  ;;  %v7805_v34 = vadd.f32 %v7803_v6, %v13483_v23 }
0x1b4a   :  { %v7520_v54 = vadd.f32 %v7518_v35, %v13468_v46  ;;  %v7788_v31 = vcombine.high %v7787_v3, %v7787_v3  ;;  %v7806_v9 = vadd.f32 %v7804_v27, %v13486_v62 }
0x1b4b   :  { %v7503_v1 = vcombine.high %v7502_v61, %v7502_v61  ;;  %v7521_v11 = vadd.f32 %v7519_v40, %v13472_v60  ;;  %v7827_v25 = vrot.slane %v7805_v34, 1 }
0x1b4c   :  { %v7542_v0 = vrot.slane %v7520_v54, 1  ;;  %v7795_v53 = vrot.slane %v7788_v31, %v12090_v12  ;;  %v7809_v48 = vcombine.high %v7805_v34, %v7806_v9  ;;  %v7828_v16 = vrot.slane %v7806_v9, 1 }
0x1b4d   :  { %v7510_v10 = vrot.slane %v7503_v1, %v12090_v12  ;;  %v7524_v7 = vcombine.low %v7520_v54, %v7521_v11  ;;  %v7543_v59 = vrot.slane %v7521_v11, 1  ;;  %v7831_v21 = vmul.f32 %v13490_v26, %v7827_v25 }
0x1b4e   :  { %v7546_v29 = vmul.f32 %v13519_v36, %v7542_v0  ;;  %v7816_v45 = vrot.slane %v7809_v48, %v12090_v12  ;;  %v7832_v44 = vmul.f32 %v13494_v51, %v7828_v16  ;;  %7797 = vst.msk [vmem:[#allocation3 + $0x25] ss:$8 sm:$0x3] %vm12119_vm15, %v7795_v53 }
0x1b4f   :  { %v7531_v28 = vrot.slane %v7524_v7, %v12090_v12  ;;  %v7547_v55 = vmul.f32 %v13523_v19, %v7543_v59  ;;  %7512 = vst.msk [vmem:[#allocation3 + $0x11] ss:$8 sm:$0x3] %vm12119_vm15, %v7510_v10  ;;  %v7833_v57 = vadd.f32 %v7831_v21, %v13483_v23 }
0x1b50   :  { %v7548_v41 = vadd.f32 %v7546_v29, %v13460_v56  ;;  %v7823_v8 = vrot.slane %v7816_v45, %v12090_v12  ;;  %v7834_v50 = vadd.f32 %v7832_v44, %v13486_v62 }
0x1b51   :  { %v7538_v18 = vrot.slane %v7531_v28, %v12090_v12  ;;  %v7549_v13 = vadd.f32 %v7547_v55, %v13462_v2  ;;  %v7857_v4 = vrot.slane %v7833_v57, 1 }
0x1b52   :  { %v7572_v24 = vrot.slane %v7548_v41, 1  ;;  %v7837_v32 = vcombine.low %v7833_v57, %v7834_v50  ;;  %v7858_v42 = vrot.slane %v7834_v50, 1  ;;  %7825 = vst.msk [vmem:[#allocation3 + $0x24] ss:$8 sm:$0x3] %vm12119_vm15, %v7823_v8 }
0x1b53   :  { %v7552_v47 = vcombine.high %v7548_v41, %v7549_v13  ;;  %v7573_v20 = vrot.slane %v7549_v13, 1  ;;  %7540 = vst.msk [vmem:[#allocation3 + $0x10] ss:$8 sm:$0x3] %vm12119_vm15, %v7538_v18  ;;  %v7861_v6 = vmul.f32 %v13490_v26, %v7857_v4 }
0x1b54   :  { %v7576_v35 = vmul.f32 %v13519_v36, %v7572_v24  ;;  %v7844_v3 = vrot.slane %v7837_v32, %v12090_v12  ;;  %v7862_v27 = vmul.f32 %v13494_v51, %v7858_v42 }
0x1b55   :  { %v7559_v61 = vrot.slane %v7552_v47, %v12090_v12  ;;  %v7577_v40 = vmul.f32 %v13523_v19, %v7573_v20  ;;  %v7863_v34 = vadd.f32 %v7861_v6, %v13483_v23 }
0x1b56   :  { %v7578_v54 = vadd.f32 %v7576_v35, %v13460_v56  ;;  %v7845_v31 = vcombine.high %v7844_v3, %v7844_v3  ;;  %v7864_v9 = vadd.f32 %v7862_v27, %v13486_v62 }
0x1b57   :  { %v7560_v1 = vcombine.high %v7559_v61, %v7559_v61  ;;  %v7579_v11 = vadd.f32 %v7577_v40, %v13462_v2  ;;  %v7886_v25 = vrot.slane %v7863_v34, 1 }
0x1b58   :  { %v7601_v0 = vrot.slane %v7578_v54, 1  ;;  %v7852_v53 = vrot.slane %v7845_v31, %v12090_v12  ;;  %v7867_v48 = vcombine.low %v7863_v34, %v7864_v9  ;;  %v7887_v16 = vrot.slane %v7864_v9, 1 }
0x1b59   :  { %v7567_v10 = vrot.slane %v7560_v1, %v12090_v12  ;;  %v7582_v7 = vcombine.high %v7578_v54, %v7579_v11  ;;  %v7602_v59 = vrot.slane %v7579_v11, 1  ;;  %v7890_v21 = vmul.f32 %v13490_v26, %v7886_v25 }
0x1b5a   :  { %v7605_v29 = vmul.f32 %v13519_v36, %v7601_v0  ;;  %v7853_v45 = vcombine.high %v7852_v53, %v7852_v53  ;;  %v7874_v44 = vrot.slane %v7867_v48, %v12090_v12  ;;  %v7891_v28 = vmul.f32 %v13494_v51, %v7887_v16 }
0x1b5b   :  { %v7568_v55 = vcombine.high %v7567_v10, %v7567_v10  ;;  %v7589_v57 = vrot.slane %v7582_v7, %v12090_v12  ;;  %v7606_v41 = vmul.f32 %v13523_v19, %v7602_v59  ;;  %v7892_v8 = vadd.f32 %v7890_v21, %v13483_v23 }
0x1b5c   :  { %v7607_v50 = vadd.f32 %v7605_v29, %v13460_v56  ;;  %v7881_v18 = vrot.slane %v7874_v44, %v12090_v12  ;;  %v7893_v13 = vadd.f32 %v7891_v28, %v13486_v62  ;;  %7855 = vst.msk [vmem:[#allocation3 + $0x23] ss:$8 sm:$0x3] %vm12119_vm15, %v7853_v45 }
0x1b5d   :  { %v7596_v4 = vrot.slane %v7589_v57, %v12090_v12  ;;  %v7608_v24 = vadd.f32 %v7606_v41, %v13462_v2  ;;  %7570 = vst.msk [vmem:[#allocation3 + $0x7] ss:$8 sm:$0x3] %vm12119_vm15, %v7568_v55  ;;  %v7915_v32 = vrot.slane %v7892_v8, 1 }
0x1b5e   :  { %v7630_v42 = vrot.slane %v7607_v50, 1  ;;  %v7882_v47 = vcombine.high %v7881_v18, %v7881_v18  ;;  %v7896_v20 = vcombine.low %v7892_v8, %v7893_v13  ;;  %v7916_v6 = vrot.slane %v7893_v13, 1 }
0x1b5f   :  { %v7597_v35 = vcombine.high %v7596_v4, %v7596_v4  ;;  %v7611_v3 = vcombine.high %v7607_v50, %v7608_v24  ;;  %v7631_v27 = vrot.slane %v7608_v24, 1  ;;  %v7919_v61 = vmul.f32 %v13490_v26, %v7915_v32 }
0x1b60   :  { %v7634_v40 = vmul.f32 %v13519_v36, %v7630_v42  ;;  %v7903_v34 = vrot.slane %v7896_v20, %v12090_v12  ;;  %v7920_v54 = vmul.f32 %v13494_v51, %v7916_v6  ;;  %7884 = vst.msk [vmem:[#allocation3 + $0x22] ss:$8 sm:$0x3] %vm12119_vm15, %v7882_v47 }
0x1b61   :  { %v7618_v31 = vrot.slane %v7611_v3, %v12090_v12  ;;  %v7635_v9 = vmul.f32 %v13523_v19, %v7631_v27  ;;  %7599 = vst.msk [vmem:[#allocation3 + $0x6] ss:$8 sm:$0x3] %vm12119_vm15, %v7597_v35  ;;  %v7921_v1 = vadd.f32 %v7919_v61, %v13483_v23 }
0x1b62   :  { %v7636_v26 = vadd.f32 %v7634_v40, %v13460_v56  ;;  %v7904_v11 = vcombine.high %v7903_v34, %v7903_v34  ;;  %v7922_v25 = vadd.f32 %v7920_v54, %v13486_v62 }
0x1b63   :  { %v7619_v0 = vcombine.high %v7618_v31, %v7618_v31  ;;  %v7637_v51 = vadd.f32 %v7635_v9, %v13462_v2  ;;  %v7943_v53 = vrot.slane %v7921_v1, 1 }
0x1b64   :  { %v7658_v48 = vrot.slane %v7636_v26, 1  ;;  %v7911_v16 = vrot.slane %v7904_v11, %v12090_v12  ;;  %v7925_v10 = vcombine.low %v7921_v1, %v7922_v25  ;;  %v7944_v7 = vrot.slane %v7922_v25, 1 }
0x1b65   :  { %v7626_v59 = vrot.slane %v7619_v0, %v12090_v12  ;;  %v7640_v21 = vcombine.high %v7636_v26, %v7637_v51  ;;  %v7659_v29 = vrot.slane %v7637_v51, 1  ;;  %v7947_v23 = vmul.f32 %v13470_v5, %v7943_v53 }
0x1b66   :  { %v7662_v45 = vmul.f32 %v13519_v36, %v7658_v48  ;;  %v7932_v44 = vrot.slane %v7925_v10, %v12090_v12  ;;  %v7948_v62 = vmul.f32 %v13476_v39, %v7944_v7  ;;  %7913 = vst.msk [vmem:[#allocation3 + $0x21] ss:$8 sm:$0x3] %vm12119_vm15, %v7911_v16 }
0x1b67   :  { %v7647_v28 = vrot.slane %v7640_v21, %v12090_v12  ;;  %v7663_v55 = vmul.f32 %v13523_v19, %v7659_v29  ;;  %7628 = vst.msk [vmem:[#allocation3 + $0x5] ss:$8 sm:$0x3] %vm12119_vm15, %v7626_v59  ;;  %v7949_v57 = vadd.f32 %v7947_v23, %v13468_v46 }
0x1b68   :  { %v7664_v41 = vadd.f32 %v7662_v45, %v13460_v56  ;;  %v7939_v8 = vrot.slane %v7932_v44, %v12090_v12  ;;  %v7950_v50 = vadd.f32 %v7948_v62, %v13472_v60 }
0x1b69   :  { %v7654_v18 = vrot.slane %v7647_v28, %v12090_v12  ;;  %v7665_v13 = vadd.f32 %v7663_v55, %v13462_v2  ;;  %v7973_v4 = vrot.slane %v7949_v57, 1 }
0x1b6a   :  { %v7688_v24 = vrot.slane %v7664_v41, 1  ;;  %v7953_v32 = vcombine.high %v7949_v57, %v7950_v50  ;;  %v7974_v42 = vrot.slane %v7950_v50, 1  ;;  %7941 = vst.msk [vmem:[#allocation3 + $0x20] ss:$8 sm:$0x3] %vm12119_vm15, %v7939_v8 }
0x1b6b   :  { %v7668_v47 = vcombine.low %v7664_v41, %v7665_v13  ;;  %v7689_v20 = vrot.slane %v7665_v13, 1  ;;  %7656 = vst.msk [vmem:[#allocation3 + $0x4] ss:$8 sm:$0x3] %vm12119_vm15, %v7654_v18  ;;  %v7977_v6 = vmul.f32 %v13470_v5, %v7973_v4 }
0x1b6c   :  { %v7692_v35 = vmul.f32 %v13519_v36, %v7688_v24  ;;  %v7960_v3 = vrot.slane %v7953_v32, %v12090_v12  ;;  %v7978_v27 = vmul.f32 %v13476_v39, %v7974_v42 }
0x1b6d   :  { %v7675_v61 = vrot.slane %v7668_v47, %v12090_v12  ;;  %v7693_v40 = vmul.f32 %v13523_v19, %v7689_v20  ;;  %v7979_v34 = vadd.f32 %v7977_v6, %v13468_v46 }
0x1b6e   :  { %v7694_v54 = vadd.f32 %v7692_v35, %v13460_v56  ;;  %v7961_v31 = vcombine.high %v7960_v3, %v7960_v3  ;;  %v7980_v9 = vadd.f32 %v7978_v27, %v13472_v60 }
0x1b6f   :  { %v7676_v1 = vcombine.high %v7675_v61, %v7675_v61  ;;  %v7695_v26 = vadd.f32 %v7693_v40, %v13462_v2  ;;  %v8002_v11 = vrot.slane %v7979_v34, 1 }
0x1b70   :  { %v7717_v25 = vrot.slane %v7694_v54, 1  ;;  %v7968_v0 = vrot.slane %v7961_v31, %v12090_v12  ;;  %v7983_v51 = vcombine.high %v7979_v34, %v7980_v9  ;;  %v8003_v53 = vrot.slane %v7980_v9, 1 }
0x1b71   :  { %v7683_v48 = vrot.slane %v7676_v1, %v12090_v12  ;;  %v7698_v16 = vcombine.low %v7694_v54, %v7695_v26  ;;  %v7718_v10 = vrot.slane %v7695_v26, 1  ;;  %v8006_v7 = vmul.f32 %v13470_v5, %v8002_v11  ;;  %v8093_v59 = vld [vmem:[#allocation3 + $0x20] sm:$0x3f] }
0x1b72   :  { %v7721_v21 = vmul.f32 %v13519_v36, %v7717_v25  ;;  %v7969_v29 = vcombine.high %v7968_v0, %v7968_v0  ;;  %v7990_v23 = vrot.slane %v7983_v51, %v12090_v12  ;;  %v8007_v45 = vmul.f32 %v13476_v39, %v8003_v53 }
0x1b73   :  { %v7684_v44 = vcombine.high %v7683_v48, %v7683_v48  ;;  %v7705_v62 = vrot.slane %v7698_v16, %v12090_v12  ;;  %v7722_v28 = vmul.f32 %v13523_v19, %v7718_v10  ;;  %v8008_v55 = vadd.f32 %v8006_v7, %v13468_v46 }
0x1b74   :  { %v7723_v57 = vadd.f32 %v7721_v21, %v13460_v56  ;;  %v7997_v41 = vrot.slane %v7990_v23, %v12090_v12  ;;  %v8009_v8 = vadd.f32 %v8007_v45, %v13472_v60  ;;  %7971 = vst.msk [vmem:[#allocation3 + $0x17] ss:$8 sm:$0x3] %vm12119_vm15, %v7969_v29  ;;  %v13633_v50 = vmul.f32 %v13488_v17, %v8093_v59  ;;  %v13975_v29 = vld [vmem:[#allocation127_spill] sm:$0xff] }
0x1b75   :  { %v7712_v18 = vrot.slane %v7705_v62, %v12090_v12  ;;  %v7724_v13 = vadd.f32 %v7722_v28, %v13462_v2  ;;  %7686 = vst.msk [vmem:[#allocation3 + $0x3] ss:$8 sm:$0x3] %vm12119_vm15, %v7684_v44  ;;  %v8031_v4 = vrot.slane %v8008_v55, 1  ;;  %v9241_v23 = vmul.f32 -1.442695, %v13975_v29 }
0x1b76   :  { %v7746_v24 = vrot.slane %v7723_v57, 1  ;;  %v7998_v32 = vcombine.high %v7997_v41, %v7997_v41  ;;  %v8012_v42 = vcombine.high %v8008_v55, %v8009_v8  ;;  %v8032_v47 = vrot.slane %v8009_v8, 1  ;;  %8228 = vrot.lane.b32.xlu0 %v13633_v50, %s11209_s10  ;;  %8216 = vrot.lane.b32.xlu1 %v13633_v50, %s11206_s4  ;;  %v8327_v41 = vld [vmem:[%s13974_s28 + $0x8] sm:$0xff] }
0x1b77   :  { %v7713_v17 = vcombine.high %v7712_v18, %v7712_v18  ;;  %v7727_v20 = vcombine.low %v7723_v57, %v7724_v13  ;;  %v7747_v6 = vrot.slane %v7724_v13, 1  ;;  %v8035_v35 = vmul.f32 %v13470_v5, %v8031_v4  ;;  %v8326_v57 = vld [vmem:[%s13974_s28] sm:$0xff]  ;;  %v8328_v18 = vld [vmem:[%s13974_s28 + $0x10] sm:$0xff]  ;;  %v8329_v13 = vld [vmem:[%s13974_s28 + $0x18] sm:$0xff] }
0x1b78   :  { %v7750_v3 = vmul.f32 %v13519_v36, %v7746_v24  ;;  %v8019_v27 = vrot.slane %v8012_v42, %v12090_v12  ;;  %v8036_v61 = vmul.f32 %v13476_v39, %v8032_v47  ;;  %8000 = vst.msk [vmem:[#allocation3 + $0x16] ss:$8 sm:$0x3] %vm12119_vm15, %v7998_v32  ;;  %10346 = vpow2.f32 %v9241_v23 }
0x1b79   :  { %v7734_v40 = vrot.slane %v7727_v20, %v12090_v12  ;;  %v7751_v34 = vmul.f32 %v13523_v19, %v7747_v6  ;;  %7715 = vst.msk [vmem:[#allocation3 + $0x2] ss:$8 sm:$0x3] %vm12119_vm15, %v7713_v17  ;;  %v8037_v54 = vadd.f32 %v8035_v35, %v13468_v46  ;;  %v9242_v55 = vmul.f32 -1.442695, %v12878_v63 }
0x1b7a   :  { %v7752_v31 = vadd.f32 %v7750_v3, %v13460_v56  ;;  %v8020_v9 = vcombine.high %v8019_v27, %v8019_v27  ;;  %v8038_v36 = vadd.f32 %v8036_v61, %v13472_v60  ;;  %v9989_v33 = vpack.c.bf16 %v8329_v13, %v8328_v18  ;;  %v8094_v20 = vld [vmem:[#allocation3 + $0x28] sm:$0x3f]  ;;  %v8315_v27 = vpop.permute.xlu0 %8314 }
0x1b7b   :  { %v7735_v1 = vcombine.high %v7734_v40, %v7734_v40  ;;  %v7753_v26 = vadd.f32 %v7751_v34, %v13462_v2  ;;  %v8059_v11 = vrot.slane %v8037_v54, 1  ;;  %10348 = vpow2.f32 %v9242_v55 }
0x1b7c   :  { %v8027_v25 = vrot.slane %v8020_v9, %v12090_v12  ;;  %v8041_v0 = vcombine.high %v8037_v54, %v8038_v36  ;;  %v8060_v51 = vrot.slane %v8038_v36, 1 }
0x1b7d   :  { %v7742_v19 = vrot.slane %v7735_v1, %v12090_v12  ;;  %v7756_v53 = vcombine.low %v7752_v31, %v7753_v26  ;;  %v8063_v48 = vmul.f32 %v13470_v5, %v8059_v11 }
0x1b7e   :  { %v8048_v16 = vrot.slane %v8041_v0, %v12090_v12  ;;  %v8064_v56 = vmul.f32 %v13476_v39, %v8060_v51  ;;  %8029 = vst.msk [vmem:[#allocation3 + $0x15] ss:$8 sm:$0x3] %vm12119_vm15, %v8027_v25 }
0x1b7f   :  { %v7763_v10 = vrot.slane %v7756_v53, %v12090_v12  ;;  %7744 = vst.msk [vmem:[#allocation3 + $0x1] ss:$8 sm:$0x3] %vm12119_vm15, %v7742_v19  ;;  %v8065_v2 = vadd.f32 %v8063_v48, %v13468_v46 }
0x1b80   :  { %v8055_v7 = vrot.slane %v8048_v16, %v12090_v12  ;;  %v8066_v59 = vadd.f32 %v8064_v56, %v13472_v60 }
0x1b81   :  { %v7770_v5 = vrot.slane %v7763_v10, %v12090_v12 }
0x1b82   :  { %v8069_v21 = vcombine.low %v8065_v2, %v8066_v59  ;;  %8057 = vst.msk [vmem:[#allocation3 + $0x14] ss:$8 sm:$0x3] %vm12119_vm15, %v8055_v7 }
0x1b83   :  { %7772 = vst.msk [vmem:[#allocation3] ss:$8 sm:$0x3] %vm12119_vm15, %v7770_v5 }
0x1b84   :  { %v8076_v39 = vrot.slane %v8069_v21, %v12090_v12 }
0x1b86   :  { %v8077_v46 = vcombine.high %v8076_v39, %v8076_v39 }
0x1b88   :  { %v8084_v60 = vrot.slane %v8077_v46, %v12090_v12  ;;  %v9986_v12 = vpack.c.bf16 %v8327_v41, %v8326_v57 }
0x1b8a   :  { %v8085_v45 = vcombine.high %v8084_v60, %v8084_v60  ;;  %v8089_v44 = vld [vmem:[#allocation3] sm:$0xff]  ;;  %v8090_v28 = vld [vmem:[#allocation3 + $0x8] sm:$0xff]  ;;  %9987 = vmatpush3.bf16.msra.mxu0 %v9986_v12 }
0x1b8b   :  { %v8190_v62 = vmul.f32 %v13464_v14, %v8089_v44  ;;  %v8191_v8 = vmul.f32 %v13466_v30, %v8090_v28  ;;  %v10347_v14 = vpop.eup %10346  ;;  %9988 = vmatprep.subr.bf16.mxu0 %v13943_v38 }
0x1b8c   :  { %8087 = vst.msk [vmem:[#allocation3 + $0x13] ss:$8 sm:$0x3] %vm12119_vm15, %v8085_v45  ;;  %v8300_v24 = vadd.f32 1.0, %v10347_v14  ;;  %v10349_v42 = vpop.eup %10348 }
0x1b8d   :  { %8224 = vrot.lane.b32.xlu0 %v8190_v62, %s11209_s10  ;;  %8212 = vrot.lane.b32.xlu1 %v8190_v62, %s11206_s4  ;;  %v8301_v17 = vadd.f32 1.0, %v10349_v42  ;;  %v13977_v42 = vld [vmem:[#allocation117_spill] sm:$0xff] }
0x1b8e   :  { %9990 = vmatpush3.bf16.msra.mxu0 %v9989_v33  ;;  %10350 = vrcp.f32 %v8300_v24 }
0x1b8f   :  { %9997 = vmatprep.subr.bf16.mxu0 %v13943_v38  ;;  %10352 = vrcp.f32 %v8301_v17 }
0x1b91   :  { %8236 = vrot.lane.b32.xlu0 %v8190_v62, %s11210_s11  ;;  %8254 = vrot.lane.b32.xlu1 %v8191_v8, %s11206_s4 }
0x1b93   :  { %v8091_v4 = vld [vmem:[#allocation3 + $0x10] sm:$0xff]  ;;  %v8092_v32 = vld [vmem:[#allocation3 + $0x18] sm:$0xff] }
0x1b94   :  { %v8192_v30 = vmul.f32 %v13474_v15, %v8091_v4  ;;  %v8193_v47 = vmul.f32 %v13479_v43, %v8092_v32  ;;  %v8195_v15 = vmul.f32 %v13492_v52, %v8094_v20  ;;  %v9239_v52 = vld [vmem:[%s13976_s12] ss:$0 sm:$0xff] }
0x1b95   :  { %8266 = vrot.lane.b32.xlu0 %v8191_v8, %s11209_s10  ;;  %8278 = vrot.lane.b32.xlu1 %v8191_v8, %s11210_s11  ;;  %v8203_v34 = vmul.f32 %v9239_v52, %v13371_v49  ;;  %v8204_v48 = vmul.f32 %v9239_v52, %v13379_v22  ;;  %v8205_v10 = vmul.f32 %v9239_v52, %v13388_v58  ;;  %v13979_v52 = vld [vmem:[#allocation126_spill] sm:$0xff] }
0x1b97   :  { %v8206_v54 = vadd.f32 %v8203_v34, %v8190_v62  ;;  %v8207_v2 = vadd.f32 %v8204_v48, %v8192_v30  ;;  %v8208_v7 = vadd.f32 %v8205_v10, %v13633_v50  ;;  %v8485_v10 = vld [vmem:[%s13980_s25 + $0x8] sm:$0xff] }
0x1b98   :  { %v10351_v6 = vpop.eup %10350 }
0x1b99   :  { %8238 = vrot.lane.b32.xlu0 %v8192_v30, %s11210_s11  ;;  %8214 = vrot.lane.b32.xlu1 %v8192_v30, %s11206_s4  ;;  %v8309_v43 = vmul.f32 %v10351_v6, %v13975_v29  ;;  %v10353_v35 = vpop.eup %10352  ;;  %v13978_v6 = vld [vmem:[#allocation125_spill] sm:$0xff] }
0x1b9a   :  { %v8310_v3 = vmul.f32 %v10353_v35, %v12878_v63 }
0x1b9d   :  { %8256 = vrot.lane.b32.xlu0 %v8193_v47, %s11206_s4  ;;  %8226 = vrot.lane.b32.xlu1 %v8192_v30, %s11209_s10 }
0x1ba1   :  { %8280 = vrot.lane.b32.xlu0 %v8193_v47, %s11210_s11  ;;  %8240 = vrot.lane.b32.xlu1 %v13633_v50, %s11210_s11 }
0x1ba5   :  { %8258 = vrot.lane.b32.xlu0 %v8195_v15, %s11206_s4  ;;  %8268 = vrot.lane.b32.xlu1 %v8193_v47, %s11209_s10 }
0x1ba9   :  { %8282 = vrot.lane.b32.xlu0 %v8195_v15, %s11210_s11  ;;  %8316 = vrot.lane.b32.xlu1 %v8309_v43, %s11206_s4 }
0x1bad   :  { %8270 = vrot.lane.b32.xlu1 %v8195_v15, %s11209_s10 }
0x1bb1   :  { %8318 = vrot.lane.b32.xlu1 %v8310_v3, %s11206_s4 }
0x1be8   :  { %v8229_v61 = vpop.permute.xlu0 %8228  ;;  %v8217_v40 = vpop.permute.xlu1 %8216 }
0x1be9   :  { %v8223_v29 = vadd.f32 %v8217_v40, %v8208_v7  ;;  %v8487_v7 = vld [vmem:[%s13980_s25 + $0x18] sm:$0xff] }
0x1beb   :  { %v8235_v60 = vadd.f32 %v8229_v61, %v8223_v29 }
0x1bff   :  { %v8225_v31 = vpop.permute.xlu0 %8224  ;;  %v8213_v9 = vpop.permute.xlu1 %8212 }
0x1c00   :  { %v8221_v36 = vadd.f32 %v8213_v9, %v8206_v54 }
0x1c02   :  { %v8233_v1 = vadd.f32 %v8225_v31, %v8221_v36 }
0x1c03   :  { %v8237_v26 = vpop.permute.xlu0 %8236  ;;  %v8255_v11 = vpop.permute.xlu1 %8254 }
0x1c04   :  { %v8245_v25 = vadd.f32 %v8237_v26, %v8233_v1 }
0x1c06   :  { %v8248_v0 = vadd.f32 %v8245_v25, %v8191_v8 }
0x1c07   :  { %v8267_v51 = vpop.permute.xlu0 %8266  ;;  %v8279_v19 = vpop.permute.xlu1 %8278 }
0x1c08   :  { %v8263_v63 = vadd.f32 %v8255_v11, %v8248_v0 }
0x1c0a   :  { %v8275_v53 = vadd.f32 %v8267_v51, %v8263_v63 }
0x1c0b   :  { %v8239_v16 = vpop.permute.xlu0 %8238  ;;  %v8215_v56 = vpop.permute.xlu1 %8214 }
0x1c0c   :  { %v8287_v49 = vadd.f32 %v8279_v19, %v8275_v53  ;;  %v8222_v5 = vadd.f32 %v8215_v56, %v8207_v2  ;;  %v8484_v56 = vld [vmem:[%s13980_s25] sm:$0xff] }
0x1c0d   :  { %v9992_v2 = vpack.c.bf16 %v8485_v10, %v8484_v56 }
0x1c0e   :  { %v8323_v59 = vmul.f32 %v8315_v27, %v8287_v49  ;;  %v8486_v49 = vld [vmem:[%s13980_s25 + $0x10] sm:$0xff] }
0x1c0f   :  { %v8257_v21 = vpop.permute.xlu0 %8256  ;;  %v8227_v39 = vpop.permute.xlu1 %8226  ;;  %9993 = vmatpush3.bf16.msra.mxu1 %v9992_v2 }
0x1c10   :  { %v8234_v23 = vadd.f32 %v8227_v39, %v8222_v5  ;;  %9772 = vmatmul.mubr.msk.f32.vlgmr.msra.gmra.mrb[84].mxu0 %vm1161_vm13, %v8323_v59  ;;  %v9995_v59 = vpack.c.bf16 %v8487_v7, %v8486_v49  ;;  %9994 = vmatprep.subr.bf16.mxu1 %v13943_v38  ;;  %v8587_v5 = vld [vmem:[%s13981_s20] sm:$0xff] }
0x1c11   :  { %9774 = vmatprep.mubr.msk.f32.mxu0 %vm11202_vm7, %v13946_v37 }
0x1c12   :  { %v8246_v22 = vadd.f32 %v8239_v16, %v8234_v23 }
0x1c13   :  { %v8241_v46 = vpop.permute.xlu1 %8240  ;;  %v8281_v58 = vpop.permute.xlu0 %8280  ;;  %9996 = vmatpush3.bf16.msra.mxu1 %v9995_v59 }
0x1c14   :  { %v8249_v45 = vadd.f32 %v8246_v22, %v8193_v47  ;;  %v8247_v44 = vadd.f32 %v8241_v46, %v8235_v60  ;;  %10003 = vmatprep.subr.bf16.mxu1 %v13943_v38 }
0x1c16   :  { %v8264_v62 = vadd.f32 %v8257_v21, %v8249_v45  ;;  %v8250_v55 = vadd.f32 %v8247_v44, %v8195_v15  ;;  %v8588_v21 = vld [vmem:[%s13981_s20 + $0x8] sm:$0xff]  ;;  %v9246_v45 = vld [vmem:[#allocation42] ss:$0 sm:$0xff] }
0x1c17   :  { %v8269_v28 = vpop.permute.xlu1 %8268  ;;  %v8259_v41 = vpop.permute.xlu0 %8258  ;;  %v9998_v39 = vpack.c.bf16 %v8588_v21, %v8587_v5 }
0x1c18   :  { %v8276_v50 = vadd.f32 %v8269_v28, %v8264_v62  ;;  %v8265_v18 = vadd.f32 %v8259_v41, %v8250_v55  ;;  %v9247_v62 = vld [vmem:[#allocation40] ss:$0 sm:$0xff] }
0x1c19   :  { %9999 = vmatpush3.bf16.msra.mxu0 %v9998_v39 }
0x1c1a   :  { %v8288_v57 = vadd.f32 %v8281_v58, %v8276_v50  ;;  %10000 = vmatprep.subr.bf16.mxu0 %v13943_v38 }
0x1c1b   :  { %v8317_v8 = vpop.permute.xlu1 %8316  ;;  %v8283_v14 = vpop.permute.xlu0 %8282 }
0x1c1c   :  { %v8324_v12 = vmul.f32 %v8317_v8, %v8288_v57 }
0x1c1e   :  { %9775 = vmatmul.mubr.msk.f32.gmra.mrb[86].mxu0 %vm1161_vm13, %v8324_v12 }
0x1c1f   :  { %v8271_v13 = vpop.permute.xlu1 %8270  ;;  %9777 = vmatprep.mubr.msk.f32.mxu0 %vm11202_vm7, %v13946_v37 }
0x1c20   :  { %v8277_v33 = vadd.f32 %v8271_v13, %v8265_v18 }
0x1c22   :  { %v8289_v4 = vadd.f32 %v8283_v14, %v8277_v33 }
0x1c23   :  { %v8319_v24 = vpop.permute.xlu1 %8318 }
0x1c24   :  { %v8325_v30 = vmul.f32 %v8319_v24, %v8289_v4 }
0x1c26   :  { %9778 = vmatmul.mubr.msk.f32.gmra.mrb[88].mxu0 %vm1161_vm13, %v8325_v30 }
0x1c27   :  { %9805 = vmatprep.mubr.msk.f32.mxu0 %vm11202_vm7, %v13946_v37 }
0x1ce3   :  { %v8405_v32 = vpop.f32.mrb[84].mxu0 }
0x1ce4   :  { %v10012_v47 = vadd.f32 %v8405_v32, %v13977_v42  ;;  %v9773_v17 = vpop.f32.mrb[85].mxu0  ;;  %v8589_v32 = vld [vmem:[%s13981_s20 + $0x10] sm:$0xff]  ;;  %v8590_v42 = vld [vmem:[%s13981_s20 + $0x18] sm:$0xff] }
0x1ce5   :  { %v9248_v17 = vld [vmem:[#allocation37] ss:$0 sm:$0xff] }
0x1ce6   :  { %v8427_v20 = vsel %vm1161_vm13, %v10012_v47, 0.0 }
0x1ce7   :  { %8428 = vadd.xlane.f32.xlu0 %v8427_v20 }
0x1cf1   :  { %v8410_v15 = vpop.f32.mrb[86].mxu0 }
0x1cf2   :  { %v10013_v43 = vadd.f32 %v8410_v15, %v13978_v6  ;;  %v9776_v35 = vpop.f32.mrb[87].mxu0 }
0x1cf4   :  { %v8430_v3 = vsel %vm1161_vm13, %v10013_v43, 0.0 }
0x1cf5   :  { %8431 = vadd.xlane.f32.xlu1 %v8430_v3 }
0x1cf9   :  { %v8415_v27 = vpop.f32.mrb[88].mxu0 }
0x1cfa   :  { %v10014_v61 = vadd.f32 %v8415_v27, %v13979_v52  ;;  %v9779_v40 = vpop.f32.mrb[89].mxu0 }
0x1cfc   :  { %v8433_v34 = vsel %vm4660_vm1, %v10014_v61, 0.0 }
0x1cfd   :  { %8434 = vadd.xlane.f32.xlu0 %v8433_v34 }
0x1d74   :  { %v8429_v54 = vpop.xlane.xlu0 %8428 }
0x1d75   :  { %v8436_v31 = vmul.f32 0.03125, %v8429_v54 }
0x1d77   :  { %v8439_v9 = vsub.f32 %v10012_v47, %v8436_v31  ;;  %v10001_v47 = vpack.c.bf16 %v8590_v42, %v8589_v32  ;;  %v9252_v31 = vld [vmem:[#allocation39] ss:$0 sm:$0xff] }
0x1d79   :  { %v8442_v36 = vmul.f32 %v8439_v9, %v8439_v9  ;;  %10002 = vmatpush3.bf16.msra.mxu0 %v10001_v47 }
0x1d7b   :  { %v8445_v1 = vsel %vm1161_vm13, %v8442_v36, 0.0 }
0x1d7c   :  { %8446 = vadd.xlane.f32.xlu0 %v8445_v1 }
0x1d82   :  { %v8432_v26 = vpop.xlane.xlu1 %8431 }
0x1d83   :  { %v8437_v11 = vmul.f32 0.03125, %v8432_v26 }
0x1d85   :  { %v8440_v25 = vsub.f32 %v10013_v43, %v8437_v11 }
0x1d87   :  { %v8443_v0 = vmul.f32 %v8440_v25, %v8440_v25 }
0x1d89   :  { %v8448_v51 = vsel %vm1161_vm13, %v8443_v0, 0.0 }
0x1d8a   :  { %8449 = vadd.xlane.f32.xlu0 %v8448_v51  ;;  %v8435_v19 = vpop.xlane.xlu0 %8434 }
0x1d8b   :  { %v8438_v63 = vmul.f32 0.03125, %v8435_v19 }
0x1d8d   :  { %v8441_v53 = vsub.f32 %v10014_v61, %v8438_v63 }
0x1d8f   :  { %v8444_v48 = vmul.f32 %v8441_v53, %v8441_v53 }
0x1d91   :  { %v8451_v16 = vsel %vm4660_vm1, %v8444_v48, 0.0 }
0x1d92   :  { %8452 = vadd.xlane.f32.xlu1 %v8451_v16 }
0x1e09   :  { %v8447_v29 = vpop.xlane.xlu0 %8446 }
0x1e0a   :  { %v8454_v23 = vmul.f32 0.03125, %v8447_v29 }
0x1e0c   :  { %v8457_v22 = vadd.f32 1e-05, %v8454_v23 }
0x1e0e   :  { %10354 = vrsqrt.f32 %v8457_v22 }
0x1e17   :  { %v8450_v46 = vpop.xlane.xlu0 %8449 }
0x1e18   :  { %v10355_v60 = vpop.eup %10354  ;;  %v8455_v58 = vmul.f32 0.03125, %v8450_v46 }
0x1e19   :  { %v8463_v44 = vmul.f32 %v10355_v60, %v8439_v9 }
0x1e1a   :  { %v8458_v28 = vadd.f32 1e-05, %v8455_v58 }
0x1e1b   :  { %v8472_v50 = vmul.f32 %v9246_v45, %v8463_v44 }
0x1e1c   :  { %10356 = vrsqrt.f32 %v8458_v28 }
0x1e1d   :  { %v8481_v55 = vadd.f32 %v9247_v62, %v8472_v50 }
0x1e1f   :  { %v8453_v57 = vpop.xlane.xlu1 %8452  ;;  %9789 = vmatmul.mubr.msk.f32.vlgmr.msra.gmra.mrb[114].mxu1 %vm1161_vm13, %v8481_v55 }
0x1e20   :  { %v8456_v41 = vmul.f32 0.03125, %v8453_v57  ;;  %9791 = vmatprep.mubr.msk.f32.mxu1 %vm11202_vm7, %v13946_v37 }
0x1e22   :  { %v8459_v8 = vadd.f32 1e-05, %v8456_v41 }
0x1e24   :  { %10358 = vrsqrt.f32 %v8459_v8  ;;  %v9256_v8 = vld [vmem:[#allocation45] ss:$0 sm:$0xff] }
0x1e26   :  { %v10357_v12 = vpop.eup %10356 }
0x1e27   :  { %v8464_v18 = vmul.f32 %v10357_v12, %v8440_v25 }
0x1e29   :  { %v8473_v13 = vmul.f32 %v9246_v45, %v8464_v18 }
0x1e2b   :  { %v8482_v33 = vadd.f32 %v9247_v62, %v8473_v13  ;;  %v9257_v13 = vld [vmem:[#allocation43] ss:$0 sm:$0xff] }
0x1e2d   :  { %9792 = vmatmul.mubr.msk.f32.gmra.mrb[116].mxu1 %vm1161_vm13, %v8482_v33 }
0x1e2e   :  { %v10359_v14 = vpop.eup %10358  ;;  %9794 = vmatprep.mubr.msk.f32.mxu1 %vm11202_vm7, %v13946_v37 }
0x1e2f   :  { %v8465_v4 = vmul.f32 %v10359_v14, %v8441_v53 }
0x1e31   :  { %v8474_v24 = vmul.f32 %v9246_v45, %v8465_v4 }
0x1e33   :  { %v8483_v30 = vadd.f32 %v9247_v62, %v8474_v24 }
0x1e35   :  { %9795 = vmatmul.mubr.msk.f32.gmra.mrb[118].mxu1 %vm1161_vm13, %v8483_v30 }
0x1e36   :  { %9822 = vmatprep.mubr.msk.f32.mxu1 %vm11202_vm7, %v13946_v37 }
0x1ef2   :  { %v8570_v20 = vpop.f32.mrb[114].mxu1 }
0x1ef3   :  { %v8571_v15 = vadd.f32 %v9248_v17, %v8570_v20  ;;  %v9790_v6 = vpop.f32.mrb[115].mxu1 }
0x1ef5   :  { %v8584_v43 = vmax.f32 %v8571_v15, 0.0 }
0x1ef7   :  { %9806 = vmatmul.mubr.msk.f32.vlgmr.msra.gmra.mrb[108].mxu0 %vm1161_vm13, %v8584_v43 }
0x1ef8   :  { %9808 = vmatprep.mubr.msk.f32.mxu0 %vm11202_vm7, %v13946_v37 }
0x1f00   :  { %v8575_v35 = vpop.f32.mrb[116].mxu1 }
0x1f01   :  { %v8576_v3 = vadd.f32 %v9248_v17, %v8575_v35  ;;  %v9793_v27 = vpop.f32.mrb[117].mxu1 }
0x1f03   :  { %v8585_v52 = vmax.f32 %v8576_v3, 0.0 }
0x1f05   :  { %9809 = vmatmul.mubr.msk.f32.gmra.mrb[110].mxu0 %vm1161_vm13, %v8585_v52 }
0x1f06   :  { %9811 = vmatprep.mubr.msk.f32.mxu0 %vm11202_vm7, %v13946_v37 }
0x1f08   :  { %v8580_v61 = vpop.f32.mrb[118].mxu1 }
0x1f09   :  { %v8581_v40 = vadd.f32 %v9248_v17, %v8580_v61  ;;  %v9796_v34 = vpop.f32.mrb[119].mxu1 }
0x1f0b   :  { %v8586_v54 = vmax.f32 %v8581_v40, 0.0 }
0x1f0d   :  { %9812 = vmatmul.mubr.msk.f32.gmra.mrb[112].mxu0 %vm1161_vm13, %v8586_v54 }
0x1fca   :  { %v8673_v9 = vpop.f32.mrb[108].mxu0 }
0x1fcb   :  { %v8674_v36 = vadd.f32 %v9252_v31, %v8673_v9  ;;  %v9807_v1 = vpop.f32.mrb[109].mxu0 }
0x1fcd   :  { %v8687_v26 = vadd.f32 %v8674_v36, %v8481_v55 }
0x1fcf   :  { %v8692_v11 = vsel %vm1161_vm13, %v8687_v26, 0.0 }
0x1fd0   :  { %8693 = vadd.xlane.f32.xlu0 %v8692_v11 }
0x1fd8   :  { %v8678_v25 = vpop.f32.mrb[110].mxu0 }
0x1fd9   :  { %v8679_v0 = vadd.f32 %v9252_v31, %v8678_v25  ;;  %v9810_v51 = vpop.f32.mrb[111].mxu0 }
0x1fdb   :  { %v8688_v19 = vadd.f32 %v8679_v0, %v8482_v33 }
0x1fdd   :  { %v8695_v63 = vsel %vm1161_vm13, %v8688_v19, 0.0 }
0x1fde   :  { %8696 = vadd.xlane.f32.xlu1 %v8695_v63  ;;  %v8808_v63 = vld [vmem:[%s11516_s27] sm:$0xff] }
0x1fe0   :  { %v8683_v53 = vpop.f32.mrb[112].mxu0 }
0x1fe1   :  { %v8684_v48 = vadd.f32 %v9252_v31, %v8683_v53  ;;  %v9813_v16 = vpop.f32.mrb[113].mxu0  ;;  %v8809_v53 = vld [vmem:[%s11516_s27 + $0x8] sm:$0xff] }
0x1fe2   :  { %v10004_v16 = vpack.c.bf16 %v8809_v53, %v8808_v63 }
0x1fe3   :  { %v8689_v56 = vadd.f32 %v8684_v48, %v8483_v30  ;;  %v8810_v48 = vld [vmem:[%s11516_s27 + $0x10] sm:$0xff] }
0x1fe4   :  { %10005 = vmatpush3.bf16.msra.mxu1 %v10004_v16 }
0x1fe5   :  { %v8698_v10 = vsel %vm4660_vm1, %v8689_v56, 0.0  ;;  %10006 = vmatprep.subr.bf16.mxu1 %v13943_v38 }
0x1fe6   :  { %8699 = vadd.xlane.f32.xlu0 %v8698_v10 }
0x205d   :  { %v8694_v49 = vpop.xlane.xlu0 %8693 }
0x205e   :  { %v8701_v2 = vmul.f32 0.03125, %v8694_v49 }
0x2060   :  { %v8704_v7 = vsub.f32 %v8687_v26, %v8701_v2 }
0x2062   :  { %v8707_v59 = vmul.f32 %v8704_v7, %v8704_v7 }
0x2064   :  { %v8710_v5 = vsel %vm1161_vm13, %v8707_v59, 0.0 }
0x2065   :  { %8711 = vadd.xlane.f32.xlu1 %v8710_v5 }
0x206b   :  { %v8697_v21 = vpop.xlane.xlu1 %8696 }
0x206c   :  { %v8702_v39 = vmul.f32 0.03125, %v8697_v21  ;;  %v9258_v21 = vld [vmem:[#allocation10] ss:$0 sm:$0xff] }
0x206e   :  { %v8705_v29 = vsub.f32 %v8688_v19, %v8702_v39 }
0x2070   :  { %v8708_v23 = vmul.f32 %v8705_v29, %v8705_v29 }
0x2072   :  { %v8713_v22 = vsel %vm1161_vm13, %v8708_v23, 0.0  ;;  %v9259_v23 = vld [vmem:[#allocation9] ss:$0 sm:$0xff] }
0x2073   :  { %8714 = vadd.xlane.f32.xlu0 %v8713_v22  ;;  %v8700_v46 = vpop.xlane.xlu0 %8699 }
0x2074   :  { %v8703_v60 = vmul.f32 0.03125, %v8700_v46 }
0x2076   :  { %v8706_v45 = vsub.f32 %v8689_v56, %v8703_v60  ;;  %v8811_v56 = vld [vmem:[%s11516_s27 + $0x18] sm:$0xff]  ;;  %s11211_s27 = smov [#allocation52]  }
0x2077   :  { %v10007_v10 = vpack.c.bf16 %v8811_v56, %v8810_v48  ;;  %s8926_s1 = sshll.u32 %s11211_s27, 4  ;;  %s8927_s1 = int_to_ptr.vmem [resolvable:$true] %s8926_s1 }
0x2078   :  { %v8709_v58 = vmul.f32 %v8706_v45, %v8706_v45  ;;  %p11059_p11 = scmp.lt.s32.totalorder %s8927_s1, %s8927_s1 }
0x2079   :  { %10008 = vmatpush3.bf16.msra.mxu1 %v10007_v10 }
0x207a   :  { %v8716_v44 = vsel %vm4660_vm1, %v8709_v58, 0.0 }
0x207b   :  { %8717 = vadd.xlane.f32.xlu1 %v8716_v44 }
0x20f2   :  { %v8712_v62 = vpop.xlane.xlu1 %8711 }
0x20f3   :  { %v8719_v28 = vmul.f32 0.03125, %v8712_v62 }
0x20f5   :  { %v8722_v50 = vadd.f32 1e-05, %v8719_v28 }
0x20f7   :  { %10360 = vrsqrt.f32 %v8722_v50 }
0x2100   :  { %v8715_v55 = vpop.xlane.xlu0 %8714 }
0x2101   :  { %v10361_v57 = vpop.eup %10360  ;;  %v8720_v41 = vmul.f32 0.03125, %v8715_v55 }
0x2102   :  { %v8728_v12 = vmul.f32 %v10361_v57, %v8704_v7 }
0x2103   :  { %v8723_v18 = vadd.f32 1e-05, %v8720_v41 }
0x2104   :  { %v8737_v33 = vmul.f32 %v9256_v8, %v8728_v12  ;;  %v9260_v12 = vld [vmem:[%s11511_s21] ss:$0 sm:$0xff]  ;;  %s11054_s21 = scalar_lea.vmem %s8927_s1, 128 }
0x2105   :  { %10362 = vrsqrt.f32 %v8723_v18  ;;  %p11055_p10 = scmp.ne.s32.totalorder %s8927_s1, %s11054_s21  ;;  %p11060_p12 = scmp.lt.s32.totalorder %s11054_s21, %s11054_s21 }
0x2106   :  { %v8746_v14 = vadd.f32 %v9257_v13, %v8737_v33 }
0x2107   :  { %p11061_p13 = por %p11060_p12, %p11059_p11 }
0x2108   :  { %v8718_v4 = vpop.xlane.xlu1 %8717  ;;  %v8751_v24 = vsel %vm1161_vm13, %v8746_v14, 0.0 }
0x2109   :  { %v8721_v30 = vmul.f32 0.03125, %v8718_v4  ;;  %8752 = vadd.xlane.f32.xlu0 %v8751_v24  ;;  %v13983_v24 = vld [vmem:[#allocation113_spill] sm:$0xff]  ;;  %p11062_p0 = pnand %p11061_p13, %p11055_p10 }
0x210b   :  { %v8724_v32 = vadd.f32 1e-05, %v8721_v30 }
0x210d   :  { %10364 = vrsqrt.f32 %v8724_v32 }
0x210f   :  { %v10363_v42 = vpop.eup %10362 }
0x2110   :  { %v8729_v47 = vmul.f32 %v10363_v42, %v8705_v29 }
0x2112   :  { %v8738_v17 = vmul.f32 %v9256_v8, %v8729_v47  ;;  %v13984_v47 = vld [vmem:[#allocation116_spill] sm:$0xff] }
0x2114   :  { %v8747_v20 = vadd.f32 %v9257_v13, %v8738_v17  ;;  %v8911_v17 = vrot.slane %v13984_v47, 5 }
0x2116   :  { %v8754_v15 = vsel %vm1161_vm13, %v8747_v20, 0.0 }
0x2117   :  { %v10365_v6 = vpop.eup %10364  ;;  %8755 = vadd.xlane.f32.xlu1 %v8754_v15 }
0x2118   :  { %v8730_v43 = vmul.f32 %v10365_v6, %v8706_v45 }
0x211a   :  { %v8739_v35 = vmul.f32 %v9256_v8, %v8730_v43 }
0x211c   :  { %v8748_v3 = vadd.f32 %v9257_v13, %v8739_v35 }
0x211e   :  { %v8757_v27 = vsel %vm4660_vm1, %v8748_v3, 0.0 }
0x211f   :  { %8758 = vadd.xlane.f32.xlu0 %v8757_v27 }
0x2196   :  { %v8753_v52 = vpop.xlane.xlu0 %8752 }
0x2197   :  { %v8760_v61 = vmul.f32 0.03125, %v8753_v52 }
0x2199   :  { %v8763_v40 = vsub.f32 %v8746_v14, %v8760_v61  ;;  %v13982_v14 = vld [vmem:[#allocation115_spill] sm:$0xff] }
0x219b   :  { %v8766_v34 = vmul.f32 %v8763_v40, %v8763_v40 }
0x219d   :  { %v8769_v54 = vsel %vm1161_vm13, %v8766_v34, 0.0 }
0x219e   :  { %8770 = vadd.xlane.f32.xlu1 %v8769_v54 }
0x21a4   :  { %v8756_v31 = vpop.xlane.xlu1 %8755 }
0x21a5   :  { %v8761_v9 = vmul.f32 0.03125, %v8756_v31 }
0x21a7   :  { %v8764_v36 = vsub.f32 %v8747_v20, %v8761_v9  ;;  %v13985_v20 = vld [vmem:[#allocation114_spill] sm:$0xff] }
0x21a8   :  { %v8915_v15 = vrot.slane %v13985_v20, 5 }
0x21a9   :  { %v8767_v1 = vmul.f32 %v8764_v36, %v8764_v36 }
0x21ab   :  { %v8772_v26 = vsel %vm1161_vm13, %v8767_v1, 0.0 }
0x21ac   :  { %8773 = vadd.xlane.f32.xlu0 %v8772_v26  ;;  %v8759_v11 = vpop.xlane.xlu0 %8758 }
0x21ad   :  { %v8762_v25 = vmul.f32 0.03125, %v8759_v11 }
0x21af   :  { %v8765_v0 = vsub.f32 %v8748_v3, %v8762_v25 }
0x21b1   :  { %v8768_v51 = vmul.f32 %v8765_v0, %v8765_v0 }
0x21b3   :  { %v8775_v19 = vsel %vm4660_vm1, %v8768_v51, 0.0 }
0x21b4   :  { %8776 = vadd.xlane.f32.xlu1 %v8775_v19 }
0x222b   :  { %v8771_v49 = vpop.xlane.xlu1 %8770 }
0x222c   :  { %v8778_v2 = vmul.f32 0.03125, %v8771_v49 }
0x222e   :  { %v8781_v7 = vadd.f32 1e-05, %v8778_v2 }
0x2230   :  { %10366 = vrsqrt.f32 %v8781_v7 }
0x2239   :  { %v8774_v59 = vpop.xlane.xlu0 %8773 }
0x223a   :  { %v10367_v5 = vpop.eup %10366  ;;  %v8779_v39 = vmul.f32 0.03125, %v8774_v59 }
0x223b   :  { %v8787_v29 = vmul.f32 %v10367_v5, %v8763_v40 }
0x223c   :  { %v8782_v22 = vadd.f32 1e-05, %v8779_v39 }
0x223d   :  { %v8796_v46 = vmul.f32 %v9258_v21, %v8787_v29 }
0x223e   :  { %10368 = vrsqrt.f32 %v8782_v22 }
0x223f   :  { %v8805_v60 = vadd.f32 %v9259_v23, %v8796_v46 }
0x2241   :  { %9823 = vmatmul.mubr.msk.f32.vlgmr.msra.gmra.mrb[120].mxu1 %vm1161_vm13, %v8805_v60  ;;  %v8777_v45 = vpop.xlane.xlu1 %8776 }
0x2242   :  { %v8780_v38 = vmul.f32 0.03125, %v8777_v45  ;;  %9825 = vmatprep.mubr.msk.f32.mxu1 %vm11202_vm7, %v13946_v37 }
0x2244   :  { %v8783_v58 = vadd.f32 1e-05, %v8780_v38 }
0x2246   :  { %10370 = vrsqrt.f32 %v8783_v58 }
0x2248   :  { %v10369_v44 = vpop.eup %10368 }
0x2249   :  { %v8788_v62 = vmul.f32 %v10369_v44, %v8764_v36 }
0x224b   :  { %v8797_v28 = vmul.f32 %v9258_v21, %v8788_v62 }
0x224d   :  { %v8806_v50 = vadd.f32 %v9259_v23, %v8797_v28 }
0x224f   :  { %9826 = vmatmul.mubr.msk.f32.gmra.mrb[122].mxu1 %vm1161_vm13, %v8806_v50 }
0x2250   :  { %v10371_v55 = vpop.eup %10370  ;;  %9828 = vmatprep.mubr.msk.f32.mxu1 %vm11202_vm7, %v13946_v37  ;;  %vm8919_vm7 = vcmask 63491  }
0x2251   :  { %v8789_v57 = vmul.f32 %v10371_v55, %v8765_v0 }
0x2253   :  { %v8798_v41 = vmul.f32 %v9258_v21, %v8789_v57 }
0x2255   :  { %v8807_v8 = vadd.f32 %v9259_v23, %v8798_v41 }
0x2257   :  { %9829 = vmatmul.mubr.msk.f32.gmra.mrb[124].mxu1 %vm1161_vm13, %v8807_v8 }
0x2314   :  { %v8894_v18 = vpop.f32.mrb[120].mxu1 }
0x2315   :  { %v8895_v13 = vadd.f32 %v9260_v12, %v8894_v18  ;;  %v9824_v33 = vpop.f32.mrb[121].mxu1 }
0x2317   :  { %v8907_v4 = vmul.f32 %v8895_v13, %v13982_v14 }
0x2319   :  { %v8908_v30 = vadd.f32 %v8907_v4, %v13983_v24 }
0x231b   :  { %8909 = vst.msk [vmem:[#allocation52] sm:$0xf] %vm615_vm2, %v8908_v30 }
0x2322   :  { %v8899_v32 = vpop.f32.mrb[122].mxu1 }
0x2323   :  { %v8900_v42 = vadd.f32 %v9260_v12, %v8899_v32  ;;  %v9827_v37 = vpop.f32.mrb[123].mxu1 }
0x2325   :  { %v8913_v6 = vmul.f32 %v8911_v17, %v8900_v42 }
0x2327   :  { %v8917_v43 = vadd.f32 %v8915_v15, %v8913_v6 }
0x2329   :  { %8920 = vst.msk [vmem:[#allocation52 + $0x1] sm:$0x78] %vm8919_vm7, %v8917_v43 }
0x232a   :  { %v8904_v35 = vpop.f32.mrb[124].mxu1 }
0x232b   :  { %11065 = shalt.err (!%p11062_p0)
}
0x232c   :  { %s11066_s2 = scalar_lea.hbm %s11521_s13, 128 }
0x232d   :  { %p11067_p1 = scmp.ne.s32.totalorder %s11521_s13, %s11066_s2  ;;  %p11070_p2 = scmp.lt.u32.totalorder %s11066_s2, %s11521_s13 }
0x232f   :  { %p11072_p3 = pnand %p11070_p2, %p11067_p1 }
0x2331   :  { %11075 = shalt.err (!%p11072_p3)
}
0x2332   :  { %s11212_s7 = smov 4   ;;  %v9830_v3 = vpop.f32.mrb[125].mxu1 }
0x2333   :  { %8932 = dma.vmem_to_hbm [thread:$0]  %s8927_s1, 128, %s11521_s13, [#allocation6], %s11209_s10, %s11209_s10, %s11212_s7  }
0x2334   :  { %11108 = dma.done.wait [#allocation6], 128  }
0x2335   :  { %11109 = vsyncadd [#allocation6], 4294967168 }
0x2336   :  { %8936 = vsyncpa [#allocation5], 1 }
0x2337   :  { %8937 = vsyncpa [#allocation8], 1 }
0x2338   :  { %8938 = vsyncpa [#allocation11], 1 }
0x2339   :  { %8939 = vsyncpa [#allocation14], 1 }
0x233a   :  { %8940 = vsyncpa [#allocation17], 1 }
0x233b   :  { %8941 = vsyncpa [#allocation20], 1 }
0x233c   :  { %8942 = vsyncpa [#allocation23], 1 }
0x233d   :  { %8943 = vsyncpa [#allocation26], 1 }
0x233e   :  { %8944 = vsyncpa [#allocation29], 1 }
0x233f   :  { %8945 = vsyncpa [#allocation32], 1 }
0x2340   :  { %8946 = vsyncpa [#allocation35], 1 }
0x2341   :  { %8947 = vsyncpa [#allocation38], 1 }
0x2342   :  { %8948 = vsyncpa [#allocation41], 1 }
0x2343   :  { %8949 = vsyncpa [#allocation44], 1 }
0x2344   :  { %8950 = vsyncpa [#allocation47], 1 }
0x2345   :  { %8951 = vsyncpa [#allocation50], 1 }
0x2346   :  { %8952 = vsyncpa [#allocation6], 1 }

</bundles_post_ra>
